<compile_context>
chip_gen: v7x
topology: tpu7x:2x2x1
jax: 0.10.0
libtpu: 0.0.40
codegen_flags: <defaults>
</compile_context>

<pallas_src>
import jax
import jax.numpy as jnp
from jax.experimental import pallas as pl
from jax.experimental.pallas import tpu as pltpu


def _round_up(v, m):
    return ((v + m - 1) // m) * m


def _make_basic_block_kernel(H, W, Cin, Cmid, Cout, Wr, Hpe, rows_per_chunk):
    """Build the fused BasicBlock kernel for fixed static shapes.

    Flat padded layout: padded image lives in a flat (Hpe*Wr, C) scratch with
    row stride Wr (Wr = round_up(W+2, 8)).  For output pixel flat index
    q = h*Wr + w, conv tap (dy, dx) lives at q + dy*Wr + dx, so every tap is a
    contiguous flat slice of the scratch.
    """
    bf16 = jnp.bfloat16

    def kernel(x_ref, w1_ref, b1_ref, w2_ref, b2_ref, o_ref, p1_ref, p2_ref):
        # ---- zero the padded scratch slabs ONCE (borders are never written
        # per step; the interior is fully overwritten every step).  Requires
        # the grid to run sequentially on one core -> dimension_semantics is
        # "arbitrary" below. ----
        @pl.when(pl.program_id(0) == 0)
        def _init():
            p1_ref[...] = jnp.zeros(p1_ref.shape, bf16)
            p2_ref[...] = jnp.zeros(p2_ref.shape, bf16)

        # ---- stage the f32 input into the bf16 zero-padded conv1 scratch ----
        # (interior rows only; the zero border persists from the init step)
        for h in range(H):
            p1_ref[pl.ds((h + 1) * Wr + 1, W), :] = x_ref[h].astype(bf16)

        def conv_chunks(src_ref, w_ref, epilogue):
            # Row-chunked conv: per chunk, pack the 9 taps into one
            # (M_chunk, 9*Cin) slab and do a single K=9*Cin MXU matmul with a
            # register-resident f32 accumulator (no VMEM acc round trips).
            for r0 in range(0, H, rows_per_chunk):
                rc = min(rows_per_chunk, H - r0)
                cm = rc * Wr
                base = r0 * Wr
                taps = [src_ref[pl.ds(base + dy * Wr + dx, cm), :]
                        for dy in range(3) for dx in range(3)]
                slab = jnp.concatenate(taps, axis=1)          # (cm, 9*Cin) bf16
                acc = jnp.dot(slab, w_ref[...],
                              preferred_element_type=jnp.float32)  # (cm, Cx) f32
                epilogue(r0, rc, cm, base, acc)

        # ---- conv1 epilogue: bias + ReLU, zero the pad/junk columns so the
        # flat re-pad keeps conv2's one-pixel zero border intact, store bf16 ----
        def conv1_epilogue(r0, rc, cm, base, acc):
            y = jnp.maximum(acc + b1_ref[...], 0.0).reshape(rc, Wr, Cmid)
            col = jax.lax.broadcasted_iota(jnp.int32, (1, Wr, 1), 1)
            y = jnp.where(col < W, y, 0.0)
            p2_ref[pl.ds(Wr + 1 + base, cm), :] = y.reshape(cm, Cmid).astype(bf16)

        # ---- conv2 epilogue: bias + f32 identity residual + ReLU + store ----
        def conv2_epilogue(r0, rc, cm, base, acc):
            out = (acc + b2_ref[...]).reshape(rc, Wr, Cout)[:, :W, :]
            out = jnp.maximum(out + x_ref[r0:r0 + rc, :, :], 0.0)
            o_ref[r0:r0 + rc, :, :] = out.astype(o_ref.dtype)

        conv_chunks(p1_ref, w1_ref, conv1_epilogue)
        conv_chunks(p2_ref, w2_ref, conv2_epilogue)

    return kernel


def _vmem_bytes_estimate(H, W, Cin, Cmid, Cout, Wr, Hpe, out_itemsize):
    """Approximate VMEM footprint (lane/sublane padded) incl. double buffers."""
    def blk2(d0, d1, isz):
        return _round_up(d0, 8) * _round_up(d1, 128) * isz

    def blk3(d0, d1, d2, isz):
        return d0 * _round_up(d1, 8) * _round_up(d2, 128) * isz

    x_b = blk3(H, W, Cin, 4)
    o_b = blk3(H, W, Cout, out_itemsize)
    w_b = blk2(9 * Cin, Cmid, 2) + blk2(9 * Cmid, Cout, 2)
    b_b = blk2(1, Cmid, 4) + blk2(1, Cout, 4)
    p_b = blk2(Hpe * Wr, Cin, 2) + blk2(Hpe * Wr, Cmid, 2)
    return 2 * (x_b + o_b + w_b + b_b) + p_b     # in/out double-buffered


def basic_block_forward_nhwc(x_nhwc, w1_hwio, bn1, w2_hwio, bn2,
                             eps=1e-5, out_dtype=jnp.float32):
    """Fused BasicBlock forward, NHWC activations.

    x_nhwc: (N, H, W, Cin) f32.  Conv weights in HWIO.  bn = (gamma, beta,
    running_mean, running_var) (eval mode).
    """
    N, H, W, Cin = x_nhwc.shape
    Cmid = w1_hwio.shape[-1]
    Cout = w2_hwio.shape[-1]
    assert w1_hwio.shape == (3, 3, Cin, Cmid)
    assert w2_hwio.shape == (3, 3, Cmid, Cout)
    assert Cin == Cout, "identity-residual path requires inplanes == planes"

    Wr = _round_up(W + 2, 8)      # padded row stride (multiple of 8 sublanes)
    Hpe = H + 3                   # top pad + bottom pad + overrun row for flat taps
    rows_per_chunk = max(1, 128 // Wr)

    # Fold eval-mode BatchNorm: scale into the conv weights, bias stays f32.
    g1, be1, rm1, rv1 = bn1
    g2, be2, rm2, rv2 = bn2
    s1 = (g1 * jax.lax.rsqrt(rv1 + eps)).astype(jnp.float32)
    b1 = (be1 - rm1 * s1).astype(jnp.float32)
    s2 = (g2 * jax.lax.rsqrt(rv2 + eps)).astype(jnp.float32)
    b2 = (be2 - rm2 * s2).astype(jnp.float32)

    # Packed weights: (ky, kx, ci, co) -> (9*Cin, Cout), matching the in-kernel
    # tap concatenation order (dy-major, then dx, then ci).
    w1p = (w1_hwio.astype(jnp.float32) * s1).reshape(9 * Cin, Cmid).astype(jnp.bfloat16)
    w2p = (w2_hwio.astype(jnp.float32) * s2).reshape(9 * Cmid, Cout).astype(jnp.bfloat16)

    x = x_nhwc.astype(jnp.float32)   # f32 input: exact identity residual in-kernel

    kernel = _make_basic_block_kernel(H, W, Cin, Cmid, Cout, Wr, Hpe, rows_per_chunk)

    out_itemsize = jnp.dtype(out_dtype).itemsize
    m_flat = H * Wr
    flops = 2 * 9 * N * m_flat * (Cin * Cmid + Cmid * Cout)
    bytes_accessed = (x.size * 4 + N * H * W * Cout * out_itemsize
                      + (w1p.size + w2p.size) * 2 + (Cmid + Cout) * 4)

    vmem_est = _vmem_bytes_estimate(H, W, Cin, Cmid, Cout, Wr, Hpe, out_itemsize)
    vmem_limit = min(128 * 1024 * 1024, max(16 * 1024 * 1024, int(vmem_est * 1.5)))

    out_nhwc = pl.pallas_call(
        kernel,
        out_shape=jax.ShapeDtypeStruct((N, H, W, Cout), out_dtype),
        grid_spec=pltpu.PrefetchScalarGridSpec(
            num_scalar_prefetch=0,
            grid=(N,),
            in_specs=[
                pl.BlockSpec((None, H, W, Cin), lambda n: (n, 0, 0, 0)),   # x (f32)
                pl.BlockSpec((9 * Cin, Cmid), lambda n: (0, 0)),           # packed w1*s1
                pl.BlockSpec((1, Cmid), lambda n: (0, 0)),                 # bn1 bias
                pl.BlockSpec((9 * Cmid, Cout), lambda n: (0, 0)),          # packed w2*s2
                pl.BlockSpec((1, Cout), lambda n: (0, 0)),                 # bn2 bias
            ],
            out_specs=pl.BlockSpec((None, H, W, Cout), lambda n: (n, 0, 0, 0)),
            scratch_shapes=[
                pltpu.VMEM((Hpe * Wr, Cin), jnp.bfloat16),    # flat padded conv1 input
                pltpu.VMEM((Hpe * Wr, Cmid), jnp.bfloat16),   # flat padded conv2 input
            ],
        ),
        compiler_params=pltpu.CompilerParams(
            # "arbitrary": the zero-once border init of the persistent scratch
            # requires the batch grid to run sequentially on a single core.
            dimension_semantics=("arbitrary",),
            vmem_limit_bytes=vmem_limit,
        ),
        cost_estimate=pl.CostEstimate(flops=flops, transcendentals=0,
                                      bytes_accessed=bytes_accessed),
    )(x, w1p, b1.reshape(1, Cmid), w2p, b2.reshape(1, Cout))

    return out_nhwc


def basic_block_forward(x_nchw, w1_hwio, bn1, w2_hwio, bn2, eps=1e-5,
                        out_dtype=jnp.float32):
    """PyTorch-interface wrapper (NCHW in / NCHW out).

    TODO(synk): in a real pipeline keep activations NHWC across blocks (and
    emit bf16) instead of paying these wrapper transposes per block.
    """
    x_nhwc = jnp.transpose(x_nchw, (0, 2, 3, 1))
    out_nhwc = basic_block_forward_nhwc(x_nhwc, w1_hwio, bn1, w2_hwio, bn2,
                                        eps=eps, out_dtype=out_dtype)
    return jnp.transpose(out_nhwc, (0, 3, 1, 2))


def _reference(x_nchw, w1_hwio, bn1, w2_hwio, bn2, eps=1e-5, conv_dtype=jnp.float32):
    """Pure-JAX reference. conv_dtype=bfloat16 mirrors the kernel's MXU inputs;
    the identity residual is always f32 (as in PyTorch / the kernel)."""
    x = jnp.transpose(x_nchw, (0, 2, 3, 1))

    def conv(v, w):
        return jax.lax.conv_general_dilated(
            v.astype(conv_dtype), w.astype(conv_dtype),
            window_strides=(1, 1), padding=((1, 1), (1, 1)),
            dimension_numbers=("NHWC", "HWIO", "NHWC"),
            preferred_element_type=jnp.float32)

    def bn(v, p):
        g, b, m, var = p
        return (v - m) / jnp.sqrt(var + eps) * g + b

    out = jax.nn.relu(bn(conv(x, w1_hwio), bn1))
    out = bn(conv(out, w2_hwio), bn2) + x.astype(jnp.float32)
    out = jax.nn.relu(out)
    return jnp.transpose(out, (0, 3, 1, 2))


if __name__ == "__main__":
    key = jax.random.PRNGKey(0)
    N, C, H, W = 2, 4, 16, 16          # inplanes = planes = 4, stride = 1
    planes = C

    k = jax.random.split(key, 9)
    x = jax.random.normal(k[0], (N, C, H, W), jnp.float32)

    # conv weights: init in PyTorch OIHW shape, convert to HWIO for the kernel
    fan = C * 3 * 3
    w1_oihw = jax.random.normal(k[1], (planes, C, 3, 3), jnp.float32) * (2.0 / fan) ** 0.5
    w2_oihw = jax.random.normal(k[2], (planes, planes, 3, 3), jnp.float32) * (2.0 / fan) ** 0.5
    w1 = jnp.transpose(w1_oihw, (2, 3, 1, 0))
    w2 = jnp.transpose(w2_oihw, (2, 3, 1, 0))

    # BatchNorm params (eval-mode), deterministic and non-trivial
    bn1 = (1.0 + 0.1 * jax.random.normal(k[3], (planes,), jnp.float32),   # gamma
           0.1 * jax.random.normal(k[4], (planes,), jnp.float32),          # beta
           0.1 * jax.random.normal(k[5], (planes,), jnp.float32),          # running_mean
           1.0 + 0.1 * jax.random.uniform(k[6], (planes,), jnp.float32))   # running_var
    bn2 = (1.0 + 0.1 * jax.random.normal(k[7], (planes,), jnp.float32),
           0.1 * jax.random.normal(k[8], (planes,), jnp.float32),
           jnp.zeros((planes,), jnp.float32),
           jnp.ones((planes,), jnp.float32))

    out = jax.block_until_ready(basic_block_forward(x, w1, bn1, w2, bn2))
    assert out.shape == (N, planes, H, W)

    # Tight structural check vs a reference with the same bf16-rounded MXU inputs.
    ref_bf16 = jax.block_until_ready(
        _reference(x, w1, bn1, w2, bn2, conv_dtype=jnp.bfloat16))
    assert jnp.allclose(out, ref_bf16, atol=3e-2, rtol=3e-2), \
        "mismatch vs bf16-matched reference"

    # Loosened check vs the pure-f32 reference (bf16 MXU inputs, f32 accumulation).
    ref_f32 = jax.block_until_ready(_reference(x, w1, bn1, w2, bn2))
    assert jnp.allclose(out, ref_f32, atol=8e-2, rtol=8e-2), \
        "mismatch vs f32 reference"

    print("KERNEL_OK")
</pallas_src>

<mosaic_0001>
module attributes {stable_mosaic.version = 11 : i64} {
  func.func @kernel(%arg0: i32, %arg1: memref<1x16x16x4xf32, #tpu.memory_space<vmem>>, %arg2: memref<36x4xbf16, #tpu.memory_space<vmem>>, %arg3: memref<1x4xf32, #tpu.memory_space<vmem>>, %arg4: memref<36x4xbf16, #tpu.memory_space<vmem>>, %arg5: memref<1x4xf32, #tpu.memory_space<vmem>>, %arg6: memref<1x16x16x4xf32, #tpu.memory_space<vmem>>, %arg7: memref<456x4xbf16, #tpu.memory_space<vmem>>, %arg8: memref<456x4xbf16, #tpu.memory_space<vmem>>) attributes {dimension_semantics = [#tpu.dimension_semantics<arbitrary>], iteration_bounds = array<i64: 2>, scalar_prefetch = 0 : i64, scratch_operands = 2 : i64, tpu.core_type = #tpu.core_type<tc>, window_params = [{transform_indices = @transform_0, window_bounds = array<i64: 1, 16, 16, 4>}, {pipeline_mode = #tpu.pipeline_mode<synchronous>, transform_indices = @transform_1, window_bounds = array<i64: 36, 4>}, {pipeline_mode = #tpu.pipeline_mode<synchronous>, transform_indices = @transform_2, window_bounds = array<i64: 1, 4>}, {pipeline_mode = #tpu.pipeline_mode<synchronous>, transform_indices = @transform_3, window_bounds = array<i64: 36, 4>}, {pipeline_mode = #tpu.pipeline_mode<synchronous>, transform_indices = @transform_4, window_bounds = array<i64: 1, 4>}, {transform_indices = @transform_5, window_bounds = array<i64: 1, 16, 16, 4>}]} {
    %c0_i32 = arith.constant 0 : i32
    %0 = arith.cmpi eq, %arg0, %c0_i32 : i32
    %1 = arith.extui %0 : i1 to i32
    %c0_i32_0 = arith.constant 0 : i32
    %2 = arith.cmpi ne, %1, %c0_i32_0 : i32
    scf.if %2 {
      %cst_280 = arith.constant 0.000000e+00 : bf16
      %279 = vector.broadcast %cst_280 : bf16 to vector<456x4xbf16>
      %c0_281 = arith.constant 0 : index
      %c0_282 = arith.constant 0 : index
      %280 = vector.load %arg7[%c0_281, %c0_282] : memref<456x4xbf16, #tpu.memory_space<vmem>>, vector<456x4xbf16>
      tpu.vector_store %arg7[%c0_281, %c0_282], %279 {strides = array<i32>} : memref<456x4xbf16, #tpu.memory_space<vmem>>, vector<456x4xbf16>,
      %cst_283 = arith.constant 0.000000e+00 : bf16
      %281 = vector.broadcast %cst_283 : bf16 to vector<456x4xbf16>
      %c0_284 = arith.constant 0 : index
      %c0_285 = arith.constant 0 : index
      %282 = vector.load %arg8[%c0_284, %c0_285] : memref<456x4xbf16, #tpu.memory_space<vmem>>, vector<456x4xbf16>
      tpu.vector_store %arg8[%c0_284, %c0_285], %281 {strides = array<i32>} : memref<456x4xbf16, #tpu.memory_space<vmem>>, vector<456x4xbf16>,
    } else {
    }
    %c0 = arith.constant 0 : index
    %c0_1 = arith.constant 0 : index
    %c0_2 = arith.constant 0 : index
    %c0_3 = arith.constant 0 : index
    %3 = vector.load %arg1[%c0, %c0_1, %c0_2, %c0_3] : memref<1x16x16x4xf32, #tpu.memory_space<vmem>>, vector<1x1x16x4xf32>
    %4 = vector.shape_cast %3 : vector<1x1x16x4xf32> to vector<16x4xf32>
    %5 = arith.truncf %4 : vector<16x4xf32> to vector<16x4xbf16>
    %c25 = arith.constant 25 : index
    %c0_4 = arith.constant 0 : index
    %6 = vector.load %arg7[%c25, %c0_4] : memref<456x4xbf16, #tpu.memory_space<vmem>>, vector<16x4xbf16>
    tpu.vector_store %arg7[%c25, %c0_4], %5 {strides = array<i32>} : memref<456x4xbf16, #tpu.memory_space<vmem>>, vector<16x4xbf16>,
    %c0_5 = arith.constant 0 : index
    %c1 = arith.constant 1 : index
    %c0_6 = arith.constant 0 : index
    %c0_7 = arith.constant 0 : index
    %7 = vector.load %arg1[%c0_5, %c1, %c0_6, %c0_7] : memref<1x16x16x4xf32, #tpu.memory_space<vmem>>, vector<1x1x16x4xf32>
    %8 = vector.shape_cast %7 : vector<1x1x16x4xf32> to vector<16x4xf32>
    %9 = arith.truncf %8 : vector<16x4xf32> to vector<16x4xbf16>
    %c49 = arith.constant 49 : index
    %c0_8 = arith.constant 0 : index
    %10 = vector.load %arg7[%c49, %c0_8] : memref<456x4xbf16, #tpu.memory_space<vmem>>, vector<16x4xbf16>
    tpu.vector_store %arg7[%c49, %c0_8], %9 {strides = array<i32>} : memref<456x4xbf16, #tpu.memory_space<vmem>>, vector<16x4xbf16>,
    %c0_9 = arith.constant 0 : index
    %c2 = arith.constant 2 : index
    %c0_10 = arith.constant 0 : index
    %c0_11 = arith.constant 0 : index
    %11 = vector.load %arg1[%c0_9, %c2, %c0_10, %c0_11] : memref<1x16x16x4xf32, #tpu.memory_space<vmem>>, vector<1x1x16x4xf32>
    %12 = vector.shape_cast %11 : vector<1x1x16x4xf32> to vector<16x4xf32>
    %13 = arith.truncf %12 : vector<16x4xf32> to vector<16x4xbf16>
    %c73 = arith.constant 73 : index
    %c0_12 = arith.constant 0 : index
    %14 = vector.load %arg7[%c73, %c0_12] : memref<456x4xbf16, #tpu.memory_space<vmem>>, vector<16x4xbf16>
    tpu.vector_store %arg7[%c73, %c0_12], %13 {strides = array<i32>} : memref<456x4xbf16, #tpu.memory_space<vmem>>, vector<16x4xbf16>,
    %c0_13 = arith.constant 0 : index
    %c3 = arith.constant 3 : index
    %c0_14 = arith.constant 0 : index
    %c0_15 = arith.constant 0 : index
    %15 = vector.load %arg1[%c0_13, %c3, %c0_14, %c0_15] : memref<1x16x16x4xf32, #tpu.memory_space<vmem>>, vector<1x1x16x4xf32>
    %16 = vector.shape_cast %15 : vector<1x1x16x4xf32> to vector<16x4xf32>
    %17 = arith.truncf %16 : vector<16x4xf32> to vector<16x4xbf16>
    %c97 = arith.constant 97 : index
    %c0_16 = arith.constant 0 : index
    %18 = vector.load %arg7[%c97, %c0_16] : memref<456x4xbf16, #tpu.memory_space<vmem>>, vector<16x4xbf16>
    tpu.vector_store %arg7[%c97, %c0_16], %17 {strides = array<i32>} : memref<456x4xbf16, #tpu.memory_space<vmem>>, vector<16x4xbf16>,
    %c0_17 = arith.constant 0 : index
    %c4 = arith.constant 4 : index
    %c0_18 = arith.constant 0 : index
    %c0_19 = arith.constant 0 : index
    %19 = vector.load %arg1[%c0_17, %c4, %c0_18, %c0_19] : memref<1x16x16x4xf32, #tpu.memory_space<vmem>>, vector<1x1x16x4xf32>
    %20 = vector.shape_cast %19 : vector<1x1x16x4xf32> to vector<16x4xf32>
    %21 = arith.truncf %20 : vector<16x4xf32> to vector<16x4xbf16>
    %c121 = arith.constant 121 : index
    %c0_20 = arith.constant 0 : index
    %22 = vector.load %arg7[%c121, %c0_20] : memref<456x4xbf16, #tpu.memory_space<vmem>>, vector<16x4xbf16>
    tpu.vector_store %arg7[%c121, %c0_20], %21 {strides = array<i32>} : memref<456x4xbf16, #tpu.memory_space<vmem>>, vector<16x4xbf16>,
    %c0_21 = arith.constant 0 : index
    %c5 = arith.constant 5 : index
    %c0_22 = arith.constant 0 : index
    %c0_23 = arith.constant 0 : index
    %23 = vector.load %arg1[%c0_21, %c5, %c0_22, %c0_23] : memref<1x16x16x4xf32, #tpu.memory_space<vmem>>, vector<1x1x16x4xf32>
    %24 = vector.shape_cast %23 : vector<1x1x16x4xf32> to vector<16x4xf32>
    %25 = arith.truncf %24 : vector<16x4xf32> to vector<16x4xbf16>
    %c145 = arith.constant 145 : index
    %c0_24 = arith.constant 0 : index
    %26 = vector.load %arg7[%c145, %c0_24] : memref<456x4xbf16, #tpu.memory_space<vmem>>, vector<16x4xbf16>
    tpu.vector_store %arg7[%c145, %c0_24], %25 {strides = array<i32>} : memref<456x4xbf16, #tpu.memory_space<vmem>>, vector<16x4xbf16>,
    %c0_25 = arith.constant 0 : index
    %c6 = arith.constant 6 : index
    %c0_26 = arith.constant 0 : index
    %c0_27 = arith.constant 0 : index
    %27 = vector.load %arg1[%c0_25, %c6, %c0_26, %c0_27] : memref<1x16x16x4xf32, #tpu.memory_space<vmem>>, vector<1x1x16x4xf32>
    %28 = vector.shape_cast %27 : vector<1x1x16x4xf32> to vector<16x4xf32>
    %29 = arith.truncf %28 : vector<16x4xf32> to vector<16x4xbf16>
    %c169 = arith.constant 169 : index
    %c0_28 = arith.constant 0 : index
    %30 = vector.load %arg7[%c169, %c0_28] : memref<456x4xbf16, #tpu.memory_space<vmem>>, vector<16x4xbf16>
    tpu.vector_store %arg7[%c169, %c0_28], %29 {strides = array<i32>} : memref<456x4xbf16, #tpu.memory_space<vmem>>, vector<16x4xbf16>,
    %c0_29 = arith.constant 0 : index
    %c7 = arith.constant 7 : index
    %c0_30 = arith.constant 0 : index
    %c0_31 = arith.constant 0 : index
    %31 = vector.load %arg1[%c0_29, %c7, %c0_30, %c0_31] : memref<1x16x16x4xf32, #tpu.memory_space<vmem>>, vector<1x1x16x4xf32>
    %32 = vector.shape_cast %31 : vector<1x1x16x4xf32> to vector<16x4xf32>
    %33 = arith.truncf %32 : vector<16x4xf32> to vector<16x4xbf16>
    %c193 = arith.constant 193 : index
    %c0_32 = arith.constant 0 : index
    %34 = vector.load %arg7[%c193, %c0_32] : memref<456x4xbf16, #tpu.memory_space<vmem>>, vector<16x4xbf16>
    tpu.vector_store %arg7[%c193, %c0_32], %33 {strides = array<i32>} : memref<456x4xbf16, #tpu.memory_space<vmem>>, vector<16x4xbf16>,
    %c0_33 = arith.constant 0 : index
    %c8 = arith.constant 8 : index
    %c0_34 = arith.constant 0 : index
    %c0_35 = arith.constant 0 : index
    %35 = vector.load %arg1[%c0_33, %c8, %c0_34, %c0_35] : memref<1x16x16x4xf32, #tpu.memory_space<vmem>>, vector<1x1x16x4xf32>
    %36 = vector.shape_cast %35 : vector<1x1x16x4xf32> to vector<16x4xf32>
    %37 = arith.truncf %36 : vector<16x4xf32> to vector<16x4xbf16>
    %c217 = arith.constant 217 : index
    %c0_36 = arith.constant 0 : index
    %38 = vector.load %arg7[%c217, %c0_36] : memref<456x4xbf16, #tpu.memory_space<vmem>>, vector<16x4xbf16>
    tpu.vector_store %arg7[%c217, %c0_36], %37 {strides = array<i32>} : memref<456x4xbf16, #tpu.memory_space<vmem>>, vector<16x4xbf16>,
    %c0_37 = arith.constant 0 : index
    %c9 = arith.constant 9 : index
    %c0_38 = arith.constant 0 : index
    %c0_39 = arith.constant 0 : index
    %39 = vector.load %arg1[%c0_37, %c9, %c0_38, %c0_39] : memref<1x16x16x4xf32, #tpu.memory_space<vmem>>, vector<1x1x16x4xf32>
    %40 = vector.shape_cast %39 : vector<1x1x16x4xf32> to vector<16x4xf32>
    %41 = arith.truncf %40 : vector<16x4xf32> to vector<16x4xbf16>
    %c241 = arith.constant 241 : index
    %c0_40 = arith.constant 0 : index
    %42 = vector.load %arg7[%c241, %c0_40] : memref<456x4xbf16, #tpu.memory_space<vmem>>, vector<16x4xbf16>
    tpu.vector_store %arg7[%c241, %c0_40], %41 {strides = array<i32>} : memref<456x4xbf16, #tpu.memory_space<vmem>>, vector<16x4xbf16>,
    %c0_41 = arith.constant 0 : index
    %c10 = arith.constant 10 : index
    %c0_42 = arith.constant 0 : index
    %c0_43 = arith.constant 0 : index
    %43 = vector.load %arg1[%c0_41, %c10, %c0_42, %c0_43] : memref<1x16x16x4xf32, #tpu.memory_space<vmem>>, vector<1x1x16x4xf32>
    %44 = vector.shape_cast %43 : vector<1x1x16x4xf32> to vector<16x4xf32>
    %45 = arith.truncf %44 : vector<16x4xf32> to vector<16x4xbf16>
    %c265 = arith.constant 265 : index
    %c0_44 = arith.constant 0 : index
    %46 = vector.load %arg7[%c265, %c0_44] : memref<456x4xbf16, #tpu.memory_space<vmem>>, vector<16x4xbf16>
    tpu.vector_store %arg7[%c265, %c0_44], %45 {strides = array<i32>} : memref<456x4xbf16, #tpu.memory_space<vmem>>, vector<16x4xbf16>,
    %c0_45 = arith.constant 0 : index
    %c11 = arith.constant 11 : index
    %c0_46 = arith.constant 0 : index
    %c0_47 = arith.constant 0 : index
    %47 = vector.load %arg1[%c0_45, %c11, %c0_46, %c0_47] : memref<1x16x16x4xf32, #tpu.memory_space<vmem>>, vector<1x1x16x4xf32>
    %48 = vector.shape_cast %47 : vector<1x1x16x4xf32> to vector<16x4xf32>
    %49 = arith.truncf %48 : vector<16x4xf32> to vector<16x4xbf16>
    %c289 = arith.constant 289 : index
    %c0_48 = arith.constant 0 : index
    %50 = vector.load %arg7[%c289, %c0_48] : memref<456x4xbf16, #tpu.memory_space<vmem>>, vector<16x4xbf16>
    tpu.vector_store %arg7[%c289, %c0_48], %49 {strides = array<i32>} : memref<456x4xbf16, #tpu.memory_space<vmem>>, vector<16x4xbf16>,
    %c0_49 = arith.constant 0 : index
    %c12 = arith.constant 12 : index
    %c0_50 = arith.constant 0 : index
    %c0_51 = arith.constant 0 : index
    %51 = vector.load %arg1[%c0_49, %c12, %c0_50, %c0_51] : memref<1x16x16x4xf32, #tpu.memory_space<vmem>>, vector<1x1x16x4xf32>
    %52 = vector.shape_cast %51 : vector<1x1x16x4xf32> to vector<16x4xf32>
    %53 = arith.truncf %52 : vector<16x4xf32> to vector<16x4xbf16>
    %c313 = arith.constant 313 : index
    %c0_52 = arith.constant 0 : index
    %54 = vector.load %arg7[%c313, %c0_52] : memref<456x4xbf16, #tpu.memory_space<vmem>>, vector<16x4xbf16>
    tpu.vector_store %arg7[%c313, %c0_52], %53 {strides = array<i32>} : memref<456x4xbf16, #tpu.memory_space<vmem>>, vector<16x4xbf16>,
    %c0_53 = arith.constant 0 : index
    %c13 = arith.constant 13 : index
    %c0_54 = arith.constant 0 : index
    %c0_55 = arith.constant 0 : index
    %55 = vector.load %arg1[%c0_53, %c13, %c0_54, %c0_55] : memref<1x16x16x4xf32, #tpu.memory_space<vmem>>, vector<1x1x16x4xf32>
    %56 = vector.shape_cast %55 : vector<1x1x16x4xf32> to vector<16x4xf32>
    %57 = arith.truncf %56 : vector<16x4xf32> to vector<16x4xbf16>
    %c337 = arith.constant 337 : index
    %c0_56 = arith.constant 0 : index
    %58 = vector.load %arg7[%c337, %c0_56] : memref<456x4xbf16, #tpu.memory_space<vmem>>, vector<16x4xbf16>
    tpu.vector_store %arg7[%c337, %c0_56], %57 {strides = array<i32>} : memref<456x4xbf16, #tpu.memory_space<vmem>>, vector<16x4xbf16>,
    %c0_57 = arith.constant 0 : index
    %c14 = arith.constant 14 : index
    %c0_58 = arith.constant 0 : index
    %c0_59 = arith.constant 0 : index
    %59 = vector.load %arg1[%c0_57, %c14, %c0_58, %c0_59] : memref<1x16x16x4xf32, #tpu.memory_space<vmem>>, vector<1x1x16x4xf32>
    %60 = vector.shape_cast %59 : vector<1x1x16x4xf32> to vector<16x4xf32>
    %61 = arith.truncf %60 : vector<16x4xf32> to vector<16x4xbf16>
    %c361 = arith.constant 361 : index
    %c0_60 = arith.constant 0 : index
    %62 = vector.load %arg7[%c361, %c0_60] : memref<456x4xbf16, #tpu.memory_space<vmem>>, vector<16x4xbf16>
    tpu.vector_store %arg7[%c361, %c0_60], %61 {strides = array<i32>} : memref<456x4xbf16, #tpu.memory_space<vmem>>, vector<16x4xbf16>,
    %c0_61 = arith.constant 0 : index
    %c15 = arith.constant 15 : index
    %c0_62 = arith.constant 0 : index
    %c0_63 = arith.constant 0 : index
    %63 = vector.load %arg1[%c0_61, %c15, %c0_62, %c0_63] : memref<1x16x16x4xf32, #tpu.memory_space<vmem>>, vector<1x1x16x4xf32>
    %64 = vector.shape_cast %63 : vector<1x1x16x4xf32> to vector<16x4xf32>
    %65 = arith.truncf %64 : vector<16x4xf32> to vector<16x4xbf16>
    %c385 = arith.constant 385 : index
    %c0_64 = arith.constant 0 : index
    %66 = vector.load %arg7[%c385, %c0_64] : memref<456x4xbf16, #tpu.memory_space<vmem>>, vector<16x4xbf16>
    tpu.vector_store %arg7[%c385, %c0_64], %65 {strides = array<i32>} : memref<456x4xbf16, #tpu.memory_space<vmem>>, vector<16x4xbf16>,
    %c0_65 = arith.constant 0 : index
    %c0_66 = arith.constant 0 : index
    %67 = vector.load %arg7[%c0_65, %c0_66] : memref<456x4xbf16, #tpu.memory_space<vmem>>, vector<120x4xbf16>
    %c1_67 = arith.constant 1 : index
    %c0_68 = arith.constant 0 : index
    %68 = vector.load %arg7[%c1_67, %c0_68] : memref<456x4xbf16, #tpu.memory_space<vmem>>, vector<120x4xbf16>
    %c2_69 = arith.constant 2 : index
    %c0_70 = arith.constant 0 : index
    %69 = vector.load %arg7[%c2_69, %c0_70] : memref<456x4xbf16, #tpu.memory_space<vmem>>, vector<120x4xbf16>
    %c24 = arith.constant 24 : index
    %c0_71 = arith.constant 0 : index
    %70 = vector.load %arg7[%c24, %c0_71] : memref<456x4xbf16, #tpu.memory_space<vmem>>, vector<120x4xbf16>
    %c25_72 = arith.constant 25 : index
    %c0_73 = arith.constant 0 : index
    %71 = vector.load %arg7[%c25_72, %c0_73] : memref<456x4xbf16, #tpu.memory_space<vmem>>, vector<120x4xbf16>
    %c26 = arith.constant 26 : index
    %c0_74 = arith.constant 0 : index
    %72 = vector.load %arg7[%c26, %c0_74] : memref<456x4xbf16, #tpu.memory_space<vmem>>, vector<120x4xbf16>
    %c48 = arith.constant 48 : index
    %c0_75 = arith.constant 0 : index
    %73 = vector.load %arg7[%c48, %c0_75] : memref<456x4xbf16, #tpu.memory_space<vmem>>, vector<120x4xbf16>
    %c49_76 = arith.constant 49 : index
    %c0_77 = arith.constant 0 : index
    %74 = vector.load %arg7[%c49_76, %c0_77] : memref<456x4xbf16, #tpu.memory_space<vmem>>, vector<120x4xbf16>
    %c50 = arith.constant 50 : index
    %c0_78 = arith.constant 0 : index
    %75 = vector.load %arg7[%c50, %c0_78] : memref<456x4xbf16, #tpu.memory_space<vmem>>, vector<120x4xbf16>
    %76 = tpu.concatenate %67, %68, %69, %70, %71, %72, %73, %74, %75 in 1 : vector<120x4xbf16>, vector<120x4xbf16>, vector<120x4xbf16>, vector<120x4xbf16>, vector<120x4xbf16>, vector<120x4xbf16>, vector<120x4xbf16>, vector<120x4xbf16>, vector<120x4xbf16> -> vector<120x36xbf16>
    %c0_79 = arith.constant 0 : index
    %c0_80 = arith.constant 0 : index
    %77 = vector.load %arg2[%c0_79, %c0_80] : memref<36x4xbf16, #tpu.memory_space<vmem>>, vector<36x4xbf16>
    %cst = arith.constant dense<0.000000e+00> : vector<120x4xf32>
    %78 = tpu.matmul %76, %77, %cst {dimension_numbers = #tpu.dot_dimension_numbers<[1], [0], [0], [1], [0, 0, 1, 1], [], []>} : vector<120x36xbf16>, vector<36x4xbf16>, vector<120x4xf32> -> vector<120x4xf32>
    %c0_81 = arith.constant 0 : index
    %c0_82 = arith.constant 0 : index
    %79 = vector.load %arg3[%c0_81, %c0_82] : memref<1x4xf32, #tpu.memory_space<vmem>>, vector<1x4xf32>
    %80 = vector.broadcast %79 : vector<1x4xf32> to vector<120x4xf32>
    %81 = arith.addf %78, %80 : vector<120x4xf32>
    %cst_83 = arith.constant 0.000000e+00 : f32
    %82 = vector.broadcast %cst_83 : f32 to vector<120x4xf32>
    %83 = arith.maximumf %81, %82 : vector<120x4xf32>
    %84 = vector.shape_cast %83 : vector<120x4xf32> to vector<5x24x4xf32>
    %85 = tpu.iota {dimensions = array<i32: 1>} : vector<1x24x1xi32>
    %c16_i32 = arith.constant 16 : i32
    %86 = vector.broadcast %c16_i32 : i32 to vector<1x24x1xi32>
    %87 = arith.cmpi slt, %85, %86 : vector<1x24x1xi32>
    %cst_84 = arith.constant 0.000000e+00 : f32
    %88 = vector.shape_cast %87 : vector<1x24x1xi1> to vector<1x24x1xi1>
    %89 = vector.broadcast %88 : vector<1x24x1xi1> to vector<5x24x4xi1>
    %90 = vector.broadcast %cst_84 : f32 to vector<5x24x4xf32>
    %91 = arith.select %89, %84, %90 : vector<5x24x4xi1>, vector<5x24x4xf32>
    %92 = vector.shape_cast %91 : vector<5x24x4xf32> to vector<120x4xf32>
    %93 = arith.truncf %92 : vector<120x4xf32> to vector<120x4xbf16>
    %c25_85 = arith.constant 25 : index
    %c0_86 = arith.constant 0 : index
    %94 = vector.load %arg8[%c25_85, %c0_86] : memref<456x4xbf16, #tpu.memory_space<vmem>>, vector<120x4xbf16>
    tpu.vector_store %arg8[%c25_85, %c0_86], %93 {strides = array<i32>} : memref<456x4xbf16, #tpu.memory_space<vmem>>, vector<120x4xbf16>,
    %c120 = arith.constant 120 : index
    %c0_87 = arith.constant 0 : index
    %95 = vector.load %arg7[%c120, %c0_87] : memref<456x4xbf16, #tpu.memory_space<vmem>>, vector<120x4xbf16>
    %c121_88 = arith.constant 121 : index
    %c0_89 = arith.constant 0 : index
    %96 = vector.load %arg7[%c121_88, %c0_89] : memref<456x4xbf16, #tpu.memory_space<vmem>>, vector<120x4xbf16>
    %c122 = arith.constant 122 : index
    %c0_90 = arith.constant 0 : index
    %97 = vector.load %arg7[%c122, %c0_90] : memref<456x4xbf16, #tpu.memory_space<vmem>>, vector<120x4xbf16>
    %c144 = arith.constant 144 : index
    %c0_91 = arith.constant 0 : index
    %98 = vector.load %arg7[%c144, %c0_91] : memref<456x4xbf16, #tpu.memory_space<vmem>>, vector<120x4xbf16>
    %c145_92 = arith.constant 145 : index
    %c0_93 = arith.constant 0 : index
    %99 = vector.load %arg7[%c145_92, %c0_93] : memref<456x4xbf16, #tpu.memory_space<vmem>>, vector<120x4xbf16>
    %c146 = arith.constant 146 : index
    %c0_94 = arith.constant 0 : index
    %100 = vector.load %arg7[%c146, %c0_94] : memref<456x4xbf16, #tpu.memory_space<vmem>>, vector<120x4xbf16>
    %c168 = arith.constant 168 : index
    %c0_95 = arith.constant 0 : index
    %101 = vector.load %arg7[%c168, %c0_95] : memref<456x4xbf16, #tpu.memory_space<vmem>>, vector<120x4xbf16>
    %c169_96 = arith.constant 169 : index
    %c0_97 = arith.constant 0 : index
    %102 = vector.load %arg7[%c169_96, %c0_97] : memref<456x4xbf16, #tpu.memory_space<vmem>>, vector<120x4xbf16>
    %c170 = arith.constant 170 : index
    %c0_98 = arith.constant 0 : index
    %103 = vector.load %arg7[%c170, %c0_98] : memref<456x4xbf16, #tpu.memory_space<vmem>>, vector<120x4xbf16>
    %104 = tpu.concatenate %95, %96, %97, %98, %99, %100, %101, %102, %103 in 1 : vector<120x4xbf16>, vector<120x4xbf16>, vector<120x4xbf16>, vector<120x4xbf16>, vector<120x4xbf16>, vector<120x4xbf16>, vector<120x4xbf16>, vector<120x4xbf16>, vector<120x4xbf16> -> vector<120x36xbf16>
    %c0_99 = arith.constant 0 : index
    %c0_100 = arith.constant 0 : index
    %105 = vector.load %arg2[%c0_99, %c0_100] : memref<36x4xbf16, #tpu.memory_space<vmem>>, vector<36x4xbf16>
    %cst_101 = arith.constant dense<0.000000e+00> : vector<120x4xf32>
    %106 = tpu.matmul %104, %105, %cst_101 {dimension_numbers = #tpu.dot_dimension_numbers<[1], [0], [0], [1], [0, 0, 1, 1], [], []>} : vector<120x36xbf16>, vector<36x4xbf16>, vector<120x4xf32> -> vector<120x4xf32>
    %c0_102 = arith.constant 0 : index
    %c0_103 = arith.constant 0 : index
    %107 = vector.load %arg3[%c0_102, %c0_103] : memref<1x4xf32, #tpu.memory_space<vmem>>, vector<1x4xf32>
    %108 = vector.broadcast %107 : vector<1x4xf32> to vector<120x4xf32>
    %109 = arith.addf %106, %108 : vector<120x4xf32>
    %cst_104 = arith.constant 0.000000e+00 : f32
    %110 = vector.broadcast %cst_104 : f32 to vector<120x4xf32>
    %111 = arith.maximumf %109, %110 : vector<120x4xf32>
    %112 = vector.shape_cast %111 : vector<120x4xf32> to vector<5x24x4xf32>
    %113 = tpu.iota {dimensions = array<i32: 1>} : vector<1x24x1xi32>
    %c16_i32_105 = arith.constant 16 : i32
    %114 = vector.broadcast %c16_i32_105 : i32 to vector<1x24x1xi32>
    %115 = arith.cmpi slt, %113, %114 : vector<1x24x1xi32>
    %cst_106 = arith.constant 0.000000e+00 : f32
    %116 = vector.shape_cast %115 : vector<1x24x1xi1> to vector<1x24x1xi1>
    %117 = vector.broadcast %116 : vector<1x24x1xi1> to vector<5x24x4xi1>
    %118 = vector.broadcast %cst_106 : f32 to vector<5x24x4xf32>
    %119 = arith.select %117, %112, %118 : vector<5x24x4xi1>, vector<5x24x4xf32>
    %120 = vector.shape_cast %119 : vector<5x24x4xf32> to vector<120x4xf32>
    %121 = arith.truncf %120 : vector<120x4xf32> to vector<120x4xbf16>
    %c145_107 = arith.constant 145 : index
    %c0_108 = arith.constant 0 : index
    %122 = vector.load %arg8[%c145_107, %c0_108] : memref<456x4xbf16, #tpu.memory_space<vmem>>, vector<120x4xbf16>
    tpu.vector_store %arg8[%c145_107, %c0_108], %121 {strides = array<i32>} : memref<456x4xbf16, #tpu.memory_space<vmem>>, vector<120x4xbf16>,
    %c240 = arith.constant 240 : index
    %c0_109 = arith.constant 0 : index
    %123 = vector.load %arg7[%c240, %c0_109] : memref<456x4xbf16, #tpu.memory_space<vmem>>, vector<120x4xbf16>
    %c241_110 = arith.constant 241 : index
    %c0_111 = arith.constant 0 : index
    %124 = vector.load %arg7[%c241_110, %c0_111] : memref<456x4xbf16, #tpu.memory_space<vmem>>, vector<120x4xbf16>
    %c242 = arith.constant 242 : index
    %c0_112 = arith.constant 0 : index
    %125 = vector.load %arg7[%c242, %c0_112] : memref<456x4xbf16, #tpu.memory_space<vmem>>, vector<120x4xbf16>
    %c264 = arith.constant 264 : index
    %c0_113 = arith.constant 0 : index
    %126 = vector.load %arg7[%c264, %c0_113] : memref<456x4xbf16, #tpu.memory_space<vmem>>, vector<120x4xbf16>
    %c265_114 = arith.constant 265 : index
    %c0_115 = arith.constant 0 : index
    %127 = vector.load %arg7[%c265_114, %c0_115] : memref<456x4xbf16, #tpu.memory_space<vmem>>, vector<120x4xbf16>
    %c266 = arith.constant 266 : index
    %c0_116 = arith.constant 0 : index
    %128 = vector.load %arg7[%c266, %c0_116] : memref<456x4xbf16, #tpu.memory_space<vmem>>, vector<120x4xbf16>
    %c288 = arith.constant 288 : index
    %c0_117 = arith.constant 0 : index
    %129 = vector.load %arg7[%c288, %c0_117] : memref<456x4xbf16, #tpu.memory_space<vmem>>, vector<120x4xbf16>
    %c289_118 = arith.constant 289 : index
    %c0_119 = arith.constant 0 : index
    %130 = vector.load %arg7[%c289_118, %c0_119] : memref<456x4xbf16, #tpu.memory_space<vmem>>, vector<120x4xbf16>
    %c290 = arith.constant 290 : index
    %c0_120 = arith.constant 0 : index
    %131 = vector.load %arg7[%c290, %c0_120] : memref<456x4xbf16, #tpu.memory_space<vmem>>, vector<120x4xbf16>
    %132 = tpu.concatenate %123, %124, %125, %126, %127, %128, %129, %130, %131 in 1 : vector<120x4xbf16>, vector<120x4xbf16>, vector<120x4xbf16>, vector<120x4xbf16>, vector<120x4xbf16>, vector<120x4xbf16>, vector<120x4xbf16>, vector<120x4xbf16>, vector<120x4xbf16> -> vector<120x36xbf16>
    %c0_121 = arith.constant 0 : index
    %c0_122 = arith.constant 0 : index
    %133 = vector.load %arg2[%c0_121, %c0_122] : memref<36x4xbf16, #tpu.memory_space<vmem>>, vector<36x4xbf16>
    %cst_123 = arith.constant dense<0.000000e+00> : vector<120x4xf32>
    %134 = tpu.matmul %132, %133, %cst_123 {dimension_numbers = #tpu.dot_dimension_numbers<[1], [0], [0], [1], [0, 0, 1, 1], [], []>} : vector<120x36xbf16>, vector<36x4xbf16>, vector<120x4xf32> -> vector<120x4xf32>
    %c0_124 = arith.constant 0 : index
    %c0_125 = arith.constant 0 : index
    %135 = vector.load %arg3[%c0_124, %c0_125] : memref<1x4xf32, #tpu.memory_space<vmem>>, vector<1x4xf32>
    %136 = vector.broadcast %135 : vector<1x4xf32> to vector<120x4xf32>
    %137 = arith.addf %134, %136 : vector<120x4xf32>
    %cst_126 = arith.constant 0.000000e+00 : f32
    %138 = vector.broadcast %cst_126 : f32 to vector<120x4xf32>
    %139 = arith.maximumf %137, %138 : vector<120x4xf32>
    %140 = vector.shape_cast %139 : vector<120x4xf32> to vector<5x24x4xf32>
    %141 = tpu.iota {dimensions = array<i32: 1>} : vector<1x24x1xi32>
    %c16_i32_127 = arith.constant 16 : i32
    %142 = vector.broadcast %c16_i32_127 : i32 to vector<1x24x1xi32>
    %143 = arith.cmpi slt, %141, %142 : vector<1x24x1xi32>
    %cst_128 = arith.constant 0.000000e+00 : f32
    %144 = vector.shape_cast %143 : vector<1x24x1xi1> to vector<1x24x1xi1>
    %145 = vector.broadcast %144 : vector<1x24x1xi1> to vector<5x24x4xi1>
    %146 = vector.broadcast %cst_128 : f32 to vector<5x24x4xf32>
    %147 = arith.select %145, %140, %146 : vector<5x24x4xi1>, vector<5x24x4xf32>
    %148 = vector.shape_cast %147 : vector<5x24x4xf32> to vector<120x4xf32>
    %149 = arith.truncf %148 : vector<120x4xf32> to vector<120x4xbf16>
    %c265_129 = arith.constant 265 : index
    %c0_130 = arith.constant 0 : index
    %150 = vector.load %arg8[%c265_129, %c0_130] : memref<456x4xbf16, #tpu.memory_space<vmem>>, vector<120x4xbf16>
    tpu.vector_store %arg8[%c265_129, %c0_130], %149 {strides = array<i32>} : memref<456x4xbf16, #tpu.memory_space<vmem>>, vector<120x4xbf16>,
    %c360 = arith.constant 360 : index
    %c0_131 = arith.constant 0 : index
    %151 = vector.load %arg7[%c360, %c0_131] : memref<456x4xbf16, #tpu.memory_space<vmem>>, vector<24x4xbf16>
    %c361_132 = arith.constant 361 : index
    %c0_133 = arith.constant 0 : index
    %152 = vector.load %arg7[%c361_132, %c0_133] : memref<456x4xbf16, #tpu.memory_space<vmem>>, vector<24x4xbf16>
    %c362 = arith.constant 362 : index
    %c0_134 = arith.constant 0 : index
    %153 = vector.load %arg7[%c362, %c0_134] : memref<456x4xbf16, #tpu.memory_space<vmem>>, vector<24x4xbf16>
    %c384 = arith.constant 384 : index
    %c0_135 = arith.constant 0 : index
    %154 = vector.load %arg7[%c384, %c0_135] : memref<456x4xbf16, #tpu.memory_space<vmem>>, vector<24x4xbf16>
    %c385_136 = arith.constant 385 : index
    %c0_137 = arith.constant 0 : index
    %155 = vector.load %arg7[%c385_136, %c0_137] : memref<456x4xbf16, #tpu.memory_space<vmem>>, vector<24x4xbf16>
    %c386 = arith.constant 386 : index
    %c0_138 = arith.constant 0 : index
    %156 = vector.load %arg7[%c386, %c0_138] : memref<456x4xbf16, #tpu.memory_space<vmem>>, vector<24x4xbf16>
    %c408 = arith.constant 408 : index
    %c0_139 = arith.constant 0 : index
    %157 = vector.load %arg7[%c408, %c0_139] : memref<456x4xbf16, #tpu.memory_space<vmem>>, vector<24x4xbf16>
    %c409 = arith.constant 409 : index
    %c0_140 = arith.constant 0 : index
    %158 = vector.load %arg7[%c409, %c0_140] : memref<456x4xbf16, #tpu.memory_space<vmem>>, vector<24x4xbf16>
    %c410 = arith.constant 410 : index
    %c0_141 = arith.constant 0 : index
    %159 = vector.load %arg7[%c410, %c0_141] : memref<456x4xbf16, #tpu.memory_space<vmem>>, vector<24x4xbf16>
    %160 = tpu.concatenate %151, %152, %153, %154, %155, %156, %157, %158, %159 in 1 : vector<24x4xbf16>, vector<24x4xbf16>, vector<24x4xbf16>, vector<24x4xbf16>, vector<24x4xbf16>, vector<24x4xbf16>, vector<24x4xbf16>, vector<24x4xbf16>, vector<24x4xbf16> -> vector<24x36xbf16>
    %c0_142 = arith.constant 0 : index
    %c0_143 = arith.constant 0 : index
    %161 = vector.load %arg2[%c0_142, %c0_143] : memref<36x4xbf16, #tpu.memory_space<vmem>>, vector<36x4xbf16>
    %cst_144 = arith.constant dense<0.000000e+00> : vector<24x4xf32>
    %162 = tpu.matmul %160, %161, %cst_144 {dimension_numbers = #tpu.dot_dimension_numbers<[1], [0], [0], [1], [0, 0, 1, 1], [], []>} : vector<24x36xbf16>, vector<36x4xbf16>, vector<24x4xf32> -> vector<24x4xf32>
    %c0_145 = arith.constant 0 : index
    %c0_146 = arith.constant 0 : index
    %163 = vector.load %arg3[%c0_145, %c0_146] : memref<1x4xf32, #tpu.memory_space<vmem>>, vector<1x4xf32>
    %164 = vector.broadcast %163 : vector<1x4xf32> to vector<24x4xf32>
    %165 = arith.addf %162, %164 : vector<24x4xf32>
    %cst_147 = arith.constant 0.000000e+00 : f32
    %166 = vector.broadcast %cst_147 : f32 to vector<24x4xf32>
    %167 = arith.maximumf %165, %166 : vector<24x4xf32>
    %168 = vector.shape_cast %167 : vector<24x4xf32> to vector<1x24x4xf32>
    %169 = tpu.iota {dimensions = array<i32: 1>} : vector<1x24x1xi32>
    %c16_i32_148 = arith.constant 16 : i32
    %170 = vector.broadcast %c16_i32_148 : i32 to vector<1x24x1xi32>
    %171 = arith.cmpi slt, %169, %170 : vector<1x24x1xi32>
    %cst_149 = arith.constant 0.000000e+00 : f32
    %172 = vector.shape_cast %171 : vector<1x24x1xi1> to vector<1x24x1xi1>
    %173 = vector.broadcast %172 : vector<1x24x1xi1> to vector<1x24x4xi1>
    %174 = vector.broadcast %cst_149 : f32 to vector<1x24x4xf32>
    %175 = arith.select %173, %168, %174 : vector<1x24x4xi1>, vector<1x24x4xf32>
    %176 = vector.shape_cast %175 : vector<1x24x4xf32> to vector<24x4xf32>
    %177 = arith.truncf %176 : vector<24x4xf32> to vector<24x4xbf16>
    %c385_150 = arith.constant 385 : index
    %c0_151 = arith.constant 0 : index
    %178 = vector.load %arg8[%c385_150, %c0_151] : memref<456x4xbf16, #tpu.memory_space<vmem>>, vector<24x4xbf16>
    tpu.vector_store %arg8[%c385_150, %c0_151], %177 {strides = array<i32>} : memref<456x4xbf16, #tpu.memory_space<vmem>>, vector<24x4xbf16>,
    %c0_152 = arith.constant 0 : index
    %c0_153 = arith.constant 0 : index
    %179 = vector.load %arg8[%c0_152, %c0_153] : memref<456x4xbf16, #tpu.memory_space<vmem>>, vector<120x4xbf16>
    %c1_154 = arith.constant 1 : index
    %c0_155 = arith.constant 0 : index
    %180 = vector.load %arg8[%c1_154, %c0_155] : memref<456x4xbf16, #tpu.memory_space<vmem>>, vector<120x4xbf16>
    %c2_156 = arith.constant 2 : index
    %c0_157 = arith.constant 0 : index
    %181 = vector.load %arg8[%c2_156, %c0_157] : memref<456x4xbf16, #tpu.memory_space<vmem>>, vector<120x4xbf16>
    %c24_158 = arith.constant 24 : index
    %c0_159 = arith.constant 0 : index
    %182 = vector.load %arg8[%c24_158, %c0_159] : memref<456x4xbf16, #tpu.memory_space<vmem>>, vector<120x4xbf16>
    %c25_160 = arith.constant 25 : index
    %c0_161 = arith.constant 0 : index
    %183 = vector.load %arg8[%c25_160, %c0_161] : memref<456x4xbf16, #tpu.memory_space<vmem>>, vector<120x4xbf16>
    %c26_162 = arith.constant 26 : index
    %c0_163 = arith.constant 0 : index
    %184 = vector.load %arg8[%c26_162, %c0_163] : memref<456x4xbf16, #tpu.memory_space<vmem>>, vector<120x4xbf16>
    %c48_164 = arith.constant 48 : index
    %c0_165 = arith.constant 0 : index
    %185 = vector.load %arg8[%c48_164, %c0_165] : memref<456x4xbf16, #tpu.memory_space<vmem>>, vector<120x4xbf16>
    %c49_166 = arith.constant 49 : index
    %c0_167 = arith.constant 0 : index
    %186 = vector.load %arg8[%c49_166, %c0_167] : memref<456x4xbf16, #tpu.memory_space<vmem>>, vector<120x4xbf16>
    %c50_168 = arith.constant 50 : index
    %c0_169 = arith.constant 0 : index
    %187 = vector.load %arg8[%c50_168, %c0_169] : memref<456x4xbf16, #tpu.memory_space<vmem>>, vector<120x4xbf16>
    %188 = tpu.concatenate %179, %180, %181, %182, %183, %184, %185, %186, %187 in 1 : vector<120x4xbf16>, vector<120x4xbf16>, vector<120x4xbf16>, vector<120x4xbf16>, vector<120x4xbf16>, vector<120x4xbf16>, vector<120x4xbf16>, vector<120x4xbf16>, vector<120x4xbf16> -> vector<120x36xbf16>
    %c0_170 = arith.constant 0 : index
    %c0_171 = arith.constant 0 : index
    %189 = vector.load %arg4[%c0_170, %c0_171] : memref<36x4xbf16, #tpu.memory_space<vmem>>, vector<36x4xbf16>
    %cst_172 = arith.constant dense<0.000000e+00> : vector<120x4xf32>
    %190 = tpu.matmul %188, %189, %cst_172 {dimension_numbers = #tpu.dot_dimension_numbers<[1], [0], [0], [1], [0, 0, 1, 1], [], []>} : vector<120x36xbf16>, vector<36x4xbf16>, vector<120x4xf32> -> vector<120x4xf32>
    %c0_173 = arith.constant 0 : index
    %c0_174 = arith.constant 0 : index
    %191 = vector.load %arg5[%c0_173, %c0_174] : memref<1x4xf32, #tpu.memory_space<vmem>>, vector<1x4xf32>
    %192 = vector.broadcast %191 : vector<1x4xf32> to vector<120x4xf32>
    %193 = arith.addf %190, %192 : vector<120x4xf32>
    %194 = vector.shape_cast %193 : vector<120x4xf32> to vector<5x24x4xf32>
    %195 = vector.extract_strided_slice %194 {offsets = [0, 0, 0], sizes = [5, 16, 4], strides = [1, 1, 1]} : vector<5x24x4xf32> to vector<5x16x4xf32>
    %c0_175 = arith.constant 0 : index
    %c0_176 = arith.constant 0 : index
    %c0_177 = arith.constant 0 : index
    %c0_178 = arith.constant 0 : index
    %196 = vector.load %arg1[%c0_175, %c0_176, %c0_177, %c0_178] : memref<1x16x16x4xf32, #tpu.memory_space<vmem>>, vector<1x5x16x4xf32>
    %197 = vector.shape_cast %196 : vector<1x5x16x4xf32> to vector<5x16x4xf32>
    %198 = arith.addf %195, %197 : vector<5x16x4xf32>
    %cst_179 = arith.constant 0.000000e+00 : f32
    %199 = vector.broadcast %cst_179 : f32 to vector<5x16x4xf32>
    %200 = arith.maximumf %198, %199 : vector<5x16x4xf32>
    %c0_180 = arith.constant 0 : index
    %c0_181 = arith.constant 0 : index
    %c0_182 = arith.constant 0 : index
    %c0_183 = arith.constant 0 : index
    %201 = vector.load %arg6[%c0_180, %c0_181, %c0_182, %c0_183] : memref<1x16x16x4xf32, #tpu.memory_space<vmem>>, vector<1x5x16x4xf32>
    %202 = vector.shape_cast %201 : vector<1x5x16x4xf32> to vector<5x16x4xf32>
    %203 = vector.shape_cast %200 : vector<5x16x4xf32> to vector<1x5x16x4xf32>
    tpu.vector_store %arg6[%c0_180, %c0_181, %c0_182, %c0_183], %203 {strides = array<i32>} : memref<1x16x16x4xf32, #tpu.memory_space<vmem>>, vector<1x5x16x4xf32>,
    %c120_184 = arith.constant 120 : index
    %c0_185 = arith.constant 0 : index
    %204 = vector.load %arg8[%c120_184, %c0_185] : memref<456x4xbf16, #tpu.memory_space<vmem>>, vector<120x4xbf16>
    %c121_186 = arith.constant 121 : index
    %c0_187 = arith.constant 0 : index
    %205 = vector.load %arg8[%c121_186, %c0_187] : memref<456x4xbf16, #tpu.memory_space<vmem>>, vector<120x4xbf16>
    %c122_188 = arith.constant 122 : index
    %c0_189 = arith.constant 0 : index
    %206 = vector.load %arg8[%c122_188, %c0_189] : memref<456x4xbf16, #tpu.memory_space<vmem>>, vector<120x4xbf16>
    %c144_190 = arith.constant 144 : index
    %c0_191 = arith.constant 0 : index
    %207 = vector.load %arg8[%c144_190, %c0_191] : memref<456x4xbf16, #tpu.memory_space<vmem>>, vector<120x4xbf16>
    %c145_192 = arith.constant 145 : index
    %c0_193 = arith.constant 0 : index
    %208 = vector.load %arg8[%c145_192, %c0_193] : memref<456x4xbf16, #tpu.memory_space<vmem>>, vector<120x4xbf16>
    %c146_194 = arith.constant 146 : index
    %c0_195 = arith.constant 0 : index
    %209 = vector.load %arg8[%c146_194, %c0_195] : memref<456x4xbf16, #tpu.memory_space<vmem>>, vector<120x4xbf16>
    %c168_196 = arith.constant 168 : index
    %c0_197 = arith.constant 0 : index
    %210 = vector.load %arg8[%c168_196, %c0_197] : memref<456x4xbf16, #tpu.memory_space<vmem>>, vector<120x4xbf16>
    %c169_198 = arith.constant 169 : index
    %c0_199 = arith.constant 0 : index
    %211 = vector.load %arg8[%c169_198, %c0_199] : memref<456x4xbf16, #tpu.memory_space<vmem>>, vector<120x4xbf16>
    %c170_200 = arith.constant 170 : index
    %c0_201 = arith.constant 0 : index
    %212 = vector.load %arg8[%c170_200, %c0_201] : memref<456x4xbf16, #tpu.memory_space<vmem>>, vector<120x4xbf16>
    %213 = tpu.concatenate %204, %205, %206, %207, %208, %209, %210, %211, %212 in 1 : vector<120x4xbf16>, vector<120x4xbf16>, vector<120x4xbf16>, vector<120x4xbf16>, vector<120x4xbf16>, vector<120x4xbf16>, vector<120x4xbf16>, vector<120x4xbf16>, vector<120x4xbf16> -> vector<120x36xbf16>
    %c0_202 = arith.constant 0 : index
    %c0_203 = arith.constant 0 : index
    %214 = vector.load %arg4[%c0_202, %c0_203] : memref<36x4xbf16, #tpu.memory_space<vmem>>, vector<36x4xbf16>
    %cst_204 = arith.constant dense<0.000000e+00> : vector<120x4xf32>
    %215 = tpu.matmul %213, %214, %cst_204 {dimension_numbers = #tpu.dot_dimension_numbers<[1], [0], [0], [1], [0, 0, 1, 1], [], []>} : vector<120x36xbf16>, vector<36x4xbf16>, vector<120x4xf32> -> vector<120x4xf32>
    %c0_205 = arith.constant 0 : index
    %c0_206 = arith.constant 0 : index
    %216 = vector.load %arg5[%c0_205, %c0_206] : memref<1x4xf32, #tpu.memory_space<vmem>>, vector<1x4xf32>
    %217 = vector.broadcast %216 : vector<1x4xf32> to vector<120x4xf32>
    %218 = arith.addf %215, %217 : vector<120x4xf32>
    %219 = vector.shape_cast %218 : vector<120x4xf32> to vector<5x24x4xf32>
    %220 = vector.extract_strided_slice %219 {offsets = [0, 0, 0], sizes = [5, 16, 4], strides = [1, 1, 1]} : vector<5x24x4xf32> to vector<5x16x4xf32>
    %c0_207 = arith.constant 0 : index
    %c5_208 = arith.constant 5 : index
    %c0_209 = arith.constant 0 : index
    %c0_210 = arith.constant 0 : index
    %221 = vector.load %arg1[%c0_207, %c5_208, %c0_209, %c0_210] : memref<1x16x16x4xf32, #tpu.memory_space<vmem>>, vector<1x5x16x4xf32>
    %222 = vector.shape_cast %221 : vector<1x5x16x4xf32> to vector<5x16x4xf32>
    %223 = arith.addf %220, %222 : vector<5x16x4xf32>
    %cst_211 = arith.constant 0.000000e+00 : f32
    %224 = vector.broadcast %cst_211 : f32 to vector<5x16x4xf32>
    %225 = arith.maximumf %223, %224 : vector<5x16x4xf32>
    %c0_212 = arith.constant 0 : index
    %c5_213 = arith.constant 5 : index
    %c0_214 = arith.constant 0 : index
    %c0_215 = arith.constant 0 : index
    %226 = vector.load %arg6[%c0_212, %c5_213, %c0_214, %c0_215] : memref<1x16x16x4xf32, #tpu.memory_space<vmem>>, vector<1x5x16x4xf32>
    %227 = vector.shape_cast %226 : vector<1x5x16x4xf32> to vector<5x16x4xf32>
    %228 = vector.shape_cast %225 : vector<5x16x4xf32> to vector<1x5x16x4xf32>
    tpu.vector_store %arg6[%c0_212, %c5_213, %c0_214, %c0_215], %228 {strides = array<i32>} : memref<1x16x16x4xf32, #tpu.memory_space<vmem>>, vector<1x5x16x4xf32>,
    %c240_216 = arith.constant 240 : index
    %c0_217 = arith.constant 0 : index
    %229 = vector.load %arg8[%c240_216, %c0_217] : memref<456x4xbf16, #tpu.memory_space<vmem>>, vector<120x4xbf16>
    %c241_218 = arith.constant 241 : index
    %c0_219 = arith.constant 0 : index
    %230 = vector.load %arg8[%c241_218, %c0_219] : memref<456x4xbf16, #tpu.memory_space<vmem>>, vector<120x4xbf16>
    %c242_220 = arith.constant 242 : index
    %c0_221 = arith.constant 0 : index
    %231 = vector.load %arg8[%c242_220, %c0_221] : memref<456x4xbf16, #tpu.memory_space<vmem>>, vector<120x4xbf16>
    %c264_222 = arith.constant 264 : index
    %c0_223 = arith.constant 0 : index
    %232 = vector.load %arg8[%c264_222, %c0_223] : memref<456x4xbf16, #tpu.memory_space<vmem>>, vector<120x4xbf16>
    %c265_224 = arith.constant 265 : index
    %c0_225 = arith.constant 0 : index
    %233 = vector.load %arg8[%c265_224, %c0_225] : memref<456x4xbf16, #tpu.memory_space<vmem>>, vector<120x4xbf16>
    %c266_226 = arith.constant 266 : index
    %c0_227 = arith.constant 0 : index
    %234 = vector.load %arg8[%c266_226, %c0_227] : memref<456x4xbf16, #tpu.memory_space<vmem>>, vector<120x4xbf16>
    %c288_228 = arith.constant 288 : index
    %c0_229 = arith.constant 0 : index
    %235 = vector.load %arg8[%c288_228, %c0_229] : memref<456x4xbf16, #tpu.memory_space<vmem>>, vector<120x4xbf16>
    %c289_230 = arith.constant 289 : index
    %c0_231 = arith.constant 0 : index
    %236 = vector.load %arg8[%c289_230, %c0_231] : memref<456x4xbf16, #tpu.memory_space<vmem>>, vector<120x4xbf16>
    %c290_232 = arith.constant 290 : index
    %c0_233 = arith.constant 0 : index
    %237 = vector.load %arg8[%c290_232, %c0_233] : memref<456x4xbf16, #tpu.memory_space<vmem>>, vector<120x4xbf16>
    %238 = tpu.concatenate %229, %230, %231, %232, %233, %234, %235, %236, %237 in 1 : vector<120x4xbf16>, vector<120x4xbf16>, vector<120x4xbf16>, vector<120x4xbf16>, vector<120x4xbf16>, vector<120x4xbf16>, vector<120x4xbf16>, vector<120x4xbf16>, vector<120x4xbf16> -> vector<120x36xbf16>
    %c0_234 = arith.constant 0 : index
    %c0_235 = arith.constant 0 : index
    %239 = vector.load %arg4[%c0_234, %c0_235] : memref<36x4xbf16, #tpu.memory_space<vmem>>, vector<36x4xbf16>
    %cst_236 = arith.constant dense<0.000000e+00> : vector<120x4xf32>
    %240 = tpu.matmul %238, %239, %cst_236 {dimension_numbers = #tpu.dot_dimension_numbers<[1], [0], [0], [1], [0, 0, 1, 1], [], []>} : vector<120x36xbf16>, vector<36x4xbf16>, vector<120x4xf32> -> vector<120x4xf32>
    %c0_237 = arith.constant 0 : index
    %c0_238 = arith.constant 0 : index
    %241 = vector.load %arg5[%c0_237, %c0_238] : memref<1x4xf32, #tpu.memory_space<vmem>>, vector<1x4xf32>
    %242 = vector.broadcast %241 : vector<1x4xf32> to vector<120x4xf32>
    %243 = arith.addf %240, %242 : vector<120x4xf32>
    %244 = vector.shape_cast %243 : vector<120x4xf32> to vector<5x24x4xf32>
    %245 = vector.extract_strided_slice %244 {offsets = [0, 0, 0], sizes = [5, 16, 4], strides = [1, 1, 1]} : vector<5x24x4xf32> to vector<5x16x4xf32>
    %c0_239 = arith.constant 0 : index
    %c10_240 = arith.constant 10 : index
    %c0_241 = arith.constant 0 : index
    %c0_242 = arith.constant 0 : index
    %246 = vector.load %arg1[%c0_239, %c10_240, %c0_241, %c0_242] : memref<1x16x16x4xf32, #tpu.memory_space<vmem>>, vector<1x5x16x4xf32>
    %247 = vector.shape_cast %246 : vector<1x5x16x4xf32> to vector<5x16x4xf32>
    %248 = arith.addf %245, %247 : vector<5x16x4xf32>
    %cst_243 = arith.constant 0.000000e+00 : f32
    %249 = vector.broadcast %cst_243 : f32 to vector<5x16x4xf32>
    %250 = arith.maximumf %248, %249 : vector<5x16x4xf32>
    %c0_244 = arith.constant 0 : index
    %c10_245 = arith.constant 10 : index
    %c0_246 = arith.constant 0 : index
    %c0_247 = arith.constant 0 : index
    %251 = vector.load %arg6[%c0_244, %c10_245, %c0_246, %c0_247] : memref<1x16x16x4xf32, #tpu.memory_space<vmem>>, vector<1x5x16x4xf32>
    %252 = vector.shape_cast %251 : vector<1x5x16x4xf32> to vector<5x16x4xf32>
    %253 = vector.shape_cast %250 : vector<5x16x4xf32> to vector<1x5x16x4xf32>
    tpu.vector_store %arg6[%c0_244, %c10_245, %c0_246, %c0_247], %253 {strides = array<i32>} : memref<1x16x16x4xf32, #tpu.memory_space<vmem>>, vector<1x5x16x4xf32>,
    %c360_248 = arith.constant 360 : index
    %c0_249 = arith.constant 0 : index
    %254 = vector.load %arg8[%c360_248, %c0_249] : memref<456x4xbf16, #tpu.memory_space<vmem>>, vector<24x4xbf16>
    %c361_250 = arith.constant 361 : index
    %c0_251 = arith.constant 0 : index
    %255 = vector.load %arg8[%c361_250, %c0_251] : memref<456x4xbf16, #tpu.memory_space<vmem>>, vector<24x4xbf16>
    %c362_252 = arith.constant 362 : index
    %c0_253 = arith.constant 0 : index
    %256 = vector.load %arg8[%c362_252, %c0_253] : memref<456x4xbf16, #tpu.memory_space<vmem>>, vector<24x4xbf16>
    %c384_254 = arith.constant 384 : index
    %c0_255 = arith.constant 0 : index
    %257 = vector.load %arg8[%c384_254, %c0_255] : memref<456x4xbf16, #tpu.memory_space<vmem>>, vector<24x4xbf16>
    %c385_256 = arith.constant 385 : index
    %c0_257 = arith.constant 0 : index
    %258 = vector.load %arg8[%c385_256, %c0_257] : memref<456x4xbf16, #tpu.memory_space<vmem>>, vector<24x4xbf16>
    %c386_258 = arith.constant 386 : index
    %c0_259 = arith.constant 0 : index
    %259 = vector.load %arg8[%c386_258, %c0_259] : memref<456x4xbf16, #tpu.memory_space<vmem>>, vector<24x4xbf16>
    %c408_260 = arith.constant 408 : index
    %c0_261 = arith.constant 0 : index
    %260 = vector.load %arg8[%c408_260, %c0_261] : memref<456x4xbf16, #tpu.memory_space<vmem>>, vector<24x4xbf16>
    %c409_262 = arith.constant 409 : index
    %c0_263 = arith.constant 0 : index
    %261 = vector.load %arg8[%c409_262, %c0_263] : memref<456x4xbf16, #tpu.memory_space<vmem>>, vector<24x4xbf16>
    %c410_264 = arith.constant 410 : index
    %c0_265 = arith.constant 0 : index
    %262 = vector.load %arg8[%c410_264, %c0_265] : memref<456x4xbf16, #tpu.memory_space<vmem>>, vector<24x4xbf16>
    %263 = tpu.concatenate %254, %255, %256, %257, %258, %259, %260, %261, %262 in 1 : vector<24x4xbf16>, vector<24x4xbf16>, vector<24x4xbf16>, vector<24x4xbf16>, vector<24x4xbf16>, vector<24x4xbf16>, vector<24x4xbf16>, vector<24x4xbf16>, vector<24x4xbf16> -> vector<24x36xbf16>
    %c0_266 = arith.constant 0 : index
    %c0_267 = arith.constant 0 : index
    %264 = vector.load %arg4[%c0_266, %c0_267] : memref<36x4xbf16, #tpu.memory_space<vmem>>, vector<36x4xbf16>
    %cst_268 = arith.constant dense<0.000000e+00> : vector<24x4xf32>
    %265 = tpu.matmul %263, %264, %cst_268 {dimension_numbers = #tpu.dot_dimension_numbers<[1], [0], [0], [1], [0, 0, 1, 1], [], []>} : vector<24x36xbf16>, vector<36x4xbf16>, vector<24x4xf32> -> vector<24x4xf32>
    %c0_269 = arith.constant 0 : index
    %c0_270 = arith.constant 0 : index
    %266 = vector.load %arg5[%c0_269, %c0_270] : memref<1x4xf32, #tpu.memory_space<vmem>>, vector<1x4xf32>
    %267 = vector.broadcast %266 : vector<1x4xf32> to vector<24x4xf32>
    %268 = arith.addf %265, %267 : vector<24x4xf32>
    %269 = vector.shape_cast %268 : vector<24x4xf32> to vector<1x24x4xf32>
    %270 = vector.extract_strided_slice %269 {offsets = [0, 0, 0], sizes = [1, 16, 4], strides = [1, 1, 1]} : vector<1x24x4xf32> to vector<1x16x4xf32>
    %c0_271 = arith.constant 0 : index
    %c15_272 = arith.constant 15 : index
    %c0_273 = arith.constant 0 : index
    %c0_274 = arith.constant 0 : index
    %271 = vector.load %arg1[%c0_271, %c15_272, %c0_273, %c0_274] : memref<1x16x16x4xf32, #tpu.memory_space<vmem>>, vector<1x1x16x4xf32>
    %272 = vector.shape_cast %271 : vector<1x1x16x4xf32> to vector<1x16x4xf32>
    %273 = arith.addf %270, %272 : vector<1x16x4xf32>
    %cst_275 = arith.constant 0.000000e+00 : f32
    %274 = vector.broadcast %cst_275 : f32 to vector<1x16x4xf32>
    %275 = arith.maximumf %273, %274 : vector<1x16x4xf32>
    %c0_276 = arith.constant 0 : index
    %c15_277 = arith.constant 15 : index
    %c0_278 = arith.constant 0 : index
    %c0_279 = arith.constant 0 : index
    %276 = vector.load %arg6[%c0_276, %c15_277, %c0_278, %c0_279] : memref<1x16x16x4xf32, #tpu.memory_space<vmem>>, vector<1x1x16x4xf32>
    %277 = vector.shape_cast %276 : vector<1x1x16x4xf32> to vector<1x16x4xf32>
    %278 = vector.shape_cast %275 : vector<1x16x4xf32> to vector<1x1x16x4xf32>
    tpu.vector_store %arg6[%c0_276, %c15_277, %c0_278, %c0_279], %278 {strides = array<i32>} : memref<1x16x16x4xf32, #tpu.memory_space<vmem>>, vector<1x1x16x4xf32>,
    return
  }
  func.func @transform_0(%arg0: i32) -> (i32, i32, i32, i32) {
    %c0_i32 = arith.constant 0 : i32
    %c0_i32_0 = arith.constant 0 : i32
    %c0_i32_1 = arith.constant 0 : i32
    %c0_i32_2 = arith.constant 0 : i32
    return %arg0, %c0_i32, %c0_i32_0, %c0_i32_1 : i32, i32, i32, i32
  }
  func.func @transform_1(%arg0: i32) -> (i32, i32) {
    %c0_i32 = arith.constant 0 : i32
    %c0_i32_0 = arith.constant 0 : i32
    %c0_i32_1 = arith.constant 0 : i32
    return %c0_i32, %c0_i32_0 : i32, i32
  }
  func.func @transform_2(%arg0: i32) -> (i32, i32) {
    %c0_i32 = arith.constant 0 : i32
    %c0_i32_0 = arith.constant 0 : i32
    %c0_i32_1 = arith.constant 0 : i32
    return %c0_i32, %c0_i32_0 : i32, i32
  }
  func.func @transform_3(%arg0: i32) -> (i32, i32) {
    %c0_i32 = arith.constant 0 : i32
    %c0_i32_0 = arith.constant 0 : i32
    %c0_i32_1 = arith.constant 0 : i32
    return %c0_i32, %c0_i32_0 : i32, i32
  }
  func.func @transform_4(%arg0: i32) -> (i32, i32) {
    %c0_i32 = arith.constant 0 : i32
    %c0_i32_0 = arith.constant 0 : i32
    %c0_i32_1 = arith.constant 0 : i32
    return %c0_i32, %c0_i32_0 : i32, i32
  }
  func.func @transform_5(%arg0: i32) -> (i32, i32, i32, i32) {
    %c0_i32 = arith.constant 0 : i32
    %c0_i32_0 = arith.constant 0 : i32
    %c0_i32_1 = arith.constant 0 : i32
    %c0_i32_2 = arith.constant 0 : i32
    return %arg0, %c0_i32, %c0_i32_0, %c0_i32_1 : i32, i32, i32, i32
  }
}

</mosaic_0001>

<bundles_post_ra>
// kernel: tpu_custom_call.1
= control target key start
LH: loop header
LB: loop body
LE: loop exit
PB: predicated region body
PF: predicated region fallthrough
CT: control target
= control target key end

     0   :  { %s7625_s18 = smov 0   ;;  %s11894_s0 = inlined_call_operand.vmem [shape: f32[2,16,16,4], index: 0, kind: input, shape index: {}]   ;;  %s11895_s1 = inlined_call_operand.vmem [shape: bf16[36,4], index: 1, kind: input, shape index: {}]   ;;  %s11896_s2 = inlined_call_operand.vmem [shape: f32[1,4], index: 2, kind: input, shape index: {}]   ;;  %s11897_s3 = inlined_call_operand.vmem [shape: bf16[36,4], index: 3, kind: input, shape index: {}]   ;;  %s11898_s4 = inlined_call_operand.vmem [shape: f32[1,4], index: 4, kind: input, shape index: {}]   ;;  %s11899_s5 = inlined_call_operand.vmem [shape: f32[2,16,16,4], index: 5, kind: output, shape index: {}]  }
   0x1 LB: > { %s6656_s19 = sadd.s32 4294967295, %s7582_s18   ;;  %p6660_p0 = scmp.ge.s32.totalorder %s7582_s18, 1  ;;  %s7582_s18 = sphi %s7625_s18, %s15_s18  }
   0x2   : > { %p187_p1 = scmp.lt.s32.totalorder %s7582_s18, 3 }
   0x4   : > { %p188_p2 = pnand %p6660_p0, %p187_p1 }
   0x6   : > { %191 = sbr.rel (%p188_p2) target bundleno = 1351 (0x547), region = 40 }
   0xd   : > { %p215_p3 = scmp.lt.s32.totalorder %s6656_s19, 1  ;;  %p6665_p4 = scmp.ne.s32.totalorder %s6656_s19, 0 }
   0xe   : > { %vm230_vm0 = vcmask (!%p6665_p4), 27648   ;;  %v7584_v0 = vmov (!%p6665_p4), 0  }
   0xf   : > { %s216_s20 = scalar_select %p215_p3, %s6656_s19, 1 }
  0x10   : > { %229 = sbr.rel (%p6665_p4) target bundleno = 71 (0x47), region = 44  ;;  %231 = vst.msk [vmem:[#allocation2] sm:$0xf] (!%p6665_p4), %vm230_vm0, %v7584_v0  ;;  %232 = vst.msk [vmem:[#allocation2 + $0x4] sm:$0xf] (!%p6665_p4), %vm230_vm0, %v7584_v0 }
  0x11   : > { %s7086_s21 = sshll.u32 %s216_s20, 8  ;;  %233 = vst.msk [vmem:[#allocation2 + $0x8] sm:$0xf] (!%p6665_p4), %vm230_vm0, %v7584_v0  ;;  %234 = vst.msk [vmem:[#allocation2 + $0xc] sm:$0xf] (!%p6665_p4), %vm230_vm0, %v7584_v0 }
  0x12   : > { %s7636_s24 = scalar_lea.vmem %s11894_s0, %s7086_s21  ;;  %s7641_s27 = scalar_lea.vmem %s11899_s5, %s7086_s21  ;;  %235 = vst.msk [vmem:[#allocation2 + $0x10] sm:$0xf] (!%p6665_p4), %vm230_vm0, %v7584_v0  ;;  %236 = vst.msk [vmem:[#allocation2 + $0x14] sm:$0xf] (!%p6665_p4), %vm230_vm0, %v7584_v0 }
  0x13   : > { %237 = vst.msk [vmem:[#allocation2 + $0x18] sm:$0xf] (!%p6665_p4), %vm230_vm0, %v7584_v0  ;;  %238 = vst.msk [vmem:[#allocation2 + $0x1c] sm:$0xf] (!%p6665_p4), %vm230_vm0, %v7584_v0 }
  0x14   : > { %239 = vst.msk [vmem:[#allocation2 + $0x20] sm:$0xf] (!%p6665_p4), %vm230_vm0, %v7584_v0  ;;  %240 = vst.msk [vmem:[#allocation2 + $0x24] sm:$0xf] (!%p6665_p4), %vm230_vm0, %v7584_v0 }
  0x15   : > { %241 = vst.msk [vmem:[#allocation2 + $0x28] sm:$0xf] (!%p6665_p4), %vm230_vm0, %v7584_v0  ;;  %242 = vst.msk [vmem:[#allocation2 + $0x2c] sm:$0xf] (!%p6665_p4), %vm230_vm0, %v7584_v0 }
  0x16   : > { %243 = vst.msk [vmem:[#allocation2 + $0x30] sm:$0xf] (!%p6665_p4), %vm230_vm0, %v7584_v0  ;;  %244 = vst.msk [vmem:[#allocation2 + $0x34] sm:$0xf] (!%p6665_p4), %vm230_vm0, %v7584_v0 }
  0x17   : > { %245 = vst.msk [vmem:[#allocation2 + $0x38] sm:$0xf] %vm230_vm0, %v7584_v0  ;;  %246 = vst.msk [vmem:[#allocation2 + $0x3c] sm:$0xf] %vm230_vm0, %v7584_v0 }
  0x18   : > { %247 = vst.msk [vmem:[#allocation2 + $0x40] sm:$0xf] %vm230_vm0, %v7584_v0  ;;  %248 = vst.msk [vmem:[#allocation2 + $0x44] sm:$0xf] %vm230_vm0, %v7584_v0 }
  0x19   : > { %249 = vst.msk [vmem:[#allocation2 + $0x48] sm:$0xf] %vm230_vm0, %v7584_v0  ;;  %250 = vst.msk [vmem:[#allocation2 + $0x4c] sm:$0xf] %vm230_vm0, %v7584_v0 }
  0x1a   : > { %251 = vst.msk [vmem:[#allocation2 + $0x50] sm:$0xf] %vm230_vm0, %v7584_v0  ;;  %252 = vst.msk [vmem:[#allocation2 + $0x54] sm:$0xf] %vm230_vm0, %v7584_v0 }
  0x1b   : > { %253 = vst.msk [vmem:[#allocation2 + $0x58] sm:$0xf] %vm230_vm0, %v7584_v0  ;;  %254 = vst.msk [vmem:[#allocation2 + $0x5c] sm:$0xf] %vm230_vm0, %v7584_v0 }
  0x1c   : > { %255 = vst.msk [vmem:[#allocation2 + $0x60] sm:$0xf] %vm230_vm0, %v7584_v0  ;;  %256 = vst.msk [vmem:[#allocation2 + $0x64] sm:$0xf] %vm230_vm0, %v7584_v0 }
  0x1d   : > { %257 = vst.msk [vmem:[#allocation2 + $0x68] sm:$0xf] %vm230_vm0, %v7584_v0  ;;  %258 = vst.msk [vmem:[#allocation2 + $0x6c] sm:$0xf] %vm230_vm0, %v7584_v0 }
  0x1e   : > { %259 = vst.msk [vmem:[#allocation2 + $0x70] sm:$0xf] %vm230_vm0, %v7584_v0  ;;  %260 = vst.msk [vmem:[#allocation2 + $0x74] sm:$0xf] %vm230_vm0, %v7584_v0 }
  0x1f   : > { %261 = vst.msk [vmem:[#allocation2 + $0x78] sm:$0xf] %vm230_vm0, %v7584_v0  ;;  %262 = vst.msk [vmem:[#allocation2 + $0x7c] sm:$0xf] %vm230_vm0, %v7584_v0 }
  0x20   : > { %263 = vst.msk [vmem:[#allocation2 + $0x80] sm:$0xf] %vm230_vm0, %v7584_v0  ;;  %264 = vst.msk [vmem:[#allocation2 + $0x84] sm:$0xf] %vm230_vm0, %v7584_v0 }
  0x21   : > { %265 = vst.msk [vmem:[#allocation2 + $0x88] sm:$0xf] %vm230_vm0, %v7584_v0  ;;  %266 = vst.msk [vmem:[#allocation2 + $0x8c] sm:$0xf] %vm230_vm0, %v7584_v0 }
  0x22   : > { %267 = vst.msk [vmem:[#allocation2 + $0x90] sm:$0xf] %vm230_vm0, %v7584_v0  ;;  %268 = vst.msk [vmem:[#allocation2 + $0x94] sm:$0xf] %vm230_vm0, %v7584_v0 }
  0x23   : > { %269 = vst.msk [vmem:[#allocation2 + $0x98] sm:$0xf] %vm230_vm0, %v7584_v0  ;;  %270 = vst.msk [vmem:[#allocation2 + $0x9c] sm:$0xf] %vm230_vm0, %v7584_v0 }
  0x24   : > { %271 = vst.msk [vmem:[#allocation2 + $0xa0] sm:$0xf] %vm230_vm0, %v7584_v0  ;;  %272 = vst.msk [vmem:[#allocation2 + $0xa4] sm:$0xf] %vm230_vm0, %v7584_v0 }
  0x25   : > { %273 = vst.msk [vmem:[#allocation2 + $0xa8] sm:$0xf] %vm230_vm0, %v7584_v0  ;;  %274 = vst.msk [vmem:[#allocation2 + $0xac] sm:$0xf] %vm230_vm0, %v7584_v0 }
  0x26   : > { %275 = vst.msk [vmem:[#allocation2 + $0xb0] sm:$0xf] %vm230_vm0, %v7584_v0  ;;  %276 = vst.msk [vmem:[#allocation2 + $0xb4] sm:$0xf] %vm230_vm0, %v7584_v0 }
  0x27   : > { %277 = vst.msk [vmem:[#allocation2 + $0xb8] sm:$0xf] %vm230_vm0, %v7584_v0  ;;  %278 = vst.msk [vmem:[#allocation2 + $0xbc] sm:$0xf] %vm230_vm0, %v7584_v0 }
  0x28   : > { %279 = vst.msk [vmem:[#allocation2 + $0xc0] sm:$0xf] %vm230_vm0, %v7584_v0  ;;  %280 = vst.msk [vmem:[#allocation2 + $0xc4] sm:$0xf] %vm230_vm0, %v7584_v0 }
  0x29   : > { %281 = vst.msk [vmem:[#allocation2 + $0xc8] sm:$0xf] %vm230_vm0, %v7584_v0  ;;  %282 = vst.msk [vmem:[#allocation2 + $0xcc] sm:$0xf] %vm230_vm0, %v7584_v0 }
  0x2a   : > { %283 = vst.msk [vmem:[#allocation2 + $0xd0] sm:$0xf] %vm230_vm0, %v7584_v0  ;;  %284 = vst.msk [vmem:[#allocation2 + $0xd4] sm:$0xf] %vm230_vm0, %v7584_v0 }
  0x2b   : > { %285 = vst.msk [vmem:[#allocation2 + $0xd8] sm:$0xf] %vm230_vm0, %v7584_v0  ;;  %288 = vst.msk [vmem:[#allocation3] sm:$0xf] %vm230_vm0, %v7584_v0 }
  0x2c   : > { %289 = vst.msk [vmem:[#allocation3 + $0x4] sm:$0xf] %vm230_vm0, %v7584_v0  ;;  %290 = vst.msk [vmem:[#allocation3 + $0x8] sm:$0xf] %vm230_vm0, %v7584_v0 }
  0x2d   : > { %291 = vst.msk [vmem:[#allocation3 + $0xc] sm:$0xf] %vm230_vm0, %v7584_v0  ;;  %292 = vst.msk [vmem:[#allocation3 + $0x10] sm:$0xf] %vm230_vm0, %v7584_v0 }
  0x2e   : > { %293 = vst.msk [vmem:[#allocation3 + $0x14] sm:$0xf] %vm230_vm0, %v7584_v0  ;;  %294 = vst.msk [vmem:[#allocation3 + $0x18] sm:$0xf] %vm230_vm0, %v7584_v0 }
  0x2f   : > { %295 = vst.msk [vmem:[#allocation3 + $0x1c] sm:$0xf] %vm230_vm0, %v7584_v0  ;;  %296 = vst.msk [vmem:[#allocation3 + $0x20] sm:$0xf] %vm230_vm0, %v7584_v0 }
  0x30   : > { %297 = vst.msk [vmem:[#allocation3 + $0x24] sm:$0xf] %vm230_vm0, %v7584_v0  ;;  %298 = vst.msk [vmem:[#allocation3 + $0x28] sm:$0xf] %vm230_vm0, %v7584_v0 }
  0x31   : > { %299 = vst.msk [vmem:[#allocation3 + $0x2c] sm:$0xf] %vm230_vm0, %v7584_v0  ;;  %300 = vst.msk [vmem:[#allocation3 + $0x30] sm:$0xf] %vm230_vm0, %v7584_v0 }
  0x32   : > { %301 = vst.msk [vmem:[#allocation3 + $0x34] sm:$0xf] %vm230_vm0, %v7584_v0  ;;  %302 = vst.msk [vmem:[#allocation3 + $0x38] sm:$0xf] %vm230_vm0, %v7584_v0 }
  0x33   : > { %303 = vst.msk [vmem:[#allocation3 + $0x3c] sm:$0xf] %vm230_vm0, %v7584_v0  ;;  %304 = vst.msk [vmem:[#allocation3 + $0x40] sm:$0xf] %vm230_vm0, %v7584_v0 }
  0x34   : > { %305 = vst.msk [vmem:[#allocation3 + $0x44] sm:$0xf] %vm230_vm0, %v7584_v0  ;;  %306 = vst.msk [vmem:[#allocation3 + $0x48] sm:$0xf] %vm230_vm0, %v7584_v0 }
  0x35   : > { %307 = vst.msk [vmem:[#allocation3 + $0x4c] sm:$0xf] %vm230_vm0, %v7584_v0  ;;  %308 = vst.msk [vmem:[#allocation3 + $0x50] sm:$0xf] %vm230_vm0, %v7584_v0 }
  0x36   : > { %309 = vst.msk [vmem:[#allocation3 + $0x54] sm:$0xf] %vm230_vm0, %v7584_v0  ;;  %310 = vst.msk [vmem:[#allocation3 + $0x58] sm:$0xf] %vm230_vm0, %v7584_v0 }
  0x37   : > { %311 = vst.msk [vmem:[#allocation3 + $0x5c] sm:$0xf] %vm230_vm0, %v7584_v0  ;;  %312 = vst.msk [vmem:[#allocation3 + $0x60] sm:$0xf] %vm230_vm0, %v7584_v0 }
  0x38   : > { %313 = vst.msk [vmem:[#allocation3 + $0x64] sm:$0xf] %vm230_vm0, %v7584_v0  ;;  %314 = vst.msk [vmem:[#allocation3 + $0x68] sm:$0xf] %vm230_vm0, %v7584_v0 }
  0x39   : > { %315 = vst.msk [vmem:[#allocation3 + $0x6c] sm:$0xf] %vm230_vm0, %v7584_v0  ;;  %316 = vst.msk [vmem:[#allocation3 + $0x70] sm:$0xf] %vm230_vm0, %v7584_v0 }
  0x3a   : > { %317 = vst.msk [vmem:[#allocation3 + $0x74] sm:$0xf] %vm230_vm0, %v7584_v0  ;;  %318 = vst.msk [vmem:[#allocation3 + $0x78] sm:$0xf] %vm230_vm0, %v7584_v0 }
  0x3b   : > { %319 = vst.msk [vmem:[#allocation3 + $0x7c] sm:$0xf] %vm230_vm0, %v7584_v0  ;;  %320 = vst.msk [vmem:[#allocation3 + $0x80] sm:$0xf] %vm230_vm0, %v7584_v0 }
  0x3c   : > { %321 = vst.msk [vmem:[#allocation3 + $0x84] sm:$0xf] %vm230_vm0, %v7584_v0  ;;  %322 = vst.msk [vmem:[#allocation3 + $0x88] sm:$0xf] %vm230_vm0, %v7584_v0 }
  0x3d   : > { %323 = vst.msk [vmem:[#allocation3 + $0x8c] sm:$0xf] %vm230_vm0, %v7584_v0  ;;  %324 = vst.msk [vmem:[#allocation3 + $0x90] sm:$0xf] %vm230_vm0, %v7584_v0 }
  0x3e   : > { %325 = vst.msk [vmem:[#allocation3 + $0x94] sm:$0xf] %vm230_vm0, %v7584_v0  ;;  %326 = vst.msk [vmem:[#allocation3 + $0x98] sm:$0xf] %vm230_vm0, %v7584_v0 }
  0x3f   : > { %327 = vst.msk [vmem:[#allocation3 + $0x9c] sm:$0xf] %vm230_vm0, %v7584_v0  ;;  %328 = vst.msk [vmem:[#allocation3 + $0xa0] sm:$0xf] %vm230_vm0, %v7584_v0 }
  0x40   : > { %329 = vst.msk [vmem:[#allocation3 + $0xa4] sm:$0xf] %vm230_vm0, %v7584_v0  ;;  %330 = vst.msk [vmem:[#allocation3 + $0xa8] sm:$0xf] %vm230_vm0, %v7584_v0 }
  0x41   : > { %331 = vst.msk [vmem:[#allocation3 + $0xac] sm:$0xf] %vm230_vm0, %v7584_v0  ;;  %332 = vst.msk [vmem:[#allocation3 + $0xb0] sm:$0xf] %vm230_vm0, %v7584_v0 }
  0x42   : > { %333 = vst.msk [vmem:[#allocation3 + $0xb4] sm:$0xf] %vm230_vm0, %v7584_v0  ;;  %334 = vst.msk [vmem:[#allocation3 + $0xb8] sm:$0xf] %vm230_vm0, %v7584_v0 }
  0x43   : > { %335 = vst.msk [vmem:[#allocation3 + $0xbc] sm:$0xf] %vm230_vm0, %v7584_v0  ;;  %336 = vst.msk [vmem:[#allocation3 + $0xc0] sm:$0xf] %vm230_vm0, %v7584_v0 }
  0x44   : > { %337 = vst.msk [vmem:[#allocation3 + $0xc4] sm:$0xf] %vm230_vm0, %v7584_v0  ;;  %338 = vst.msk [vmem:[#allocation3 + $0xc8] sm:$0xf] %vm230_vm0, %v7584_v0 }
  0x45   : > { %339 = vst.msk [vmem:[#allocation3 + $0xcc] sm:$0xf] %vm230_vm0, %v7584_v0  ;;  %340 = vst.msk [vmem:[#allocation3 + $0xd0] sm:$0xf] %vm230_vm0, %v7584_v0 }
  0x46   : > { %341 = vst.msk [vmem:[#allocation3 + $0xd4] sm:$0xf] %vm230_vm0, %v7584_v0  ;;  %342 = vst.msk [vmem:[#allocation3 + $0xd8] sm:$0xf] %vm230_vm0, %v7584_v0 }
  0x47 PF: > { %v345_v1 = vld [vmem:[%s7636_s24] sm:$0xff]  ;;  %v346_v2 = vld [vmem:[%s7636_s24 + $0x8] sm:$0xff]  ;;  %vm353_vm1 = vsmask.f32 256  ;;  %vm354_vm2 = vsmask.f32 4368 }
  0x48   : > { %v7088_v3 = vpack.c.bf16 %v345_v1, %v345_v1  ;;  %v7089_v4 = vpack.c.bf16 %v346_v2, %v346_v2  ;;  %vm376_vm3 = vcmask 27648   ;;  %vm377_vm4 = vsmask.f32 7938  ;;  %vm7866_vm6 = vmor %vm353_vm1, %vm354_vm2  ;;  %v7870_v10 = vld [vmem:[#allocation2 + $0x4] sm:$0xf]  ;;  %v6668_v12 = vld [vmem:[%s7636_s24 + $0x10] sm:$0xff] }
  0x49   : > { %vm384_vm5 = vcmask 24576   ;;  %v11957_v5 = vmov 0  ;;  %v945_v11 = vld [vmem:[#allocation2] sm:$0xe]  ;;  %vm7874_vm7 = vmand %vm376_vm3, %vm377_vm4  ;;  %v11960_v15 = vmov 0  ;;  %v6669_v17 = vld [vmem:[%s7636_s24 + $0x18] sm:$0xff]  ;;  %v7090_v22 = vpack.c.bf16 %v6668_v12, %v6668_v12 }
  0x4a   : > { %v11958_v5 = vsel %vm7866_vm6, 4294967295, %v11957_v5  ;;  %v357_v6 = vshrl.u32 %v7088_v3, 16  ;;  %v360_v7 = vshll.u32 %v7088_v3, 16  ;;  %v365_v8 = vshrl.u32 %v7089_v4, 16  ;;  %v6672_v18 = vld [vmem:[%s7636_s24 + $0x20] sm:$0xff]  ;;  %vm7883_vm8 = vmand %vm384_vm5, %vm353_vm1  ;;  %v6673_v29 = vld [vmem:[%s7636_s24 + $0x28] sm:$0xff] }
  0x4b   : > { %11959 = vst [vmem:[#allocation4_spill] sm:$0xff] %v11958_v5  ;;  %v368_v9 = vshll.u32 %v7089_v4, 16  ;;  %v11961_v15 = vsel %vm7874_vm7, 4294967295, %v11960_v15  ;;  %v6737_v16 = vcombine.low %v945_v11, %v7870_v10  ;;  %v379_v19 = vld [vmem:[#allocation2 + $0xc] sm:$0xf]  ;;  %v7091_v23 = vpack.c.bf16 %v6669_v17, %v6669_v17  ;;  %v6676_v34 = vld [vmem:[%s7636_s24 + $0x30] sm:$0xff] }
  0x4c   : > { %v359_v13 = vrot.slane %v357_v6, 7  ;;  %v367_v14 = vrot.slane %v365_v8, 7  ;;  %11962 = vst [vmem:[#allocation5_spill] sm:$0xff] %v11961_v15  ;;  %v386_v21 = vld [vmem:[#allocation2 + $0x14] sm:$0x1]  ;;  %v7092_v24 = vpack.c.bf16 %v6672_v18, %v6672_v18  ;;  %v399_v31 = vshrl.u32 %v7090_v22, 16 }
  0x4d   : > { %v7888_v30 = vrot.slane %v6737_v16, 1  ;;  %v402_v32 = vshll.u32 %v7090_v22, 16  ;;  %v407_v33 = vshrl.u32 %v7091_v23, 16  ;;  %v6677_v35 = vld [vmem:[%s7636_s24 + $0x38] sm:$0xff]  ;;  %v410_v39 = vshll.u32 %v7091_v23, 16  ;;  %v6680_v40 = vld [vmem:[%s7636_s24 + $0x40] sm:$0xff] }
  0x4e   : > { %v362_v25 = vor.u32 %v360_v7, %v359_v13  ;;  %v363_v26 = vrot.slane %v359_v13, 4  ;;  %v370_v27 = vor.u32 %v368_v9, %v367_v14  ;;  %v372_v28 = vrot.slane %v367_v14, 4  ;;  %v418_v45 = vld [vmem:[#allocation2 + $0x18] sm:$0xf]  ;;  %v422_v46 = vld [vmem:[#allocation2 + $0x20] sm:$0x1] }
  0x4f   : > { %v401_v41 = vrot.slane %v399_v31, 7  ;;  %v409_v42 = vrot.slane %v407_v33, 7  ;;  %v435_v43 = vshrl.u32 %v7092_v24, 16  ;;  %v438_v44 = vshll.u32 %v7092_v24, 16  ;;  %v931_v55 = vld [vmem:[#allocation2 + $0x8] sm:$0xf] }
  0x50   : > { %v371_v36 = vsel %vm7866_vm6, %v363_v26, %v370_v27  ;;  %v380_v37 = vsel %vm7874_vm7, %v362_v25, %v379_v19  ;;  %v387_v38 = vsel %vm7883_vm8, %v372_v28, %v386_v21  ;;  %vm1080_vm9 = vcmask 1046528   ;;  %v929_v60 = vld [vmem:[#allocation2] sm:$0xf]  ;;  %v454_v0 = vld [vmem:[#allocation2 + $0x24] sm:$0xf]  ;;  %s7585_s28 = smov 8  }
  0x51   : > { %381 = vst [vmem:[#allocation2 + $0xc] sm:$0xf] %v380_v37  ;;  %383 = vst.msk [vmem:[#allocation2 + $0x10] sm:$0xf] %vm376_vm3, %v371_v36  ;;  %v7093_v47 = vpack.c.bf16 %v6673_v29, %v6673_v29  ;;  %v7094_v48 = vpack.c.bf16 %v6676_v34, %v6676_v34  ;;  %v7095_v49 = vpack.c.bf16 %v6677_v35, %v6677_v35  ;;  %v405_v52 = vrot.slane %v401_v41, 4  ;;  %s7586_s29 = smov 4  }
  0x52   : > { %388 = vst [vmem:[#allocation2 + $0x14] sm:$0x1] %v387_v38  ;;  %v7096_v50 = vpack.c.bf16 %v6680_v40, %v6680_v40  ;;  %v404_v51 = vor.u32 %v402_v32, %v401_v41  ;;  %v412_v53 = vor.u32 %v410_v39, %v409_v42  ;;  %v414_v54 = vrot.slane %v409_v42, 4  ;;  %v458_v6 = vld [vmem:[#allocation2 + $0x2c] sm:$0x1]  ;;  %s7587_s30 = smov 12  }
  0x53   : > { %v437_v56 = vrot.slane %v435_v43, 7  ;;  %v443_v57 = vshrl.u32 %v7093_v47, 16  ;;  %v446_v58 = vshll.u32 %v7093_v47, 16  ;;  %v471_v59 = vshrl.u32 %v7094_v48, 16  ;;  %v490_v11 = vld [vmem:[#allocation2 + $0x30] sm:$0xf] }
  0x54   : > { %v413_v61 = vsel %vm7866_vm6, %v405_v52, %v412_v53  ;;  %v419_v62 = vsel %vm7874_vm7, %v404_v51, %v418_v45  ;;  %v423_v63 = vsel %vm7883_vm8, %v414_v54, %v422_v46  ;;  %v474_v1 = vshll.u32 %v7094_v48, 16  ;;  %v494_v34 = vld [vmem:[#allocation2 + $0x38] sm:$0x1]  ;;  %v526_v35 = vld [vmem:[#allocation2 + $0x3c] sm:$0xf]  ;;  %s7588_s6 = smov 16  }
  0x55   : > { %420 = vst [vmem:[#allocation2 + $0x18] sm:$0xf] %v419_v62  ;;  %421 = vst.msk [vmem:[#allocation2 + $0x1c] sm:$0xf] %vm376_vm3, %v413_v61  ;;  %v440_v2 = vor.u32 %v438_v44, %v437_v56  ;;  %v441_v3 = vrot.slane %v437_v56, 4  ;;  %v445_v4 = vrot.slane %v443_v57, 7  ;;  %v7914_v18 = vcombine.low %v929_v60, %v7870_v10 }
  0x56   : > { %424 = vst [vmem:[#allocation2 + $0x20] sm:$0x1] %v423_v63  ;;  %v473_v7 = vrot.slane %v471_v59, 7  ;;  %v479_v8 = vshrl.u32 %v7095_v49, 16  ;;  %v482_v9 = vshll.u32 %v7095_v49, 16  ;;  %v507_v12 = vshrl.u32 %v7096_v50, 16 }
  0x57   : > { %v510_v13 = vshll.u32 %v7096_v50, 16  ;;  %v455_v19 = vsel %vm7874_vm7, %v440_v2, %v454_v0  ;;  %v448_v21 = vor.u32 %v446_v58, %v445_v4  ;;  %v450_v25 = vrot.slane %v445_v4, 4  ;;  %v6681_v50 = vld [vmem:[%s7636_s24 + $0x48] sm:$0xff]  ;;  %v6684_v59 = vld [vmem:[%s7636_s24 + $0x50] sm:$0xff]  ;;  %s7589_s7 = smov 20   ;;  %s7590_s8 = smov 24  }
  0x58   : > { %v7907_v14 = vld [vmem:[#allocation2 + $0xc] sm:$0xf]  ;;  %v7909_v16 = vld [vmem:[#allocation2 + $0x10] sm:$0xf]  ;;  %v476_v22 = vor.u32 %v474_v1, %v473_v7  ;;  %456 = vst [vmem:[#allocation2 + $0x24] sm:$0xf] %v455_v19  ;;  %v7097_v4 = vpack.c.bf16 %v6681_v50, %v6681_v50 }
  0x59   : > { %v7911_v17 = vld [vmem:[#allocation2 + $0x14] sm:$0xf]  ;;  %v7919_v23 = vcombine.low %v931_v55, %v7907_v14  ;;  %v477_v26 = vrot.slane %v473_v7, 4  ;;  %v449_v27 = vsel %vm7866_vm6, %v441_v3, %v448_v21  ;;  %v481_v10 = vrot.slane %v479_v8, 7  ;;  %s7591_s13 = smov 28   ;;  %s7592_s16 = smov 32  }
  0x5a   : > { %v7923_v24 = vcombine.low %v7909_v16, %v7911_v17  ;;  %v491_v28 = vsel %vm7874_vm7, %v476_v22, %v490_v11  ;;  %v7929_v29 = vrot.slane %v507_v12, 7  ;;  %457 = vst.msk [vmem:[#allocation2 + $0x28] sm:$0xf] %vm376_vm3, %v449_v27  ;;  %v459_v33 = vsel %vm7883_vm8, %v450_v25, %v458_v6 }
  0x5b   : > { %v1082_v31 = vrot.slane %v7919_v23, 1  ;;  %492 = vst [vmem:[#allocation2 + $0x30] sm:$0xf] %v491_v28  ;;  %460 = vst [vmem:[#allocation2 + $0x2c] sm:$0x1] %v459_v33  ;;  %v484_v36 = vor.u32 %v482_v9, %v481_v10  ;;  %v486_v37 = vrot.slane %v481_v10, 4  ;;  %v7098_v12 = vpack.c.bf16 %v6684_v59, %v6684_v59 }
  0x5c   : > { %v1084_v32 = vrot.slane %v7923_v24, 1  ;;  %v512_v38 = vor.u32 %v510_v13, %v7929_v29  ;;  %v7940_v41 = vld [vmem:[#allocation2 + $0x18] sm:$0xf]  ;;  %v7942_v42 = vld [vmem:[#allocation2 + $0x1c] sm:$0xf]  ;;  %v1001_v46 = vshll.u32 %v7914_v18, 16 }
  0x5d   : > { %v1083_v40 = vsel %vm1080_vm9, %v7888_v30, %v1082_v31  ;;  %v7946_v43 = vld [vmem:[#allocation2 + $0x20] sm:$0xf]  ;;  %v7950_v44 = vcombine.low %v7940_v41, %v7942_v42  ;;  %v485_v45 = vsel %vm7866_vm6, %v477_v26, %v484_v36  ;;  %v495_v30 = vsel %vm7883_vm8, %v486_v37, %v494_v34 }
  0x5e   : > { %v1085_v39 = vsel %vm1080_vm9, %v1082_v31, %v1084_v32  ;;  %1096 = vrot.lane.b32.xlu0 %v1083_v40, %s7585_s28  ;;  %493 = vst.msk [vmem:[#allocation2 + $0x34] sm:$0xf] %vm376_vm3, %v485_v45  ;;  %496 = vst [vmem:[#allocation2 + $0x38] sm:$0x1] %v495_v30  ;;  %v527_v47 = vsel %vm7874_vm7, %v512_v38, %v526_v35  ;;  %vm997_vm10 = vsmask.f32 7424 }
  0x5f   : > { %1098 = vrot.lane.b32.xlu1 %v1085_v39, %s7585_s28  ;;  %11965 = vst [vmem:[#allocation6_spill] sm:$0xff] %v7950_v44  ;;  %v7960_v48 = vld [vmem:[#allocation2 + $0x24] sm:$0xf]  ;;  %v1086_v49 = vrot.slane %v7950_v44, 1  ;;  %528 = vst [vmem:[#allocation2 + $0x3c] sm:$0xf] %v527_v47 }
  0x60   : > { %v7966_v51 = vcombine.low %v7946_v43, %v7960_v48  ;;  %v999_v52 = vshrl.u32 %v7914_v18, 16  ;;  %v1006_v53 = vshll.u32 %v7919_v23, 16  ;;  %v1003_v56 = vrot.slane %v1001_v46, 1 }
  0x61   : > { %v1087_v54 = vsel %vm1080_vm9, %v1084_v32, %v1086_v49  ;;  %v7971_v55 = vld [vmem:[#allocation2 + $0x28] sm:$0xf]  ;;  %v1014_v57 = vshll.u32 %v7923_v24, 16  ;;  %v1022_v58 = vshll.u32 %v7950_v44, 16  ;;  %v1010_v62 = vshrl.u32 %v7919_v23, 16 }
  0x62   : > { %11966 = vst [vmem:[#allocation7_spill] sm:$0xff] %v7966_v51  ;;  %v7977_v60 = vrot.slane %v7966_v51, 1  ;;  %1100 = vrot.lane.b32.xlu0 %v1087_v54, %s7585_s28  ;;  %v7980_v61 = vld [vmem:[#allocation2 + $0x2c] sm:$0xf]  ;;  %v7983_v63 = vld [vmem:[#allocation2 + $0x30] sm:$0xf]  ;;  %v1004_v9 = vor.u32 %v1003_v56, %v999_v52 }
  0x63   : > { %v7987_v0 = vcombine.low %v7971_v55, %v7980_v61  ;;  %v1018_v2 = vshrl.u32 %v7923_v24, 16  ;;  %v1030_v3 = vshll.u32 %v7966_v51, 16  ;;  %v1008_v11 = vrot.slane %v1006_v53, 1 }
  0x64   : > { %v1089_v1 = vsel %vm1080_vm9, %v1086_v49, %v7977_v60  ;;  %v1016_v21 = vrot.slane %v1014_v57, 1  ;;  %v1026_v22 = vshrl.u32 %v7950_v44, 16  ;;  %v1024_v10 = vrot.slane %v1022_v58, 1 }
  0x65   : > { %11967 = vst [vmem:[#allocation8_spill] sm:$0xff] %v7987_v0  ;;  %1102 = vrot.lane.b32.xlu1 %v1089_v1, %s7585_s28  ;;  %v7994_v6 = vld [vmem:[#allocation2 + $0x34] sm:$0xf]  ;;  %v1090_v7 = vrot.slane %v7987_v0, 1  ;;  %v7997_v8 = vld [vmem:[#allocation2 + $0x38] sm:$0xf]  ;;  %v1012_v28 = vor.u32 %v1010_v62, %v1008_v11  ;;  %v1009_v37 = vsel %vm997_vm10, %v1004_v9, %v1008_v11 }
  0x66   : > { %v8001_v13 = vcombine.low %v7983_v63, %v7994_v6  ;;  %v944_v19 = vld [vmem:[#allocation2 + $0x3c] sm:$0x1]  ;;  %v1038_v25 = vshll.u32 %v7987_v0, 16  ;;  %v1032_v32 = vrot.slane %v1030_v3, 1  ;;  %v1034_v33 = vshrl.u32 %v7966_v51, 16 }
  0x67   : > { %v8007_v26 = vsel %vm1080_vm9, %v7977_v60, %v1090_v7  ;;  %v8010_v27 = vcombine.low %v7997_v8, %v944_v19  ;;  %v1020_v39 = vor.u32 %v1018_v2, %v1016_v21  ;;  %v515_v46 = vshrl.u32 %v7097_v4, 16  ;;  %v530_v62 = vld [vmem:[#allocation2 + $0x44] sm:$0x1]  ;;  %v562_v1 = vld [vmem:[#allocation2 + $0x48] sm:$0xf] }
  0x68   : > { %11968 = vst [vmem:[#allocation9_spill] sm:$0xff] %v8001_v13  ;;  %v8013_v31 = vrot.slane %v8001_v13, 1  ;;  %1104 = vrot.lane.b32.xlu0 %v8007_v26, %s7585_s28  ;;  %v1046_v34 = vshll.u32 %v8001_v13, 16  ;;  %v1040_v40 = vrot.slane %v1038_v25, 1  ;;  %v1050_v45 = vshrl.u32 %v8001_v13, 16 }
  0x69   : > { %v1054_v35 = vshll.u32 %v8010_v27, 16  ;;  %v1058_v36 = vshrl.u32 %v8010_v27, 16  ;;  %v543_v47 = vshrl.u32 %v7098_v12, 16  ;;  %v546_v49 = vshll.u32 %v7098_v12, 16 }
  0x6a   : > { %v8024_v38 = vsel %vm1080_vm9, %v1090_v7, %v8013_v31  ;;  %v1017_v50 = vsel %vm997_vm10, %v1012_v28, %v1016_v21  ;;  %v1036_v52 = vor.u32 %v1034_v33, %v1032_v32  ;;  %v1048_v53 = vrot.slane %v1046_v34, 1  ;;  %v6685_v34 = vld [vmem:[%s7636_s24 + $0x58] sm:$0xff] }
  0x6b   : > { %1106 = vrot.lane.b32.xlu1 %v8024_v38, %s7585_s28  ;;  %v1056_v30 = vrot.slane %v1054_v35, 1  ;;  %v513_v54 = vrot.slane %v7929_v29, 4  ;;  %v517_v57 = vrot.slane %v515_v46, 7  ;;  %v8032_v58 = vrot.slane %v543_v47, 7  ;;  %v6688_v35 = vld [vmem:[%s7636_s24 + $0x60] sm:$0xff] }
  0x6c   : > { %1061 = vrot.lane.b32.xlu0 %v1009_v37, %s7586_s29  ;;  %v518_v59 = vshll.u32 %v7097_v4, 16  ;;  %v1025_v9 = vsel %vm997_vm10, %v1020_v39, %v1024_v10  ;;  %v1028_v11 = vor.u32 %v1026_v22, %v1024_v10  ;;  %v8039_v29 = vsel %vm997_vm10, %v1036_v52, %v1040_v40 }
  0x6d   : > { %v1060_v56 = vor.u32 %v1058_v36, %v1056_v30  ;;  %v522_v2 = vrot.slane %v517_v57, 4  ;;  %v548_v3 = vor.u32 %v546_v49, %v8032_v58  ;;  %v1042_v4 = vshrl.u32 %v7987_v0, 16 }
  0x6e   : > { %v520_v7 = vor.u32 %v518_v59, %v517_v57  ;;  %v8042_v12 = vor.u32 %v1050_v45, %v1048_v53  ;;  %v8053_v22 = vsel %vm997_vm10, %v1028_v11, %v1032_v32  ;;  %v1094_v33 = vrot.slane %v8010_v27, 1  ;;  %v6689_v32 = vld [vmem:[%s7636_s24 + $0x68] sm:$0xff] }
  0x6f   : > { %1075 = vrot.lane.b32.xlu1 %v1060_v56, %s7586_s29  ;;  %v531_v19 = vsel %vm7883_vm8, %v522_v2, %v530_v62  ;;  %v563_v21 = vsel %vm7874_vm7, %v548_v3, %v562_v1  ;;  %v1044_v10 = vor.u32 %v1042_v4, %v1040_v40  ;;  %v7099_v39 = vpack.c.bf16 %v6685_v34, %v6685_v34 }
  0x70   : > { %1063 = vrot.lane.b32.xlu0 %v1017_v50, %s7586_s29  ;;  %v521_v25 = vsel %vm7866_vm6, %v513_v54, %v520_v7  ;;  %532 = vst [vmem:[#allocation2 + $0x44] sm:$0x1] %v531_v19  ;;  %564 = vst [vmem:[#allocation2 + $0x48] sm:$0xf] %v563_v21  ;;  %v1057_v28 = vsel %vm997_vm10, %v8042_v12, %v1056_v30  ;;  %v1095_v37 = vsel %vm1080_vm9, %v8013_v31, %v1094_v33  ;;  %v566_v50 = vld [vmem:[#allocation2 + $0x50] sm:$0x1] }
  0x71   : > { %529 = vst.msk [vmem:[#allocation2 + $0x40] sm:$0xf] %vm376_vm3, %v521_v25  ;;  %v8065_v36 = vsel %vm997_vm10, %v1044_v10, %v1048_v53  ;;  %v7100_v40 = vpack.c.bf16 %v6688_v35, %v6688_v35  ;;  %v551_v27 = vshrl.u32 %v7099_v39, 16  ;;  %v7101_v45 = vpack.c.bf16 %v6689_v32, %v6689_v32  ;;  %v955_v7 = vld [vmem:[#allocation2 + $0x18] sm:$0xe] }
  0x72   : > { %v8076_v30 = vcombine.low %v7907_v14, %v7909_v16  ;;  %v8080_v49 = vcombine.low %v7911_v17, %v7940_v41  ;;  %v8085_v54 = vcombine.low %v7960_v48, %v7971_v55  ;;  %v8089_v56 = vcombine.low %v7942_v42, %v7946_v43  ;;  %v946_v14 = vld [vmem:[#allocation2 + $0x3c] sm:$0xf]  ;;  %v598_v55 = vld [vmem:[#allocation2 + $0x54] sm:$0xf] }
  0x73   : > { %1065 = vrot.lane.b32.xlu1 %v1025_v9, %s7586_s29  ;;  %v553_v46 = vrot.slane %v551_v27, 7  ;;  %v579_v47 = vshrl.u32 %v7100_v40, 16  ;;  %v582_v52 = vshll.u32 %v7100_v40, 16  ;;  %v587_v53 = vshrl.u32 %v7101_v45, 16 }
  0x74   : > { %1069 = vrot.lane.b32.xlu0 %v8039_v29, %s7586_s29  ;;  %v1148_v62 = vshll.u32 %v8076_v30, 16  ;;  %v1153_v17 = vshll.u32 %v8080_v49, 16  ;;  %v8096_v41 = vcombine.low %v7997_v8, %v946_v14  ;;  %v590_v3 = vshll.u32 %v7101_v45, 16 }
  0x75   : > { %v558_v57 = vrot.slane %v553_v46, 4  ;;  %v581_v59 = vrot.slane %v579_v47, 7  ;;  %v589_v48 = vrot.slane %v587_v53, 7  ;;  %v8102_v9 = vcombine.low %v7980_v61, %v7983_v63 }
  0x76   : > { %v549_v11 = vrot.slane %v8032_v58, 4  ;;  %v554_v4 = vshll.u32 %v7099_v39, 16  ;;  %v1288_v19 = vshll.u32 %v8096_v41, 16  ;;  %v1157_v21 = vshrl.u32 %v8080_v49, 16 }
  0x77   : > { %1067 = vrot.lane.b32.xlu1 %v8053_v22, %s7586_s29  ;;  %v567_v43 = vsel %vm7883_vm8, %v558_v57, %v566_v50  ;;  %v584_v1 = vor.u32 %v582_v52, %v581_v59  ;;  %v585_v2 = vrot.slane %v581_v59, 4  ;;  %v1161_v25 = vshll.u32 %v8089_v56, 16 }
  0x78   : > { %1073 = vrot.lane.b32.xlu0 %v1057_v28, %s7586_s29  ;;  %568 = vst [vmem:[#allocation2 + $0x50] sm:$0x1] %v567_v43  ;;  %v592_v10 = vor.u32 %v590_v3, %v589_v48  ;;  %v1146_v61 = vshrl.u32 %v8076_v30, 16  ;;  %v556_v63 = vor.u32 %v554_v4, %v553_v46  ;;  %v8115_v58 = vrot.slane %v1288_v19, 1  ;;  %v8118_v34 = vld [vmem:[#allocation2 + $0x40] sm:$0xf] }
  0x79   : > { %v599_v28 = vsel %vm7874_vm7, %v584_v1, %v598_v55  ;;  %v1155_v35 = vrot.slane %v1153_v17, 1  ;;  %v1150_v32 = vrot.slane %v1148_v62, 1  ;;  %v1340_v39 = vrot.slane %v8096_v41, 1  ;;  %v6693_v62 = vld [vmem:[%s7636_s24 + $0x78] sm:$0xff]  ;;  %v949_v17 = vld [vmem:[#allocation2 + $0x48] sm:$0x1] }
  0x7a   : > { %600 = vst [vmem:[#allocation2 + $0x54] sm:$0xf] %v599_v28  ;;  %v1169_v40 = vshll.u32 %v8085_v54, 16  ;;  %v557_v27 = vsel %vm7866_vm6, %v549_v11, %v556_v63  ;;  %v8137_v46 = vcombine.low %v7994_v6, %v7997_v8  ;;  %v8151_v50 = vcombine.low %v946_v14, %v8118_v34  ;;  %v602_v8 = vld [vmem:[#allocation2 + $0x5c] sm:$0x1]  ;;  %v6696_v28 = vld [vmem:[%s7636_s24 + $0x80] sm:$0xff] }
  0x7b   : > { %1071 = vrot.lane.b32.xlu1 %v8065_v36, %s7586_s29  ;;  %565 = vst.msk [vmem:[#allocation2 + $0x4c] sm:$0xf] %vm376_vm3, %v557_v27  ;;  %v8144_v47 = vsel %vm1080_vm9, %v8013_v31, %v1340_v39  ;;  %v1165_v52 = vshrl.u32 %v8089_v56, 16  ;;  %v1163_v53 = vrot.slane %v1161_v25, 1  ;;  %v1151_v57 = vor.u32 %v1150_v32, %v1146_v61  ;;  %v6697_v61 = vld [vmem:[%s7636_s24 + $0x88] sm:$0xff] }
  0x7c   : > { %1108 = vrot.lane.b32.xlu0 %v1095_v37, %s7585_s28  ;;  %v593_v37 = vsel %vm7866_vm6, %v585_v2, %v592_v10  ;;  %v594_v59 = vrot.slane %v589_v48, 4  ;;  %v1159_v55 = vor.u32 %v1157_v21, %v1155_v35  ;;  %v1171_v43 = vrot.slane %v1169_v40, 1 }
  0x7d   : > { %601 = vst.msk [vmem:[#allocation2 + $0x58] sm:$0xf] %vm376_vm3, %v593_v37  ;;  %v1173_v1 = vshrl.u32 %v8085_v54, 16  ;;  %v1177_v14 = vshll.u32 %v8102_v9, 16  ;;  %v1185_v2 = vshll.u32 %v8137_v46, 16  ;;  %v1181_v11 = vshrl.u32 %v8102_v9, 16 }
  0x7e   : > { %v603_v48 = vsel %vm7883_vm8, %v594_v59, %v602_v8  ;;  %v7103_v19 = vpack.c.bf16 %v6693_v62, %v6693_v62  ;;  %v1156_v25 = vsel %vm997_vm10, %v1151_v57, %v1155_v35  ;;  %v1164_v63 = vsel %vm997_vm10, %v1159_v55, %v1163_v53  ;;  %v634_v37 = vld [vmem:[#allocation2 + $0x60] sm:$0xf]  ;;  %v950_v8 = vld [vmem:[#allocation2 + $0xc] sm:$0xe] }
  0x7f   : > { %1110 = vrot.lane.b32.xlu1 %v1094_v33, %s7585_s28  ;;  %v6753_v33 = vcombine.low %v955_v7, %v7942_v42  ;;  %v8130_v42 = vsel %vm997_vm10, %v8042_v12, %v8115_v58  ;;  %v8148_v12 = vld [vmem:[#allocation2 + $0x44] sm:$0xf]  ;;  %v1167_v7 = vor.u32 %v1165_v52, %v1163_v53  ;;  %604 = vst [vmem:[#allocation2 + $0x5c] sm:$0x1] %v603_v48  ;;  %v1189_v32 = vshrl.u32 %v8137_v46, 16 }
  0x80   : > { %1126 = vrot.lane.b32.xlu0 %v8076_v30, %s7587_s30  ;;  %v6692_v30 = vld [vmem:[%s7636_s24 + $0x70] sm:$0xff]  ;;  %v8172_v21 = vcombine.low %v8148_v12, %v949_v17  ;;  %v1175_v40 = vor.u32 %v1173_v1, %v1171_v43  ;;  %v1187_v27 = vrot.slane %v1185_v2, 1  ;;  %v623_v57 = vshrl.u32 %v7103_v19, 16 }
  0x81   : > { %v1338_v45 = vrot.slane %v6753_v33, 1  ;;  %v7102_v31 = vpack.c.bf16 %v6692_v30, %v6692_v30  ;;  %v1179_v33 = vrot.slane %v1177_v14, 1  ;;  %v1172_v35 = vsel %vm997_vm10, %v1167_v7, %v1171_v43 }
  0x82   : > { %v7104_v53 = vpack.c.bf16 %v6696_v28, %v6696_v28  ;;  %v1201_v59 = vshll.u32 %v8172_v21, 16  ;;  %v7105_v17 = vpack.c.bf16 %v6697_v61, %v6697_v61  ;;  %v1228_v55 = vrot.slane %v8080_v49, 1 }
  0x83   : > { %1128 = vrot.lane.b32.xlu1 %v8080_v49, %s7587_s30  ;;  %v8156_v6 = vsel %vm1080_vm9, %v1338_v45, %v7977_v60  ;;  %v6745_v60 = vcombine.low %v8148_v12, %v8148_v12  ;;  %v615_v3 = vshrl.u32 %v7102_v31, 16  ;;  %v618_v4 = vshll.u32 %v7102_v31, 16 }
  0x84   : > { %1130 = vrot.lane.b32.xlu0 %v8089_v56, %s7587_s30  ;;  %v1193_v45 = vshll.u32 %v8151_v50, 16  ;;  %v1183_v52 = vor.u32 %v1181_v11, %v1179_v33  ;;  %v1197_v31 = vshrl.u32 %v8151_v50, 16  ;;  %v626_v1 = vshll.u32 %v7103_v19, 16 }
  0x85   : > { %v617_v10 = vrot.slane %v615_v3, 7  ;;  %v1180_v43 = vsel %vm997_vm10, %v1175_v40, %v1179_v33  ;;  %v1191_v14 = vor.u32 %v1189_v32, %v1187_v27  ;;  %v6747_v2 = vcombine.low %v950_v8, %v7909_v16 }
  0x86   : > { %v1188_v48 = vsel %vm997_vm10, %v1183_v52, %v1187_v27  ;;  %v625_v7 = vrot.slane %v623_v57, 7  ;;  %v651_v11 = vshrl.u32 %v7104_v53, 16  ;;  %v654_v19 = vshll.u32 %v7104_v53, 16  ;;  %v674_v57 = vld [vmem:[#allocation2 + $0x74] sm:$0x1] }
  0x87   : > { %1132 = vrot.lane.b32.xlu1 %v8085_v54, %s7587_s30  ;;  %v620_v30 = vor.u32 %v618_v4, %v617_v10  ;;  %v621_v3 = vrot.slane %v617_v10, 4  ;;  %v1203_v4 = vrot.slane %v1201_v59, 1  ;;  %v659_v28 = vshrl.u32 %v7105_v17, 16 }
  0x88   : > { %1134 = vrot.lane.b32.xlu0 %v8102_v9, %s7587_s30  ;;  %v1205_v61 = vshrl.u32 %v8172_v21, 16  ;;  %v630_v33 = vrot.slane %v625_v7, 4  ;;  %v653_v32 = vrot.slane %v651_v11, 7  ;;  %v1227_v40 = vrot.slane %v6747_v2, 1 }
  0x89   : > { %v635_v62 = vsel %vm7874_vm7, %v620_v30, %v634_v37  ;;  %v6700_v37 = vld [vmem:[%s7636_s24 + $0x90] sm:$0xff]  ;;  %v661_v27 = vrot.slane %v659_v28, 7  ;;  %v662_v10 = vshll.u32 %v7105_v17, 16  ;;  %vm1545_vm11 = vcmask 1041408  }
  0x8a   : > { %636 = vst [vmem:[#allocation2 + $0x60] sm:$0xf] %v635_v62  ;;  %v656_v52 = vor.u32 %v654_v19, %v653_v32  ;;  %v657_v8 = vrot.slane %v653_v32, 4  ;;  %v7106_v62 = vpack.c.bf16 %v6700_v37, %v6700_v37  ;;  %v1207_v17 = vor.u32 %v1205_v61, %v1203_v4  ;;  %v6704_v19 = vld [vmem:[%s7636_s24 + $0xa0] sm:$0xff] }
  0x8b   : > { %1136 = vrot.lane.b32.xlu1 %v8137_v46, %s7587_s30  ;;  %v664_v59 = vor.u32 %v662_v10, %v661_v27  ;;  %v1236_v61 = vrot.slane %v8137_v46, 1  ;;  %v7108_v32 = vpack.c.bf16 %v6704_v19, %v6704_v19  ;;  %v1240_v46 = vrot.slane %v8172_v21, 1  ;;  %v8282_v19 = vld [vmem:[#allocation2 + $0x48] sm:$0xff]  }
  0x8c   : > { %1138 = vrot.lane.b32.xlu0 %v8151_v50, %s7587_s30  ;;  %v690_v2 = vshll.u32 %v7106_v62, 16  ;;  %vm1364_vm12 = vcmask 31744   ;;  %vm1382_vm13 = vcmask 64512   ;;  %vm1399_vm14 = vcmask 97280  }
  0x8d   : > { %v726_v10 = vshll.u32 %v7108_v32, 16  ;;  %vm1416_vm15 = vcmask 130048   ;;  %vm1433_vm0 = vcmask 162816   ;;  %vm1450_vm1 = vcmask 195584  }
  0x8e   : > { %vm1467_vm2 = vcmask 228352   ;;  %vm1484_vm4 = vcmask 261120   ;;  %vm1528_vm5 = vcmask 293888  }
  0x8f   : > { %1140 = vrot.lane.b32.xlu1 %v6745_v60, %s7587_s30  ;;  %v1195_v60 = vrot.slane %v1193_v45, 1  ;;  %v670_v45 = vld [vmem:[#allocation2 + $0x6c] sm:$0xf] }
  0x90   : > { %1208 = vrot.lane.b32.xlu0 %v1156_v25, %s7588_s6  ;;  %v638_v25 = vld [vmem:[#allocation2 + $0x68] sm:$0x1] }
  0x91   : > { %v1199_v49 = vor.u32 %v1197_v31, %v1195_v60  ;;  %v1196_v16 = vsel %vm997_vm10, %v1191_v14, %v1195_v60  ;;  %v666_v31 = vrot.slane %v661_v27, 4  ;;  %v687_v60 = vshrl.u32 %v7106_v62, 16 }
  0x92   : > { %v723_v27 = vshrl.u32 %v7108_v32, 16  ;;  %v6708_v32 = vld [vmem:[%s7636_s24 + $0xb0] sm:$0xff] }
  0x93   : > { %1210 = vrot.lane.b32.xlu1 %v1164_v63, %s7588_s6  ;;  %v628_v63 = vor.u32 %v626_v1, %v625_v7  ;;  %v1204_v53 = vsel %vm997_vm10, %v1199_v49, %v1203_v4  ;;  %v671_v1 = vsel %vm7874_vm7, %v656_v52, %v670_v45  ;;  %v675_v14 = vsel %vm7883_vm8, %v666_v31, %v674_v57  ;;  %v706_v4 = vld [vmem:[#allocation2 + $0x78] sm:$0xf] }
  0x94   : > { %1212 = vrot.lane.b32.xlu0 %v1172_v35, %s7588_s6  ;;  %v639_v35 = vsel %vm7883_vm8, %v630_v33, %v638_v25  ;;  %672 = vst [vmem:[#allocation2 + $0x6c] sm:$0xf] %v671_v1  ;;  %676 = vst [vmem:[#allocation2 + $0x74] sm:$0x1] %v675_v14  ;;  %v1232_v7 = vrot.slane %v8085_v54, 1  ;;  %v689_v11 = vrot.slane %v687_v60, 7 }
  0x95   : > { %v629_v30 = vsel %vm7866_vm6, %v621_v3, %v628_v63  ;;  %640 = vst [vmem:[#allocation2 + $0x68] sm:$0x1] %v639_v35  ;;  %v1229_v3 = vsel %vm1080_vm9, %v1227_v40, %v1228_v55  ;;  %v6701_v25 = vld [vmem:[%s7636_s24 + $0x98] sm:$0xff]  ;;  %v8233_v35 = vrot.slane %v723_v27, 7  ;;  %v1292_v27 = vshrl.u32 %v8096_v41, 16 }
  0x96   : > { %637 = vst.msk [vmem:[#allocation2 + $0x64] sm:$0xf] %vm376_vm3, %v629_v30  ;;  %v692_v49 = vor.u32 %v690_v2, %v689_v11  ;;  %v7107_v33 = vpack.c.bf16 %v6701_v25, %v6701_v25  ;;  %v693_v45 = vrot.slane %v689_v11, 4 }
  0x97   : > { %1214 = vrot.lane.b32.xlu1 %v1180_v43, %s7588_s6  ;;  %v665_v43 = vsel %vm7866_vm6, %v657_v8, %v664_v59  ;;  %v710_v8 = vld [vmem:[#allocation2 + $0x80] sm:$0x1]  ;;  %v728_v21 = vor.u32 %v726_v10, %v8233_v35  ;;  %v729_v10 = vrot.slane %v8233_v35, 4 }
  0x98   : > { %1216 = vrot.lane.b32.xlu0 %v1188_v48, %s7588_s6  ;;  %v1230_v48 = vrot.slane %v8089_v56, 1  ;;  %673 = vst.msk [vmem:[#allocation2 + $0x70] sm:$0xf] %vm376_vm3, %v665_v43  ;;  %v1234_v56 = vrot.slane %v8102_v9, 1  ;;  %v707_v54 = vsel %vm7874_vm7, %v692_v49, %v706_v4  ;;  %v698_v40 = vshll.u32 %v7107_v33, 16 }
  0x99   : > { %708 = vst [vmem:[#allocation2 + $0x78] sm:$0xf] %v707_v54  ;;  %v8278_v4 = vcombine.low %v8118_v34, %v8148_v12  ;;  %v953_v49 = vld [vmem:[#allocation2 + $0x50] sm:$0xf]  ;;  %v7448_v12 = vld [vmem:[%s11895_s1] sm:$0xff]  }
  0x9a   : > { %v1231_v28 = vsel %vm1080_vm9, %v1228_v55, %v1230_v48  ;;  %v1233_v63 = vsel %vm1080_vm9, %v1230_v48, %v1232_v7  ;;  %v1235_v37 = vsel %vm1080_vm9, %v1232_v7, %v1234_v56  ;;  %v1238_v55 = vrot.slane %v8151_v50, 1  ;;  %v742_v50 = vld [vmem:[#allocation2 + $0x84] sm:$0xf]  ;;  %7240 = vmatprep.subr.bf16.mxu0 %v7448_v12 }
  0x9b   : > { %1218 = vrot.lane.b32.xlu1 %v1196_v16, %s7588_s6  ;;  %v1237_v9 = vsel %vm1080_vm9, %v1234_v56, %v1236_v61  ;;  %v695_v16 = vshrl.u32 %v7107_v33, 16  ;;  %v8248_v1 = vld [vmem:[#allocation2 + $0x6c] sm:$0xf]  ;;  %v8261_v60 = vld [vmem:[#allocation2 + $0x74] sm:$0xf]  ;;  %v6751_v33 = vcombine.low %v953_v49, %v953_v49  ;;  %7241 = vmatpush3.bf16.msra.mxu0 %v7448_v12 }
  0x9c   : > { %1220 = vrot.lane.b32.xlu0 %v1204_v53, %s7588_s6  ;;  %v1239_v52 = vsel %vm1080_vm9, %v1236_v61, %v1238_v55  ;;  %v1241_v57 = vsel %vm1080_vm9, %v1238_v55, %v1240_v46  ;;  %v954_v56 = vld [vmem:[#allocation2 + $0x54] sm:$0x1] }
  0x9d   : > { %v697_v30 = vrot.slane %v695_v16, 7 }
  0x9f   : > { %1222 = vrot.lane.b32.xlu1 %v1207_v17, %s7588_s6  ;;  %v700_v53 = vor.u32 %v698_v40, %v697_v30  ;;  %v702_v59 = vrot.slane %v697_v30, 4  ;;  %v743_v17 = vsel %vm7874_vm7, %v728_v21, %v742_v50  ;;  %v8250_v43 = vld [vmem:[#allocation2 + $0x70] sm:$0xf]  ;;  %v1296_v40 = vshll.u32 %v8278_v4, 16  ;;  %v7451_v50 = vld [vmem:[%s11895_s1 + $0x8] sm:$0xff]  }
  0xa0   : > { %1242 = vrot.lane.b32.xlu0 %v1229_v3, %s7589_s7  ;;  %744 = vst [vmem:[#allocation2 + $0x84] sm:$0xf] %v743_v17  ;;  %v8257_v14 = vcombine.low %v8248_v1, %v8250_v43  ;;  %v8266_v48 = vld [vmem:[#allocation2 + $0x78] sm:$0xf]  ;;  %v6705_v3 = vld [vmem:[%s7636_s24 + $0xa8] sm:$0xff]  ;;  %7242 = vmatprep.subr.bf16.mxu0 %v7451_v50 }
  0xa1   : > { %v701_v31 = vsel %vm7866_vm6, %v693_v45, %v700_v53  ;;  %v711_v62 = vsel %vm7883_vm8, %v702_v59, %v710_v8  ;;  %v8271_v7 = vcombine.low %v8261_v60, %v8266_v48  ;;  %v7109_v25 = vpack.c.bf16 %v6705_v3, %v6705_v3  ;;  %7243 = vmatpush3.bf16.msra.mxu0 %v7451_v50 }
  0xa2   : > { %709 = vst.msk [vmem:[#allocation2 + $0x7c] sm:$0xf] %vm376_vm3, %v701_v31  ;;  %712 = vst [vmem:[#allocation2 + $0x80] sm:$0x1] %v711_v62  ;;  %v2020_v2 = vshll.u32 %v8257_v14, 16  ;;  %v2024_v11 = vshrl.u32 %v8257_v14, 16  ;;  %v1294_v62 = vor.u32 %v1292_v27, %v8115_v58 }
  0xa3   : > { %1244 = vrot.lane.b32.xlu1 %v1231_v28, %s7589_s7  ;;  %11969 = vst [vmem:[#allocation10_spill] sm:$0xff] %v8257_v14  ;;  %v8287_v61 = vrot.slane %v8257_v14, 1  ;;  %v11900_v54 = vrot.slane %v8271_v7, 1  ;;  %v734_v16 = vshll.u32 %v7109_v25, 16  ;;  %v1300_v8 = vshrl.u32 %v8278_v4, 16 }
  0xa4   : > { %1246 = vrot.lane.b32.xlu0 %v1233_v63, %s7589_s7  ;;  %v8284_v28 = vrot.slane %v2020_v2, 1  ;;  %v2261_v63 = vshll.u32 %v8271_v7, 16  ;;  %v1304_v53 = vshll.u32 %v8282_v19, 16  ;;  %v1298_v31 = vrot.slane %v1296_v40, 1  ;;  %v778_v58 = vld [vmem:[#allocation2 + $0x90] sm:$0xf] }
  0xa5   : > { %v8306_v55 = vsel %vm1080_vm9, %v8287_v61, %v11900_v54  ;;  %v1308_v3 = vshrl.u32 %v8282_v19, 16 }
  0xa6   : > { %v8292_v34 = vor.u32 %v2024_v11, %v8284_v28 }
  0xa7   : > { %1248 = vrot.lane.b32.xlu1 %v1235_v37, %s7589_s7  ;;  %v8300_v37 = vrot.slane %v2261_v63, 1  ;;  %v1306_v63 = vrot.slane %v1304_v53, 1 }
  0xa8   : > { %1250 = vrot.lane.b32.xlu0 %v1237_v9, %s7589_s7  ;;  %v731_v9 = vshrl.u32 %v7109_v25, 16 }
  0xa9   : > { %11970 = vst [vmem:[#allocation11_spill] sm:$0xff] %v8300_v37  ;;  %v8318_v45 = vsel %vm997_vm10, %v8292_v34, %v8300_v37  ;;  %v1310_v27 = vor.u32 %v1308_v3, %v1306_v63  ;;  %v6712_v3 = vld [vmem:[%s7636_s24 + $0xc0] sm:$0xff] }
  0xaa   : > { %v733_v30 = vrot.slane %v731_v9, 7  ;;  %v1299_v9 = vsel %vm997_vm10, %v1294_v62, %v1298_v31 }
  0xab   : > { %1252 = vrot.lane.b32.xlu1 %v1239_v52, %s7589_s7  ;;  %v7110_v52 = vpack.c.bf16 %v6708_v32, %v6708_v32  ;;  %v1302_v32 = vor.u32 %v1300_v8, %v1298_v31  ;;  %v782_v31 = vld [vmem:[#allocation2 + $0x98] sm:$0x1] }
  0xac   : > { %1254 = vrot.lane.b32.xlu0 %v1241_v57, %s7589_s7  ;;  %v746_v57 = vld [vmem:[#allocation2 + $0x8c] sm:$0x1]  ;;  %v736_v35 = vor.u32 %v734_v16, %v733_v30  ;;  %v738_v59 = vrot.slane %v733_v30, 4  ;;  %v1904_v30 = vld [vmem:[#allocation2 + $0x3c] sm:$0xf] }
  0xad   : > { %v759_v21 = vshrl.u32 %v7110_v52, 16  ;;  %v762_v2 = vshll.u32 %v7110_v52, 16  ;;  %v8352_v52 = vld [vmem:[#allocation2 + $0x40] sm:$0xf] }
  0xae   : > { %v737_v11 = vsel %vm7866_vm6, %v729_v10, %v736_v35 }
  0xaf   : > { %1256 = vrot.lane.b32.xlu1 %v1240_v46, %s7589_s7  ;;  %v8308_v46 = vcombine.low %v953_v49, %v954_v56  ;;  %v747_v49 = vsel %vm7883_vm8, %v738_v59, %v746_v57  ;;  %v761_v25 = vrot.slane %v759_v21, 7  ;;  %745 = vst.msk [vmem:[#allocation2 + $0x88] sm:$0xf] %vm376_vm3, %v737_v11  ;;  %v6709_v56 = vld [vmem:[%s7636_s24 + $0xb8] sm:$0xff]  ;;  %v1307_v57 = vsel %vm997_vm10, %v1302_v32, %v1306_v63  ;;  %v1906_v59 = vld [vmem:[#allocation2 + $0x44] sm:$0xf] }
  0xb0   : > { %1268 = vrot.lane.b32.xlu0 %v7950_v44, %s7590_s8  ;;  %748 = vst [vmem:[#allocation2 + $0x8c] sm:$0x1] %v747_v49  ;;  %v7111_v12 = vpack.c.bf16 %v6709_v56, %v6709_v56  ;;  %v8357_v21 = vld [vmem:[#allocation2 + $0x48] sm:$0xf] }
  0xb1   : > { %v1312_v17 = vshll.u32 %v8308_v46, 16  ;;  %v8366_v11 = vcombine.low %v1906_v59, %v8357_v21 }
  0xb2   : > { %v767_v10 = vshrl.u32 %v7111_v12, 16  ;;  %v770_v50 = vshll.u32 %v7111_v12, 16  ;;  %v8380_v12 = vld [vmem:[#allocation2 + $0x58] sm:$0xf] }
  0xb3   : > { %1270 = vrot.lane.b32.xlu1 %v7966_v51, %s7590_s8  ;;  %v1314_v40 = vrot.slane %v1312_v17, 1  ;;  %v765_v17 = vrot.slane %v761_v25, 4  ;;  %11972 = vst [vmem:[#allocation13_spill] sm:$0xff] %v8366_v11 }
  0xb4   : > { %1272 = vrot.lane.b32.xlu0 %v7987_v0, %s7590_s8  ;;  %v769_v8 = vrot.slane %v767_v10, 7  ;;  %v1980_v10 = vshll.u32 %v8366_v11, 16 }
  0xb5   : > { %v1315_v53 = vsel %vm997_vm10, %v1310_v27, %v1314_v40  ;;  %v8387_v27 = vld [vmem:[#allocation2 + $0x50] sm:$0xf] }
  0xb6   : > { %v772_v35 = vor.u32 %v770_v50, %v769_v8  ;;  %v1344_v50 = vrot.slane %v8282_v19, 1 }
  0xb7   : > { %1274 = vrot.lane.b32.xlu1 %v8001_v13, %s7590_s8 }
  0xb8   : > { %1276 = vrot.lane.b32.xlu0 %v8096_v41, %s7590_s8  ;;  %v773_v49 = vsel %vm7866_vm6, %v765_v17, %v772_v35  ;;  %v8410_v17 = vld [vmem:[#allocation2 + $0x60] sm:$0xf] }
  0xb9   : > { %781 = vst.msk [vmem:[#allocation2 + $0x94] sm:$0xf] %vm376_vm3, %v773_v49  ;;  %v8416_v49 = vld [vmem:[#allocation2 + $0x64] sm:$0xf] }
  0xbb   : > { %1278 = vrot.lane.b32.xlu1 %v8278_v4, %s7590_s8 }
  0xbc   : > { %1280 = vrot.lane.b32.xlu0 %v8282_v19, %s7590_s8 }
  0xbf   : > { %1282 = vrot.lane.b32.xlu1 %v6751_v33, %s7590_s8  ;;  %v764_v33 = vor.u32 %v762_v2, %v761_v25  ;;  %v774_v2 = vrot.slane %v769_v8, 4  ;;  %v6713_v25 = vld [vmem:[%s7636_s24 + $0xc8] sm:$0xff] }
  0xc0   : > { %1319 = vrot.lane.b32.xlu0 %v8053_v22, %s7591_s13  ;;  %v7454_v22 = vld [vmem:[%s11895_s1 + $0x10] ss:$0 sps:$4 sm:$0x33]   ;;  %v7113_v32 = vpack.c.bf16 %v6713_v25, %v6713_v25 }
  0xc1   : > { %7392 = vmatprep.subr.msk.bf16.mxu0 %vm1545_vm11, %v7454_v22  ;;  %v1547_v16 = vsel %vm1545_vm11, %v7454_v22, 0  ;;  %v783_v22 = vsel %vm7883_vm8, %v774_v2, %v782_v31  ;;  %v814_v2 = vld [vmem:[#allocation2 + $0x9c] sm:$0xf] }
  0xc2   : > { %7245 = vmatpush3.bf16.msra.mxu0 %v1547_v16  ;;  %784 = vst [vmem:[#allocation2 + $0x98] sm:$0x1] %v783_v22  ;;  %v1342_v16 = vrot.slane %v8278_v4, 1  ;;  %v803_v8 = vshrl.u32 %v7113_v32, 16  ;;  %v806_v31 = vshll.u32 %v7113_v32, 16 }
  0xc3   : > { %1321 = vrot.lane.b32.xlu1 %v8039_v29, %s7591_s13  ;;  %v779_v29 = vsel %vm7874_vm7, %v764_v33, %v778_v58  ;;  %v7112_v58 = vpack.c.bf16 %v6712_v3, %v6712_v3  ;;  %v8378_v33 = vld [vmem:[#allocation2 + $0x54] sm:$0xf]  ;;  %v1346_v3 = vrot.slane %v8308_v46, 1  ;;  %v8418_v22 = vld [vmem:[#allocation2 + $0x68] sm:$0xf] }
  0xc4   : > { %1323 = vrot.lane.b32.xlu0 %v8065_v36, %s7591_s13  ;;  %780 = vst [vmem:[#allocation2 + $0x90] sm:$0xf] %v779_v29  ;;  %v1316_v36 = vshrl.u32 %v8308_v46, 16  ;;  %v805_v59 = vrot.slane %v803_v8, 7  ;;  %v818_v32 = vld [vmem:[#allocation2 + $0xa4] sm:$0x1]  ;;  %v1345_v8 = vsel %vm1080_vm9, %v1342_v16, %v1344_v50 }
  0xc6   : > { %v1318_v62 = vor.u32 %v1316_v36, %v1314_v40  ;;  %v8385_v40 = vld [vmem:[#allocation2 + $0x4c] sm:$0xf]  ;;  %v798_v36 = vshll.u32 %v7112_v58, 16 }
  0xc7   : > { %1325 = vrot.lane.b32.xlu1 %v8130_v42, %s7591_s13  ;;  %v8360_v42 = vcombine.low %v1904_v30, %v8352_v52  ;;  %v8402_v4 = vcombine.low %v8385_v40, %v8387_v27 }
  0xc8   : > { %1327 = vrot.lane.b32.xlu0 %v1299_v9, %s7591_s13  ;;  %v795_v9 = vshrl.u32 %v7112_v58, 16  ;;  %v808_v58 = vor.u32 %v806_v31, %v805_v59 }
  0xc9   : > { %11971 = vst [vmem:[#allocation12_spill] sm:$0xff] %v8360_v42  ;;  %v1975_v56 = vshll.u32 %v8360_v42, 16  ;;  %11974 = vst [vmem:[#allocation15_spill] sm:$0xff] %v8402_v4 }
  0xca   : > { %v797_v30 = vrot.slane %v795_v9, 7 }
  0xcb   : > { %1329 = vrot.lane.b32.xlu1 %v1307_v57, %s7591_s13  ;;  %v1973_v57 = vshrl.u32 %v8360_v42, 16 }
  0xcc   : > { %1331 = vrot.lane.b32.xlu0 %v1315_v53, %s7591_s13  ;;  %v1977_v53 = vrot.slane %v1975_v56, 1  ;;  %v800_v35 = vor.u32 %v798_v36, %v797_v30  ;;  %v1984_v56 = vshrl.u32 %v8366_v11, 16  ;;  %v801_v9 = vrot.slane %v797_v30, 4 }
  0xcd   : > { %v810_v36 = vrot.slane %v805_v59, 4 }
  0xce   : > { %v1978_v31 = vor.u32 %v1977_v53, %v1973_v57  ;;  %v809_v54 = vsel %vm7866_vm6, %v801_v9, %v808_v58 }
  0xcf   : > { %1333 = vrot.lane.b32.xlu1 %v1318_v62, %s7591_s13  ;;  %v8408_v62 = vld [vmem:[#allocation2 + $0x5c] sm:$0xf]  ;;  %v819_v30 = vsel %vm7883_vm8, %v810_v36, %v818_v32  ;;  %817 = vst.msk [vmem:[#allocation2 + $0xa0] sm:$0xf] %vm376_vm3, %v809_v54 }
  0xd0   : > { %v8376_v63 = vpop.permute.xlu0 %1096  ;;  %1348 = vrot.lane.b32.xlu0 %v8156_v6, %s7592_s16  ;;  %v8396_v6 = vcombine.low %v8378_v33, %v8380_v12  ;;  %v8431_v46 = vcombine.low %v8408_v62, %v8410_v17  ;;  %820 = vst [vmem:[#allocation2 + $0xa4] sm:$0x1] %v819_v30  ;;  %v1924_v30 = vld [vmem:[#allocation2 + $0x84] sm:$0x1] }
  0xd1   : > { %v8389_v29 = vpop.permute.xlu1 %1098 }
  0xd2   : > { %11973 = vst [vmem:[#allocation14_spill] sm:$0xff] %v8396_v6  ;;  %v1996_v25 = vshll.u32 %v8396_v6, 16  ;;  %11976 = vst [vmem:[#allocation17_spill] sm:$0xff] %v8431_v46  ;;  %v2004_v53 = vshll.u32 %v8431_v46, 16  ;;  %v2008_v54 = vshrl.u32 %v8431_v46, 16 }
  0xd3   : > { %1350 = vrot.lane.b32.xlu1 %v8007_v26, %s7592_s16  ;;  %v1343_v26 = vsel %vm1080_vm9, %v1340_v39, %v1342_v16  ;;  %v1988_v39 = vshll.u32 %v8402_v4, 16  ;;  %v1919_v16 = vld [vmem:[#allocation2 + $0x78] sm:$0x1] }
  0xd4   : > { %1352 = vrot.lane.b32.xlu0 %v8024_v38, %s7592_s16  ;;  %v8406_v19 = vpop.permute.xlu0 %1100  ;;  %v815_v38 = vsel %vm7874_vm7, %v800_v35, %v814_v2  ;;  %v1982_v35 = vrot.slane %v1980_v10, 1  ;;  %v8437_v2 = vcombine.low %v8416_v49, %v8418_v22  ;;  %v1998_v57 = vrot.slane %v1996_v25, 1  ;;  %v8460_v25 = vld [vmem:[#allocation2 + $0x7c] sm:$0xf] }
  0xd5   : > { %816 = vst [vmem:[#allocation2 + $0x9c] sm:$0xf] %v815_v38  ;;  %v1992_v38 = vshrl.u32 %v8402_v4, 16  ;;  %v1990_v10 = vrot.slane %v1988_v39, 1 }
  0xd6   : > { %v2012_v58 = vshll.u32 %v8437_v2, 16  ;;  %v1983_v9 = vsel %vm997_vm10, %v1978_v31, %v1982_v35  ;;  %v2016_v31 = vshrl.u32 %v8437_v2, 16 }
  0xd7   : > { %1354 = vrot.lane.b32.xlu1 %v8144_v47, %s7592_s16  ;;  %v8426_v41 = vpop.permute.xlu1 %1102  ;;  %v1347_v47 = vsel %vm1080_vm9, %v1344_v50, %v1346_v3  ;;  %v2000_v50 = vshrl.u32 %v8396_v6, 16  ;;  %v1994_v36 = vor.u32 %v1992_v38, %v1990_v10  ;;  %v8470_v38 = vcombine.low %v8266_v48, %v8460_v25 }
  0xd8   : > { %11975 = vst [vmem:[#allocation16_spill] sm:$0xff] %v8426_v41  ;;  %1356 = vrot.lane.b32.xlu0 %v1343_v26, %s7592_s16  ;;  %v1986_v26 = vor.u32 %v1984_v56, %v1982_v35  ;;  %v2006_v56 = vrot.slane %v2004_v53, 1  ;;  %v2014_v35 = vrot.slane %v2012_v58, 1 }
  0xd9   : > { %v2166_v58 = vshll.u32 %v8470_v38, 16 }
  0xda   : > { %v8445_v59 = vpop.permute.xlu0 %1104  ;;  %v1991_v42 = vsel %vm997_vm10, %v1986_v26, %v1990_v10  ;;  %v2010_v13 = vor.u32 %v2008_v54, %v2006_v56  ;;  %v1920_v10 = vld [vmem:[#allocation2 + $0x3c] sm:$0xe] }
  0xdb   : > { %11977 = vst [vmem:[#allocation18_spill] sm:$0xff] %v8445_v59  ;;  %1358 = vrot.lane.b32.xlu1 %v1345_v8, %s7592_s16  ;;  %v8458_v8 = vcombine.low %v8261_v60, %v1919_v16  ;;  %v8497_v0 = vrot.slane %v2166_v58, 1 }
  0xdc   : > { %1360 = vrot.lane.b32.xlu0 %v1347_v47, %s7592_s16  ;;  %v2002_v47 = vor.u32 %v2000_v50, %v1998_v57  ;;  %v8476_v50 = vld [vmem:[#allocation2 + $0x80] sm:$0xf] }
  0xdd   : > { %v8453_v32 = vpop.permute.xlu1 %1106  ;;  %v8481_v26 = vcombine.low %v8476_v50, %v1924_v30 }
  0xde   : > { %11978 = vst [vmem:[#allocation19_spill] sm:$0xff] %v8453_v32  ;;  %v8462_v39 = vpop.permute.xlu0 %1061  ;;  %v1999_v32 = vsel %vm997_vm10, %v1994_v36, %v1998_v57  ;;  %v8486_v48 = vsel %vm997_vm10, %v2002_v47, %v2006_v56  ;;  %v2018_v57 = vor.u32 %v2016_v31, %v2014_v35  ;;  %v8492_v36 = vsel %vm997_vm10, %v2010_v13, %v2014_v35 }
  0xdf   : > { %1362 = vrot.lane.b32.xlu1 %v1346_v3, %s7592_s16  ;;  %v2028_v3 = vshll.u32 %v8458_v8, 16  ;;  %11980 = vst [vmem:[#allocation21_spill] sm:$0xff] %v8481_v26  ;;  %v2174_v47 = vshll.u32 %v8481_v26, 16 }
  0xe0   : > { %2035 = vrot.lane.b32.xlu0 %v1983_v9, %s7586_s29  ;;  %v8506_v13 = vsel %vm997_vm10, %v2018_v57, %v8284_v28 }
  0xe1   : > { %v8472_v16 = vpop.permute.xlu1 %1075  ;;  %v2030_v54 = vrot.slane %v2028_v3, 1  ;;  %v8511_v56 = vrot.slane %v2174_v47, 1  ;;  %v2055_v3 = vrot.slane %v8366_v11, 1 }
  0xe2   : > { %11979 = vst [vmem:[#allocation20_spill] sm:$0xff] %v8472_v16  ;;  %v8478_v53 = vpop.permute.xlu0 %1063  ;;  %v6790_v16 = vcombine.low %v1920_v10, %v8352_v52 }
  0xe3   : > { %2037 = vrot.lane.b32.xlu1 %v1991_v42, %s7586_s29  ;;  %v2170_v42 = vshrl.u32 %v8470_v38, 16  ;;  %11982 = vst [vmem:[#allocation23_spill] sm:$0xff] %v8511_v56  ;;  %v2031_v31 = vsel %vm997_vm10, %v8292_v34, %v2030_v54 }
  0xe4   : > { %2039 = vrot.lane.b32.xlu0 %v1999_v32, %s7586_s29  ;;  %v2032_v32 = vshrl.u32 %v8458_v8, 16  ;;  %v2054_v10 = vrot.slane %v6790_v16, 1  ;;  %v2059_v16 = vrot.slane %v8396_v6, 1 }
  0xe5   : > { %v8489_v9 = vpop.permute.xlu1 %1065  ;;  %v2172_v52 = vor.u32 %v2170_v42, %v8497_v0  ;;  %v2057_v42 = vrot.slane %v8402_v4, 1 }
  0xe6   : > { %v8495_v30 = vpop.permute.xlu0 %1069  ;;  %v2034_v57 = vor.u32 %v2032_v32, %v2030_v54  ;;  %v2056_v34 = vsel %vm1080_vm9, %v2054_v10, %v2055_v3  ;;  %v8538_v54 = vrot.slane %v8431_v46, 1  ;;  %v2063_v10 = vrot.slane %v8437_v2, 1 }
  0xe7   : > { %11981 = vst [vmem:[#allocation22_spill] sm:$0xff] %v8495_v30  ;;  %2041 = vrot.lane.b32.xlu1 %v8486_v48, %s7586_s29  ;;  %v8522_v28 = vsel %vm997_vm10, %v2172_v52, %v8511_v56  ;;  %v2058_v52 = vsel %vm1080_vm9, %v2055_v3, %v2057_v42  ;;  %v2067_v56 = vrot.slane %v8458_v8, 1 }
  0xe8   : > { %2043 = vrot.lane.b32.xlu0 %v8492_v36, %s7586_s29  ;;  %11985 = vst [vmem:[#allocation26_spill] sm:$0xff] %v8522_v28  ;;  %v6716_v28 = vld [vmem:[%s7636_s24 + $0xd0] sm:$0xff] }
  0xe9   : > { %v8513_v35 = vpop.permute.xlu1 %1067  ;;  %v7114_v26 = vpack.c.bf16 %v6716_v28, %v6716_v28 }
  0xea   : > { %11983 = vst [vmem:[#allocation24_spill] sm:$0xff] %v8513_v35  ;;  %v8518_v58 = vpop.permute.xlu0 %1073  ;;  %v886_v35 = vld [vmem:[#allocation2 + $0xb4] sm:$0xf] }
  0xeb   : > { %11984 = vst [vmem:[#allocation25_spill] sm:$0xff] %v8518_v58  ;;  %2045 = vrot.lane.b32.xlu1 %v8506_v13, %s7586_s29 }
  0xec   : > { %2047 = vrot.lane.b32.xlu0 %v2031_v31, %s7586_s29  ;;  %v2060_v31 = vsel %vm1080_vm9, %v2057_v42, %v2059_v16 }
  0xed   : > { %v8528_v47 = vpop.permute.xlu1 %1071 }
  0xee   : > { %11986 = vst [vmem:[#allocation27_spill] sm:$0xff] %v8528_v47  ;;  %v8532_v11 = vpop.permute.xlu0 %1108 }
  0xef   : > { %11987 = vst [vmem:[#allocation28_spill] sm:$0xff] %v8532_v11  ;;  %2049 = vrot.lane.b32.xlu1 %v2034_v57, %s7586_s29  ;;  %v2062_v57 = vsel %vm1080_vm9, %v2059_v16, %v8538_v54 }
  0xf0   : > { %2069 = vrot.lane.b32.xlu0 %v2056_v34, %s7585_s28  ;;  %v8554_v34 = vsel %vm1080_vm9, %v8538_v54, %v2063_v10 }
  0xf1   : > { %v8540_v32 = vpop.permute.xlu1 %1110 }
  0xf2   : > { %11988 = vst [vmem:[#allocation29_spill] sm:$0xff] %v8540_v32  ;;  %v8544_v4 = vpop.permute.xlu0 %1126  ;;  %v831_v32 = vshrl.u32 %v7114_v26, 16 }
  0xf3   : > { %2071 = vrot.lane.b32.xlu1 %v2058_v52, %s7585_s28  ;;  %v8563_v52 = vsel %vm1080_vm9, %v2063_v10, %v8287_v61  ;;  %v6791_v10 = vcombine.low %v8357_v21, %v8385_v40  ;;  %v8592_v21 = vcombine.low %v8380_v12, %v8408_v62  ;;  %v8610_v62 = vcombine.low %v8418_v22, %v8248_v1 }
  0xf4   : > { %2073 = vrot.lane.b32.xlu0 %v2060_v31, %s7585_s28  ;;  %v2068_v31 = vsel %vm1080_vm9, %v8287_v61, %v2067_v56  ;;  %v833_v28 = vrot.slane %v831_v32, 7  ;;  %v850_v61 = vld [vmem:[#allocation2 + $0xa8] sm:$0xf]  ;;  %v6717_v32 = vld [vmem:[%s7636_s24 + $0xd8] sm:$0xff]  ;;  %v8622_v1 = vcombine.low %v8250_v43, %v8261_v60 }
  0xf5   : > { %v8550_v3 = vpop.permute.xlu1 %1128  ;;  %v2138_v44 = vshrl.u32 %v8592_v21, 16 }
  0xf6   : > { %v8557_v42 = vpop.permute.xlu0 %1130  ;;  %v837_v22 = vrot.slane %v833_v28, 4 }
  0xf7   : > { %2075 = vrot.lane.b32.xlu1 %v2062_v57, %s7585_s28  ;;  %v834_v57 = vshll.u32 %v7114_v26, 16 }
  0xf8   : > { %2077 = vrot.lane.b32.xlu0 %v8554_v34, %s7585_s28 }
  0xf9   : > { %v8567_v16 = vpop.permute.xlu1 %1132  ;;  %v836_v58 = vor.u32 %v834_v57, %v833_v28  ;;  %v2121_v57 = vshll.u32 %v6791_v10, 16 }
  0xfa   : > { %11989 = vst [vmem:[#allocation30_spill] sm:$0xff] %v8567_v16  ;;  %v8571_v8 = vpop.permute.xlu0 %1134 }
  0xfb   : > { %11990 = vst [vmem:[#allocation31_spill] sm:$0xff] %v8571_v8  ;;  %2079 = vrot.lane.b32.xlu1 %v8563_v52, %s7585_s28  ;;  %v8585_v8 = vcombine.low %v8387_v27, %v8378_v33  ;;  %v851_v26 = vsel %vm7874_vm7, %v836_v58, %v850_v61  ;;  %v8604_v33 = vcombine.low %v8410_v17, %v8416_v49 }
  0xfc   : > { %2081 = vrot.lane.b32.xlu0 %v2068_v31, %s7585_s28  ;;  %852 = vst [vmem:[#allocation2 + $0xa8] sm:$0xf] %v851_v26  ;;  %v2119_v26 = vshrl.u32 %v6791_v10, 16 }
  0xfd   : > { %v8578_v11 = vpop.permute.xlu1 %1136  ;;  %v2126_v61 = vshll.u32 %v8585_v8, 16  ;;  %v2130_v49 = vshrl.u32 %v8585_v8, 16 }
  0xfe   : > { %11991 = vst [vmem:[#allocation32_spill] sm:$0xff] %v8578_v11  ;;  %v8580_v47 = vpop.permute.xlu0 %1138  ;;  %v6720_v11 = vld [vmem:[%s7636_s24 + $0xe0] sm:$0xff] }
  0xff   : > { %11992 = vst [vmem:[#allocation33_spill] sm:$0xff] %v8580_v47  ;;  %2083 = vrot.lane.b32.xlu1 %v2067_v56, %s7585_s28  ;;  %v7115_v47 = vpack.c.bf16 %v6717_v32, %v6717_v32  ;;  %v7116_v58 = vpack.c.bf16 %v6720_v11, %v6720_v11  ;;  %v2134_v11 = vshll.u32 %v8592_v21, 16 }
 0x100   : > { %2099 = vrot.lane.b32.xlu0 %v6791_v10, %s7587_s30 }
 0x101   : > { %v8595_v31 = vpop.permute.xlu1 %1140  ;;  %v839_v27 = vshrl.u32 %v7115_v47, 16  ;;  %v842_v16 = vshll.u32 %v7115_v47, 16  ;;  %v867_v37 = vshrl.u32 %v7116_v58, 16  ;;  %v2128_v47 = vrot.slane %v2126_v61, 1  ;;  %v854_v61 = vld [vmem:[#allocation2 + $0xb0] sm:$0x1] }
 0x102   : > { %11993 = vst [vmem:[#allocation34_spill] sm:$0xff] %v8595_v31  ;;  %v8597_v56 = vpop.permute.xlu0 %1208  ;;  %v2123_v31 = vrot.slane %v2121_v57, 1  ;;  %v2142_v57 = vshll.u32 %v8604_v33, 16  ;;  %v870_v41 = vshll.u32 %v7116_v58, 16 }
 0x103   : > { %2101 = vrot.lane.b32.xlu1 %v8585_v8, %s7587_s30  ;;  %v841_v59 = vrot.slane %v839_v27, 7  ;;  %v8628_v27 = vrot.slane %v867_v37, 7  ;;  %v6798_v37 = vcombine.low %v8476_v50, %v8476_v50 }
 0x104   : > { %2103 = vrot.lane.b32.xlu0 %v8592_v21, %s7587_s30  ;;  %v2124_v30 = vor.u32 %v2123_v31, %v2119_v26  ;;  %v2150_v31 = vshll.u32 %v8610_v62, 16  ;;  %v2132_v26 = vor.u32 %v2130_v49, %v2128_v47 }
 0x105   : > { %v8613_v32 = vpop.permute.xlu1 %1210  ;;  %v844_v10 = vor.u32 %v842_v16, %v841_v59  ;;  %v846_v60 = vrot.slane %v841_v59, 4  ;;  %v2136_v16 = vrot.slane %v2134_v11, 1  ;;  %v872_v59 = vor.u32 %v870_v41, %v8628_v27 }
 0x106   : > { %v8615_v17 = vpop.permute.xlu0 %1212  ;;  %v2144_v11 = vrot.slane %v2142_v57, 1  ;;  %v2152_v49 = vrot.slane %v2150_v31, 1 }
 0x107   : > { %11994 = vst [vmem:[#allocation35_spill] sm:$0xff] %v8615_v17  ;;  %2105 = vrot.lane.b32.xlu1 %v8604_v33, %s7587_s30  ;;  %v845_v43 = vsel %vm7866_vm6, %v837_v22, %v844_v10  ;;  %v855_v58 = vsel %vm7883_vm8, %v846_v60, %v854_v61  ;;  %v2146_v22 = vshrl.u32 %v8604_v33, 16  ;;  %v2158_v10 = vshll.u32 %v8622_v1, 16  ;;  %v1925_v61 = vld [vmem:[#allocation2 + $0x48] sm:$0xe] }
 0x108   : > { %2107 = vrot.lane.b32.xlu0 %v8610_v62, %s7587_s30  ;;  %853 = vst.msk [vmem:[#allocation2 + $0xac] sm:$0xf] %vm376_vm3, %v845_v43  ;;  %856 = vst [vmem:[#allocation2 + $0xb0] sm:$0x1] %v855_v58  ;;  %v2154_v17 = vshrl.u32 %v8610_v62, 16  ;;  %v887_v41 = vsel %vm7874_vm7, %v872_v59, %v886_v35  ;;  %v2137_v57 = vsel %vm997_vm10, %v2132_v26, %v2136_v16 }
 0x109   : > { %v8630_v51 = vpop.permute.xlu1 %1214  ;;  %888 = vst [vmem:[#allocation2 + $0xb4] sm:$0xf] %v887_v41  ;;  %v2148_v58 = vor.u32 %v2146_v22, %v2144_v11  ;;  %v6800_v59 = vcombine.low %v1925_v61, %v8385_v40  ;;  %v2201_v40 = vrot.slane %v8585_v8, 1  ;;  %v6721_v22 = vld [vmem:[%s7636_s24 + $0xe8] sm:$0xff] }
 0x10a   : > { %11995 = vst [vmem:[#allocation36_spill] sm:$0xff] %v8630_v51  ;;  %v8635_v28 = vpop.permute.xlu0 %1216  ;;  %v2140_v51 = vor.u32 %v2138_v44, %v2136_v16  ;;  %v2162_v44 = vshrl.u32 %v8622_v1, 16  ;;  %v2156_v35 = vor.u32 %v2154_v17, %v2152_v49  ;;  %v7462_v16 = vld [vmem:[%s11895_s1] sm:$0xff]   ;;  %v7117_v8 = vpack.c.bf16 %v6721_v22, %v6721_v22 }
 0x10b   : > { %11996 = vst [vmem:[#allocation37_spill] sm:$0xff] %v8635_v28  ;;  %2109 = vrot.lane.b32.xlu1 %v8622_v1, %s7587_s30  ;;  %v2129_v28 = vsel %vm997_vm10, %v2124_v30, %v2128_v47  ;;  %7262 = vmatprep.subr.bf16.mxu1 %v7462_v16  ;;  %v2200_v17 = vrot.slane %v6800_v59, 1 }
 0x10c   : > { %2111 = vrot.lane.b32.xlu0 %v8470_v38, %s7587_s30  ;;  %v2145_v47 = vsel %vm997_vm10, %v2140_v51, %v2144_v11  ;;  %7263 = vmatpush3.bf16.msra.mxu1 %v7462_v16  ;;  %v7463_v11 = vld [vmem:[%s11895_s1 + $0x8] sm:$0xff]  }
 0x10d   : > { %v8650_v43 = vpop.permute.xlu1 %1218  ;;  %7264 = vmatprep.subr.bf16.mxu1 %v7463_v11 }
 0x10e   : > { %11997 = vst [vmem:[#allocation38_spill] sm:$0xff] %v8650_v43  ;;  %v8656_v60 = vpop.permute.xlu0 %1220  ;;  %v2160_v43 = vrot.slane %v2158_v10, 1 }
 0x10f   : > { %2113 = vrot.lane.b32.xlu1 %v6798_v37, %s7587_s30 }
 0x110   : > { %2181 = vrot.lane.b32.xlu0 %v2129_v28, %s7588_s6  ;;  %v2153_v28 = vsel %vm997_vm10, %v2148_v58, %v2152_v49  ;;  %v2164_v37 = vor.u32 %v2162_v44, %v2160_v43  ;;  %v2161_v51 = vsel %vm997_vm10, %v2156_v35, %v2160_v43  ;;  %v2203_v43 = vrot.slane %v8592_v21, 1  ;;  %7265 = vmatpush3.bf16.msra.mxu1 %v7463_v11  ;;  %v1930_v58 = vld [vmem:[#allocation2 + $0x54] sm:$0xe]  ;;  %v7465_v44 = vld [vmem:[%s11895_s1 + $0x10] ss:$0 sps:$4 sm:$0x33]  }
 0x111   : > { %v8662_v30 = vpop.permute.xlu1 %1222  ;;  %v2202_v49 = vsel %vm1080_vm9, %v2200_v17, %v2201_v40  ;;  %7393 = vmatprep.subr.msk.bf16.mxu1 %vm1545_vm11, %v7465_v44  ;;  %v2510_v21 = vsel %vm1545_vm11, %v7465_v44, 0  ;;  %v6806_v16 = vcombine.low %v1930_v58, %v8380_v12  ;;  %v2205_v58 = vrot.slane %v8604_v33, 1 }
 0x112   : > { %11998 = vst [vmem:[#allocation39_spill] sm:$0xff] %v8662_v30  ;;  %v8666_v41 = vpop.permute.xlu0 %1242  ;;  %v2169_v10 = vsel %vm997_vm10, %v2164_v37, %v8497_v0  ;;  %v2204_v0 = vsel %vm1080_vm9, %v2201_v40, %v2203_v43  ;;  %v8765_v30 = vld [vmem:[#allocation2 + $0x88] sm:$0xf] }
 0x113   : > { %2183 = vrot.lane.b32.xlu1 %v2137_v57, %s7588_s6  ;;  %v2311_v11 = vrot.slane %v6806_v16, 1  ;;  %v8731_v16 = vld [vmem:[#allocation2 + $0x7c] sm:$0xf]  ;;  %v2206_v33 = vsel %vm1080_vm9, %v2203_v43, %v2205_v58 }
 0x114   : > { %2185 = vrot.lane.b32.xlu0 %v2145_v47, %s7588_s6  ;;  %v875_v47 = vshrl.u32 %v7117_v8, 16  ;;  %7267 = vmatpush3.bf16.msra.mxu1 %v2510_v21  ;;  %v2854_v21 = vld [vmem:[#allocation2 + $0x78] sm:$0xf] }
 0x115   : > { %v8674_v31 = vpop.permute.xlu1 %1244 }
 0x116   : > { %v8678_v26 = vpop.permute.xlu0 %1246  ;;  %v877_v35 = vrot.slane %v875_v47, 7 }
 0x117   : > { %2187 = vrot.lane.b32.xlu1 %v2153_v28, %s7588_s6  ;;  %v878_v28 = vshll.u32 %v7117_v8, 16 }
 0x118   : > { %2189 = vrot.lane.b32.xlu0 %v2161_v51, %s7588_s6  ;;  %v873_v51 = vrot.slane %v8628_v27, 4  ;;  %v6724_v27 = vld [vmem:[%s7636_s24 + $0xf0] sm:$0xff] }
 0x119   : > { %v8689_v61 = vpop.permute.xlu1 %1248  ;;  %v880_v40 = vor.u32 %v878_v28, %v877_v35  ;;  %v7118_v44 = vpack.c.bf16 %v6724_v27, %v6724_v27  ;;  %v11914_v28 = vrot.slane %v8610_v62, 1  ;;  %v8743_v27 = vcombine.low %v2854_v21, %v8731_v16 }
 0x11a   : > { %v8692_v57 = vpop.permute.xlu0 %1250 }
 0x11b   : > { %2191 = vrot.lane.b32.xlu1 %v2169_v10, %s7588_s6  ;;  %v881_v22 = vsel %vm7866_vm6, %v873_v51, %v880_v40  ;;  %v6725_v10 = vld [vmem:[%s7636_s24 + $0xf8] sm:$0xff]  ;;  %v2856_v51 = vld [vmem:[#allocation2 + $0x80] sm:$0xf]  ;;  %v882_v40 = vrot.slane %v877_v35, 4  ;;  %v906_v35 = vshll.u32 %v7118_v44, 16  ;;  %v2208_v43 = vsel %vm1080_vm9, %v2205_v58, %v11914_v28 }
 0x11c   : > { %2215 = vrot.lane.b32.xlu0 %v2202_v49, %s7589_s7  ;;  %889 = vst.msk [vmem:[#allocation2 + $0xb8] sm:$0xf] %vm376_vm3, %v881_v22  ;;  %v2312_v49 = vsel %vm1080_vm9, %v2311_v11, %v8538_v54  ;;  %v7119_v47 = vpack.c.bf16 %v6725_v10, %v6725_v10  ;;  %v8740_v22 = vld [vmem:[#allocation2 + $0x84] sm:$0xf]  ;;  %v890_v10 = vld [vmem:[#allocation2 + $0xbc] sm:$0x1] }
 0x11d   : > { %v8702_v59 = vpop.permute.xlu1 %1252  ;;  %v8756_v21 = vcombine.low %v2856_v51, %v8740_v22  ;;  %v8767_v58 = vld [vmem:[#allocation2 + $0x8c] sm:$0xf] }
 0x11e   : > { %v8705_v37 = vpop.permute.xlu0 %1254  ;;  %v911_v54 = vshrl.u32 %v7119_v47, 16  ;;  %v8781_v28 = vcombine.low %v8765_v30, %v8767_v58 }
 0x11f   : > { %2217 = vrot.lane.b32.xlu1 %v2204_v0, %s7589_s7  ;;  %v2934_v15 = vshrl.u32 %v8756_v21, 16 }
 0x120   : > { %2241 = vrot.lane.b32.xlu0 %v8396_v6, %s7590_s8  ;;  %v8758_v6 = vrot.slane %v911_v54, 7  ;;  %v2938_v5 = vshll.u32 %v8781_v28, 16 }
 0x121   : > { %v8711_v17 = vpop.permute.xlu1 %1256 }
 0x122   : > { %11999 = vst [vmem:[#allocation40_spill] sm:$0xff] %v8711_v17  ;;  %v8715_v12 = vpop.permute.xlu0 %1268 }
 0x123   : > { %2243 = vrot.lane.b32.xlu1 %v8431_v46, %s7590_s8 }
 0x124   : > { %2292 = vrot.lane.b32.xlu0 %v8486_v48, %s7591_s13  ;;  %v903_v48 = vshrl.u32 %v7118_v44, 16 }
 0x125   : > { %v8724_v8 = vpop.permute.xlu1 %1270 }
 0x126   : > { %v8729_v0 = vpop.permute.xlu0 %1272  ;;  %v905_v46 = vrot.slane %v903_v48, 7  ;;  %v922_v48 = vld [vmem:[#allocation2 + $0xc0] sm:$0xf] }
 0x127   : > { %2294 = vrot.lane.b32.xlu1 %v8492_v36, %s7591_s13 }
 0x128   : > { %2321 = vrot.lane.b32.xlu0 %v2312_v49, %s7592_s16  ;;  %v891_v49 = vsel %vm7883_vm8, %v882_v40, %v890_v10  ;;  %v2925_v40 = vshll.u32 %v8743_v27, 16  ;;  %v908_v10 = vor.u32 %v906_v35, %v905_v46  ;;  %v2930_v35 = vshll.u32 %v8756_v21, 16 }
 0x129   : > { %v8737_v11 = vpop.permute.xlu1 %1274  ;;  %892 = vst [vmem:[#allocation2 + $0xbc] sm:$0x1] %v891_v49  ;;  %v914_v49 = vshll.u32 %v7119_v47, 16 }
 0x12a   : > { %v8745_v36 = vpop.permute.xlu0 %1276  ;;  %v923_v51 = vsel %vm7874_vm7, %v908_v10, %v922_v48  ;;  %v2927_v47 = vrot.slane %v2925_v40, 1  ;;  %v2870_v10 = vld [vmem:[#allocation2 + $0x78] sm:$0xe] }
 0x12b   : > { %2323 = vrot.lane.b32.xlu1 %v8554_v34, %s7592_s16  ;;  %v909_v34 = vrot.slane %v905_v46, 4  ;;  %v916_v54 = vor.u32 %v914_v49, %v8758_v6  ;;  %924 = vst [vmem:[#allocation2 + $0xc0] sm:$0xf] %v923_v51  ;;  %v2932_v51 = vrot.slane %v2930_v35, 1  ;;  %v8807_v35 = vrot.slane %v2938_v5, 1 }
 0x12c   : > { %2219 = vrot.lane.b32.xlu0 %v2206_v33, %s7589_s7  ;;  %v2923_v33 = vshrl.u32 %v8743_v27, 16  ;;  %v8820_v5 = vcombine.low %v8460_v25, %v8476_v50 }
 0x12d   : > { %v8760_v17 = vpop.permute.xlu1 %1278 }
 0x12e   : > { %v8763_v44 = vpop.permute.xlu0 %1280  ;;  %v2928_v49 = vor.u32 %v2927_v47, %v2923_v33  ;;  %v2936_v47 = vor.u32 %v2934_v15, %v2932_v51  ;;  %v2211_v15 = vrot.slane %v8470_v38, 1 }
 0x12f   : > { %2221 = vrot.lane.b32.xlu1 %v2208_v43, %s7589_s7  ;;  %v917_v43 = vsel %vm7866_vm6, %v909_v34, %v916_v54  ;;  %v6843_v54 = vcombine.low %v2870_v10, %v8731_v16  ;;  %v1366_v16 = vsel %vm1364_vm12, %v7914_v18, %v8462_v39  ;;  %v12000_v18 = vrot.slane %v8610_v62, 1 }
 0x130   : > { %2245 = vrot.lane.b32.xlu0 %v8437_v2, %s7590_s8  ;;  %925 = vst.msk [vmem:[#allocation2 + $0xc4] sm:$0xf] %vm376_vm3, %v917_v43  ;;  %v2933_v33 = vsel %vm997_vm10, %v2928_v49, %v2932_v51  ;;  %v2941_v50 = vsel %vm997_vm10, %v2936_v47, %v8807_v35  ;;  %v1370_v62 = vsel %vm1364_vm12, %v7923_v24, %v8489_v9  ;;  %v3007_v24 = vrot.slane %v8781_v28, 1 }
 0x131   : > { %v8776_v46 = vpop.permute.xlu1 %1282 }
 0x132   : > { %v8785_v48 = vpop.permute.xlu0 %1319 }
 0x133   : > { %2247 = vrot.lane.b32.xlu1 %v8257_v14, %s7590_s8  ;;  %v3005_v14 = vrot.slane %v8756_v21, 1 }
 0x134   : > { %2296 = vrot.lane.b32.xlu0 %v8506_v13, %s7591_s13  ;;  %v2209_v13 = vrot.slane %v8622_v1, 1  ;;  %v1384_v1 = vsel %vm1382_vm13, %v1366_v16, %v8376_v63 }
 0x135   : > { %v8792_v40 = vpop.permute.xlu1 %1321 }
 0x136   : > { %v8796_v34 = vpop.permute.xlu0 %1323  ;;  %v2210_v39 = vsel %vm1080_vm9, %v12000_v18, %v2209_v13  ;;  %v2212_v51 = vsel %vm1080_vm9, %v2209_v13, %v2211_v15  ;;  %v1388_v13 = vsel %vm1382_vm13, %v1370_v62, %v8406_v19  ;;  %v2269_v19 = vshll.u32 %v8820_v5, 16  ;;  %v12002_v62 = vld [vmem:[#allocation24_spill] sm:$0xff] }
 0x137   : > { %2298 = vrot.lane.b32.xlu1 %v8318_v45, %s7591_s13  ;;  %v3004_v45 = vrot.slane %v6843_v54, 1  ;;  %v2265_v54 = vshrl.u32 %v8271_v7, 16 }
 0x138   : > { %2325 = vrot.lane.b32.xlu0 %v8563_v52, %s7592_s16  ;;  %v8828_v52 = vcombine.low %v8740_v22, %v8765_v30  ;;  %v1401_v22 = vsel %vm1399_vm14, %v1384_v1, %v8544_v4 }
 0x139   : > { %v8804_v43 = vpop.permute.xlu1 %1325  ;;  %v1418_v63 = vsel %vm1416_vm15, %v1401_v22, %v8597_v56  ;;  %v12003_v22 = vld [vmem:[#allocation6_spill] sm:$0xff] }
 0x13a   : > { %v8812_v10 = vpop.permute.xlu0 %1327  ;;  %v1435_v9 = vsel %vm1433_vm0, %v1418_v63, %v8666_v41  ;;  %v3071_v56 = vshll.u32 %v8828_v52, 16  ;;  %v1405_v41 = vsel %vm1399_vm14, %v1388_v13, %v8557_v42  ;;  %v3008_v42 = vsel %vm1080_vm9, %v3005_v14, %v3007_v24 }
 0x13b   : > { %2327 = vrot.lane.b32.xlu1 %v8306_v55, %s7592_s16  ;;  %v1368_v55 = vsel %vm1364_vm12, %v7919_v23, %v8478_v53  ;;  %v3006_v23 = vsel %vm1080_vm9, %v3004_v45, %v3005_v14  ;;  %v8847_v53 = vld [vmem:[#allocation2 + $0x90] sm:$0xf]  ;;  %v1452_v47 = vsel %vm1450_vm1, %v1435_v9, %v8715_v12 }
 0x13c   : > { %2985 = vrot.lane.b32.xlu0 %v2933_v33, %s7586_s29  ;;  %v1386_v4 = vsel %vm1382_vm13, %v1368_v55, %v8389_v29  ;;  %v8873_v29 = vcombine.low %v8767_v58, %v8847_v53 }
 0x13d   : > { %v8835_v25 = vpop.permute.xlu1 %1329  ;;  %v1403_v33 = vsel %vm1399_vm14, %v1386_v4, %v8550_v3  ;;  %v1469_v3 = vsel %vm1467_vm2, %v1452_v47, %v8785_v48  ;;  %v12004_v4 = vld [vmem:[#allocation22_spill] sm:$0xff]  ;;  %v2273_v47 = vshrl.u32 %v8820_v5, 16 }
 0x13e   : > { %v8844_v49 = vpop.permute.xlu0 %1331  ;;  %v1420_v45 = vsel %vm1416_vm15, %v1403_v33, %v8613_v32  ;;  %v8891_v32 = vld [vmem:[#allocation2 + $0x84] sm:$0xff]  }
 0x13f   : > { %2223 = vrot.lane.b32.xlu1 %v2210_v39, %s7589_s7  ;;  %v12001_v39 = vld [vmem:[#allocation35_spill] sm:$0xff]  ;;  %v1437_v55 = vsel %vm1433_vm0, %v1420_v45, %v8674_v31  ;;  %v3069_v31 = vshrl.u32 %v8828_v52, 16  ;;  %v2277_v45 = vshll.u32 %v8891_v32, 16 }
 0x140   : > { %2987 = vrot.lane.b32.xlu0 %v2941_v50, %s7586_s29  ;;  %v1422_v12 = vsel %vm1416_vm15, %v1405_v41, %v12001_v39  ;;  %v1454_v1 = vsel %vm1450_vm1, %v1437_v55, %v8724_v8  ;;  %v3073_v50 = vrot.slane %v3071_v56, 1  ;;  %v3076_v8 = vshll.u32 %v8873_v29, 16  ;;  %v8915_v41 = vld [vmem:[#allocation2 + $0x94] sm:$0xf] }
 0x141   : > { %v8869_v16 = vpop.permute.xlu1 %1333  ;;  %v1439_v48 = vsel %vm1433_vm0, %v1422_v12, %v8678_v26  ;;  %v1471_v26 = vsel %vm1467_vm2, %v1454_v1, %v8792_v40  ;;  %v2271_v12 = vrot.slane %v2269_v19, 1  ;;  %v12009_v1 = vld [vmem:[#allocation18_spill] sm:$0xff] }
 0x142   : > { %v1349_v18 = vpop.permute.xlu0 %1348  ;;  %v1456_v14 = vsel %vm1450_vm1, %v1439_v48, %v8729_v0  ;;  %v8917_v0 = vld [vmem:[#allocation2 + $0x98] sm:$0xf]  ;;  %v3074_v55 = vor.u32 %v3073_v50, %v3069_v31  ;;  %v3078_v31 = vrot.slane %v3076_v8, 1 }
 0x143   : > { %3019 = vrot.lane.b32.xlu1 %v3006_v23, %s7585_s28  ;;  %v1486_v58 = vsel %vm1484_vm4, %v1469_v3, %v1349_v18  ;;  %v1372_v23 = vsel %vm1364_vm12, %v12003_v22, %v12002_v62  ;;  %v1473_v56 = vsel %vm1467_vm2, %v1456_v14, %v8796_v34  ;;  %v12006_v3 = vld [vmem:[#allocation16_spill] sm:$0xff]  ;;  %v12007_v18 = vld [vmem:[#allocation11_spill] sm:$0xff]  ;;  %v8935_v14 = vcombine.low %v8915_v41, %v8917_v0 }
 0x144   : > { %2225 = vrot.lane.b32.xlu0 %v2212_v51, %s7589_s7  ;;  %7246 = vmatprep.mubr.msk.bf16.mxu0 %vm1528_vm5, %v1486_v58  ;;  %v12005_v51 = vld [vmem:[#allocation7_spill] sm:$0xff]  ;;  %v1390_v34 = vsel %vm1382_vm13, %v1372_v23, %v12006_v3  ;;  %v2267_v39 = vor.u32 %v2265_v54, %v12007_v18  ;;  %v12008_v58 = vld [vmem:[#allocation30_spill] sm:$0xff]  ;;  %v918_v23 = vrot.slane %v8758_v6, 4  ;;  %v2275_v50 = vor.u32 %v2273_v47, %v2271_v12 }
 0x145   : > { %v1351_v63 = vpop.permute.xlu1 %1350  ;;  %v1374_v9 = vsel %vm1364_vm12, %v12005_v51, %v12004_v4  ;;  %v1407_v48 = vsel %vm1399_vm14, %v1390_v34, %v12008_v58  ;;  %v926_v4 = vld [vmem:[#allocation2 + $0xc8] sm:$0x1]  ;;  %v12012_v51 = vld [vmem:[#allocation37_spill] sm:$0xff]  ;;  %v8948_v6 = vrot.slane %v2277_v45, 1  ;;  %v3084_v18 = vshll.u32 %v8935_v14, 16 }
 0x146   : > { %v1488_v33 = vsel %vm1484_vm4, %v1471_v26, %v1351_v63  ;;  %v1353_v13 = vpop.permute.xlu0 %1352  ;;  %v1392_v62 = vsel %vm1382_vm13, %v1374_v9, %v12009_v1  ;;  %v12011_v63 = vld [vmem:[#allocation36_spill] sm:$0xff]  ;;  %v2272_v47 = vsel %vm997_vm10, %v2267_v39, %v2271_v12  ;;  %v2315_v1 = vrot.slane %v8820_v5, 1 }
 0x147   : > { %2249 = vrot.lane.b32.xlu1 %v8271_v7, %s7590_s8  ;;  %7247 = vmatmul.mubr.msk.bf16.vlgmr.msra.gmra.mrb[0].mxu0 %vm1528_vm5, %v1488_v33  ;;  %v1490_v40 = vsel %vm1484_vm4, %v1473_v56, %v1353_v13  ;;  %v1424_v54 = vsel %vm1416_vm15, %v1407_v48, %v12011_v63  ;;  %v927_v33 = vsel %vm7883_vm8, %v918_v23, %v926_v4  ;;  %v12014_v45 = vld [vmem:[#allocation8_spill] sm:$0xff]  ;;  %v12015_v23 = vld [vmem:[#allocation25_spill] sm:$0xff]  ;;  %v8995_v4 = vld [vmem:[#allocation2 + $0x9c] sm:$0xf] }
 0x148   : > { %3021 = vrot.lane.b32.xlu0 %v3008_v42, %s7585_s28  ;;  %7250 = vmatprep.mubr.msk.bf16.mxu0 %vm1528_vm5, %v1490_v40  ;;  %v12010_v42 = vld [vmem:[#allocation31_spill] sm:$0xff]  ;;  %v1441_v56 = vsel %vm1433_vm0, %v1424_v54, %v8689_v61  ;;  %v3080_v40 = vshrl.u32 %v8873_v29, 16  ;;  %928 = vst [vmem:[#allocation2 + $0xc8] sm:$0x1] %v927_v33  ;;  %v3079_v48 = vsel %vm997_vm10, %v3074_v55, %v3078_v31  ;;  %v12019_v54 = vld [vmem:[#allocation32_spill] sm:$0xff]  ;;  %v12020_v33 = vld [vmem:[#allocation33_spill] sm:$0xff] }
 0x149   : > { %v1355_v22 = vpop.permute.xlu1 %1354  ;;  %v1409_v26 = vsel %vm1399_vm14, %v1392_v62, %v12010_v42  ;;  %v1458_v8 = vsel %vm1450_vm1, %v1441_v56, %v8737_v11  ;;  %v2875_v61 = vld [vmem:[#allocation2 + $0x84] sm:$0xe] }
 0x14a   : > { %v1357_v19 = vpop.permute.xlu0 %1356  ;;  %v1426_v9 = vsel %vm1416_vm15, %v1409_v26, %v12012_v51  ;;  %v12017_v42 = vld [vmem:[#allocation19_spill] sm:$0xff]  ;;  %v12018_v26 = vld [vmem:[#allocation28_spill] sm:$0xff]  ;;  %v8999_v51 = vcombine.low %v8847_v53, %v8915_v41 }
 0x14b   : > { %3049 = vrot.lane.b32.xlu1 %v8828_v52, %s7587_s30  ;;  %v1443_v13 = vsel %vm1433_vm0, %v1426_v9, %v8692_v57  ;;  %v12013_v52 = vld [vmem:[#allocation27_spill] sm:$0xff]  ;;  %v1475_v57 = vsel %vm1467_vm2, %v1458_v8, %v8804_v43  ;;  %v6853_v43 = vcombine.low %v2875_v61, %v8765_v30  ;;  %v7568_v9 = vld [vmem:[#allocation2 + $0x38] sm:$0xf]  ;;  %v12022_v61 = vrot.slane %v8271_v7, 1 }
 0x14c   : > { %2251 = vrot.lane.b32.xlu0 %v8820_v5, %s7590_s8  ;;  %v1376_v3 = vsel %vm1364_vm12, %v12014_v45, %v12013_v52  ;;  %v1460_v34 = vsel %vm1450_vm1, %v1443_v13, %v8745_v36  ;;  %v1492_v12 = vsel %vm1484_vm4, %v1475_v57, %v1355_v22  ;;  %v2280_v36 = vsel %vm997_vm10, %v2275_v50, %v8948_v6  ;;  %v12021_v13 = vld [vmem:[#allocation38_spill] sm:$0xff] }
 0x14d   : > { %v1359_v11 = vpop.permute.xlu1 %1358  ;;  %v1477_v39 = vsel %vm1467_vm2, %v1460_v34, %v8812_v10  ;;  %v12016_v10 = vld [vmem:[#allocation9_spill] sm:$0xff]  ;;  %v1394_v55 = vsel %vm1382_vm13, %v1376_v3, %v12017_v42  ;;  %v3082_v5 = vor.u32 %v3080_v40, %v3078_v31  ;;  %v8993_v50 = vrot.slane %v3084_v18, 1  ;;  %v12025_v42 = vld [vmem:[#allocation34_spill] sm:$0xff] }
 0x14e   : > { %v1361_v58 = vpop.permute.xlu0 %1360  ;;  %v1494_v62 = vsel %vm1484_vm4, %v1477_v39, %v1357_v19  ;;  %v1378_v22 = vsel %vm1364_vm12, %v12016_v10, %v12015_v23  ;;  %v1411_v19 = vsel %vm1399_vm14, %v1394_v55, %v12019_v54  ;;  %v6735_v56 = vcombine.low %v7568_v9, %v7568_v9  ;;  %v9036_v39 = vld [vmem:[#allocation2 + $0xa4] sm:$0xf]  ;;  %v12024_v10 = vld [vmem:[#allocation29_spill] sm:$0xff] }
 0x14f   : > { %2300 = vrot.lane.b32.xlu1 %v2272_v47, %s7591_s13  ;;  %7251 = vmatmul.mubr.msk.bf16.gmra.mrb[4].mxu0 %vm1528_vm5, %v1492_v12  ;;  %v1396_v63 = vsel %vm1382_vm13, %v1378_v22, %v12018_v26  ;;  %v1428_v8 = vsel %vm1416_vm15, %v1411_v19, %v12021_v13  ;;  %v2316_v40 = vsel %vm1080_vm9, %v12022_v61, %v2315_v1  ;;  %v3150_v45 = vrot.slane %v6853_v43, 1  ;;  %v7471_v19 = vld [vmem:[%s11895_s1 + $0x8] sm:$0xff]   ;;  %v12026_v9 = vld [vmem:[#allocation39_spill] sm:$0xff] }
 0x150   : > { %7254 = vmatprep.mubr.msk.bf16.mxu0 %vm1528_vm5, %v1494_v62  ;;  %3051 = vrot.lane.b32.xlu0 %v8873_v29, %s7587_s30  ;;  %v1413_v31 = vsel %vm1399_vm14, %v1396_v63, %v12020_v33  ;;  %v1445_v53 = vsel %vm1433_vm0, %v1428_v8, %v8702_v59  ;;  %v3151_v3 = vrot.slane %v8873_v29, 1  ;;  %v2317_v7 = vrot.slane %v8891_v32, 1  ;;  %v12023_v62 = vld [vmem:[#allocation20_spill] sm:$0xff] }
 0x151   : > { %v8991_v30 = vpop.permute.xlu1 %1362  ;;  %v1430_v52 = vsel %vm1416_vm15, %v1413_v31, %v8656_v60  ;;  %v1462_v57 = vsel %vm1450_vm1, %v1445_v53, %v8760_v17  ;;  %v9024_v60 = vcombine.low %v8917_v0, %v8995_v4  ;;  %v9034_v17 = vld [vmem:[#allocation2 + $0xa0] sm:$0xf]  ;;  %v2946_v12 = vshll.u32 %v8999_v51, 16  ;;  %v2880_v31 = vld [vmem:[#allocation2 + $0x90] sm:$0xe]  ;;  %v12027_v13 = vld [vmem:[#allocation40_spill] sm:$0xff] }
 0x152   : > { %v9005_v47 = vpop.permute.xlu0 %2035  ;;  %v1447_v34 = vsel %vm1433_vm0, %v1430_v52, %v8705_v37  ;;  %v1479_v29 = vsel %vm1467_vm2, %v1462_v57, %v8835_v25  ;;  %v3087_v37 = vsel %vm997_vm10, %v3082_v5, %v8993_v50  ;;  %v7468_v0 = vld [vmem:[%s11895_s1] sm:$0xff]   ;;  %v3153_v23 = vrot.slane %v8935_v14, 1 }
 0x153   : > { %3131 = vrot.lane.b32.xlu1 %v3079_v48, %s7588_s6  ;;  %v1464_v59 = vsel %vm1450_vm1, %v1447_v34, %v8763_v44  ;;  %v1496_v25 = vsel %vm1484_vm4, %v1479_v29, %v1359_v11  ;;  %v9060_v11 = vcombine.low %v9034_v17, %v9036_v39  ;;  %v2318_v26 = vsel %vm1080_vm9, %v2315_v1, %v2317_v7 }
 0x154   : > { %2302 = vrot.lane.b32.xlu0 %v2280_v36, %s7591_s13  ;;  %v1481_v44 = vsel %vm1467_vm2, %v1464_v59, %v8844_v49  ;;  %v1381_v36 = vsel %vm1364_vm12, %v6735_v56, %v12023_v62  ;;  %v3152_v49 = vsel %vm1080_vm9, %v3150_v45, %v3151_v3  ;;  %v2948_v63 = vrot.slane %v2946_v12, 1  ;;  %7284 = vmatprep.subr.bf16.mxu0 %v7468_v0 }
 0x155   : > { %v9030_v18 = vpop.permute.xlu1 %2037  ;;  %v1498_v43 = vsel %vm1484_vm4, %v1481_v44, %v1361_v58  ;;  %v1398_v22 = vsel %vm1382_vm13, %v1381_v36, %v12024_v10  ;;  %v2954_v58 = vshll.u32 %v9024_v60, 16  ;;  %v2950_v54 = vshrl.u32 %v8999_v51, 16  ;;  %7285 = vmatpush3.bf16.msra.mxu0 %v7468_v0 }
 0x156   : > { %v9045_v48 = vpop.permute.xlu0 %2039  ;;  %v1415_v55 = vsel %vm1399_vm14, %v1398_v22, %v12025_v42  ;;  %v3154_v1 = vsel %vm1080_vm9, %v3151_v3, %v3153_v23  ;;  %7286 = vmatprep.subr.bf16.mxu0 %v7471_v19  ;;  %v2958_v52 = vshrl.u32 %v9024_v60, 16  ;;  %v2962_v53 = vshll.u32 %v9060_v11, 16  ;;  %v7474_v3 = vld [vmem:[%s11895_s1 + $0x10] ss:$0 sps:$4 sm:$0x33]  }
 0x157   : > { %2329 = vrot.lane.b32.xlu1 %v2316_v40, %s7592_s16  ;;  %7255 = vmatmul.mubr.msk.bf16.gmra.mrb[8].mxu0 %vm1528_vm5, %v1496_v25  ;;  %v1432_v56 = vsel %vm1416_vm15, %v1415_v55, %v12026_v9  ;;  %v2956_v40 = vrot.slane %v2954_v58, 1  ;;  %v2952_v57 = vor.u32 %v2950_v54, %v2948_v63  ;;  %v6859_v59 = vcombine.low %v2880_v31, %v8915_v41  ;;  %v12028_v42 = vld [vmem:[#allocation21_spill] sm:$0xff]  ;;  %v12029_v9 = vld [vmem:[#allocation26_spill] sm:$0xff]  ;;  %v12030_v31 = vld [vmem:[#allocation23_spill] sm:$0xff] }
 0x158   : > { %7258 = vmatprep.mubr.msk.bf16.mxu0 %vm1528_vm5, %v1498_v43  ;;  %3133 = vrot.lane.b32.xlu0 %v3087_v37, %s7588_s6  ;;  %v1449_v8 = vsel %vm1433_vm0, %v1432_v56, %v12027_v13  ;;  %v9106_v37 = vrot.slane %v2962_v53, 1  ;;  %v3011_v0 = vrot.slane %v9024_v60, 1  ;;  %v2942_v25 = vshrl.u32 %v8781_v28, 16  ;;  %v1929_v53 = vld [vmem:[#allocation2 + $0x90] sm:$0x1] }
 0x159   : > { %v9065_v5 = vpop.permute.xlu1 %2041  ;;  %v1466_v61 = vsel %vm1450_vm1, %v1449_v8, %v8776_v46  ;;  %7287 = vmatpush3.bf16.msra.mxu0 %v7471_v19  ;;  %v2960_v41 = vor.u32 %v2958_v52, %v2956_v40  ;;  %v3261_v44 = vrot.slane %v6859_v59, 1  ;;  %v3013_v58 = vrot.slane %v9060_v11, 1  ;;  %v1928_v52 = vld [vmem:[#allocation2 + $0x8c] sm:$0xf] }
 0x15a   : > { %v9076_v33 = vpop.permute.xlu0 %2043  ;;  %v1483_v45 = vsel %vm1467_vm2, %v1466_v61, %v8869_v16  ;;  %v3460_v16 = vsel %vm1545_vm11, %v7474_v3, 0  ;;  %7394 = vmatprep.subr.msk.bf16.mxu0 %vm1545_vm11, %v7474_v3  ;;  %v2944_v22 = vor.u32 %v2942_v25, %v8807_v35  ;;  %v2178_v55 = vshrl.u32 %v12028_v42, 16 }
 0x15b   : > { %3165 = vrot.lane.b32.xlu1 %v3152_v49, %s7589_s7  ;;  %v1500_v46 = vsel %vm1484_vm4, %v1483_v45, %v8991_v30  ;;  %v2957_v30 = vsel %vm997_vm10, %v2952_v57, %v2956_v40  ;;  %v9120_v36 = vsel %vm997_vm10, %v2960_v41, %v9106_v37  ;;  %v3262_v10 = vsel %vm1080_vm9, %v3261_v44, %v3011_v0  ;;  %v2866_v44 = vld [vmem:[#allocation2 + $0xa8] sm:$0xf] }
 0x15c   : > { %2331 = vrot.lane.b32.xlu0 %v2318_v26, %s7592_s16  ;;  %v2949_v54 = vsel %vm997_vm10, %v2944_v22, %v2948_v63  ;;  %v9144_v35 = vsel %vm1080_vm9, %v3011_v0, %v3013_v58  ;;  %v2213_v56 = vrot.slane %v12028_v42, 1  ;;  %v2180_v13 = vor.u32 %v2178_v55, %v12030_v31 }
 0x15d   : > { %v9091_v34 = vpop.permute.xlu1 %2045  ;;  %7289 = vmatpush3.bf16.msra.mxu0 %v3460_v16  ;;  %v3009_v61 = vrot.slane %v8999_v51, 1  ;;  %v9169_v38 = vcombine.low %v1928_v52, %v1929_v53  ;;  %v2281_v3 = vshrl.u32 %v8891_v32, 16  ;;  %v9194_v55 = vcombine.low %v9036_v39, %v2866_v44 }
 0x15e   : > { %v9099_v29 = vpop.permute.xlu0 %2047  ;;  %v2214_v63 = vsel %vm1080_vm9, %v2211_v15, %v2213_v56 }
 0x15f   : > { %3167 = vrot.lane.b32.xlu1 %v3154_v1, %s7589_s7  ;;  %7259 = vmatmul.mubr.msk.bf16.gmra.mrb[12].mxu0 %vm1528_vm5, %v1500_v46  ;;  %v3010_v57 = vsel %vm1080_vm9, %v3007_v24, %v3009_v61  ;;  %v6847_v46 = vcombine.low %v8995_v4, %v9034_v17  ;;  %v2285_v16 = vshll.u32 %v9169_v38, 16  ;;  %v3012_v41 = vsel %vm1080_vm9, %v3009_v61, %v3011_v0 }
 0x160   : > { %3191 = vrot.lane.b32.xlu0 %v8999_v51, %s7590_s8  ;;  %v2283_v25 = vor.u32 %v2281_v3, %v8948_v6  ;;  %v6804_v4 = vcombine.low %v1928_v52, %v1928_v52  ;;  %v3088_v17 = vshrl.u32 %v8935_v14, 16  ;;  %v3100_v39 = vshll.u32 %v9194_v55, 16 }
 0x161   : > { %v9109_v12 = vpop.permute.xlu1 %2049  ;;  %v3092_v22 = vshll.u32 %v6847_v46, 16  ;;  %v2319_v52 = vrot.slane %v9169_v38, 1 }
 0x162   : > { %v9114_v62 = vpop.permute.xlu0 %2069  ;;  %v3090_v6 = vor.u32 %v3088_v17, %v8993_v50  ;;  %v9211_v3 = vrot.slane %v3100_v39, 1 }
 0x163   : > { %3193 = vrot.lane.b32.xlu1 %v9024_v60, %s7590_s8 }
 0x164   : > { %3242 = vrot.lane.b32.xlu0 %v2957_v30, %s7591_s13 }
 0x165   : > { %v9123_v43 = vpop.permute.xlu1 %2071 }
 0x166   : > { %v9127_v49 = vpop.permute.xlu0 %2073 }
 0x167   : > { %3244 = vrot.lane.b32.xlu1 %v9120_v36, %s7591_s13 }
 0x168   : > { %3271 = vrot.lane.b32.xlu0 %v3262_v10, %s7592_s16  ;;  %v2287_v10 = vrot.slane %v2285_v16, 1  ;;  %v2867_v16 = vld [vmem:[#allocation2 + $0xac] sm:$0xf] }
 0x169   : > { %v9134_v26 = vpop.permute.xlu1 %2075  ;;  %v9220_v17 = vcombine.low %v2866_v44, %v2867_v16 }
 0x16a   : > { %v9137_v19 = vpop.permute.xlu0 %2077 }
 0x16b   : > { %2193 = vrot.lane.b32.xlu1 %v12029_v9, %s7588_s6  ;;  %v3094_v9 = vrot.slane %v3092_v22, 1  ;;  %v9226_v22 = vld [vmem:[#allocation2 + $0xb0] sm:$0xf]  ;;  %v2974_v39 = vshrl.u32 %v9220_v17, 16 }
 0x16c   : > { %2989 = vrot.lane.b32.xlu0 %v2949_v54, %s7586_s29  ;;  %v2288_v54 = vsel %vm997_vm10, %v2283_v25, %v2287_v10  ;;  %v2320_v25 = vsel %vm1080_vm9, %v2317_v7, %v2319_v52  ;;  %v11920_v7 = vrot.slane %v9194_v55, 1 }
 0x16d   : > { %v9149_v8 = vpop.permute.xlu1 %2079  ;;  %v3095_v61 = vsel %vm997_vm10, %v3090_v6, %v3094_v9 }
 0x16e   : > { %v9151_v1 = vpop.permute.xlu0 %2081 }
 0x16f   : > { %3273 = vrot.lane.b32.xlu1 %v9144_v35, %s7592_s16 }
 0x170   : > { %2195 = vrot.lane.b32.xlu0 %v2180_v13, %s7588_s6  ;;  %v3096_v13 = vshrl.u32 %v6847_v46, 16 }
 0x171   : > { %v9160_v40 = vpop.permute.xlu1 %2083 }
 0x172   : > { %v9162_v45 = vpop.permute.xlu0 %2099  ;;  %v3098_v50 = vor.u32 %v3096_v13, %v3094_v9 }
 0x173   : > { %2227 = vrot.lane.b32.xlu1 %v2214_v63, %s7589_s7 }
 0x174   : > { %2991 = vrot.lane.b32.xlu0 %v2957_v30, %s7586_s29 }
 0x175   : > { %v9171_v15 = vpop.permute.xlu1 %2101 }
 0x176   : > { %v9173_v59 = vpop.permute.xlu0 %2103 }
 0x177   : > { %3023 = vrot.lane.b32.xlu1 %v3010_v57, %s7585_s28 }
 0x178   : > { %2229 = vrot.lane.b32.xlu0 %v2213_v56, %s7589_s7  ;;  %v2289_v56 = vshrl.u32 %v9169_v38, 16 }
 0x179   : > { %v9181_v24 = vpop.permute.xlu1 %2105 }
 0x17a   : > { %v9184_v30 = vpop.permute.xlu0 %2107  ;;  %v2291_v53 = vor.u32 %v2289_v56, %v2287_v10  ;;  %v3103_v10 = vsel %vm997_vm10, %v3098_v50, %v9211_v3  ;;  %v2966_v56 = vshrl.u32 %v9060_v11, 16 }
 0x17b   : > { %2253 = vrot.lane.b32.xlu1 %v8891_v32, %s7590_s8 }
 0x17c   : > { %3025 = vrot.lane.b32.xlu0 %v3012_v41, %s7585_s28  ;;  %v2968_v50 = vor.u32 %v2966_v56, %v9106_v37  ;;  %v9268_v56 = vrot.slane %v9220_v17, 1 }
 0x17d   : > { %v9191_v42 = vpop.permute.xlu1 %2109 }
 0x17e   : > { %v9196_v0 = vpop.permute.xlu0 %2111 }
 0x17f   : > { %3053 = vrot.lane.b32.xlu1 %v8935_v14, %s7587_s30 }
 0x180   : > { %2255 = vrot.lane.b32.xlu0 %v6804_v4, %s7590_s8  ;;  %v3155_v4 = vrot.slane %v6847_v46, 1 }
 0x181   : > { %v9204_v31 = vpop.permute.xlu1 %2113 }
 0x182   : > { %v2182_v63 = vpop.permute.xlu0 %2181  ;;  %v3156_v32 = vsel %vm1080_vm9, %v3153_v23, %v3155_v4  ;;  %v3158_v14 = vsel %vm1080_vm9, %v3155_v4, %v11920_v7 }
 0x183   : > { %2304 = vrot.lane.b32.xlu1 %v2288_v54, %s7591_s13  ;;  %v9228_v54 = vld [vmem:[#allocation2 + $0xb4] sm:$0xf] }
 0x184   : > { %3055 = vrot.lane.b32.xlu0 %v6847_v46, %s7587_s30  ;;  %v2970_v46 = vshll.u32 %v9220_v17, 16  ;;  %v9241_v44 = vcombine.low %v9226_v22, %v9228_v54 }
 0x185   : > { %v2184_v57 = vpop.permute.xlu1 %2183 }
 0x186   : > { %v9213_v41 = vpop.permute.xlu0 %2185  ;;  %v2972_v23 = vrot.slane %v2970_v46, 1 }
 0x187   : > { %3135 = vrot.lane.b32.xlu1 %v3095_v61, %s7588_s6  ;;  %v3211_v61 = vshll.u32 %v9241_v44, 16 }
 0x188   : > { %2306 = vrot.lane.b32.xlu0 %v2291_v53, %s7591_s13  ;;  %v9260_v4 = vor.u32 %v2974_v39, %v2972_v23  ;;  %v2973_v37 = vsel %vm997_vm10, %v2968_v50, %v2972_v23 }
 0x189   : > { %v9222_v38 = vpop.permute.xlu1 %2187 }
 0x18a   : > { %v9230_v6 = vpop.permute.xlu0 %2189 }
 0x18b   : > { %2333 = vrot.lane.b32.xlu1 %v2320_v25, %s7592_s16 }
 0x18c   : > { %3137 = vrot.lane.b32.xlu0 %v3103_v10, %s7588_s6  ;;  %v12031_v10 = vld [vmem:[#allocation12_spill] sm:$0xff] }
 0x18d   : > { %v9243_v9 = vpop.permute.xlu1 %2191 }
 0x18e   : > { %v2216_v13 = vpop.permute.xlu0 %2215 }
 0x18f   : > { %3169 = vrot.lane.b32.xlu1 %v3156_v32, %s7589_s7  ;;  %v2338_v32 = vsel %vm1364_vm12, %v12031_v10, %v9005_v47  ;;  %v12032_v10 = vld [vmem:[#allocation13_spill] sm:$0xff] }
 0x190   : > { %2335 = vrot.lane.b32.xlu0 %v2319_v52, %s7592_s16  ;;  %v9262_v52 = vrot.slane %v3211_v61, 1  ;;  %v2355_v46 = vsel %vm1382_vm13, %v2338_v32, %v9114_v62  ;;  %v2340_v39 = vsel %vm1364_vm12, %v12032_v10, %v9030_v18  ;;  %v3016_v32 = vsel %vm1080_vm9, %v3013_v58, %v9268_v56 }
 0x191   : > { %v2218_v53 = vpop.permute.xlu1 %2217  ;;  %v2357_v62 = vsel %vm1382_vm13, %v2340_v39, %v9123_v43  ;;  %v3263_v43 = vrot.slane %v9241_v44, 1 }
 0x192   : > { %v2242_v25 = vpop.permute.xlu0 %2241  ;;  %v3214_v50 = vsel %vm997_vm10, %v9260_v4, %v9262_v52 }
 0x193   : > { %3171 = vrot.lane.b32.xlu1 %v3158_v14, %s7589_s7  ;;  %v2371_v14 = vsel %vm1399_vm14, %v2355_v46, %v9162_v45  ;;  %v2373_v45 = vsel %vm1399_vm14, %v2357_v62, %v9171_v15 }
 0x194   : > { %3195 = vrot.lane.b32.xlu0 %v9060_v11, %s7590_s8  ;;  %v2387_v61 = vsel %vm1416_vm15, %v2371_v14, %v2182_v63 }
 0x195   : > { %v2244_v7 = vpop.permute.xlu1 %2243  ;;  %v2403_v23 = vsel %vm1433_vm0, %v2387_v61, %v2216_v13  ;;  %v2389_v13 = vsel %vm1416_vm15, %v2373_v45, %v2184_v57 }
 0x196   : > { %v2293_v47 = vpop.permute.xlu0 %2292  ;;  %v2419_v18 = vsel %vm1450_vm1, %v2403_v23, %v2242_v25  ;;  %v2405_v10 = vsel %vm1433_vm0, %v2389_v13, %v2218_v53  ;;  %v9299_v25 = vcombine.low %v2867_v16, %v9226_v22  ;;  %v3264_v53 = vsel %vm1080_vm9, %v9268_v56, %v3263_v43 }
 0x197   : > { %3197 = vrot.lane.b32.xlu1 %v9220_v17, %s7590_s8  ;;  %v2435_v46 = vsel %vm1467_vm2, %v2419_v18, %v2293_v47  ;;  %v2421_v39 = vsel %vm1450_vm1, %v2405_v10, %v2244_v7  ;;  %v2872_v47 = vld [vmem:[#allocation2 + $0xb8] sm:$0xf] }
 0x198   : > { %3246 = vrot.lane.b32.xlu0 %v2973_v37, %s7591_s13  ;;  %v3108_v16 = vshll.u32 %v9299_v25, 16  ;;  %v9316_v7 = vcombine.low %v9228_v54, %v2872_v47 }
 0x199   : > { %v2295_v63 = vpop.permute.xlu1 %2294 }
 0x19a   : > { %v2322_v14 = vpop.permute.xlu0 %2321  ;;  %v2437_v58 = vsel %vm1467_vm2, %v2421_v39, %v2295_v63  ;;  %v3110_v18 = vrot.slane %v3108_v16, 1  ;;  %v3112_v63 = vshrl.u32 %v9299_v25, 16 }
 0x19b   : > { %3248 = vrot.lane.b32.xlu1 %v3214_v50, %s7591_s13  ;;  %v2451_v15 = vsel %vm1484_vm4, %v2435_v46, %v2322_v14  ;;  %v3104_v50 = vshrl.u32 %v9194_v55, 16  ;;  %v3116_v46 = vshll.u32 %v9316_v7, 16 }
 0x19c   : > { %3275 = vrot.lane.b32.xlu0 %v3016_v32, %s7592_s16  ;;  %7268 = vmatprep.mubr.msk.bf16.mxu1 %vm1528_vm5, %v2451_v15  ;;  %v9330_v15 = vld [vmem:[#allocation2 + $0xbc] sm:$0xf] }
 0x19d   : > { %v2324_v57 = vpop.permute.xlu1 %2323  ;;  %v3106_v10 = vor.u32 %v3104_v50, %v9211_v3 }
 0x19e   : > { %v2453_v61 = vsel %vm1484_vm4, %v2437_v58, %v2324_v57  ;;  %v2220_v62 = vpop.permute.xlu0 %2219  ;;  %v12034_v58 = vld [vmem:[#allocation14_spill] sm:$0xff]  ;;  %v3114_v57 = vor.u32 %v3112_v63, %v3110_v18 }
 0x19f   : > { %2993 = vrot.lane.b32.xlu1 %v9120_v36, %s7586_s29  ;;  %7269 = vmatmul.mubr.msk.bf16.vlgmr.msra.gmra.mrb[0].mxu1 %vm1528_vm5, %v2453_v61  ;;  %v12033_v36 = vld [vmem:[#allocation15_spill] sm:$0xff]  ;;  %v3111_v61 = vsel %vm997_vm10, %v3106_v10, %v3110_v18 }
 0x1a0   : > { %3277 = vrot.lane.b32.xlu0 %v3264_v53, %s7592_s16  ;;  %v2342_v13 = vsel %vm1364_vm12, %v12033_v36, %v9045_v48  ;;  %v2344_v48 = vsel %vm1364_vm12, %v12034_v58, %v9065_v5  ;;  %v9348_v53 = vcombine.low %v2872_v47, %v9330_v15  ;;  %v3161_v47 = vrot.slane %v9316_v7, 1  ;;  %v9369_v36 = vld [vmem:[#allocation2 + $0xc0] sm:$0xff]  }
 0x1a1   : > { %v2222_v23 = vpop.permute.xlu1 %2221  ;;  %v2359_v54 = vsel %vm1382_vm13, %v2342_v13, %v9127_v49  ;;  %v2361_v49 = vsel %vm1382_vm13, %v2344_v48, %v9134_v26  ;;  %v3159_v26 = vrot.slane %v9299_v25, 1  ;;  %v12035_v13 = vrot.slane %v9194_v55, 1 }
 0x1a2   : > { %v2246_v45 = vpop.permute.xlu0 %2245  ;;  %v2377_v5 = vsel %vm1399_vm14, %v2361_v49, %v9181_v24  ;;  %v3219_v18 = vshll.u32 %v9348_v53, 16  ;;  %v3223_v58 = vshrl.u32 %v9348_v53, 16  ;;  %v3227_v48 = vshll.u32 %v9369_v36, 16 }
 0x1a3   : > { %2995 = vrot.lane.b32.xlu1 %v2973_v37, %s7586_s29  ;;  %v2375_v37 = vsel %vm1399_vm14, %v2359_v54, %v9173_v59  ;;  %v9345_v59 = vrot.slane %v3116_v46, 1  ;;  %v3160_v46 = vsel %vm1080_vm9, %v12035_v13, %v3159_v26  ;;  %v3215_v54 = vshrl.u32 %v9241_v44, 16 }
 0x1a4   : > { %3027 = vrot.lane.b32.xlu0 %v9144_v35, %s7585_s28  ;;  %v2391_v35 = vsel %vm1416_vm15, %v2375_v37, %v9213_v41 }
 0x1a5   : > { %v2248_v14 = vpop.permute.xlu1 %2247  ;;  %v2407_v3 = vsel %vm1433_vm0, %v2391_v35, %v2220_v62  ;;  %v2393_v62 = vsel %vm1416_vm15, %v2377_v5, %v9222_v38  ;;  %v3119_v38 = vsel %vm997_vm10, %v3114_v57, %v9345_v59  ;;  %v3217_v49 = vor.u32 %v3215_v54, %v9262_v52  ;;  %v2874_v52 = vld [vmem:[#allocation2 + $0xc0] sm:$0x1] }
 0x1a6   : > { %v2297_v39 = vpop.permute.xlu0 %2296  ;;  %v2423_v41 = vsel %vm1450_vm1, %v2407_v3, %v2246_v45  ;;  %v2409_v63 = vsel %vm1433_vm0, %v2393_v62, %v2222_v23 }
 0x1a7   : > { %3029 = vrot.lane.b32.xlu1 %v3016_v32, %s7585_s28  ;;  %v2439_v16 = vsel %vm1467_vm2, %v2423_v41, %v2297_v39  ;;  %v2425_v45 = vsel %vm1450_vm1, %v2409_v63, %v2248_v14  ;;  %v2869_v14 = vld [vmem:[#allocation2 + $0xb4] sm:$0x1]  ;;  %v3162_v39 = vsel %vm1080_vm9, %v3159_v26, %v3161_v47  ;;  %v9398_v41 = vrot.slane %v3227_v48, 1 }
 0x1a8   : > { %3057 = vrot.lane.b32.xlu0 %v9194_v55, %s7587_s30  ;;  %v3221_v55 = vrot.slane %v3219_v18, 1  ;;  %v9388_v35 = vcombine.low %v9226_v22, %v2869_v14  ;;  %v3265_v26 = vrot.slane %v9348_v53, 1  ;;  %v9419_v18 = vcombine.low %v9330_v15, %v2874_v52 }
 0x1a9   : > { %v2299_v32 = vpop.permute.xlu1 %2298 }
 0x1aa   : > { %v2326_v50 = vpop.permute.xlu0 %2325  ;;  %v2441_v23 = vsel %vm1467_vm2, %v2425_v45, %v2299_v32  ;;  %v3225_v5 = vor.u32 %v3223_v58, %v3221_v55  ;;  %v2978_v32 = vshll.u32 %v9388_v35, 16  ;;  %v3222_v22 = vsel %vm997_vm10, %v3217_v49, %v3221_v55 }
 0x1ab   : > { %3059 = vrot.lane.b32.xlu1 %v9299_v25, %s7587_s30  ;;  %v2455_v24 = vsel %vm1484_vm4, %v2439_v16, %v2326_v50  ;;  %v3267_v45 = vrot.slane %v9369_v36, 1 }
 0x1ac   : > { %3139 = vrot.lane.b32.xlu0 %v3111_v61, %s7588_s6  ;;  %7272 = vmatprep.mubr.msk.bf16.mxu1 %vm1528_vm5, %v2455_v24  ;;  %v3230_v16 = vsel %vm997_vm10, %v3225_v5, %v9398_v41  ;;  %v2980_v50 = vrot.slane %v2978_v32, 1  ;;  %v3266_v24 = vsel %vm1080_vm9, %v3263_v43, %v3265_v26  ;;  %v12037_v32 = vld [vmem:[#allocation17_spill] sm:$0xff] }
 0x1ad   : > { %v2328_v25 = vpop.permute.xlu1 %2327  ;;  %v3268_v43 = vsel %vm1080_vm9, %v3265_v26, %v3267_v45 }
 0x1ae   : > { %v2457_v10 = vsel %vm1484_vm4, %v2441_v23, %v2328_v25  ;;  %v9377_v37 = vpop.permute.xlu0 %2985  ;;  %v7593_v23 = vmov 0.0|0.0  }
 0x1af   : > { %3141 = vrot.lane.b32.xlu1 %v3119_v38, %s7588_s6  ;;  %7273 = vmatmul.mubr.msk.bf16.gmra.mrb[4].mxu1 %vm1528_vm5, %v2457_v10  ;;  %v6780_v25 = vcombine.low %v7593_v23, %v7593_v23 }
 0x1b0   : > { %3173 = vrot.lane.b32.xlu0 %v3160_v46, %s7589_s7  ;;  %v3017_v46 = vrot.slane %v9388_v35, 1 }
 0x1b1   : > { %v9390_v57 = vpop.permute.xlu1 %2223  ;;  %v1860_v54 = vshrl.u32 %v6780_v25, 16  ;;  %v1863_v58 = vshll.u32 %v6780_v25, 16 }
 0x1b2   : > { %v9393_v3 = vpop.permute.xlu0 %2987  ;;  %v3018_v49 = vsel %vm1080_vm9, %v9268_v56, %v3017_v46 }
 0x1b3   : > { %3175 = vrot.lane.b32.xlu1 %v3162_v39, %s7589_s7  ;;  %v3124_v39 = vshll.u32 %v9419_v18, 16  ;;  %v1862_v55 = vrot.slane %v1860_v54, 7 }
 0x1b4   : > { %3199 = vrot.lane.b32.xlu0 %v9241_v44, %s7590_s8  ;;  %v2981_v44 = vsel %vm997_vm10, %v9260_v4, %v2980_v50  ;;  %v3120_v4 = vshrl.u32 %v9316_v7, 16 }
 0x1b5   : > { %v9401_v61 = vpop.permute.xlu1 %3019  ;;  %v9438_v5 = vor.u32 %v1863_v58, %v1862_v55  ;;  %v3126_v26 = vrot.slane %v3124_v39, 1  ;;  %v9446_v52 = vrot.slane %v1862_v55, 4  ;;  %v3807_v58 = vld [vmem:[#allocation2 + $0xc0] sm:$0x1] }
 0x1b6   : > { %v9405_v62 = vpop.permute.xlu0 %2225  ;;  %v3122_v56 = vor.u32 %v3120_v4, %v9345_v59  ;;  %v2879_v59 = vld [vmem:[#allocation2 + $0xcc] sm:$0x1] }
 0x1b7   : > { %3201 = vrot.lane.b32.xlu1 %v9348_v53, %s7590_s8  ;;  %v2982_v53 = vshrl.u32 %v9388_v35, 16  ;;  %12036 = vst [vmem:[#allocation35_spill] sm:$0xff] %v9438_v5 }
 0x1b8   : > { %3250 = vrot.lane.b32.xlu0 %v3222_v22, %s7591_s13  ;;  %v2346_v22 = vsel %vm1364_vm12, %v12037_v32, %v9076_v33  ;;  %v3163_v32 = vrot.slane %v9419_v18, 1 }
 0x1b9   : > { %v2250_v63 = vpop.permute.xlu1 %2249  ;;  %v2984_v10 = vor.u32 %v2982_v53, %v2980_v50  ;;  %v3804_v50 = vld [vmem:[#allocation2 + $0xb4] sm:$0xf]  ;;  %v4113_v53 = vld [vmem:[#allocation3 + $0xcc] sm:$0x1] }
 0x1ba   : > { %v9416_v38 = vpop.permute.xlu0 %3021  ;;  %v4114_v25 = vsel %vm7883_vm8, %v9446_v52, %v4113_v53  ;;  %v3231_v53 = vshrl.u32 %v9369_v36, 16 }
 0x1bb   : > { %3252 = vrot.lane.b32.xlu1 %v3230_v16, %s7591_s13  ;;  %v2363_v16 = vsel %vm1382_vm13, %v2346_v22, %v9137_v19  ;;  %4115 = vst [vmem:[#allocation3 + $0xcc] sm:$0x1] %v4114_v25 }
 0x1bc   : > { %3279 = vrot.lane.b32.xlu0 %v3266_v24, %s7592_s16  ;;  %v9452_v24 = vld [vmem:[#allocation2 + $0xb8] sm:$0xf]  ;;  %v2379_v23 = vsel %vm1399_vm14, %v2363_v16, %v9184_v30  ;;  %v6851_v30 = vcombine.low %v9330_v15, %v9330_v15 }
 0x1bd   : > { %v9426_v13 = vpop.permute.xlu1 %3049  ;;  %v2395_v19 = vsel %vm1416_vm15, %v2379_v23, %v9230_v6  ;;  %v9472_v39 = vcombine.low %v3804_v50, %v9452_v24  ;;  %v2348_v6 = vsel %vm1364_vm12, %v8437_v2, %v9091_v34 }
 0x1be   : > { %v2252_v14 = vpop.permute.xlu0 %2251  ;;  %v2411_v54 = vsel %vm1433_vm0, %v2395_v19, %v9390_v57  ;;  %v3127_v57 = vsel %vm997_vm10, %v3122_v56, %v3126_v26  ;;  %v2365_v15 = vsel %vm1382_vm13, %v2348_v6, %v9149_v8 }
 0x1bf   : > { %2997 = vrot.lane.b32.xlu1 %v2981_v44, %s7586_s29  ;;  %v2427_v55 = vsel %vm1450_vm1, %v2411_v54, %v2250_v63  ;;  %v2381_v34 = vsel %vm1399_vm14, %v2365_v15, %v9191_v42  ;;  %v3831_v19 = vshrl.u32 %v9472_v39, 16 }
 0x1c0   : > { %3281 = vrot.lane.b32.xlu0 %v3268_v43, %s7592_s16  ;;  %v9463_v43 = vld [vmem:[#allocation2 + $0xc8] sm:$0xf]  ;;  %v2397_v16 = vsel %vm1416_vm15, %v2381_v34, %v9243_v9  ;;  %v3164_v9 = vsel %vm1080_vm9, %v3161_v47, %v3163_v32  ;;  %v3233_v47 = vor.u32 %v3231_v53, %v9398_v41 }
 0x1c1   : > { %v2301_v48 = vpop.permute.xlu1 %2300  ;;  %v9488_v2 = vcombine.low %v9463_v43, %v2879_v59  ;;  %v2413_v42 = vsel %vm1433_vm0, %v2397_v16, %v9405_v62 }
 0x1c2   : > { %v9440_v35 = vpop.permute.xlu0 %3051  ;;  %v2443_v4 = vsel %vm1467_vm2, %v2427_v55, %v2301_v48  ;;  %v3833_v48 = vshll.u32 %v9472_v39, 16  ;;  %v2429_v56 = vsel %vm1450_vm1, %v2413_v42, %v2252_v14  ;;  %v3288_v55 = vsel %vm1364_vm12, %v8743_v27, %v9377_v37 }
 0x1c3   : > { %2999 = vrot.lane.b32.xlu1 %v2984_v10, %s7586_s29  ;;  %v3128_v10 = vshrl.u32 %v9419_v18, 16  ;;  %v3305_v41 = vsel %vm1382_vm13, %v3288_v55, %v9401_v61  ;;  %v3269_v27 = vrot.slane %v9488_v2, 1  ;;  %v3814_v55 = vld [vmem:[#allocation2 + $0xcc] sm:$0xf] }
 0x1c4   : > { %3031 = vrot.lane.b32.xlu0 %v3018_v49, %s7585_s28  ;;  %v3835_v59 = vrot.slane %v3833_v48, 1 }
 0x1c5   : > { %v9456_v33 = vpop.permute.xlu1 %3131  ;;  %v3130_v8 = vor.u32 %v3128_v10, %v3126_v26  ;;  %v3235_v26 = vshll.u32 %v9488_v2, 16 }
 0x1c6   : > { %v2303_v44 = vpop.permute.xlu0 %2302  ;;  %v3836_v10 = vor.u32 %v3835_v59, %v3831_v19 }
 0x1c7   : > { %3033 = vrot.lane.b32.xlu1 %v3017_v46, %s7585_s28  ;;  %v9481_v46 = vld [vmem:[#allocation2 + $0xbc] sm:$0xf]  ;;  %v2445_v23 = vsel %vm1467_vm2, %v2429_v56, %v2303_v44  ;;  %v3237_v54 = vrot.slane %v3235_v26, 1  ;;  %v6857_v44 = vcombine.low %v9463_v43, %v9463_v43  ;;  %v9532_v43 = vld [vmem:[#allocation2 + $0xc4] sm:$0xf] }
 0x1c8   : > { %3061 = vrot.lane.b32.xlu0 %v9316_v7, %s7587_s30  ;;  %v9500_v18 = vcombine.low %v9481_v46, %v3807_v58  ;;  %v3808_v58 = vld [vmem:[#allocation2 + $0xb4] sm:$0xe]  ;;  %v3811_v56 = vld [vmem:[#allocation2 + $0xc8] sm:$0xf] }
 0x1c9   : > { %v2330_v49 = vpop.permute.xlu1 %2329  ;;  %v6890_v61 = vcombine.low %v3808_v58, %v9452_v24  ;;  %v3270_v24 = vsel %vm1080_vm9, %v3267_v45, %v3269_v27 }
 0x1ca   : > { %v2459_v63 = vsel %vm1484_vm4, %v2443_v4, %v2330_v49  ;;  %v9493_v22 = vpop.permute.xlu0 %3133  ;;  %v3838_v14 = vshll.u32 %v9500_v18, 16  ;;  %v3238_v4 = vsel %vm997_vm10, %v3233_v47, %v3237_v54  ;;  %v3809_v49 = vld [vmem:[#allocation2 + $0xc0] sm:$0xf]  ;;  %v3842_v48 = vshrl.u32 %v9500_v18, 16 }
 0x1cb   : > { %7276 = vmatprep.mubr.msk.bf16.mxu1 %vm1528_vm5, %v2459_v63  ;;  %3063 = vrot.lane.b32.xlu1 %v6851_v30, %s7587_s30 }
 0x1cc   : > { %3143 = vrot.lane.b32.xlu0 %v3127_v57, %s7588_s6  ;;  %v3840_v6 = vrot.slane %v3838_v14, 1  ;;  %v3239_v57 = vshrl.u32 %v9488_v2, 16 }
 0x1cd   : > { %v3166_v50 = vpop.permute.xlu1 %3165 }
 0x1ce   : > { %v2332_v25 = vpop.permute.xlu0 %2331  ;;  %v3841_v63 = vsel %vm997_vm10, %v3836_v10, %v3840_v6 }
 0x1cf   : > { %3145 = vrot.lane.b32.xlu1 %v3130_v8, %s7588_s6  ;;  %v2461_v62 = vsel %vm1484_vm4, %v2445_v23, %v2332_v25  ;;  %v3241_v8 = vor.u32 %v3239_v57, %v3237_v54  ;;  %v3852_v23 = vrot.slane %v6890_v61, 1  ;;  %v3853_v25 = vrot.slane %v9500_v18, 1  ;;  %v3815_v57 = vld [vmem:[#allocation2 + $0xd0] sm:$0xf] }
 0x1d0   : > { %3177 = vrot.lane.b32.xlu0 %v3164_v9, %s7589_s7  ;;  %7277 = vmatmul.mubr.msk.bf16.gmra.mrb[8].mxu1 %vm1528_vm5, %v2461_v62  ;;  %v6892_v61 = vcombine.low %v3811_v56, %v3811_v56 }
 0x1d1   : > { %v3168_v7 = vpop.permute.xlu1 %3167  ;;  %v3854_v14 = vsel %vm1080_vm9, %v3852_v23, %v3853_v25 }
 0x1d2   : > { %v3192_v30 = vpop.permute.xlu0 %3191 }
 0x1d3   : > { %3179 = vrot.lane.b32.xlu1 %v3163_v32, %s7589_s7  ;;  %v3321_v32 = vsel %vm1399_vm14, %v3305_v41, %v9426_v13  ;;  %v6891_v13 = vcombine.low %v3809_v49, %v9532_v43  ;;  %v6895_v49 = vcombine.low %v3814_v55, %v3815_v57  ;;  %v12038_v55 = vld [vmem:[#allocation10_spill] sm:$0xff] }
 0x1d4   : > { %3203 = vrot.lane.b32.xlu0 %v9369_v36, %s7590_s8  ;;  %v3337_v37 = vsel %vm1416_vm15, %v3321_v32, %v9456_v33  ;;  %v3812_v33 = vld [vmem:[#allocation2 + $0xcc] sm:$0x1]  ;;  %v3844_v36 = vor.u32 %v3842_v48, %v3840_v6 }
 0x1d5   : > { %v3194_v15 = vpop.permute.xlu1 %3193  ;;  %v3353_v16 = vsel %vm1433_vm0, %v3337_v37, %v3166_v50  ;;  %v3290_v50 = vsel %vm1364_vm12, %v8756_v21, %v9393_v3  ;;  %v9561_v45 = vcombine.low %v3811_v56, %v3812_v33  ;;  %v3877_v19 = vshll.u32 %v6891_v13, 16  ;;  %v3817_v37 = vld [vmem:[#allocation2 + $0xd8] sm:$0x1]  ;;  %v7498_v56 = vld [vmem:[%s11895_s1 + $0x8] sm:$0xff]  }
 0x1d6   : > { %v3243_v34 = vpop.permute.xlu0 %3242  ;;  %v3369_v2 = vsel %vm1450_vm1, %v3353_v16, %v3192_v30  ;;  %v3307_v62 = vsel %vm1382_vm13, %v3290_v50, %v9416_v38  ;;  %v3875_v54 = vshrl.u32 %v6891_v13, 16 }
 0x1d7   : > { %3205 = vrot.lane.b32.xlu1 %v6857_v44, %s7590_s8  ;;  %v3385_v9 = vsel %vm1467_vm2, %v3369_v2, %v3243_v34  ;;  %v3323_v21 = vsel %vm1399_vm14, %v3307_v62, %v9440_v35  ;;  %v3879_v30 = vrot.slane %v3877_v19, 1  ;;  %v3882_v35 = vshll.u32 %v9561_v45, 16  ;;  %v3816_v34 = vld [vmem:[#allocation2 + $0xd4] sm:$0xf] }
 0x1d8   : > { %3254 = vrot.lane.b32.xlu0 %v3238_v4, %s7591_s13  ;;  %v3339_v59 = vsel %vm1416_vm15, %v3323_v21, %v9493_v22  ;;  %v3897_v48 = vrot.slane %v9561_v45, 1  ;;  %v9599_v2 = vcombine.low %v3816_v34, %v3817_v37  ;;  %v7501_v62 = vld [vmem:[%s11895_s1 + $0x10] ss:$0 sps:$4 sm:$0x33]  }
 0x1d9   : > { %v3245_v42 = vpop.permute.xlu1 %3244  ;;  %v3355_v38 = vsel %vm1433_vm0, %v3339_v59, %v3168_v7  ;;  %v3813_v7 = vld [vmem:[#allocation2 + $0xc0] sm:$0xe]  ;;  %v3880_v58 = vor.u32 %v3879_v30, %v3875_v54  ;;  %v3884_v41 = vrot.slane %v3882_v35, 1 }
 0x1da   : > { %v3272_v53 = vpop.permute.xlu0 %3271  ;;  %v3371_v47 = vsel %vm1450_vm1, %v3355_v38, %v3194_v15  ;;  %v6894_v4 = vcombine.low %v3813_v7, %v9532_v43  ;;  %v3930_v54 = vshrl.u32 %v9599_v2, 16 }
 0x1db   : > { %3845 = vrot.lane.b32.xlu1 %v3841_v63, %s7586_s29  ;;  %v3401_v26 = vsel %vm1484_vm4, %v3385_v9, %v3272_v53  ;;  %v3387_v44 = vsel %vm1467_vm2, %v3371_v47, %v3245_v42  ;;  %v7495_v63 = vld [vmem:[%s11895_s1] sm:$0xff]   ;;  %v3885_v16 = vsel %vm997_vm10, %v3880_v58, %v3884_v41  ;;  %v3921_v42 = vshll.u32 %v6895_v49, 16 }
 0x1dc   : > { %3256 = vrot.lane.b32.xlu0 %v3241_v8, %s7591_s13  ;;  %7290 = vmatprep.mubr.msk.bf16.mxu0 %vm1528_vm5, %v3401_v26  ;;  %v3896_v8 = vrot.slane %v6894_v4, 1  ;;  %v3926_v26 = vshll.u32 %v9599_v2, 16  ;;  %v6896_v47 = vcombine.low %v3816_v34, %v3816_v34 }
 0x1dd   : > { %v9565_v3 = vpop.permute.xlu1 %2193  ;;  %7306 = vmatprep.subr.bf16.mxu1 %v7495_v63  ;;  %v3923_v50 = vrot.slane %v3921_v42, 1 }
 0x1de   : > { %v9569_v18 = vpop.permute.xlu0 %2989  ;;  %7307 = vmatpush3.bf16.msra.mxu1 %v7495_v63  ;;  %v3898_v53 = vsel %vm1080_vm9, %v3896_v8, %v3897_v48  ;;  %v3928_v21 = vrot.slane %v3926_v26, 1 }
 0x1df   : > { %3283 = vrot.lane.b32.xlu1 %v3270_v24, %s7592_s16  ;;  %7308 = vmatprep.subr.bf16.mxu1 %v7498_v56  ;;  %v3919_v24 = vshrl.u32 %v6895_v49, 16 }
 0x1e0   : > { %3847 = vrot.lane.b32.xlu0 %v3844_v36, %s7586_s29  ;;  %v4012_v36 = vsel %vm1545_vm11, %v7501_v62, 0  ;;  %v3932_v58 = vor.u32 %v3930_v54, %v3928_v21 }
 0x1e1   : > { %v3274_v10 = vpop.permute.xlu1 %3273  ;;  %v3924_v19 = vor.u32 %v3923_v50, %v3919_v24 }
 0x1e2   : > { %v3403_v22 = vsel %vm1484_vm4, %v3387_v44, %v3274_v10  ;;  %v9579_v6 = vpop.permute.xlu0 %2195  ;;  %7309 = vmatpush3.bf16.msra.mxu1 %v7498_v56 }
 0x1e3   : > { %7291 = vmatmul.mubr.msk.bf16.vlgmr.msra.gmra.mrb[16].mxu0 %vm1528_vm5, %v3403_v22  ;;  %3855 = vrot.lane.b32.xlu1 %v3854_v14, %s7585_s28  ;;  %v1901_v14 = vld [vmem:[#allocation3 + $0x48] sm:$0x1]  ;;  %v3929_v44 = vsel %vm997_vm10, %v3924_v19, %v3928_v21  ;;  %v3941_v22 = vrot.slane %v9599_v2, 1 }
 0x1e4   : > { %3285 = vrot.lane.b32.xlu0 %v3269_v27, %s7592_s16  ;;  %v3886_v27 = vshrl.u32 %v9561_v45, 16  ;;  %7395 = vmatprep.subr.msk.bf16.mxu1 %vm1545_vm11, %v7501_v62  ;;  %v1902_v30 = vsel %vm7883_vm8, %v9446_v52, %v1901_v14 }
 0x1e5   : > { %v9584_v15 = vpop.permute.xlu1 %2227  ;;  %1903 = vst [vmem:[#allocation3 + $0x48] sm:$0x1] %v1902_v30 }
 0x1e6   : > { %v9587_v32 = vpop.permute.xlu0 %2991  ;;  %7311 = vmatpush3.bf16.msra.mxu1 %v4012_v36 }
 0x1e7   : > { %3857 = vrot.lane.b32.xlu1 %v3853_v25, %s7585_s28  ;;  %v3818_v25 = vld [vmem:[#allocation2 + $0xcc] sm:$0xe]  ;;  %v3294_v36 = vsel %vm1364_vm12, %v8999_v51, %v9587_v32 }
 0x1e8   : > { %3867 = vrot.lane.b32.xlu0 %v6891_v13, %s7587_s30  ;;  %v3888_v13 = vor.u32 %v3886_v27, %v3884_v41  ;;  %v6898_v59 = vcombine.low %v3818_v25, %v3815_v57  ;;  %v2350_v57 = vsel %vm1364_vm12, %v12038_v55, %v9099_v29  ;;  %v7569_v41 = vld [vmem:[#allocation2 + $0x74] sm:$0xf] }
 0x1e9   : > { %v9596_v43 = vpop.permute.xlu1 %3023  ;;  %v6788_v4 = vcombine.low %v7569_v41, %v7569_v41 }
 0x1ea   : > { %v9601_v33 = vpop.permute.xlu0 %2229  ;;  %v3940_v10 = vrot.slane %v6898_v59, 1 }
 0x1eb   : > { %3869 = vrot.lane.b32.xlu1 %v6892_v61, %s7587_s30 }
 0x1ec   : > { %3889 = vrot.lane.b32.xlu0 %v3885_v16, %s7588_s6  ;;  %v3942_v63 = vsel %vm1080_vm9, %v3940_v10, %v3941_v22  ;;  %v4116_v10 = vld [vmem:[#allocation3] sm:$0xf] }
 0x1ed   : > { %v2254_v9 = vpop.permute.xlu1 %2253 }
 0x1ee   : > { %v9610_v23 = vpop.permute.xlu0 %3025 }
 0x1ef   : > { %3891 = vrot.lane.b32.xlu1 %v3888_v13, %s7588_s6  ;;  %v3311_v21 = vsel %vm1382_vm13, %v3294_v36, %v9610_v23 }
 0x1f0   : > { %3899 = vrot.lane.b32.xlu0 %v3898_v53, %s7589_s7 }
 0x1f1   : > { %v3054_v45 = vpop.permute.xlu1 %3053 }
 0x1f2   : > { %v2256_v38 = vpop.permute.xlu0 %2255 }
 0x1f3   : > { %3901 = vrot.lane.b32.xlu1 %v3897_v48, %s7589_s7 }
 0x1f4   : > { %3911 = vrot.lane.b32.xlu0 %v6895_v49, %s7590_s8  ;;  %v2367_v49 = vsel %vm1382_vm13, %v2350_v57, %v9151_v1  ;;  %v2353_v1 = vsel %vm1364_vm12, %v6788_v4, %v9109_v12  ;;  %v9693_v57 = vld [vmem:[%s11896_s2] ss:$0 sm:$0xff] }
 0x1f5   : > { %v2305_v35 = vpop.permute.xlu1 %2304  ;;  %v2383_v34 = vsel %vm1399_vm14, %v2367_v49, %v9196_v0  ;;  %v2369_v0 = vsel %vm1382_vm13, %v2353_v1, %v9160_v40 }
 0x1f6   : > { %v3056_v7 = vpop.permute.xlu0 %3055  ;;  %v2399_v61 = vsel %vm1416_vm15, %v2383_v34, %v9565_v3  ;;  %v2385_v3 = vsel %vm1399_vm14, %v2369_v0, %v9204_v31 }
 0x1f7   : > { %3913 = vrot.lane.b32.xlu1 %v6896_v47, %s7590_s8  ;;  %v2415_v27 = vsel %vm1433_vm0, %v2399_v61, %v9584_v15  ;;  %v2401_v42 = vsel %vm1416_vm15, %v2385_v3, %v9579_v6  ;;  %v3292_v6 = vsel %vm1364_vm12, %v8781_v28, %v9569_v18 }
 0x1f8   : > { %3933 = vrot.lane.b32.xlu0 %v3929_v44, %s7591_s13  ;;  %v2431_v16 = vsel %vm1450_vm1, %v2415_v27, %v2254_v9  ;;  %v2417_v12 = vsel %vm1433_vm0, %v2401_v42, %v9601_v33  ;;  %v3309_v50 = vsel %vm1382_vm13, %v3292_v6, %v9596_v43  ;;  %v3327_v43 = vsel %vm1399_vm14, %v3311_v21, %v3056_v7 }
 0x1f9   : > { %v3136_v37 = vpop.permute.xlu1 %3135  ;;  %v2447_v8 = vsel %vm1467_vm2, %v2431_v16, %v2305_v35  ;;  %v2433_v40 = vsel %vm1450_vm1, %v2417_v12, %v2256_v38  ;;  %v3325_v26 = vsel %vm1399_vm14, %v3309_v50, %v3054_v45  ;;  %v7594_v27 = vmov 0  }
 0x1fa   : > { %v2307_v29 = vpop.permute.xlu0 %2306  ;;  %v3341_v62 = vsel %vm1416_vm15, %v3325_v26, %v3136_v37  ;;  %v9704_v1 = vrot.slane %v7594_v27, 7 }
 0x1fb   : > { %3935 = vrot.lane.b32.xlu1 %v3932_v58, %s7591_s13  ;;  %v2449_v13 = vsel %vm1467_vm2, %v2433_v40, %v2307_v29 }
 0x1fc   : > { %3943 = vrot.lane.b32.xlu0 %v3942_v63, %s7592_s16 }
 0x1fd   : > { %v2334_v48 = vpop.permute.xlu1 %2333 }
 0x1fe   : > { %v2463_v15 = vsel %vm1484_vm4, %v2447_v8, %v2334_v48  ;;  %v3138_v2 = vpop.permute.xlu0 %3137 }
 0x1ff   : > { %7280 = vmatprep.mubr.msk.bf16.mxu1 %vm1528_vm5, %v2463_v15  ;;  %3945 = vrot.lane.b32.xlu1 %v3941_v22, %s7592_s16  ;;  %v3343_v38 = vsel %vm1416_vm15, %v3327_v43, %v3138_v2  ;;  %v9686_v22 = vld [vmem:[#allocation3 + $0x4] sm:$0xf] }
 0x200   : > { %v9698_v49 = vcombine.low %v4116_v10, %v9686_v22 }
 0x201   : > { %v3170_v56 = vpop.permute.xlu1 %3169 }
 0x202   : > { %v2336_v9 = vpop.permute.xlu0 %2335  ;;  %v3357_v19 = vsel %vm1433_vm0, %v3341_v62, %v3170_v56  ;;  %v4187_v15 = vshll.u32 %v9698_v49, 16 }
 0x203   : > { %v2465_v31 = vsel %vm1484_vm4, %v2449_v13, %v2336_v9  ;;  %v9711_v13 = vrot.slane %v9704_v1, 4 }
 0x204   : > { %7281 = vmatmul.mubr.msk.bf16.gmra.mrb[12].mxu1 %vm1528_vm5, %v2465_v31 }
 0x205   : > { %v3172_v53 = vpop.permute.xlu1 %3171 }
 0x206   : > { %v3196_v24 = vpop.permute.xlu0 %3195  ;;  %v3359_v47 = vsel %vm1433_vm0, %v3343_v38, %v3172_v53  ;;  %v4185_v53 = vshrl.u32 %v9698_v49, 16 }
 0x207   : > { %v3373_v28 = vsel %vm1450_vm1, %v3357_v19, %v3196_v24 }
 0x209   : > { %v3198_v33 = vpop.permute.xlu1 %3197 }
 0x20a   : > { %v3247_v25 = vpop.permute.xlu0 %3246  ;;  %v3375_v51 = vsel %vm1450_vm1, %v3359_v47, %v3198_v33 }
 0x20b   : > { %v3389_v59 = vsel %vm1467_vm2, %v3373_v28, %v3247_v25  ;;  %v9715_v25 = vrot.slane %v4187_v15, 1 }
 0x20d   : > { %v3249_v18 = vpop.permute.xlu1 %3248 }
 0x20e   : > { %v3276_v45 = vpop.permute.xlu0 %3275  ;;  %v3391_v23 = vsel %vm1467_vm2, %v3375_v51, %v3249_v18 }
 0x20f   : > { %v3405_v14 = vsel %vm1484_vm4, %v3389_v59, %v3276_v45 }
 0x210   : > { %7294 = vmatprep.mubr.msk.bf16.mxu0 %vm1528_vm5, %v3405_v14  ;;  %v1884_v14 = vld [vmem:[#allocation3 + $0xc] sm:$0xf] }
 0x211   : > { %v2994_v32 = vpop.permute.xlu1 %2993 }
 0x212   : > { %v3278_v54 = vpop.permute.xlu0 %3277  ;;  %v3296_v7 = vsel %vm1364_vm12, %v9024_v60, %v2994_v32 }
 0x213   : > { %v3407_v30 = vsel %vm1484_vm4, %v3391_v23, %v3278_v54 }
 0x214   : > { %7295 = vmatmul.mubr.msk.bf16.gmra.mrb[20].mxu0 %vm1528_vm5, %v3407_v30 }
 0x215   : > { %v2996_v35 = vpop.permute.xlu1 %2995 }
 0x216   : > { %v3028_v44 = vpop.permute.xlu0 %3027  ;;  %v3298_v58 = vsel %vm1364_vm12, %v9060_v11, %v2996_v35 }
 0x217   : > { %v3313_v34 = vsel %vm1382_vm13, %v3296_v7, %v3028_v44 }
 0x219   : > { %v3030_v55 = vpop.permute.xlu1 %3029 }
 0x21a   : > { %v7248_v41 = vpop.f32.mrb[0].mxu0  ;;  %v3058_v4 = vpop.permute.xlu0 %3057  ;;  %v3315_v61 = vsel %vm1382_vm13, %v3298_v58, %v3030_v55 }
 0x21b   : > { %v1583_v37 = vpop.f32.mrb[1].mxu0  ;;  %v3329_v8 = vsel %vm1399_vm14, %v3313_v34, %v3058_v4 }
 0x21c   : > { %v1584_v63 = vadd.f32 %v9693_v57, %v1583_v37  ;;  %v7249_v60 = vpop.f32.mrb[2].mxu0 }
 0x21d   : > { %v1595_v29 = vadd.f32 %v7249_v60, %v9693_v57  ;;  %v3060_v16 = vpop.permute.xlu1 %3059  ;;  %v1586_v11 = vpop.f32.mrb[3].mxu0 }
 0x21e   : > { %v1645_v0 = vmax.f32 %v1584_v63, 0.0  ;;  %v1587_v48 = vadd.f32 %v9693_v57, %v1586_v11  ;;  %v3140_v3 = vpop.permute.xlu0 %3139  ;;  %v3331_v12 = vsel %vm1399_vm14, %v3315_v61, %v3060_v16 }
 0x21f   : > { %v1648_v2 = vmax.f32 %v1595_v29, 0.0  ;;  %v3345_v9 = vsel %vm1416_vm15, %v3329_v8, %v3140_v3 }
 0x220   : > { %v7120_v42 = vpack.c.bf16 %v1645_v0, %v1645_v0  ;;  %v1646_v40 = vmax.f32 %v1587_v48, 0.0 }
 0x221   : > { %v7123_v56 = vpack.c.bf16 %v1648_v2, %v1648_v2  ;;  %v3142_v31 = vpop.permute.xlu1 %3141 }
 0x222   : > { %v1735_v24 = vshrl.u32 %v7120_v42, 16  ;;  %v1738_v6 = vshll.u32 %v7120_v42, 16  ;;  %v7121_v50 = vpack.c.bf16 %v1646_v40, %v1646_v40  ;;  %v7252_v33 = vpop.f32.mrb[4].mxu0  ;;  %v3174_v26 = vpop.permute.xlu0 %3173  ;;  %v3347_v19 = vsel %vm1416_vm15, %v3331_v12, %v3142_v31 }
 0x223   : > { %v1761_v62 = vshrl.u32 %v7123_v56, 16  ;;  %v1764_v36 = vshll.u32 %v7123_v56, 16  ;;  %v1608_v21 = vadd.f32 %v7252_v33, %v9693_v57  ;;  %v1599_v28 = vpop.f32.mrb[5].mxu0  ;;  %v3361_v38 = vsel %vm1433_vm0, %v3345_v9, %v3174_v26 }
 0x224   : > { %v1737_v18 = vrot.slane %v1735_v24, 7  ;;  %v1743_v43 = vshrl.u32 %v7121_v50, 16  ;;  %v1600_v59 = vadd.f32 %v9693_v57, %v1599_v28  ;;  %v7253_v45 = vpop.f32.mrb[6].mxu0  ;;  %v1746_v51 = vshll.u32 %v7121_v50, 16 }
 0x225   : > { %v9721_v47 = vrot.slane %v1761_v62, 7  ;;  %v1651_v32 = vmax.f32 %v1608_v21, 0.0  ;;  %v1611_v23 = vadd.f32 %v7253_v45, %v9693_v57  ;;  %v3176_v54 = vpop.permute.xlu1 %3175  ;;  %v1602_v30 = vpop.f32.mrb[7].mxu0 }
 0x226   : > { %v1740_v35 = vor.u32 %v1738_v6, %v1737_v18  ;;  %v1741_v44 = vrot.slane %v1737_v18, 4  ;;  %v1745_v10 = vrot.slane %v1743_v43, 7  ;;  %v1649_v7 = vmax.f32 %v1600_v59, 0.0  ;;  %v3200_v55 = vpop.permute.xlu0 %3199 }
 0x227   : > { %v1766_v58 = vor.u32 %v1764_v36, %v9721_v47  ;;  %v1768_v41 = vrot.slane %v9721_v47, 4  ;;  %v7126_v4 = vpack.c.bf16 %v1651_v32, %v1651_v32  ;;  %v1652_v34 = vmax.f32 %v1611_v23, 0.0  ;;  %v4118_v23 = vld [vmem:[#allocation3 + $0x8] sm:$0xf] }
 0x228   : > { %v1885_v63 = vsel %vm7874_vm7, %v1740_v35, %v1884_v14  ;;  %v1748_v60 = vor.u32 %v1746_v51, %v1745_v10  ;;  %v1750_v61 = vrot.slane %v1745_v10, 4  ;;  %v7124_v29 = vpack.c.bf16 %v1649_v7, %v1649_v7 }
 0x229   : > { %1886 = vst [vmem:[#allocation3 + $0xc] sm:$0xf] %v1885_v63  ;;  %v1767_v16 = vsel %vm7866_vm6, %v9711_v13, %v1766_v58  ;;  %v1788_v11 = vshrl.u32 %v7126_v4, 16  ;;  %v1791_v0 = vshll.u32 %v7126_v4, 16  ;;  %v7127_v8 = vpack.c.bf16 %v1652_v34, %v1652_v34  ;;  %v3202_v48 = vpop.permute.xlu1 %3201 }
 0x22a   : > { %1889 = vst.msk [vmem:[#allocation3 + $0x18] sm:$0xf] %vm376_vm3, %v1767_v16  ;;  %v1749_v3 = vsel %vm7866_vm6, %v1741_v44, %v1748_v60  ;;  %v1758_v15 = vsel %vm7866_vm6, %v1750_v61, %v9704_v1  ;;  %v1770_v2 = vshrl.u32 %v7124_v29, 16  ;;  %v1773_v42 = vshll.u32 %v7124_v29, 16  ;;  %v7256_v12 = vpop.f32.mrb[8].mxu0  ;;  %v3251_v40 = vpop.permute.xlu0 %3250 }
 0x22b   : > { %1887 = vst.msk [vmem:[#allocation3 + $0x10] sm:$0xf] %vm376_vm3, %v1749_v3  ;;  %1888 = vst.msk [vmem:[#allocation3 + $0x14] sm:$0xf] %vm376_vm3, %v1758_v15  ;;  %v1790_v56 = vrot.slane %v1788_v11, 7  ;;  %v1797_v9 = vshrl.u32 %v7127_v8, 16  ;;  %v3363_v24 = vsel %vm1433_vm0, %v3347_v19, %v3176_v54  ;;  %v3377_v33 = vsel %vm1450_vm1, %v3361_v38, %v3200_v55 }
 0x22c   : > { %v1800_v31 = vshll.u32 %v7127_v8, 16  ;;  %v1615_v6 = vpop.f32.mrb[9].mxu0  ;;  %v1772_v50 = vrot.slane %v1770_v2, 7  ;;  %v3379_v26 = vsel %vm1450_vm1, %v3363_v24, %v3202_v48  ;;  %v1624_v62 = vadd.f32 %v7256_v12, %v9693_v57 }
 0x22d   : > { %v7257_v36 = vpop.f32.mrb[10].mxu0  ;;  %v1793_v21 = vor.u32 %v1791_v0, %v1790_v56  ;;  %v1795_v28 = vrot.slane %v1790_v56, 4  ;;  %v1799_v18 = vrot.slane %v1797_v9, 7  ;;  %v3393_v43 = vsel %vm1467_vm2, %v3377_v33, %v3251_v40  ;;  %v3253_v59 = vpop.permute.xlu1 %3252 }
 0x22e   : > { %v1618_v45 = vpop.f32.mrb[11].mxu0  ;;  %v1775_v14 = vor.u32 %v1773_v42, %v1772_v50  ;;  %v1777_v47 = vrot.slane %v1772_v50, 4  ;;  %v1655_v51 = vmax.f32 %v1624_v62, 0.0  ;;  %v3395_v19 = vsel %vm1467_vm2, %v3379_v26, %v3253_v59  ;;  %v3280_v32 = vpop.permute.xlu0 %3279 }
 0x22f   : > { %v1794_v38 = vsel %vm7866_vm6, %v9711_v13, %v1793_v21  ;;  %v1802_v54 = vor.u32 %v1800_v31, %v1799_v18  ;;  %v1804_v30 = vrot.slane %v1799_v18, 4  ;;  %v1619_v35 = vadd.f32 %v9693_v57, %v1618_v45 }
 0x230   : > { %1892 = vst.msk [vmem:[#allocation3 + $0x24] sm:$0xf] %vm376_vm3, %v1794_v38  ;;  %v1776_v44 = vsel %vm7866_vm6, %v1768_v41, %v1775_v14  ;;  %v1785_v10 = vsel %vm7866_vm6, %v1777_v47, %v9704_v1  ;;  %v7130_v7 = vpack.c.bf16 %v1655_v51, %v1655_v51  ;;  %v3409_v55 = vsel %vm1484_vm4, %v3393_v43, %v3280_v32  ;;  %v9756_v58 = vld [vmem:[#allocation3 + $0xc] sm:$0xf] }
 0x231   : > { %1890 = vst.msk [vmem:[#allocation3 + $0x1c] sm:$0xf] %vm376_vm3, %v1776_v44  ;;  %1891 = vst.msk [vmem:[#allocation3 + $0x20] sm:$0xf] %vm376_vm3, %v1785_v10  ;;  %v1803_v4 = vsel %vm7866_vm6, %v1795_v28, %v1802_v54  ;;  %v1812_v41 = vsel %vm7866_vm6, %v1804_v30, %v9704_v1  ;;  %v1654_v34 = vmax.f32 %v1619_v35, 0.0  ;;  %v2998_v63 = vpop.permute.xlu1 %2997  ;;  %7298 = vmatprep.mubr.msk.bf16.mxu0 %vm1528_vm5, %v3409_v55 }
 0x232   : > { %v9767_v60 = vcombine.low %v4118_v23, %v9756_v58  ;;  %1893 = vst.msk [vmem:[#allocation3 + $0x28] sm:$0xf] %vm376_vm3, %v1803_v4  ;;  %1894 = vst.msk [vmem:[#allocation3 + $0x2c] sm:$0xf] %vm376_vm3, %v1812_v41  ;;  %v1824_v61 = vshrl.u32 %v7130_v7, 16  ;;  %v7260_v29 = vpop.f32.mrb[12].mxu0  ;;  %v3282_v16 = vpop.permute.xlu0 %3281  ;;  %v4190_v3 = vor.u32 %v9715_v25, %v4185_v53 }
 0x233   : > { %v9771_v11 = vld [vmem:[#allocation3 + $0x10] sm:$0xf]  ;;  %v7129_v0 = vpack.c.bf16 %v1654_v34, %v1654_v34  ;;  %v1631_v8 = vpop.f32.mrb[13].mxu0  ;;  %v3411_v48 = vsel %vm1484_vm4, %v3395_v19, %v3282_v16  ;;  %v9778_v2 = vld [vmem:[#allocation3 + $0x14] sm:$0xf]  ;;  %v1827_v9 = vshll.u32 %v7130_v7, 16 }
 0x234   : > { %v4192_v15 = vshll.u32 %v9767_v60, 16  ;;  %v1826_v42 = vrot.slane %v1824_v61, 7  ;;  %v1632_v12 = vadd.f32 %v9693_v57, %v1631_v8  ;;  %v7261_v40 = vpop.f32.mrb[14].mxu0  ;;  %7299 = vmatmul.mubr.msk.bf16.gmra.mrb[24].mxu0 %vm1528_vm5, %v3411_v48  ;;  %v9784_v56 = vcombine.low %v9771_v11, %v9778_v2  ;;  %v9796_v47 = vld [vmem:[#allocation3 + $0x18] sm:$0xf] }
 0x235   : > { %v1815_v31 = vshrl.u32 %v7129_v0, 16  ;;  %v9786_v24 = vpop.permute.xlu1 %2999  ;;  %v1634_v6 = vpop.f32.mrb[15].mxu0  ;;  %v1818_v50 = vshll.u32 %v7129_v0, 16  ;;  %v4196_v62 = vshrl.u32 %v9767_v60, 16  ;;  %v3300_v0 = vsel %vm1364_vm12, %v9220_v17, %v2998_v63 }
 0x236   : > { %v4194_v53 = vrot.slane %v4192_v15, 1  ;;  %v1831_v25 = vrot.slane %v1826_v42, 4  ;;  %v1657_v33 = vmax.f32 %v1632_v12, 0.0  ;;  %v3032_v26 = vpop.permute.xlu0 %3031  ;;  %v1829_v36 = vor.u32 %v1827_v9, %v1826_v42  ;;  %v7570_v9 = vld [vmem:[#allocation2 + $0xb0] sm:$0xf] }
 0x237   : > { %v1817_v21 = vrot.slane %v1815_v31, 7  ;;  %v1635_v28 = vadd.f32 %v9693_v57, %v1634_v6  ;;  %v4200_v14 = vshll.u32 %v9784_v56, 16  ;;  %v9807_v7 = vld [vmem:[#allocation3 + $0x24] sm:$0xf]  ;;  %v6841_v31 = vcombine.low %v7570_v9, %v7570_v9 }
 0x238   : > { %v4195_v18 = vsel %vm997_vm10, %v4190_v3, %v4194_v53  ;;  %v1839_v43 = vsel %vm7866_vm6, %v1831_v25, %v9704_v1  ;;  %v7132_v59 = vpack.c.bf16 %v1657_v33, %v1657_v33  ;;  %v4198_v45 = vor.u32 %v4196_v62, %v4194_v53  ;;  %v9798_v51 = vld [vmem:[#allocation3 + $0x1c] sm:$0xf]  ;;  %v9805_v10 = vld [vmem:[#allocation3 + $0x20] sm:$0xf] }
 0x239   : > { %4247 = vrot.lane.b32.xlu0 %v4195_v18, %s7586_s29  ;;  %1897 = vst.msk [vmem:[#allocation3 + $0x38] sm:$0xf] %vm376_vm3, %v1839_v43  ;;  %v1820_v19 = vor.u32 %v1818_v50, %v1817_v21  ;;  %v1822_v32 = vrot.slane %v1817_v21, 4  ;;  %v1658_v23 = vmax.f32 %v1635_v28, 0.0  ;;  %v3034_v38 = vpop.permute.xlu1 %3033  ;;  %v9803_v54 = vcombine.low %v9796_v47, %v9798_v51  ;;  %v9826_v42 = vld [vmem:[#allocation3 + $0x28] sm:$0xf] }
 0x23a   : > { %v1842_v30 = vshrl.u32 %v7132_v59, 16  ;;  %v4202_v35 = vrot.slane %v4200_v14, 1  ;;  %v3062_v44 = vpop.permute.xlu0 %3061  ;;  %v1845_v61 = vshll.u32 %v7132_v59, 16  ;;  %v4204_v3 = vshrl.u32 %v9784_v56, 16  ;;  %v9828_v12 = vld [vmem:[#allocation3 + $0x2c] sm:$0xf] }
 0x23b   : > { %v1821_v55 = vsel %vm7866_vm6, %v9711_v13, %v1820_v19  ;;  %v1830_v4 = vsel %vm7866_vm6, %v1822_v32, %v1829_v36  ;;  %v7133_v41 = vpack.c.bf16 %v1658_v23, %v1658_v23  ;;  %v4208_v16 = vshll.u32 %v9803_v54, 16 }
 0x23c   : > { %1895 = vst.msk [vmem:[#allocation3 + $0x30] sm:$0xf] %vm376_vm3, %v1821_v55  ;;  %1896 = vst.msk [vmem:[#allocation3 + $0x34] sm:$0xf] %vm376_vm3, %v1830_v4  ;;  %v1844_v34 = vrot.slane %v1842_v30, 7  ;;  %v4203_v29 = vsel %vm997_vm10, %v4198_v45, %v4202_v35  ;;  %v9824_v15 = vcombine.low %v9805_v10, %v9807_v7  ;;  %v4212_v17 = vshrl.u32 %v9803_v54, 16 }
 0x23d   : > { %v1851_v8 = vshrl.u32 %v7133_v41, 16  ;;  %4249 = vrot.lane.b32.xlu1 %v4203_v29, %s7586_s29  ;;  %v3064_v48 = vpop.permute.xlu1 %3063  ;;  %v1854_v6 = vshll.u32 %v7133_v41, 16  ;;  %v4206_v25 = vor.u32 %v4204_v3, %v4202_v35  ;;  %v4210_v50 = vrot.slane %v4208_v16, 1 }
 0x23e   : > { %12041 = vst [vmem:[#allocation24_spill] sm:$0xff] %v9824_v15  ;;  %v1847_v40 = vor.u32 %v1845_v61, %v1844_v34  ;;  %v3144_v53 = vpop.permute.xlu0 %3143  ;;  %v4216_v33 = vshll.u32 %v9824_v15, 16  ;;  %v1849_v36 = vrot.slane %v1844_v34, 4  ;;  %v3317_v21 = vsel %vm1382_vm13, %v3300_v0, %v3032_v26 }
 0x23f   : > { %v1853_v63 = vrot.slane %v1851_v8, 7  ;;  %v9838_v28 = vcombine.low %v9826_v42, %v9828_v12  ;;  %v4211_v59 = vsel %vm997_vm10, %v4206_v25, %v4210_v50  ;;  %v4214_v14 = vor.u32 %v4212_v17, %v4210_v50 }
 0x240   : > { %v1848_v62 = vsel %vm7866_vm6, %v9711_v13, %v1847_v40  ;;  %v3303_v19 = vsel %vm1364_vm12, %v6841_v31, %v9786_v24  ;;  %4251 = vrot.lane.b32.xlu0 %v4211_v59, %s7586_s29  ;;  %v4218_v32 = vrot.slane %v4216_v33, 1  ;;  %v4220_v26 = vshrl.u32 %v9824_v15, 16  ;;  %v9878_v25 = vld [vmem:[#allocation3 + $0x38] sm:$0xf] }
 0x241   : > { %12042 = vst [vmem:[#allocation6_spill] sm:$0xff] %v9838_v28  ;;  %1898 = vst.msk [vmem:[#allocation3 + $0x3c] sm:$0xf] %vm376_vm3, %v1848_v62  ;;  %v1856_v18 = vor.u32 %v1854_v6, %v1853_v63  ;;  %v1858_v43 = vrot.slane %v1853_v63, 4  ;;  %v3146_v45 = vpop.permute.xlu1 %3145  ;;  %v4224_v23 = vshll.u32 %v9838_v28, 16  ;;  %v3333_v4 = vsel %vm1399_vm14, %v3317_v21, %v3062_v44 }
 0x242   : > { %v3178_v30 = vpop.permute.xlu0 %3177  ;;  %v9860_v34 = vsel %vm997_vm10, %v4214_v14, %v4218_v32  ;;  %v4222_v61 = vor.u32 %v4220_v26, %v4218_v32  ;;  %v3319_v0 = vsel %vm1382_vm13, %v3303_v19, %v3034_v38  ;;  %v3349_v8 = vsel %vm1416_vm15, %v3333_v4, %v3144_v53  ;;  %v4132_v6 = vld [vmem:[#allocation3] sm:$0xe] }
 0x243   : > { %v1857_v35 = vsel %vm7866_vm6, %v1849_v36, %v1856_v18  ;;  %v1866_v55 = vsel %vm7866_vm6, %v1858_v43, %v9438_v5  ;;  %v9853_v41 = vld [vmem:[#allocation3 + $0x30] sm:$0xf]  ;;  %v9855_v24 = vld [vmem:[#allocation3 + $0x34] sm:$0xf]  ;;  %v4226_v29 = vrot.slane %v4224_v23, 1  ;;  %4253 = vrot.lane.b32.xlu1 %v9860_v34, %s7586_s29  ;;  %v4228_v9 = vshrl.u32 %v9838_v28, 16 }
 0x244   : > { %1899 = vst.msk [vmem:[#allocation3 + $0x40] sm:$0xf] %vm376_vm3, %v1857_v35  ;;  %1900 = vst.msk [vmem:[#allocation3 + $0x44] sm:$0xf] %vm376_vm3, %v1866_v55  ;;  %v9864_v16 = vcombine.low %v9853_v41, %v9855_v24  ;;  %v3335_v38 = vsel %vm1399_vm14, %v3319_v0, %v3064_v48  ;;  %v3365_v53 = vsel %vm1433_vm0, %v3349_v8, %v3178_v30 }
 0x245   : > { %v3180_v44 = vpop.permute.xlu1 %3179  ;;  %v9871_v3 = vsel %vm997_vm10, %v4222_v61, %v4226_v29  ;;  %v4230_v17 = vor.u32 %v4228_v9, %v4226_v29  ;;  %v6917_v18 = vcombine.low %v4132_v6, %v9686_v22  ;;  %v3351_v43 = vsel %vm1416_vm15, %v3335_v38, %v3146_v45 }
 0x246   : > { %12043 = vst [vmem:[#allocation22_spill] sm:$0xff] %v9864_v16  ;;  %v3204_v40 = vpop.permute.xlu0 %3203  ;;  %v4232_v31 = vshll.u32 %v9864_v16, 16  ;;  %4255 = vrot.lane.b32.xlu0 %v9871_v3, %s7586_s29  ;;  %v4236_v48 = vshrl.u32 %v9864_v16, 16  ;;  %v3367_v30 = vsel %vm1433_vm0, %v3351_v43, %v3180_v44  ;;  %v4267_v61 = vrot.slane %v9767_v60, 1 }
 0x247   : > { %v3381_v14 = vsel %vm1450_vm1, %v3365_v53, %v3204_v40  ;;  %v4266_v35 = vrot.slane %v6917_v18, 1  ;;  %v4269_v29 = vrot.slane %v9784_v56, 1  ;;  %v6888_v53 = vcombine.low %v9481_v46, %v9481_v46 }
 0x248   : > { %v4234_v63 = vrot.slane %v4232_v31, 1  ;;  %v4131_v50 = vld [vmem:[#allocation3 + $0x3c] sm:$0x1]  ;;  %v4271_v31 = vrot.slane %v9803_v54, 1  ;;  %v4275_v43 = vrot.slane %v9838_v28, 1 }
 0x249   : > { %v3206_v33 = vpop.permute.xlu1 %3205  ;;  %v9882_v62 = vcombine.low %v9878_v25, %v4131_v50  ;;  %v4268_v9 = vsel %vm1080_vm9, %v4266_v35, %v4267_v61  ;;  %v4270_v38 = vsel %vm1080_vm9, %v4267_v61, %v4269_v29  ;;  %v9915_v50 = vld [vmem:[#allocation3 + $0x3c] sm:$0xf] }
 0x24a   : > { %v9885_v36 = vsel %vm997_vm10, %v4230_v17, %v4234_v63  ;;  %v3255_v21 = vpop.permute.xlu0 %3254  ;;  %v9894_v32 = vor.u32 %v4236_v48, %v4234_v63  ;;  %v3383_v0 = vsel %vm1450_vm1, %v3367_v30, %v3206_v33  ;;  %v4273_v17 = vrot.slane %v9824_v15, 1 }
 0x24b   : > { %4257 = vrot.lane.b32.xlu1 %v9885_v36, %s7586_s29  ;;  %v4240_v59 = vshll.u32 %v9882_v62, 16  ;;  %v4244_v23 = vshrl.u32 %v9882_v62, 16  ;;  %v3397_v45 = vsel %vm1467_vm2, %v3381_v14, %v3255_v21  ;;  %v4272_v21 = vsel %vm1080_vm9, %v4269_v29, %v4271_v31  ;;  %v9935_v35 = vld [vmem:[#allocation3 + $0x44] sm:$0xf]  ;;  %v4142_v29 = vld [vmem:[#allocation3 + $0x18] sm:$0xe] }
 0x24c   : > { %v4277_v48 = vrot.slane %v9864_v16, 1  ;;  %v9928_v14 = vcombine.low %v9878_v25, %v9915_v50  ;;  %v4279_v61 = vrot.slane %v9882_v62, 1 }
 0x24d   : > { %v3846_v19 = vpop.permute.xlu1 %3845  ;;  %v4242_v26 = vrot.slane %v4240_v59, 1  ;;  %v4274_v59 = vsel %vm1080_vm9, %v4271_v31, %v4273_v17 }
 0x24e   : > { %v3257_v22 = vpop.permute.xlu0 %3256 }
 0x24f   : > { %v4243_v55 = vsel %vm997_vm10, %v9894_v32, %v4242_v26  ;;  %v4246_v4 = vor.u32 %v4244_v23, %v4242_v26  ;;  %v3399_v6 = vsel %vm1467_vm2, %v3383_v0, %v3257_v22  ;;  %v2851_v26 = vld [vmem:[#allocation3 + $0x84] sm:$0x1]  ;;  %v3948_v23 = vsel %vm1364_vm12, %v9472_v39, %v3846_v19  ;;  %v9933_v22 = vld [vmem:[#allocation3 + $0x40] sm:$0xf] }
 0x250   : > { %4259 = vrot.lane.b32.xlu0 %v4243_v55, %s7586_s29  ;;  %v9939_v55 = vsel %vm1080_vm9, %v4273_v17, %v4275_v43  ;;  %v6933_v39 = vcombine.low %v4142_v29, %v9798_v51  ;;  %v4473_v19 = vshll.u32 %v9928_v14, 16  ;;  %v2852_v0 = vsel %vm7883_vm8, %v9446_v52, %v2851_v26 }
 0x251   : > { %v3284_v8 = vpop.permute.xlu1 %3283  ;;  %4261 = vrot.lane.b32.xlu1 %v4246_v4, %s7586_s29  ;;  %v9942_v4 = vsel %vm1080_vm9, %v4275_v43, %v4277_v48  ;;  %2853 = vst [vmem:[#allocation3 + $0x84] sm:$0x1] %v2852_v0  ;;  %v9958_v62 = vcombine.low %v9933_v22, %v9935_v35 }
 0x252   : > { %v3413_v44 = vsel %vm1484_vm4, %v3397_v45, %v3284_v8  ;;  %v3848_v40 = vpop.permute.xlu0 %3847  ;;  %v4525_v8 = vrot.slane %v9928_v14, 1  ;;  %v4523_v31 = vrot.slane %v6933_v39, 1  ;;  %v9991_v39 = vcombine.low %v9778_v2, %v9796_v47 }
 0x253   : > { %7302 = vmatprep.mubr.msk.bf16.mxu0 %vm1528_vm5, %v3413_v44  ;;  %v3951_v45 = vsel %vm1364_vm12, %v6888_v53, %v3848_v40  ;;  %v4477_v53 = vshrl.u32 %v9928_v14, 16  ;;  %v10008_v47 = vcombine.low %v9807_v7, %v9826_v42 }
 0x254   : > { %4281 = vrot.lane.b32.xlu0 %v4268_v9, %s7585_s28  ;;  %v4338_v7 = vshll.u32 %v9991_v39, 16 }
 0x255   : > { %v3856_v63 = vpop.permute.xlu1 %3855  ;;  %4283 = vrot.lane.b32.xlu1 %v4270_v38, %s7585_s28  ;;  %v9961_v38 = vsel %vm1080_vm9, %v4277_v48, %v4525_v8 }
 0x256   : > { %v3286_v33 = vpop.permute.xlu0 %3285  ;;  %v3953_v44 = vsel %vm1382_vm13, %v3948_v23, %v3856_v63  ;;  %v4280_v63 = vsel %vm1080_vm9, %v4277_v48, %v4279_v61 }
 0x257   : > { %v3415_v18 = vsel %vm1484_vm4, %v3399_v6, %v3286_v33  ;;  %v4475_v6 = vrot.slane %v4473_v19, 1 }
 0x258   : > { %4285 = vrot.lane.b32.xlu0 %v4272_v21, %s7585_s28  ;;  %7303 = vmatmul.mubr.msk.bf16.gmra.mrb[28].mxu0 %vm1528_vm5, %v3415_v18  ;;  %v4481_v21 = vshll.u32 %v9958_v62, 16  ;;  %v4527_v18 = vrot.slane %v9958_v62, 1 }
 0x259   : > { %v3858_v46 = vpop.permute.xlu1 %3857  ;;  %4287 = vrot.lane.b32.xlu1 %v4274_v59, %s7585_s28  ;;  %v9971_v59 = vsel %vm1080_vm9, %v4523_v31, %v4273_v17  ;;  %v9975_v26 = vsel %vm997_vm10, %v9894_v32, %v4475_v6  ;;  %v4479_v23 = vor.u32 %v4477_v53, %v4475_v6  ;;  %v10024_v6 = vcombine.low %v9855_v24, %v9878_v25 }
 0x25a   : > { %v3868_v30 = vpop.permute.xlu0 %3867  ;;  %v3955_v33 = vsel %vm1382_vm13, %v3951_v45, %v3858_v46  ;;  %v9978_v48 = vrot.slane %v4481_v21, 1  ;;  %v9983_v46 = vsel %vm1080_vm9, %v4525_v8, %v4527_v18  ;;  %v10004_v8 = vcombine.low %v9798_v51, %v9805_v10 }
 0x25b   : > { %v3957_v43 = vsel %vm1399_vm14, %v3953_v44, %v3868_v30  ;;  %v6918_v30 = vcombine.low %v9756_v58, %v9771_v11  ;;  %v10018_v51 = vcombine.low %v9828_v12, %v9853_v41  ;;  %v10034_v12 = vcombine.low %v9915_v50, %v9933_v22 }
 0x25c   : > { %4289 = vrot.lane.b32.xlu0 %v9939_v55, %s7585_s28  ;;  %v4346_v42 = vshll.u32 %v10004_v8, 16  ;;  %v6925_v24 = vcombine.low %v9935_v35, %v9935_v35  ;;  %v4340_v25 = vrot.slane %v4338_v7, 1  ;;  %v4342_v50 = vshrl.u32 %v9991_v39, 16 }
 0x25d   : > { %v3870_v40 = vpop.permute.xlu1 %3869  ;;  %4291 = vrot.lane.b32.xlu1 %v9942_v4, %s7585_s28  ;;  %v4333_v44 = vshll.u32 %v6918_v30, 16  ;;  %v4331_v41 = vshrl.u32 %v6918_v30, 16 }
 0x25e   : > { %v3890_v9 = vpop.permute.xlu0 %3889  ;;  %v3959_v45 = vsel %vm1399_vm14, %v3955_v33, %v3870_v40 }
 0x25f   : > { %v3961_v32 = vsel %vm1416_vm15, %v3957_v43, %v3890_v9  ;;  %v4335_v53 = vrot.slane %v4333_v44, 1 }
 0x260   : > { %4293 = vrot.lane.b32.xlu0 %v4280_v63, %s7585_s28 }
 0x261   : > { %v3892_v29 = vpop.permute.xlu1 %3891  ;;  %4295 = vrot.lane.b32.xlu1 %v4279_v61, %s7585_s28  ;;  %v9995_v61 = vsel %vm997_vm10, %v4479_v23, %v9978_v48  ;;  %v4348_v23 = vrot.slane %v4346_v42, 1 }
 0x262   : > { %v3900_v17 = vpop.permute.xlu0 %3899  ;;  %v3963_v58 = vsel %vm1416_vm15, %v3959_v45, %v3892_v29  ;;  %v4354_v29 = vshll.u32 %v10008_v47, 16 }
 0x263   : > { %v3965_v0 = vsel %vm1433_vm0, %v3961_v32, %v3900_v17  ;;  %v4336_v32 = vor.u32 %v4335_v53, %v4331_v41 }
 0x264   : > { %4311 = vrot.lane.b32.xlu0 %v6918_v30, %s7587_s30  ;;  %v4350_v30 = vshrl.u32 %v10004_v8, 16  ;;  %v4356_v44 = vrot.slane %v4354_v29, 1 }
 0x265   : > { %v3902_v19 = vpop.permute.xlu1 %3901  ;;  %4313 = vrot.lane.b32.xlu1 %v9991_v39, %s7587_s30 }
 0x266   : > { %v3912_v2 = vpop.permute.xlu0 %3911  ;;  %v3967_v40 = vsel %vm1433_vm0, %v3963_v58, %v3902_v19  ;;  %v4362_v19 = vshll.u32 %v10018_v51, 16 }
 0x267   : > { %v3969_v9 = vsel %vm1450_vm1, %v3965_v0, %v3912_v2  ;;  %v4344_v2 = vor.u32 %v4342_v50, %v4340_v25  ;;  %v4374_v50 = vshrl.u32 %v10024_v6, 16 }
 0x268   : > { %4315 = vrot.lane.b32.xlu0 %v10004_v8, %s7587_s30  ;;  %v4364_v7 = vrot.slane %v4362_v19, 1 }
 0x269   : > { %v3914_v31 = vpop.permute.xlu1 %3913  ;;  %4317 = vrot.lane.b32.xlu1 %v10008_v47, %s7587_s30 }
 0x26a   : > { %v3934_v10 = vpop.permute.xlu0 %3933  ;;  %v3971_v33 = vsel %vm1450_vm1, %v3967_v40, %v3914_v31  ;;  %v4370_v40 = vshll.u32 %v10024_v6, 16  ;;  %v4341_v31 = vsel %vm997_vm10, %v4336_v32, %v4340_v25 }
 0x26b   : > { %v3973_v63 = vsel %vm1467_vm2, %v3969_v9, %v3934_v10  ;;  %v4352_v10 = vor.u32 %v4350_v30, %v4348_v23 }
 0x26c   : > { %4319 = vrot.lane.b32.xlu0 %v10018_v51, %s7587_s30 }
 0x26d   : > { %v3936_v21 = vpop.permute.xlu1 %3935  ;;  %4321 = vrot.lane.b32.xlu1 %v10024_v6, %s7587_s30  ;;  %v4357_v19 = vsel %vm997_vm10, %v4352_v10, %v4356_v44 }
 0x26e   : > { %v3944_v43 = vpop.permute.xlu0 %3943  ;;  %v3975_v17 = vsel %vm1467_vm2, %v3971_v33, %v3936_v21  ;;  %v4349_v33 = vsel %vm997_vm10, %v4344_v2, %v4348_v23  ;;  %v4378_v21 = vshll.u32 %v10034_v12, 16 }
 0x26f   : > { %v3977_v45 = vsel %vm1484_vm4, %v3973_v63, %v3944_v43  ;;  %v4358_v63 = vshrl.u32 %v10008_v47, 16 }
 0x270   : > { %4323 = vrot.lane.b32.xlu0 %v10034_v12, %s7587_s30  ;;  %7312 = vmatprep.mubr.msk.bf16.mxu1 %vm1528_vm5, %v3977_v45  ;;  %v4372_v45 = vrot.slane %v4370_v40, 1 }
 0x271   : > { %v3946_v22 = vpop.permute.xlu1 %3945  ;;  %4325 = vrot.lane.b32.xlu1 %v6925_v24, %s7587_s30  ;;  %v4366_v24 = vshrl.u32 %v10018_v51, 16 }
 0x272   : > { %v3979_v58 = vsel %vm1484_vm4, %v3975_v17, %v3946_v22  ;;  %v7270_v0 = vpop.f32.mrb[0].mxu1  ;;  %v4360_v17 = vor.u32 %v4358_v63, %v4356_v44 }
 0x273   : > { %v2546_v9 = vpop.f32.mrb[1].mxu1  ;;  %7313 = vmatmul.mubr.msk.bf16.vlgmr.msra.gmra.mrb[16].mxu1 %vm1528_vm5, %v3979_v58  ;;  %v4368_v23 = vor.u32 %v4366_v24, %v4364_v7  ;;  %v4380_v0 = vrot.slane %v4378_v21, 1 }
 0x274   : > { %v2547_v42 = vadd.f32 %v9693_v57, %v2546_v9  ;;  %v7271_v53 = vpop.f32.mrb[2].mxu1  ;;  %4393 = vrot.lane.b32.xlu0 %v4341_v31, %s7588_s6  ;;  %v4365_v58 = vsel %vm997_vm10, %v4360_v17, %v4364_v7 }
 0x275   : > { %v2558_v41 = vadd.f32 %v7271_v53, %v9693_v57  ;;  %4395 = vrot.lane.b32.xlu1 %v4349_v33, %s7588_s6  ;;  %v2549_v43 = vpop.f32.mrb[3].mxu1  ;;  %v4373_v53 = vsel %vm997_vm10, %v4368_v23, %v4372_v45 }
 0x276   : > { %v2608_v25 = vmax.f32 %v2547_v42, 0.0  ;;  %v2550_v29 = vadd.f32 %v9693_v57, %v2549_v43  ;;  %v4376_v42 = vor.u32 %v4374_v50, %v4372_v45 }
 0x277   : > { %v2611_v32 = vmax.f32 %v2558_v41, 0.0  ;;  %v2834_v41 = vld [vmem:[#allocation3 + $0x48] sm:$0xf] }
 0x278   : > { %v7134_v22 = vpack.c.bf16 %v2608_v25, %v2608_v25  ;;  %v2609_v30 = vmax.f32 %v2550_v29, 0.0  ;;  %4397 = vrot.lane.b32.xlu0 %v4357_v19, %s7588_s6  ;;  %v4381_v63 = vsel %vm997_vm10, %v4376_v42, %v4380_v0 }
 0x279   : > { %v7137_v2 = vpack.c.bf16 %v2611_v32, %v2611_v32  ;;  %4399 = vrot.lane.b32.xlu1 %v4365_v58, %s7588_s6 }
 0x27a   : > { %v2685_v9 = vshrl.u32 %v7134_v22, 16  ;;  %v7135_v31 = vpack.c.bf16 %v2609_v30, %v2609_v30  ;;  %v2688_v10 = vshll.u32 %v7134_v22, 16 }
 0x27b   : > { %v2711_v40 = vshrl.u32 %v7137_v2, 16  ;;  %v2714_v7 = vshll.u32 %v7137_v2, 16 }
 0x27c   : > { %v2687_v44 = vrot.slane %v2685_v9, 7  ;;  %v2693_v33 = vshrl.u32 %v7135_v31, 16  ;;  %4401 = vrot.lane.b32.xlu0 %v4373_v53, %s7588_s6  ;;  %v2696_v25 = vshll.u32 %v7135_v31, 16 }
 0x27d   : > { %v10069_v43 = vrot.slane %v2711_v40, 7  ;;  %4403 = vrot.lane.b32.xlu1 %v4381_v63, %s7588_s6 }
 0x27e   : > { %v2690_v21 = vor.u32 %v2688_v10, %v2687_v44  ;;  %v2695_v24 = vrot.slane %v2693_v33, 7  ;;  %v2691_v17 = vrot.slane %v2687_v44, 4  ;;  %v4137_v44 = vld [vmem:[#allocation3 + $0xc] sm:$0xe] }
 0x27f   : > { %v2716_v29 = vor.u32 %v2714_v7, %v10069_v43  ;;  %v6927_v33 = vcombine.low %v4137_v44, %v9771_v11 }
 0x280   : > { %v2835_v45 = vsel %vm7874_vm7, %v2690_v21, %v2834_v41  ;;  %v2698_v32 = vor.u32 %v2696_v25, %v2695_v24  ;;  %v2700_v19 = vrot.slane %v2695_v24, 4 }
 0x281   : > { %2836 = vst [vmem:[#allocation3 + $0x48] sm:$0xf] %v2835_v45  ;;  %v2717_v23 = vsel %vm7866_vm6, %v9711_v13, %v2716_v29  ;;  %v4382_v45 = vshrl.u32 %v10034_v12, 16 }
 0x282   : > { %2839 = vst.msk [vmem:[#allocation3 + $0x54] sm:$0xf] %vm376_vm3, %v2717_v23  ;;  %v2699_v50 = vsel %vm7866_vm6, %v2691_v17, %v2698_v32  ;;  %v2708_v22 = vsel %vm7866_vm6, %v2700_v19, %v9704_v1  ;;  %v7274_v30 = vpop.f32.mrb[4].mxu1  ;;  %v4412_v32 = vrot.slane %v6927_v33, 1 }
 0x283   : > { %2837 = vst.msk [vmem:[#allocation3 + $0x4c] sm:$0xf] %vm376_vm3, %v2699_v50  ;;  %2838 = vst.msk [vmem:[#allocation3 + $0x50] sm:$0xf] %vm376_vm3, %v2708_v22  ;;  %v2571_v58 = vadd.f32 %v7274_v30, %v9693_v57  ;;  %v2562_v2 = vpop.f32.mrb[5].mxu1  ;;  %v2718_v22 = vrot.slane %v10069_v43, 4 }
 0x284   : > { %v2563_v9 = vadd.f32 %v9693_v57, %v2562_v2  ;;  %v7275_v31 = vpop.f32.mrb[6].mxu1  ;;  %v4384_v2 = vor.u32 %v4382_v45, %v4380_v0  ;;  %v4417_v45 = vrot.slane %v10008_v47, 1  ;;  %v7524_v47 = vld [vmem:[%s11897_s3] sm:$0xff]  }
 0x285   : > { %v2614_v42 = vmax.f32 %v2571_v58, 0.0  ;;  %v2574_v40 = vadd.f32 %v7275_v31, %v9693_v57  ;;  %v2565_v53 = vpop.f32.mrb[7].mxu1  ;;  %v4413_v57 = vrot.slane %v9991_v39, 1  ;;  %7316 = vmatprep.subr.bf16.mxu1 %v7524_v47 }
 0x286   : > { %v2612_v10 = vmax.f32 %v2563_v9, 0.0  ;;  %7317 = vmatpush3.bf16.msra.mxu1 %v7524_v47 }
 0x287   : > { %v7140_v63 = vpack.c.bf16 %v2614_v42, %v2614_v42  ;;  %v2615_v41 = vmax.f32 %v2574_v40, 0.0 }
 0x288   : > { %v7138_v7 = vpack.c.bf16 %v2612_v10, %v2612_v10  ;;  %v4136_v21 = vld [vmem:[#allocation3 + $0x48] sm:$0x1] }
 0x289   : > { %v2738_v24 = vshrl.u32 %v7140_v63, 16  ;;  %v7141_v25 = vpack.c.bf16 %v2615_v41, %v2615_v41  ;;  %v10091_v29 = vcombine.low %v9935_v35, %v4136_v21  ;;  %v2741_v23 = vshll.u32 %v7140_v63, 16 }
 0x28a   : > { %v2720_v17 = vshrl.u32 %v7138_v7, 16  ;;  %v2723_v58 = vshll.u32 %v7138_v7, 16 }
 0x28b   : > { %v2740_v19 = vrot.slane %v2738_v24, 7  ;;  %v2747_v50 = vshrl.u32 %v7141_v25, 16  ;;  %v4386_v11 = vshll.u32 %v10091_v29, 16  ;;  %v2750_v35 = vshll.u32 %v7141_v25, 16 }
 0x28c   : > { %v2722_v30 = vrot.slane %v2720_v17, 7  ;;  %v4390_v10 = vshrl.u32 %v10091_v29, 16  ;;  %v4415_v25 = vrot.slane %v10004_v8, 1  ;;  %v4414_v17 = vsel %vm1080_vm9, %v4412_v32, %v4413_v57 }
 0x28d   : > { %v2743_v9 = vor.u32 %v2741_v23, %v2740_v19  ;;  %v2749_v31 = vrot.slane %v2747_v50, 7  ;;  %v4388_v42 = vrot.slane %v4386_v11, 1  ;;  %v2745_v40 = vrot.slane %v2740_v19, 4 }
 0x28e   : > { %v2725_v53 = vor.u32 %v2723_v58, %v2722_v30  ;;  %v2727_v44 = vrot.slane %v2722_v30, 4  ;;  %v4416_v19 = vsel %vm1080_vm9, %v4413_v57, %v4415_v25  ;;  %v4419_v23 = vrot.slane %v10018_v51, 1  ;;  %v7525_v51 = vld [vmem:[%s11897_s3 + $0x8] sm:$0xff]  }
 0x28f   : > { %v2744_v39 = vsel %vm7866_vm6, %v9711_v13, %v2743_v9  ;;  %v2752_v33 = vor.u32 %v2750_v35, %v2749_v31  ;;  %v2754_v63 = vrot.slane %v2749_v31, 4  ;;  %v4389_v43 = vsel %vm997_vm10, %v4384_v2, %v4388_v42  ;;  %7318 = vmatprep.subr.bf16.mxu1 %v7525_v51  ;;  %v10158_v2 = vld [vmem:[%s11896_s2] ss:$0 sm:$0xff] }
 0x290   : > { %2842 = vst.msk [vmem:[#allocation3 + $0x60] sm:$0xf] %vm376_vm3, %v2744_v39  ;;  %v2726_v0 = vsel %vm7866_vm6, %v2718_v22, %v2725_v53  ;;  %v2735_v41 = vsel %vm7866_vm6, %v2727_v44, %v9704_v1  ;;  %4405 = vrot.lane.b32.xlu0 %v4389_v43, %s7588_s6  ;;  %v4392_v7 = vor.u32 %v4390_v10, %v4388_v42  ;;  %v4421_v50 = vrot.slane %v10024_v6, 1  ;;  %v7526_v22 = vld [vmem:[%s11897_s3 + $0x10] ss:$0 sps:$4 sm:$0x33]  }
 0x291   : > { %2840 = vst.msk [vmem:[#allocation3 + $0x58] sm:$0xf] %vm376_vm3, %v2726_v0  ;;  %2841 = vst.msk [vmem:[#allocation3 + $0x5c] sm:$0xf] %vm376_vm3, %v2735_v41  ;;  %v2753_v21 = vsel %vm7866_vm6, %v2745_v40, %v2752_v33  ;;  %v2762_v24 = vsel %vm7866_vm6, %v2754_v63, %v9704_v1  ;;  %v4418_v8 = vsel %vm1080_vm9, %v4415_v25, %v4417_v45  ;;  %v4423_v32 = vrot.slane %v10034_v12, 1 }
 0x292   : > { %2843 = vst.msk [vmem:[#allocation3 + $0x64] sm:$0xf] %vm376_vm3, %v2753_v21  ;;  %2844 = vst.msk [vmem:[#allocation3 + $0x68] sm:$0xf] %vm376_vm3, %v2762_v24  ;;  %4407 = vrot.lane.b32.xlu1 %v4392_v7, %s7588_s6  ;;  %v4420_v11 = vsel %vm1080_vm9, %v4417_v45, %v4419_v23  ;;  %v4422_v57 = vsel %vm1080_vm9, %v4419_v23, %v4421_v50  ;;  %v4425_v6 = vrot.slane %v10091_v29, 1  ;;  %7319 = vmatpush3.bf16.msra.mxu1 %v7525_v51 }
 0x293   : > { %v4424_v12 = vsel %vm1080_vm9, %v4421_v50, %v4423_v32  ;;  %7396 = vmatprep.subr.msk.bf16.mxu1 %vm1545_vm11, %v7526_v22  ;;  %v4722_v42 = vsel %vm1545_vm11, %v7526_v22, 0  ;;  %v10179_v25 = vld [vmem:[#allocation3 + $0x40] sm:$0xf]  ;;  %v4855_v23 = vld [vmem:[#allocation3 + $0x3c] sm:$0xf] }
 0x294   : > { %4427 = vrot.lane.b32.xlu0 %v4414_v17, %s7589_s7  ;;  %v4426_v30 = vsel %vm1080_vm9, %v4423_v32, %v4425_v6  ;;  %v10183_v17 = vld [vmem:[#allocation3 + $0x48] sm:$0xff]   ;;  %v10197_v50 = vcombine.low %v4855_v23, %v10179_v25  ;;  %v4857_v51 = vld [vmem:[#allocation3 + $0x44] sm:$0xf] }
 0x295   : > { %v4489_v47 = vshll.u32 %v10183_v17, 16 }
 0x296   : > { %4429 = vrot.lane.b32.xlu1 %v4416_v19, %s7589_s7  ;;  %7321 = vmatpush3.bf16.msra.mxu1 %v4722_v42  ;;  %12044 = vst [vmem:[#allocation7_spill] sm:$0xff] %v10197_v50 }
 0x298   : > { %4431 = vrot.lane.b32.xlu0 %v4418_v8, %s7589_s7 }
 0x29a   : > { %4433 = vrot.lane.b32.xlu1 %v4420_v11, %s7589_s7  ;;  %v10202_v11 = vld [vmem:[%s11896_s2] ss:$0 sm:$0xff] }
 0x29b   : > { %12045 = vst [vmem:[#allocation16_spill] sm:$0xff] %v10202_v11 }
 0x29c   : > { %4435 = vrot.lane.b32.xlu0 %v4422_v57, %s7589_s7 }
 0x29e   : > { %4437 = vrot.lane.b32.xlu1 %v4424_v12, %s7589_s7 }
 0x2a0   : > { %4439 = vrot.lane.b32.xlu0 %v4426_v30, %s7589_s7 }
 0x2a2   : > { %4453 = vrot.lane.b32.xlu1 %v9803_v54, %s7590_s8 }
 0x2a3   : > { %v7278_v58 = vpop.f32.mrb[8].mxu1 }
 0x2a4   : > { %4455 = vrot.lane.b32.xlu0 %v9824_v15, %s7590_s8  ;;  %v2587_v9 = vadd.f32 %v10158_v2, %v7278_v58  ;;  %v2578_v31 = vpop.f32.mrb[9].mxu1 }
 0x2a5   : > { %v7279_v35 = vpop.f32.mrb[10].mxu1  ;;  %v10219_v31 = vld [vmem:[#allocation3 + $0x50] sm:$0xf] }
 0x2a6   : > { %4504 = vrot.lane.b32.xlu1 %v9860_v34, %s7591_s13  ;;  %v2618_v40 = vmax.f32 %v2587_v9, 0.0  ;;  %v2581_v53 = vpop.f32.mrb[11].mxu1  ;;  %v4926_v9 = vshll.u32 %v10197_v50, 16 }
 0x2a7   : > { %v2582_v44 = vadd.f32 %v10158_v2, %v2581_v53 }
 0x2a8   : > { %v7144_v10 = vpack.c.bf16 %v2618_v40, %v2618_v40  ;;  %4506 = vrot.lane.b32.xlu0 %v9871_v3, %s7591_s13 }
 0x2a9   : > { %v2617_v39 = vmax.f32 %v2582_v44, 0.0  ;;  %v4485_v44 = vshrl.u32 %v9958_v62, 16 }
 0x2aa   : > { %v2774_v33 = vshrl.u32 %v7144_v10, 16  ;;  %4533 = vrot.lane.b32.xlu1 %v9971_v59, %s7592_s16  ;;  %v2777_v41 = vshll.u32 %v7144_v10, 16  ;;  %v10226_v10 = vrot.slane %v4489_v47, 1 }
 0x2ab   : > { %v7143_v63 = vpack.c.bf16 %v2617_v39, %v2617_v39  ;;  %v10192_v8 = vpop.permute.xlu0 %4247 }
 0x2ac   : > { %v2776_v43 = vrot.slane %v2774_v33, 7  ;;  %4535 = vrot.lane.b32.xlu0 %v9939_v55, %s7592_s16 }
 0x2ad   : > { %v2765_v34 = vshrl.u32 %v7143_v63, 16  ;;  %v2768_v21 = vshll.u32 %v7143_v63, 16 }
 0x2ae   : > { %v2781_v0 = vrot.slane %v2776_v43, 4  ;;  %4457 = vrot.lane.b32.xlu1 %v9838_v28, %s7590_s8  ;;  %v2779_v59 = vor.u32 %v2777_v41, %v2776_v43 }
 0x2af   : > { %v2767_v7 = vrot.slane %v2765_v34, 7  ;;  %v10207_v57 = vpop.permute.xlu1 %4249 }
 0x2b0   : > { %v2789_v3 = vsel %vm7866_vm6, %v2781_v0, %v9704_v1  ;;  %4459 = vrot.lane.b32.xlu0 %v9864_v16, %s7590_s8  ;;  %v4928_v0 = vrot.slane %v4926_v9, 1  ;;  %v7535_v16 = vld [vmem:[%s11897_s3 + $0x10] ss:$0 sps:$4 sm:$0x33]  }
 0x2b1   : > { %2847 = vst.msk [vmem:[#allocation3 + $0x74] sm:$0xf] %vm376_vm3, %v2789_v3  ;;  %v2770_v24 = vor.u32 %v2768_v21, %v2767_v7  ;;  %v2772_v55 = vrot.slane %v2767_v7, 4  ;;  %v4924_v7 = vshrl.u32 %v10197_v50, 16  ;;  %v4871_v21 = vld [vmem:[#allocation3 + $0x3c] sm:$0xe] }
 0x2b2   : > { %4508 = vrot.lane.b32.xlu1 %v9885_v36, %s7591_s13  ;;  %v4858_v36 = vld [vmem:[#allocation3 + $0x48] sm:$0xf]  ;;  %v10211_v22 = vpop.permute.xlu0 %4251 }
 0x2b3   : > { %v2771_v45 = vsel %vm7866_vm6, %v9711_v13, %v2770_v24  ;;  %v2780_v19 = vsel %vm7866_vm6, %v2772_v55, %v2779_v59 }
 0x2b4   : > { %2845 = vst.msk [vmem:[#allocation3 + $0x6c] sm:$0xf] %vm376_vm3, %v2771_v45  ;;  %2846 = vst.msk [vmem:[#allocation3 + $0x70] sm:$0xf] %vm376_vm3, %v2780_v19  ;;  %4510 = vrot.lane.b32.xlu0 %v9975_v26, %s7591_s13  ;;  %v10209_v26 = vcombine.low %v4857_v51, %v4858_v36  ;;  %v6955_v45 = vcombine.low %v4871_v21, %v10179_v25 }
 0x2b6   : > { %4537 = vrot.lane.b32.xlu1 %v9942_v4, %s7592_s16  ;;  %v7292_v32 = vpop.f32.mrb[16].mxu0  ;;  %12046 = vst [vmem:[#allocation11_spill] sm:$0xff] %v10209_v26  ;;  %v10217_v4 = vld [vmem:[#allocation3 + $0x4c] sm:$0xf]  ;;  %v4931_v33 = vshll.u32 %v10209_v26, 16  ;;  %v4935_v25 = vshrl.u32 %v10209_v26, 16 }
 0x2b7   : > { %v3496_v12 = vpop.f32.mrb[17].mxu0  ;;  %v10233_v63 = vcombine.low %v10217_v4, %v10219_v31 }
 0x2b8   : > { %v3497_v30 = vadd.f32 %v10202_v11, %v3496_v12  ;;  %v7293_v58 = vpop.f32.mrb[18].mxu0  ;;  %4539 = vrot.lane.b32.xlu0 %v9961_v38, %s7592_s16  ;;  %v10228_v38 = vpop.permute.xlu1 %4253  ;;  %v4933_v32 = vrot.slane %v4931_v33, 1  ;;  %v5006_v33 = vrot.slane %v10209_v26, 1 }
 0x2b9   : > { %v3508_v35 = vadd.f32 %v7293_v58, %v10202_v11  ;;  %v3499_v42 = vpop.f32.mrb[19].mxu0  ;;  %12047 = vst [vmem:[#allocation30_spill] sm:$0xff] %v10233_v63  ;;  %v10239_v59 = vpop.permute.xlu0 %4255  ;;  %v4939_v47 = vshll.u32 %v10233_v63, 16  ;;  %v4929_v58 = vor.u32 %v4928_v0, %v4924_v7 }
 0x2ba   : > { %v3558_v40 = vmax.f32 %v3497_v30, 0.0  ;;  %v3500_v53 = vadd.f32 %v10202_v11, %v3499_v42  ;;  %4461 = vrot.lane.b32.xlu1 %v9928_v14, %s7590_s8  ;;  %v4487_v14 = vor.u32 %v4485_v44, %v9978_v48  ;;  %12048 = vst [vmem:[#allocation18_spill] sm:$0xff] %v10239_v59  ;;  %v11923_v48 = vrot.slane %v10183_v17, 1 }
 0x2bb   : > { %v3561_v39 = vmax.f32 %v3508_v35, 0.0  ;;  %v6956_v42 = vcombine.low %v4858_v36, %v10217_v4  ;;  %v4937_v0 = vor.u32 %v4935_v25, %v4933_v32 }
 0x2bc   : > { %v7148_v43 = vpack.c.bf16 %v3558_v40, %v3558_v40  ;;  %v3559_v34 = vmax.f32 %v3500_v53, 0.0  ;;  %4463 = vrot.lane.b32.xlu0 %v9958_v62, %s7590_s8  ;;  %v4492_v55 = vsel %vm997_vm10, %v4487_v14, %v10226_v10  ;;  %v4530_v36 = vsel %vm1080_vm9, %v4527_v18, %v11923_v48 }
 0x2bd   : > { %v7151_v41 = vpack.c.bf16 %v3561_v39, %v3561_v39  ;;  %v10246_v23 = vpop.permute.xlu1 %4257  ;;  %v4934_v18 = vsel %vm997_vm10, %v4929_v58, %v4933_v32  ;;  %v5005_v58 = vrot.slane %v6955_v45, 1 }
 0x2be   : > { %v3635_v3 = vshrl.u32 %v7148_v43, 16  ;;  %v7149_v24 = vpack.c.bf16 %v3559_v34, %v3559_v34  ;;  %4512 = vrot.lane.b32.xlu1 %v9995_v61, %s7591_s13  ;;  %12049 = vst [vmem:[#allocation31_spill] sm:$0xff] %v10246_v23  ;;  %v3638_v12 = vshll.u32 %v7148_v43, 16  ;;  %v3784_v61 = vld [vmem:[#allocation3 + $0x84] sm:$0xf] }
 0x2bf   : > { %v3661_v19 = vshrl.u32 %v7151_v41, 16  ;;  %v3664_v35 = vshll.u32 %v7151_v41, 16  ;;  %v10260_v43 = vld [vmem:[#allocation3 + $0x54] sm:$0xf]  ;;  %v10270_v41 = vrot.slane %v4939_v47, 1  ;;  %v5072_v47 = vshll.u32 %v6956_v42, 16 }
 0x2c0   : > { %v3637_v51 = vrot.slane %v3635_v3, 7  ;;  %v3643_v30 = vshrl.u32 %v7149_v24, 16  ;;  %4514 = vrot.lane.b32.xlu0 %v4492_v55, %s7591_s13  ;;  %v3646_v44 = vshll.u32 %v7149_v24, 16  ;;  %v10275_v24 = vld [vmem:[#allocation3 + $0x58] sm:$0xf]  ;;  %v5007_v25 = vsel %vm1080_vm9, %v5005_v58, %v5006_v33 }
 0x2c1   : > { %v10251_v9 = vrot.slane %v3661_v19, 7  ;;  %v10277_v55 = vld [vmem:[#allocation3 + $0x5c] sm:$0xf]  ;;  %v10285_v19 = vcombine.low %v10219_v31, %v10260_v43  ;;  %v4942_v32 = vsel %vm997_vm10, %v4937_v0, %v10270_v41 }
 0x2c2   : > { %v3640_v40 = vor.u32 %v3638_v12, %v3637_v51  ;;  %v3645_v53 = vrot.slane %v3643_v30, 7  ;;  %4541 = vrot.lane.b32.xlu1 %v9983_v46, %s7592_s16  ;;  %v10257_v39 = vpop.permute.xlu0 %4259  ;;  %v3641_v46 = vrot.slane %v3637_v51, 4 }
 0x2c3   : > { %12050 = vst [vmem:[#allocation36_spill] sm:$0xff] %v10257_v39  ;;  %v3666_v34 = vor.u32 %v3664_v35, %v10251_v9  ;;  %v10263_v14 = vpop.permute.xlu1 %4261  ;;  %v10305_v35 = vcombine.low %v10275_v24, %v10277_v55  ;;  %v5152_v58 = vrot.slane %v10285_v19, 1 }
 0x2c4   : > { %12051 = vst [vmem:[#allocation37_spill] sm:$0xff] %v10263_v14  ;;  %v3785_v7 = vsel %vm7874_vm7, %v3640_v40, %v3784_v61  ;;  %v3648_v21 = vor.u32 %v3646_v44, %v3645_v53  ;;  %v3650_v3 = vrot.slane %v3645_v53, 4  ;;  %4543 = vrot.lane.b32.xlu0 %v4530_v36, %s7592_s16  ;;  %v11922_v61 = vrot.slane %v10233_v63, 1  ;;  %v3801_v44 = vld [vmem:[#allocation3 + $0xc0] sm:$0x1] }
 0x2c5   : > { %3786 = vst [vmem:[#allocation3 + $0x84] sm:$0xf] %v3785_v7  ;;  %v3667_v62 = vsel %vm7866_vm6, %v9711_v13, %v3666_v34  ;;  %v5074_v40 = vrot.slane %v5072_v47, 1  ;;  %v5077_v53 = vshll.u32 %v10285_v19, 16  ;;  %v3802_v45 = vsel %vm7883_vm8, %v9446_v52, %v3801_v44 }
 0x2c6   : > { %3789 = vst.msk [vmem:[#allocation3 + $0x90] sm:$0xf] %vm376_vm3, %v3667_v62  ;;  %v3649_v51 = vsel %vm7866_vm6, %v3641_v46, %v3648_v21  ;;  %v3658_v12 = vsel %vm7866_vm6, %v3650_v3, %v9704_v1  ;;  %4986 = vrot.lane.b32.xlu1 %v4934_v18, %s7586_s29  ;;  %v10294_v30 = vpop.permute.xlu0 %4281  ;;  %v5009_v0 = vsel %vm1080_vm9, %v5006_v33, %v11922_v61  ;;  %v5070_v46 = vshrl.u32 %v6956_v42, 16  ;;  %v4876_v21 = vld [vmem:[#allocation3 + $0x48] sm:$0xe] }
 0x2c7   : > { %3787 = vst.msk [vmem:[#allocation3 + $0x88] sm:$0xf] %vm376_vm3, %v3649_v51  ;;  %3788 = vst.msk [vmem:[#allocation3 + $0x8c] sm:$0xf] %vm376_vm3, %v3658_v12  ;;  %v10298_v31 = vpop.permute.xlu1 %4283  ;;  %v5085_v7 = vshll.u32 %v10305_v35, 16  ;;  %v5079_v62 = vrot.slane %v5077_v53, 1  ;;  %v6965_v18 = vcombine.low %v4876_v21, %v10217_v4 }
 0x2c8   : > { %4988 = vrot.lane.b32.xlu0 %v4942_v32, %s7586_s29  ;;  %3803 = vst [vmem:[#allocation3 + $0xc0] sm:$0x1] %v3802_v45  ;;  %v5075_v3 = vor.u32 %v5074_v40, %v5070_v46  ;;  %v5081_v52 = vshrl.u32 %v10285_v19, 16  ;;  %v4140_v4 = vld [vmem:[#allocation3 + $0x50] sm:$0xf]  ;;  %v10341_v40 = vcombine.low %v10260_v43, %v10275_v24  ;;  %v11921_v46 = vrot.slane %v10305_v35, 1 }
 0x2c9   : > { %v10328_v47 = vrot.slane %v5085_v7, 1  ;;  %v5151_v32 = vrot.slane %v6965_v18, 1  ;;  %v10353_v7 = vld [vmem:[#allocation3 + $0x60] sm:$0xf] }
 0x2ca   : > { %5020 = vrot.lane.b32.xlu1 %v5007_v25, %s7585_s28  ;;  %v10311_v34 = vpop.permute.xlu0 %4285  ;;  %v5080_v51 = vsel %vm997_vm10, %v5075_v3, %v5079_v62  ;;  %v5083_v12 = vor.u32 %v5081_v52, %v5079_v62  ;;  %12054 = vst [vmem:[#allocation25_spill] sm:$0xff] %v10341_v40  ;;  %v4947_v21 = vshll.u32 %v10341_v40, 16 }
 0x2cb   : > { %v10316_v36 = vpop.permute.xlu1 %4287  ;;  %v5153_v44 = vsel %vm1080_vm9, %v5151_v32, %v5152_v58  ;;  %v5155_v32 = vsel %vm1080_vm9, %v5152_v58, %v11921_v46  ;;  %v7531_v58 = vld [vmem:[%s11897_s3] sm:$0xff]  }
 0x2cc   : > { %5022 = vrot.lane.b32.xlu0 %v5009_v0, %s7585_s28  ;;  %v5088_v25 = vsel %vm997_vm10, %v5083_v12, %v10328_v47  ;;  %v10367_v12 = vcombine.low %v10277_v55, %v10353_v7  ;;  %7338 = vmatprep.subr.bf16.mxu0 %v7531_v58 }
 0x2cd   : > { %7339 = vmatpush3.bf16.msra.mxu0 %v7531_v58 }
 0x2ce   : > { %5050 = vrot.lane.b32.xlu1 %v6956_v42, %s7587_s30  ;;  %v10325_v20 = vpop.permute.xlu0 %4289  ;;  %v4141_v42 = vld [vmem:[#allocation3 + $0x54] sm:$0x1]  ;;  %12057 = vst [vmem:[#allocation28_spill] sm:$0xff] %v10367_v12 }
 0x2cf   : > { %12052 = vst [vmem:[#allocation27_spill] sm:$0xff] %v10325_v20  ;;  %v10330_v33 = vpop.permute.xlu1 %4291  ;;  %v10347_v45 = vcombine.low %v4140_v4, %v4141_v42  ;;  %v4493_v42 = vshrl.u32 %v10183_v17, 16 }
 0x2d0   : > { %12053 = vst [vmem:[#allocation8_spill] sm:$0xff] %v10330_v33  ;;  %5052 = vrot.lane.b32.xlu0 %v10285_v19, %s7587_s30 }
 0x2d1   : > { %v4497_v18 = vshll.u32 %v10347_v45, 16  ;;  %v4501_v14 = vshrl.u32 %v10347_v45, 16  ;;  %v11927_v58 = vrot.slane %v10347_v45, 1  ;;  %v12067_v37 = vrot.slane %v10347_v45, 1 }
 0x2d2   : > { %5132 = vrot.lane.b32.xlu1 %v5080_v51, %s7588_s6  ;;  %v10343_v53 = vpop.permute.xlu0 %4293 }
 0x2d3   : > { %12055 = vst [vmem:[#allocation9_spill] sm:$0xff] %v10343_v53  ;;  %v10349_v19 = vpop.permute.xlu1 %4295 }
 0x2d4   : > { %5134 = vrot.lane.b32.xlu0 %v5088_v25, %s7588_s6  ;;  %12056 = vst [vmem:[#allocation19_spill] sm:$0xff] %v10349_v19 }
 0x2d6   : > { %5166 = vrot.lane.b32.xlu1 %v5153_v44, %s7589_s7  ;;  %v10361_v52 = vpop.permute.xlu0 %4311  ;;  %v10377_v44 = vrot.slane %v4947_v21, 1  ;;  %v4951_v21 = vshrl.u32 %v10341_v40, 16 }
 0x2d7   : > { %v7282_v0 = vpop.f32.mrb[12].mxu1  ;;  %v10374_v25 = vpop.permute.xlu1 %4313 }
 0x2d8   : > { %4441 = vrot.lane.b32.xlu0 %v4425_v6, %s7589_s7  ;;  %v2594_v43 = vpop.f32.mrb[13].mxu1  ;;  %v10379_v0 = vld [vmem:[#allocation3 + $0x64] sm:$0xf] }
 0x2d9   : > { %v2595_v3 = vadd.f32 %v10158_v2, %v2594_v43  ;;  %v7283_v62 = vpop.f32.mrb[14].mxu1  ;;  %v10381_v43 = vld [vmem:[#allocation3 + $0x68] sm:$0xf] }
 0x2da   : > { %4465 = vrot.lane.b32.xlu1 %v10183_v17, %s7590_s8  ;;  %v2597_v51 = vpop.f32.mrb[15].mxu1  ;;  %v4499_v62 = vrot.slane %v4497_v18, 1  ;;  %v4953_v18 = vor.u32 %v4951_v21, %v10377_v44 }
 0x2db   : > { %v2620_v29 = vmax.f32 %v2595_v3, 0.0  ;;  %v2598_v6 = vadd.f32 %v10158_v2, %v2597_v51  ;;  %v4495_v2 = vor.u32 %v4493_v42, %v10226_v10  ;;  %v6931_v51 = vcombine.low %v4140_v4, %v4140_v4  ;;  %v10395_v10 = vpop.permute.xlu0 %4315  ;;  %v10403_v26 = vpop.permute.xlu1 %4317 }
 0x2dc   : > { %5168 = vrot.lane.b32.xlu0 %v5155_v32, %s7589_s7  ;;  %v4955_v32 = vshll.u32 %v10367_v12, 16 }
 0x2dd   : > { %v7146_v55 = vpack.c.bf16 %v2620_v29, %v2620_v29  ;;  %v2621_v3 = vmax.f32 %v2598_v6, 0.0  ;;  %v10393_v29 = vcombine.low %v10379_v0, %v10381_v43  ;;  %v4500_v48 = vsel %vm997_vm10, %v4495_v2, %v4499_v62 }
 0x2de   : > { %5192 = vrot.lane.b32.xlu1 %v10341_v40, %s7590_s8  ;;  %v4957_v19 = vrot.slane %v4955_v32, 1 }
 0x2df   : > { %v2792_v46 = vshrl.u32 %v7146_v55, 16  ;;  %v7147_v61 = vpack.c.bf16 %v2621_v3, %v2621_v3  ;;  %v2795_v4 = vshll.u32 %v7146_v55, 16  ;;  %v7532_v3 = vld [vmem:[%s11897_s3 + $0x8] sm:$0xff]   ;;  %v4881_v55 = vld [vmem:[#allocation3 + $0x54] sm:$0xe] }
 0x2e0   : > { %4467 = vrot.lane.b32.xlu0 %v6931_v51, %s7590_s8  ;;  %7340 = vmatprep.subr.bf16.mxu0 %v7532_v3  ;;  %v10411_v2 = vsel %vm997_vm10, %v4953_v18, %v4957_v19  ;;  %v6971_v32 = vcombine.low %v4881_v55, %v10275_v24  ;;  %v10423_v18 = vpop.permute.xlu0 %4319  ;;  %v4503_v24 = vor.u32 %v4501_v14, %v4499_v62  ;;  %v10438_v14 = vpop.permute.xlu1 %4321 }
 0x2e1   : > { %v2794_v6 = vrot.slane %v2792_v46, 7  ;;  %v2801_v42 = vshrl.u32 %v7147_v61, 16  ;;  %v2804_v21 = vshll.u32 %v7147_v61, 16  ;;  %v4963_v46 = vshll.u32 %v10393_v29, 16  ;;  %7341 = vmatpush3.bf16.msra.mxu0 %v7532_v3  ;;  %12058 = vst [vmem:[#allocation32_spill] sm:$0xff] %v10423_v18  ;;  %12059 = vst [vmem:[#allocation33_spill] sm:$0xff] %v10438_v14 }
 0x2e2   : > { %4516 = vrot.lane.b32.xlu1 %v4500_v48, %s7591_s13  ;;  %v4959_v48 = vshrl.u32 %v10367_v12, 16  ;;  %7397 = vmatprep.subr.msk.bf16.mxu0 %vm1545_vm11, %v7535_v16 }
 0x2e3   : > { %v2797_v51 = vor.u32 %v2795_v4, %v2794_v6  ;;  %v2803_v50 = vrot.slane %v2801_v42, 7  ;;  %v2799_v4 = vrot.slane %v2794_v6, 4 }
 0x2e4   : > { %5194 = vrot.lane.b32.xlu0 %v10367_v12, %s7590_s8  ;;  %v4961_v3 = vor.u32 %v4959_v48, %v4957_v19 }
 0x2e5   : > { %v2798_v61 = vsel %vm7866_vm6, %v9711_v13, %v2797_v51  ;;  %v2806_v42 = vor.u32 %v2804_v21, %v2803_v50  ;;  %v2808_v53 = vrot.slane %v2803_v50, 4  ;;  %v10432_v51 = vrot.slane %v4963_v46, 1 }
 0x2e6   : > { %2848 = vst.msk [vmem:[#allocation3 + $0x78] sm:$0xf] %vm376_vm3, %v2798_v61  ;;  %5243 = vrot.lane.b32.xlu1 %v10411_v2, %s7591_s13  ;;  %v5461_v21 = vsel %vm1545_vm11, %v7535_v16, 0  ;;  %v10449_v61 = vrot.slane %v10367_v12, 1  ;;  %v10473_v12 = vld [vmem:[#allocation3 + $0x84] sm:$0xf] }
 0x2e7   : > { %v2807_v55 = vsel %vm7866_vm6, %v2799_v4, %v2806_v42  ;;  %v2816_v50 = vsel %vm7866_vm6, %v2808_v53, %v9438_v5  ;;  %v7296_v6 = vpop.f32.mrb[20].mxu0  ;;  %7343 = vmatpush3.bf16.msra.mxu0 %v5461_v21  ;;  %v12060_v53 = vrot.slane %v10183_v17, 1  ;;  %v5262_v4 = vrot.slane %v6971_v32, 1  ;;  %v10463_v32 = vpop.permute.xlu0 %4323 }
 0x2e8   : > { %2849 = vst.msk [vmem:[#allocation3 + $0x7c] sm:$0xf] %vm376_vm3, %v2807_v55  ;;  %2850 = vst.msk [vmem:[#allocation3 + $0x80] sm:$0xf] %vm376_vm3, %v2816_v50  ;;  %4518 = vrot.lane.b32.xlu0 %v4503_v24, %s7591_s13  ;;  %v3521_v19 = vadd.f32 %v7296_v6, %v10202_v11  ;;  %v3512_v62 = vpop.f32.mrb[21].mxu0  ;;  %v4943_v50 = vshrl.u32 %v10233_v63, 16  ;;  %v10456_v17 = vsel %vm997_vm10, %v4961_v3, %v10432_v51 }
 0x2e9   : > { %v4532_v46 = vsel %vm1080_vm9, %v12060_v53, %v11927_v58  ;;  %v3513_v16 = vadd.f32 %v10202_v11, %v3512_v62  ;;  %v7297_v48 = vpop.f32.mrb[22].mxu0  ;;  %12061 = vst [vmem:[#allocation38_spill] sm:$0xff] %v10456_v17  ;;  %v10459_v62 = vld [vmem:[#allocation3 + $0x88] sm:$0xf]  ;;  %v10461_v53 = vld [vmem:[#allocation3 + $0x8c] sm:$0xf] }
 0x2ea   : > { %4545 = vrot.lane.b32.xlu1 %v4532_v46, %s7592_s16  ;;  %v3564_v42 = vmax.f32 %v3521_v19, 0.0  ;;  %v3524_v24 = vadd.f32 %v7297_v48, %v10202_v11  ;;  %v3515_v55 = vpop.f32.mrb[23].mxu0  ;;  %12062 = vst [vmem:[#allocation20_spill] sm:$0xff] %v10463_v32  ;;  %v4945_v3 = vor.u32 %v4943_v50, %v10270_v41 }
 0x2eb   : > { %v3562_v6 = vmax.f32 %v3513_v16, 0.0  ;;  %v5263_v16 = vsel %vm1080_vm9, %v5262_v4, %v10449_v61  ;;  %v10470_v55 = vpop.permute.xlu1 %4325  ;;  %v12065_v4 = vrot.slane %v10393_v29, 1 }
 0x2ec   : > { %v7154_v46 = vpack.c.bf16 %v3564_v42, %v3564_v42  ;;  %v3565_v19 = vmax.f32 %v3524_v24, 0.0  ;;  %5245 = vrot.lane.b32.xlu0 %v10456_v17, %s7591_s13  ;;  %12063 = vst [vmem:[#allocation29_spill] sm:$0xff] %v10470_v55  ;;  %v10477_v42 = vcombine.low %v10459_v62, %v10461_v53 }
 0x2ed   : > { %v7152_v48 = vpack.c.bf16 %v3562_v6, %v3562_v6  ;;  %v4950_v6 = vsel %vm997_vm10, %v4945_v3, %v10377_v44  ;;  %v10485_v41 = vsel %vm1080_vm9, %v10449_v61, %v12065_v4  ;;  %v5595_v5 = vld [vmem:[#allocation3 + $0x78] sm:$0xf]  ;;  %v10496_v4 = vpop.permute.xlu0 %4393 }
 0x2ee   : > { %v3688_v58 = vshrl.u32 %v7154_v46, 16  ;;  %v7155_v21 = vpack.c.bf16 %v3565_v19, %v3565_v19  ;;  %5272 = vrot.lane.b32.xlu1 %v5263_v16, %s7592_s16  ;;  %12064 = vst [vmem:[#allocation34_spill] sm:$0xff] %v10477_v42  ;;  %12066 = vst [vmem:[#allocation39_spill] sm:$0xff] %v10485_v41  ;;  %v3668_v16 = vrot.slane %v10251_v9, 4  ;;  %v3691_v32 = vshll.u32 %v7154_v46, 16 }
 0x2ef   : > { %v3670_v24 = vshrl.u32 %v7152_v48, 16  ;;  %v5596_v50 = vld [vmem:[#allocation3 + $0x7c] sm:$0xf]  ;;  %v5597_v19 = vld [vmem:[#allocation3 + $0x80] sm:$0xf]  ;;  %v3673_v44 = vshll.u32 %v7152_v48, 16  ;;  %v10501_v48 = vpop.permute.xlu1 %4395 }
 0x2f0   : > { %v3690_v55 = vrot.slane %v3688_v58, 7  ;;  %v3697_v39 = vshrl.u32 %v7155_v21, 16  ;;  %4547 = vrot.lane.b32.xlu0 %v12067_v37, %s7592_s16  ;;  %v10491_v3 = vcombine.low %v5595_v5, %v5596_v50  ;;  %v10494_v14 = vcombine.low %v5597_v19, %v10473_v12 }
 0x2f1   : > { %v3672_v17 = vrot.slane %v3670_v24, 7  ;;  %v3700_v9 = vshll.u32 %v7155_v21, 16  ;;  %v5679_v58 = vshll.u32 %v10477_v42, 16 }
 0x2f2   : > { %12068 = vst [vmem:[#allocation40_spill] sm:$0xff] %v10491_v3  ;;  %12069 = vst [vmem:[#allocation21_spill] sm:$0xff] %v10494_v14  ;;  %v3693_v18 = vor.u32 %v3691_v32, %v3690_v55  ;;  %v3699_v33 = vrot.slane %v3697_v39, 7  ;;  %4990 = vrot.lane.b32.xlu1 %v4950_v6, %s7586_s29  ;;  %v3695_v46 = vrot.slane %v3690_v55, 4  ;;  %v5666_v24 = vshll.u32 %v10491_v3, 16 }
 0x2f3   : > { %v3675_v45 = vor.u32 %v3673_v44, %v3672_v17  ;;  %v3677_v37 = vrot.slane %v3672_v17, 4  ;;  %v5671_v39 = vshll.u32 %v10494_v14, 16  ;;  %v5664_v32 = vshrl.u32 %v10491_v3, 16 }
 0x2f4   : > { %v3694_v5 = vsel %vm7866_vm6, %v9711_v13, %v3693_v18  ;;  %v3702_v19 = vor.u32 %v3700_v9, %v3699_v33  ;;  %v3704_v20 = vrot.slane %v3699_v33, 4  ;;  %5274 = vrot.lane.b32.xlu0 %v10485_v41, %s7592_s16  ;;  %v5668_v55 = vrot.slane %v5666_v24, 1  ;;  %v10526_v9 = vpop.permute.xlu0 %4397 }
 0x2f5   : > { %3792 = vst.msk [vmem:[#allocation3 + $0x9c] sm:$0xf] %vm376_vm3, %v3694_v5  ;;  %v3676_v17 = vsel %vm7866_vm6, %v3668_v16, %v3675_v45  ;;  %v3685_v21 = vsel %vm7866_vm6, %v3677_v37, %v9704_v1  ;;  %v5673_v6 = vrot.slane %v5671_v39, 1  ;;  %v5675_v16 = vshrl.u32 %v10494_v14, 16 }
 0x2f6   : > { %3790 = vst.msk [vmem:[#allocation3 + $0x94] sm:$0xf] %vm376_vm3, %v3676_v17  ;;  %3791 = vst.msk [vmem:[#allocation3 + $0x98] sm:$0xf] %vm376_vm3, %v3685_v21  ;;  %v3703_v33 = vsel %vm7866_vm6, %v3695_v46, %v3702_v19  ;;  %v3712_v18 = vsel %vm7866_vm6, %v3704_v20, %v9704_v1  ;;  %v5669_v44 = vor.u32 %v5668_v55, %v5664_v32  ;;  %v10530_v37 = vrot.slane %v5679_v58, 1  ;;  %v10534_v19 = vpop.permute.xlu1 %4399 }
 0x2f7   : > { %3793 = vst.msk [vmem:[#allocation3 + $0xa0] sm:$0xf] %vm376_vm3, %v3703_v33  ;;  %3794 = vst.msk [vmem:[#allocation3 + $0xa4] sm:$0xf] %vm376_vm3, %v3712_v18  ;;  %v5677_v45 = vor.u32 %v5675_v16, %v5673_v6  ;;  %v5611_v46 = vld [vmem:[#allocation3 + $0x78] sm:$0xe] }
 0x2f8   : > { %4992 = vrot.lane.b32.xlu0 %v10411_v2, %s7586_s29  ;;  %12070 = vst [vmem:[#allocation26_spill] sm:$0xff] %v10530_v37  ;;  %v5674_v24 = vsel %vm997_vm10, %v5669_v44, %v5673_v6  ;;  %v5010_v20 = vrot.slane %v10341_v40, 1  ;;  %v7013_v5 = vcombine.low %v5611_v46, %v5596_v50  ;;  %v4867_v17 = vld [vmem:[#allocation3 + $0x6c] sm:$0xf]  ;;  %v10539_v21 = vld [vmem:[#allocation3 + $0x70] sm:$0xf]  ;;  %v10546_v50 = vpop.permute.xlu0 %4401  ;;  %v10559_v44 = vcombine.low %v10353_v7, %v10379_v0 }
 0x2f9   : > { %5726 = vrot.lane.b32.xlu1 %v5674_v24, %s7586_s29  ;;  %v5682_v39 = vsel %vm997_vm10, %v5677_v45, %v10530_v37  ;;  %12071 = vst [vmem:[#allocation23_spill] sm:$0xff] %v10539_v21  ;;  %v12072_v2 = vrot.slane %v10233_v63, 1  ;;  %v5746_v55 = vrot.slane %v10494_v14, 1  ;;  %12073 = vst [vmem:[#allocation12_spill] sm:$0xff] %v10546_v50  ;;  %v10550_v33 = vcombine.low %v4867_v17, %v10539_v21  ;;  %v4870_v18 = vld [vmem:[#allocation3 + $0x78] sm:$0x1] }
 0x2fa   : > { %v5745_v32 = vrot.slane %v7013_v5, 1  ;;  %v5013_v6 = vsel %vm1080_vm9, %v5010_v20, %v10449_v61  ;;  %v10554_v16 = vpop.permute.xlu1 %4403  ;;  %v10561_v45 = vld [vmem:[#allocation3 + $0x74] sm:$0xf]  ;;  %v11933_v24 = vrot.slane %v10477_v42, 1  ;;  %v7014_v5 = vcombine.low %v10473_v12, %v10459_v62 }
 0x2fb   : > { %v5011_v58 = vsel %vm1080_vm9, %v12072_v2, %v5010_v20  ;;  %12074 = vst [vmem:[#allocation13_spill] sm:$0xff] %v10550_v33  ;;  %12075 = vst [vmem:[#allocation15_spill] sm:$0xff] %v10554_v16  ;;  %v10573_v20 = vld [vmem:[#allocation3 + $0x90] sm:$0xf]  ;;  %v10576_v7 = vcombine.low %v10381_v43, %v4867_v17  ;;  %v4971_v0 = vshll.u32 %v10550_v33, 16 }
 0x2fc   : > { %5728 = vrot.lane.b32.xlu0 %v5682_v39, %s7586_s29  ;;  %v5747_v46 = vsel %vm1080_vm9, %v5745_v32, %v5746_v55  ;;  %v10568_v39 = vcombine.low %v10561_v45, %v4870_v18  ;;  %v5749_v2 = vsel %vm1080_vm9, %v5746_v55, %v11933_v24  ;;  %v5093_v18 = vshll.u32 %v10559_v44, 16 }
 0x2fd   : > { %5024 = vrot.lane.b32.xlu1 %v5011_v58, %s7585_s28  ;;  %v10585_v12 = vld [vmem:[#allocation3 + $0x94] sm:$0xf]  ;;  %v10587_v32 = vld [vmem:[#allocation3 + $0x98] sm:$0xf]  ;;  %v10592_v43 = vcombine.low %v10461_v53, %v10573_v20  ;;  %v5812_v17 = vshll.u32 %v7014_v5, 16  ;;  %v5101_v55 = vshll.u32 %v10576_v7, 16 }
 0x2fe   : > { %12076 = vst [vmem:[#allocation14_spill] sm:$0xff] %v10568_v39  ;;  %v10604_v14 = vcombine.low %v10585_v12, %v10587_v32  ;;  %v5089_v53 = vshrl.u32 %v10305_v35, 16 }
 0x2ff   : > { %v5814_v21 = vrot.slane %v5812_v17, 1  ;;  %v5817_v41 = vshll.u32 %v10592_v43, 16  ;;  %v5810_v17 = vshrl.u32 %v7014_v5, 16  ;;  %v5821_v59 = vshrl.u32 %v10592_v43, 16 }
 0x300   : > { %5026 = vrot.lane.b32.xlu0 %v5013_v6, %s7585_s28  ;;  %v4979_v6 = vshll.u32 %v10568_v39, 16  ;;  %v5095_v39 = vrot.slane %v5093_v18, 1 }
 0x301   : > { %5760 = vrot.lane.b32.xlu1 %v5747_v46, %s7585_s28  ;;  %v5815_v23 = vor.u32 %v5814_v21, %v5810_v17 }
 0x302   : > { %v10570_v61 = vpop.permute.xlu0 %4405  ;;  %v10615_v16 = vrot.slane %v4979_v6, 1 }
 0x303   : > { %12077 = vst [vmem:[#allocation17_spill] sm:$0xff] %v10570_v61  ;;  %v5091_v61 = vor.u32 %v5089_v53, %v10328_v47  ;;  %v5825_v53 = vshll.u32 %v10604_v14, 16 }
 0x304   : > { %v10582_v58 = vpop.permute.xlu1 %4407  ;;  %5762 = vrot.lane.b32.xlu0 %v5749_v2, %s7585_s28  ;;  %v10600_v2 = vrot.slane %v4971_v0, 1  ;;  %12079 = vst [vmem:[#allocation4_spill] sm:$0xff] %v10615_v16 }
 0x305   : > { %12078 = vst [vmem:[#allocation10_spill] sm:$0xff] %v10582_v58  ;;  %5054 = vrot.lane.b32.xlu1 %v10305_v35, %s7587_s30  ;;  %v4975_v58 = vshrl.u32 %v10550_v33, 16 }
 0x306   : > { %v10595_v46 = vpop.permute.xlu0 %4427 }
 0x307   : > { %v7300_v24 = vpop.f32.mrb[24].mxu0  ;;  %v10624_v18 = vor.u32 %v4975_v58, %v10600_v2  ;;  %v5096_v58 = vsel %vm997_vm10, %v5091_v61, %v5095_v39 }
 0x308   : > { %v10607_v40 = vpop.permute.xlu1 %4429  ;;  %5056 = vrot.lane.b32.xlu0 %v10559_v44, %s7587_s30  ;;  %v3537_v3 = vadd.f32 %v7300_v24, %v10202_v11  ;;  %v3528_v63 = vpop.f32.mrb[25].mxu0  ;;  %v5097_v24 = vshrl.u32 %v10559_v44, 16 }
 0x309   : > { %v7301_v0 = vpop.f32.mrb[26].mxu0  ;;  %5790 = vrot.lane.b32.xlu1 %v7014_v5, %s7587_s30  ;;  %v10621_v63 = vrot.slane %v5101_v55, 1  ;;  %v10635_v55 = vsel %vm997_vm10, %v10624_v18, %v10615_v16  ;;  %v5616_v16 = vld [vmem:[#allocation3 + $0x84] sm:$0xe] }
 0x30a   : > { %v3568_v37 = vmax.f32 %v3537_v3, 0.0  ;;  %v10617_v50 = vpop.permute.xlu0 %4431  ;;  %v3531_v42 = vpop.f32.mrb[27].mxu0  ;;  %v5099_v3 = vor.u32 %v5097_v24, %v5095_v39  ;;  %12081 = vst [vmem:[#allocation42_spill] sm:$0xff] %v10635_v55  ;;  %v7023_v21 = vcombine.low %v5616_v16, %v10459_v62 }
 0x30b   : > { %v3532_v47 = vadd.f32 %v10202_v11, %v3531_v42  ;;  %v5819_v42 = vrot.slane %v5817_v41, 1  ;;  %v5156_v41 = vrot.slane %v10559_v44, 1 }
 0x30c   : > { %v7158_v6 = vpack.c.bf16 %v3568_v37, %v3568_v37  ;;  %v10628_v0 = vpop.permute.xlu1 %4433  ;;  %5792 = vrot.lane.b32.xlu0 %v10592_v43, %s7587_s30  ;;  %v5104_v37 = vsel %vm997_vm10, %v5099_v3, %v10621_v63 }
 0x30d   : > { %12080 = vst [vmem:[#allocation41_spill] sm:$0xff] %v10628_v0  ;;  %v3567_v28 = vmax.f32 %v3532_v47, 0.0  ;;  %5136 = vrot.lane.b32.xlu1 %v5096_v58, %s7588_s6  ;;  %v10644_v0 = vrot.slane %v5825_v53, 1  ;;  %v5820_v17 = vsel %vm997_vm10, %v5815_v23, %v5819_v42  ;;  %v11952_v53 = vrot.slane %v10576_v7, 1 }
 0x30e   : > { %v3724_v5 = vshrl.u32 %v7158_v6, 16  ;;  %v10638_v11 = vpop.permute.xlu0 %4435  ;;  %v3727_v15 = vshll.u32 %v7158_v6, 16  ;;  %v5823_v6 = vor.u32 %v5821_v59, %v5819_v42  ;;  %v12082_v59 = vrot.slane %v10305_v35, 1 }
 0x30f   : > { %v7157_v24 = vpack.c.bf16 %v3567_v28, %v3567_v28  ;;  %v5159_v35 = vsel %vm1080_vm9, %v5156_v41, %v11952_v53 }
 0x310   : > { %v3726_v47 = vrot.slane %v3724_v5, 7  ;;  %v10646_v55 = vpop.permute.xlu1 %4437  ;;  %5138 = vrot.lane.b32.xlu0 %v5104_v37, %s7588_s6  ;;  %v5828_v37 = vsel %vm997_vm10, %v5823_v6, %v10644_v0  ;;  %v5157_v23 = vsel %vm1080_vm9, %v12082_v59, %v5156_v41  ;;  %v10692_v41 = vld [vmem:[#allocation3 + $0x9c] sm:$0xf]  ;;  %v10728_v59 = vld [vmem:[#allocation3 + $0xa4] sm:$0xf] }
 0x311   : > { %v3715_v39 = vshrl.u32 %v7157_v24, 16  ;;  %v3718_v61 = vshll.u32 %v7157_v24, 16  ;;  %5872 = vrot.lane.b32.xlu1 %v5820_v17, %s7588_s6  ;;  %v5892_v24 = vrot.slane %v10592_v43, 1 }
 0x312   : > { %v3731_v28 = vrot.slane %v3726_v47, 4  ;;  %v10652_v3 = vpop.permute.xlu0 %4439  ;;  %v3729_v58 = vor.u32 %v3727_v15, %v3726_v47  ;;  %v5891_v15 = vrot.slane %v7023_v21, 1  ;;  %v4550_v47 = vsel %vm1364_vm12, %v9698_v49, %v10192_v8 }
 0x313   : > { %v3717_v5 = vrot.slane %v3715_v39, 7  ;;  %v4567_v21 = vsel %vm1382_vm13, %v4550_v47, %v10294_v30  ;;  %v11951_v8 = vrot.slane %v10604_v14, 1 }
 0x314   : > { %v3739_v62 = vsel %vm7866_vm6, %v3731_v28, %v9704_v1  ;;  %v4454_v16 = vpop.permute.xlu1 %4453  ;;  %5874 = vrot.lane.b32.xlu0 %v5828_v37, %s7588_s6  ;;  %v4552_v1 = vsel %vm1364_vm12, %v9767_v60, %v10207_v57  ;;  %v4583_v57 = vsel %vm1399_vm14, %v4567_v21, %v10361_v52  ;;  %v10702_v52 = vcombine.low %v10573_v20, %v10585_v12 }
 0x315   : > { %3797 = vst.msk [vmem:[#allocation3 + $0xb0] sm:$0xf] %vm376_vm3, %v3739_v62  ;;  %v3720_v44 = vor.u32 %v3718_v61, %v3717_v5  ;;  %v3722_v42 = vrot.slane %v3717_v5, 4  ;;  %5170 = vrot.lane.b32.xlu1 %v5157_v23, %s7589_s7  ;;  %v4569_v60 = vsel %vm1382_vm13, %v4552_v1, %v10298_v31  ;;  %v10694_v61 = vld [vmem:[#allocation3 + $0x78] sm:$0xf]  ;;  %v4599_v31 = vsel %vm1416_vm15, %v4583_v57, %v10496_v4 }
 0x316   : > { %v4456_v39 = vpop.permute.xlu0 %4455  ;;  %v4585_v17 = vsel %vm1399_vm14, %v4569_v60, %v10374_v25  ;;  %12083 = vst [vmem:[#allocation43_spill] sm:$0xff] %v10702_v52  ;;  %v5893_v6 = vsel %vm1080_vm9, %v5891_v15, %v5892_v24  ;;  %v5895_v4 = vsel %vm1080_vm9, %v5892_v24, %v11951_v8  ;;  %v10716_v20 = vcombine.low %v10587_v32, %v10692_v41 }
 0x317   : > { %v3721_v43 = vsel %vm7866_vm6, %v9711_v13, %v3720_v44  ;;  %v3730_v49 = vsel %vm7866_vm6, %v3722_v42, %v3729_v58  ;;  %v4601_v28 = vsel %vm1416_vm15, %v4585_v17, %v10501_v48  ;;  %v4615_v58 = vsel %vm1433_vm0, %v4599_v31, %v10595_v46 }
 0x318   : > { %3795 = vst.msk [vmem:[#allocation3 + $0xa8] sm:$0xf] %vm376_vm3, %v3721_v43  ;;  %3796 = vst.msk [vmem:[#allocation3 + $0xac] sm:$0xf] %vm376_vm3, %v3730_v49  ;;  %v4505_v30 = vpop.permute.xlu1 %4504  ;;  %5172 = vrot.lane.b32.xlu0 %v5159_v35, %s7589_s7  ;;  %v4631_v25 = vsel %vm1450_vm1, %v4615_v58, %v4454_v16  ;;  %v10720_v37 = vcombine.low %v10561_v45, %v10694_v61  ;;  %v4617_v48 = vsel %vm1433_vm0, %v4601_v28, %v10607_v40  ;;  %v10726_v16 = vld [vmem:[#allocation3 + $0xa0] sm:$0xf] }
 0x319   : > { %5906 = vrot.lane.b32.xlu1 %v5893_v6, %s7589_s7  ;;  %12084 = vst [vmem:[#allocation44_spill] sm:$0xff] %v10716_v20  ;;  %v4647_v46 = vsel %vm1467_vm2, %v4631_v25, %v4505_v30  ;;  %v4633_v23 = vsel %vm1450_vm1, %v4617_v48, %v4456_v39  ;;  %v5687_v44 = vshll.u32 %v10702_v52, 16  ;;  %v5695_v47 = vshll.u32 %v10716_v20, 16 }
 0x31a   : > { %v4507_v5 = vpop.permute.xlu0 %4506  ;;  %v5212_v24 = vshll.u32 %v10720_v37, 16  ;;  %v10742_v1 = vcombine.low %v10726_v16, %v10728_v59  ;;  %v4967_v35 = vshrl.u32 %v10393_v29, 16  ;;  %v4554_v21 = vsel %vm1364_vm12, %v9784_v56, %v10211_v22 }
 0x31b   : > { %v4649_v42 = vsel %vm1467_vm2, %v4633_v23, %v4507_v5  ;;  %v10751_v43 = vrot.slane %v5687_v44, 1  ;;  %v4556_v49 = vsel %vm1364_vm12, %v9803_v54, %v10228_v38  ;;  %v4571_v60 = vsel %vm1382_vm13, %v4554_v21, %v10311_v34  ;;  %v7544_v54 = vld [vmem:[%s11897_s3] sm:$0xff]  }
 0x31c   : > { %v4534_v62 = vpop.permute.xlu1 %4533  ;;  %5908 = vrot.lane.b32.xlu0 %v5895_v4, %s7589_s7  ;;  %v4969_v30 = vor.u32 %v4967_v35, %v10432_v51  ;;  %v10761_v17 = vrot.slane %v5212_v24, 1  ;;  %v5691_v31 = vshrl.u32 %v10702_v52, 16  ;;  %v5697_v56 = vrot.slane %v5695_v47, 1  ;;  %7360 = vmatprep.subr.bf16.mxu1 %v7544_v54 }
 0x31d   : > { %v4663_v32 = vsel %vm1484_vm4, %v4647_v46, %v4534_v62  ;;  %5196 = vrot.lane.b32.xlu1 %v10393_v29, %s7590_s8  ;;  %v5703_v22 = vshll.u32 %v10742_v1, 16  ;;  %v4573_v38 = vsel %vm1382_vm13, %v4556_v49, %v10316_v36  ;;  %v4587_v34 = vsel %vm1399_vm14, %v4571_v60, %v10395_v10  ;;  %v12085_v46 = vld [vmem:[#allocation41_spill] sm:$0xff]  ;;  %v12086_v49 = vld [vmem:[#allocation18_spill] sm:$0xff]  ;;  %v12087_v60 = vld [vmem:[#allocation24_spill] sm:$0xff] }
 0x31e   : > { %7322 = vmatprep.mubr.msk.bf16.mxu1 %vm1528_vm5, %v4663_v32  ;;  %v4536_v40 = vpop.permute.xlu0 %4535  ;;  %v10776_v51 = vsel %vm997_vm10, %v4969_v30, %v10600_v2  ;;  %v4589_v28 = vsel %vm1399_vm14, %v4573_v38, %v10403_v26  ;;  %v4603_v58 = vsel %vm1416_vm15, %v4587_v34, %v10526_v9  ;;  %v5693_v5 = vor.u32 %v5691_v31, %v10751_v43 }
 0x31f   : > { %v4665_v15 = vsel %vm1484_vm4, %v4649_v42, %v4536_v40  ;;  %v5699_v36 = vshrl.u32 %v10716_v20, 16  ;;  %v4605_v10 = vsel %vm1416_vm15, %v4589_v28, %v10534_v19  ;;  %v4619_v25 = vsel %vm1433_vm0, %v4603_v58, %v10617_v50  ;;  %v7547_v19 = vld [vmem:[%s11897_s3 + $0x8] sm:$0xff]  }
 0x320   : > { %v4458_v39 = vpop.permute.xlu1 %4457  ;;  %5198 = vrot.lane.b32.xlu0 %v10550_v33, %s7590_s8  ;;  %7323 = vmatmul.mubr.msk.bf16.vlgmr.msra.gmra.mrb[20].mxu1 %vm1528_vm5, %v4665_v15  ;;  %v5215_v9 = vsel %vm997_vm10, %v10624_v18, %v10761_v17  ;;  %v10794_v48 = vrot.slane %v5703_v22, 1  ;;  %v4621_v50 = vsel %vm1433_vm0, %v4605_v10, %v12085_v46  ;;  %v10804_v32 = vrot.slane %v10550_v33, 1  ;;  %v5621_v18 = vld [vmem:[#allocation3 + $0x90] sm:$0xe]  ;;  %v12094_v46 = vld [vmem:[#allocation8_spill] sm:$0xff] }
 0x321   : > { %5932 = vrot.lane.b32.xlu1 %v10702_v52, %s7590_s8  ;;  %v4635_v26 = vsel %vm1450_vm1, %v4619_v25, %v4458_v39  ;;  %v5701_v2 = vor.u32 %v5699_v36, %v5697_v56  ;;  %7361 = vmatpush3.bf16.msra.mxu1 %v7544_v54  ;;  %v10809_v40 = vsel %vm997_vm10, %v5693_v5, %v5697_v56  ;;  %v12088_v56 = vrot.slane %v10393_v29, 1  ;;  %v12089_v54 = vld [vmem:[#allocation16_spill] sm:$0xff]  ;;  %v12090_v5 = vld [vmem:[#allocation31_spill] sm:$0xff]  ;;  %v12091_v36 = vld [vmem:[#allocation6_spill] sm:$0xff] }
 0x322   : > { %v4460_v57 = vpop.permute.xlu0 %4459  ;;  %v7029_v15 = vcombine.low %v5621_v18, %v10585_v12  ;;  %7362 = vmatprep.subr.bf16.mxu1 %v7547_v19  ;;  %v7548_v12 = vld [vmem:[%s11897_s3 + $0x10] ss:$0 sps:$4 sm:$0x33]   ;;  %v4560_v10 = vsel %vm1364_vm12, %v12091_v36, %v12090_v5  ;;  %v12092_v25 = vld [vmem:[#allocation27_spill] sm:$0xff] }
 0x323   : > { %v4637_v44 = vsel %vm1450_vm1, %v4621_v50, %v4460_v57  ;;  %v10819_v35 = vsel %vm997_vm10, %v5701_v2, %v10794_v48  ;;  %v4558_v57 = vsel %vm1364_vm12, %v12087_v60, %v12086_v49  ;;  %v10834_v22 = vsel %vm1080_vm9, %v12088_v56, %v10804_v32  ;;  %v12093_v2 = vld [vmem:[#allocation34_spill] sm:$0xff] }
 0x324   : > { %v4509_v6 = vpop.permute.xlu1 %4508  ;;  %5934 = vrot.lane.b32.xlu0 %v10716_v20, %s7590_s8  ;;  %v6002_v28 = vrot.slane %v7029_v15, 1  ;;  %v6201_v58 = vsel %vm1545_vm11, %v7548_v12, 0  ;;  %v4577_v50 = vsel %vm1382_vm13, %v4560_v10, %v12094_v46  ;;  %v12096_v15 = vld [vmem:[#allocation33_spill] sm:$0xff]  ;;  %v12099_v49 = vld [vmem:[#allocation26_spill] sm:$0xff] }
 0x325   : > { %5247 = vrot.lane.b32.xlu1 %v10776_v51, %s7591_s13  ;;  %v4651_v62 = vsel %vm1467_vm2, %v4635_v26, %v4509_v6  ;;  %7363 = vmatpush3.bf16.msra.mxu1 %v7547_v19  ;;  %v10838_v6 = vrot.slane %v10716_v20, 1  ;;  %v5683_v19 = vshrl.u32 %v12093_v2, 16 }
 0x326   : > { %v4511_v4 = vpop.permute.xlu0 %4510  ;;  %7398 = vmatprep.subr.msk.bf16.mxu1 %vm1545_vm11, %v7548_v12  ;;  %v12098_v12 = vld [vmem:[#allocation38_spill] sm:$0xff] }
 0x327   : > { %v4653_v24 = vsel %vm1467_vm2, %v4637_v44, %v4511_v4  ;;  %v4575_v4 = vsel %vm1382_vm13, %v4558_v57, %v12092_v25  ;;  %v7572_v44 = vld [vmem:[%s11896_s2] ss:$0 sm:$0xff]  ;;  %v5685_v60 = vor.u32 %v5683_v19, %v12099_v49  ;;  %v11950_v57 = vrot.slane %v10720_v37, 1 }
 0x328   : > { %v4538_v23 = vpop.permute.xlu1 %4537  ;;  %5249 = vrot.lane.b32.xlu0 %v5215_v9, %s7591_s13 }
 0x329   : > { %v4667_v42 = vsel %vm1484_vm4, %v4651_v62, %v4538_v23  ;;  %5983 = vrot.lane.b32.xlu1 %v10809_v40, %s7591_s13  ;;  %v12095_v62 = vld [vmem:[#allocation32_spill] sm:$0xff]  ;;  %7365 = vmatpush3.bf16.msra.mxu1 %v6201_v58  ;;  %v5690_v10 = vsel %vm997_vm10, %v5685_v60, %v10751_v43 }
 0x32a   : > { %7326 = vmatprep.mubr.msk.bf16.mxu1 %vm1528_vm5, %v4667_v42  ;;  %v4540_v47 = vpop.permute.xlu0 %4539  ;;  %v4591_v23 = vsel %vm1399_vm14, %v4575_v4, %v12095_v62 }
 0x32b   : > { %v4669_v39 = vsel %vm1484_vm4, %v4653_v24, %v4540_v47  ;;  %v7304_v21 = vpop.f32.mrb[28].mxu0  ;;  %v4593_v24 = vsel %vm1399_vm14, %v4577_v50, %v12096_v15  ;;  %v12097_v47 = vld [vmem:[#allocation12_spill] sm:$0xff] }
 0x32c   : > { %v4462_v30 = vpop.permute.xlu1 %4461  ;;  %5985 = vrot.lane.b32.xlu0 %v10819_v35, %s7591_s13  ;;  %7327 = vmatmul.mubr.msk.bf16.gmra.mrb[24].mxu1 %vm1528_vm5, %v4669_v39  ;;  %v3544_v31 = vpop.f32.mrb[29].mxu0  ;;  %v4607_v39 = vsel %vm1416_vm15, %v4591_v23, %v12097_v47 }
 0x32d   : > { %v3545_v38 = vadd.f32 %v12089_v54, %v3544_v31  ;;  %v7305_v34 = vpop.f32.mrb[30].mxu0  ;;  %5276 = vrot.lane.b32.xlu1 %v10834_v22, %s7592_s16  ;;  %v12100_v31 = vld [vmem:[#allocation15_spill] sm:$0xff]  ;;  %v4623_v58 = vsel %vm1433_vm0, %v4607_v39, %v10638_v11  ;;  %v5265_v11 = vsel %vm1080_vm9, %v10804_v32, %v11950_v57 }
 0x32e   : > { %v4464_v26 = vpop.permute.xlu0 %4463  ;;  %v3547_v9 = vpop.f32.mrb[31].mxu0  ;;  %v4609_v56 = vsel %vm1416_vm15, %v4593_v24, %v12100_v31  ;;  %v6003_v34 = vsel %vm1080_vm9, %v6002_v28, %v10838_v6  ;;  %v4639_v25 = vsel %vm1450_vm1, %v4623_v58, %v4462_v30  ;;  %v12101_v31 = vld [vmem:[#allocation35_spill] sm:$0xff] }
 0x32f   : > { %v3570_v18 = vmax.f32 %v3545_v38, 0.0  ;;  %v3548_v42 = vadd.f32 %v7572_v44, %v3547_v9  ;;  %v4625_v5 = vsel %vm1433_vm0, %v4609_v56, %v10646_v55  ;;  %v11949_v55 = vrot.slane %v10742_v1, 1 }
 0x330   : > { %v4513_v21 = vpop.permute.xlu1 %4512  ;;  %4994 = vrot.lane.b32.xlu0 %v12098_v12, %s7586_s29  ;;  %v4641_v46 = vsel %vm1450_vm1, %v4625_v5, %v4464_v26  ;;  %v12102_v5 = vld [vmem:[#allocation39_spill] sm:$0xff] }
 0x331   : > { %v7160_v54 = vpack.c.bf16 %v3570_v18, %v3570_v18  ;;  %v3571_v38 = vmax.f32 %v3548_v42, 0.0  ;;  %6012 = vrot.lane.b32.xlu1 %v6003_v34, %s7592_s16  ;;  %v4655_v28 = vsel %vm1467_vm2, %v4639_v25, %v4513_v21  ;;  %v10902_v49 = vsel %vm1080_vm9, %v10838_v6, %v11949_v55  ;;  %v10921_v34 = vld [vmem:[#allocation3 + $0xac] sm:$0xf] }
 0x332   : > { %v4515_v36 = vpop.permute.xlu0 %4514 }
 0x333   : > { %v3742_v4 = vshrl.u32 %v7160_v54, 16  ;;  %v3745_v9 = vshll.u32 %v7160_v54, 16  ;;  %v7161_v19 = vpack.c.bf16 %v3571_v38, %v3571_v38  ;;  %v4657_v18 = vsel %vm1467_vm2, %v4641_v46, %v4515_v36  ;;  %v5607_v38 = vld [vmem:[#allocation3 + $0xa8] sm:$0xf]  ;;  %v10943_v46 = vld [vmem:[#allocation3 + $0xb0] sm:$0xf] }
 0x334   : > { %v4542_v50 = vpop.permute.xlu1 %4541  ;;  %5730 = vrot.lane.b32.xlu0 %v5690_v10, %s7586_s29  ;;  %v5750_v54 = vrot.slane %v10702_v52, 1  ;;  %v12103_v10 = vld [vmem:[#allocation23_spill] sm:$0xff] }
 0x335   : > { %v3744_v43 = vrot.slane %v3742_v4, 7  ;;  %v3751_v62 = vshrl.u32 %v7161_v19, 16  ;;  %v3754_v30 = vshll.u32 %v7161_v19, 16  ;;  %v4671_v23 = vsel %vm1484_vm4, %v4655_v28, %v4542_v50  ;;  %5278 = vrot.lane.b32.xlu1 %v5265_v11, %s7592_s16 }
 0x336   : > { %7330 = vmatprep.mubr.msk.bf16.mxu1 %vm1528_vm5, %v4671_v23  ;;  %v4544_v26 = vpop.permute.xlu0 %4543  ;;  %v10933_v25 = vcombine.low %v12103_v10, %v10561_v45  ;;  %v10938_v4 = vcombine.low %v5607_v38, %v10921_v34  ;;  %v5753_v45 = vsel %vm1080_vm9, %v5750_v54, %v10838_v6  ;;  %v6899_v23 = vld [vmem:[%s11896_s2] ss:$0 sm:$0xff]  ;;  %v5105_v6 = vshrl.u32 %v10576_v7, 16 }
 0x337   : > { %v3747_v44 = vor.u32 %v3745_v9, %v3744_v43  ;;  %v3749_v42 = vrot.slane %v3744_v43, 4  ;;  %v3753_v15 = vrot.slane %v3751_v62, 7  ;;  %v4673_v24 = vsel %vm1484_vm4, %v4657_v18, %v4544_v26 }
 0x338   : > { %v10890_v47 = vpop.permute.xlu1 %4986  ;;  %4996 = vrot.lane.b32.xlu0 %v10776_v51, %s7586_s29  ;;  %7331 = vmatmul.mubr.msk.bf16.gmra.mrb[28].mxu1 %vm1528_vm5, %v4673_v24  ;;  %v12104_v9 = vrot.slane %v12093_v2, 1  ;;  %v5109_v62 = vshll.u32 %v10933_v25, 16  ;;  %v10967_v18 = vcombine.low %v10692_v41, %v10726_v16  ;;  %v5107_v24 = vor.u32 %v5105_v6, %v10621_v63 }
 0x339   : > { %v3748_v39 = vsel %vm7866_vm6, %v9711_v13, %v3747_v44  ;;  %v3756_v21 = vor.u32 %v3754_v30, %v3753_v15  ;;  %v3758_v12 = vrot.slane %v3753_v15, 4  ;;  %6014 = vrot.lane.b32.xlu1 %v10902_v49, %s7592_s16  ;;  %v5711_v30 = vshll.u32 %v10938_v4, 16 }
 0x33a   : > { %3798 = vst.msk [vmem:[#allocation3 + $0xb4] sm:$0xf] %vm376_vm3, %v3748_v39  ;;  %v10905_v60 = vpop.permute.xlu0 %4988  ;;  %v5751_v19 = vsel %vm1080_vm9, %v12104_v9, %v5750_v54  ;;  %v5715_v44 = vshrl.u32 %v10938_v4, 16  ;;  %v10979_v41 = vcombine.low %v10728_v59, %v5607_v38  ;;  %v5833_v63 = vshll.u32 %v10967_v18, 16 }
 0x33b   : > { %v3757_v51 = vsel %vm7866_vm6, %v3749_v42, %v3756_v21  ;;  %v3766_v13 = vsel %vm7866_vm6, %v3758_v12, %v12101_v31 }
 0x33c   : > { %3799 = vst.msk [vmem:[#allocation3 + $0xb8] sm:$0xf] %vm376_vm3, %v3757_v51  ;;  %3800 = vst.msk [vmem:[#allocation3 + $0xbc] sm:$0xf] %vm376_vm3, %v3766_v13  ;;  %v10916_v56 = vpop.permute.xlu1 %5020  ;;  %5732 = vrot.lane.b32.xlu0 %v10809_v40, %s7586_s29  ;;  %v10935_v40 = vld [vmem:[#allocation3 + $0x7c] sm:$0xf] }
 0x33d   : > { %5028 = vrot.lane.b32.xlu1 %v12102_v5, %s7585_s28  ;;  %v10955_v11 = vcombine.low %v10694_v61, %v10935_v40  ;;  %v5111_v51 = vrot.slane %v5109_v62, 1  ;;  %v10985_v13 = vrot.slane %v5711_v30, 1  ;;  %v5113_v5 = vshrl.u32 %v10933_v25, 16 }
 0x33e   : > { %v10923_v58 = vpop.permute.xlu0 %5022  ;;  %v5829_v62 = vshrl.u32 %v10604_v14, 16  ;;  %v5841_v30 = vshll.u32 %v10979_v41, 16 }
 0x33f   : > { %v5117_v39 = vshll.u32 %v10955_v11, 16  ;;  %v10994_v59 = vor.u32 %v5715_v44, %v10985_v13 }
 0x340   : > { %v10927_v36 = vpop.permute.xlu1 %5050  ;;  %5030 = vrot.lane.b32.xlu0 %v10834_v22, %s7585_s28  ;;  %v11023_v55 = vrot.slane %v5841_v30, 1  ;;  %v5160_v30 = vrot.slane %v10933_v25, 1 }
 0x341   : > { %v5610_v28 = vld [vmem:[#allocation3 + $0xb4] sm:$0x1]  ;;  %5764 = vrot.lane.b32.xlu1 %v5751_v19, %s7585_s28 }
 0x342   : > { %v10945_v50 = vpop.permute.xlu0 %5052  ;;  %v10949_v22 = vcombine.low %v10943_v46, %v5610_v28  ;;  %v5112_v28 = vsel %vm997_vm10, %v5107_v24, %v5111_v51  ;;  %v5835_v24 = vrot.slane %v5833_v63, 1 }
 0x344   : > { %v10957_v43 = vpop.permute.xlu1 %5132  ;;  %5766 = vrot.lane.b32.xlu0 %v5753_v45, %s7585_s28  ;;  %v5719_v42 = vshll.u32 %v10949_v22, 16  ;;  %v10999_v45 = vrot.slane %v5117_v39, 1  ;;  %v11014_v39 = vrot.slane %v10938_v4, 1 }
 0x345   : > { %5058 = vrot.lane.b32.xlu1 %v10576_v7, %s7587_s30 }
 0x346   : > { %v7314_v61 = vpop.f32.mrb[16].mxu1  ;;  %v10970_v26 = vpop.permute.xlu0 %5134  ;;  %v10996_v38 = vrot.slane %v5719_v42, 1  ;;  %v5831_v42 = vor.u32 %v5829_v62, %v10644_v0 }
 0x347   : > { %v4048_v15 = vpop.f32.mrb[17].mxu1 }
 0x348   : > { %v10981_v16 = vpop.permute.xlu1 %5166  ;;  %v4049_v21 = vadd.f32 %v6899_v23, %v4048_v15  ;;  %v7315_v12 = vpop.f32.mrb[18].mxu1  ;;  %5060 = vrot.lane.b32.xlu0 %v10933_v25, %s7587_s30  ;;  %v5115_v15 = vor.u32 %v5113_v5, %v5111_v51  ;;  %v11010_v44 = vsel %vm997_vm10, %v10994_v59, %v10996_v38  ;;  %v5837_v5 = vshrl.u32 %v10967_v18, 16  ;;  %v11045_v25 = vld [vmem:[#allocation3 + $0x80] sm:$0xf] }
 0x349   : > { %v4051_v54 = vpop.f32.mrb[19].mxu1  ;;  %5794 = vrot.lane.b32.xlu1 %v10604_v14, %s7587_s30  ;;  %v11072_v27 = vcombine.low %v10935_v40, %v11045_v25  ;;  %v12113_v40 = vld [vmem:[#allocation7_spill] sm:$0xff] }
 0x34a   : > { %v4062_v10 = vmax.f32 %v4049_v21, 0.0  ;;  %v4052_v9 = vadd.f32 %v6899_v23, %v4051_v54  ;;  %v10989_v19 = vpop.permute.xlu0 %4441  ;;  %v11955_v21 = vrot.slane %v10949_v22, 1  ;;  %v5120_v51 = vsel %vm997_vm10, %v5115_v15, %v10999_v45 }
 0x34b   : > { %v5836_v15 = vsel %vm997_vm10, %v5831_v42, %v5835_v24  ;;  %v5839_v57 = vor.u32 %v5837_v5, %v5835_v24 }
 0x34c   : > { %v7162_v6 = vpack.c.bf16 %v4062_v10, %v4062_v10  ;;  %v4063_v23 = vmax.f32 %v4052_v9, 0.0  ;;  %v11003_v61 = vpop.permute.xlu1 %4465  ;;  %5796 = vrot.lane.b32.xlu0 %v10967_v18, %s7587_s30  ;;  %v11029_v0 = vsel %vm1080_vm9, %v11014_v39, %v11955_v21 }
 0x34d   : > { %5140 = vrot.lane.b32.xlu1 %v5112_v28, %s7588_s6  ;;  %v4108_v28 = vld [vmem:[#allocation3 + $0xc0] sm:$0xf] }
 0x34e   : > { %v4079_v12 = vshrl.u32 %v7162_v6, 16  ;;  %v4082_v54 = vshll.u32 %v7162_v6, 16  ;;  %v7163_v10 = vpack.c.bf16 %v4063_v23, %v4063_v23  ;;  %v11017_v9 = vpop.permute.xlu0 %5168 }
 0x350   : > { %v4081_v63 = vrot.slane %v4079_v12, 7  ;;  %v4087_v62 = vshrl.u32 %v7163_v10, 16  ;;  %v4090_v6 = vshll.u32 %v7163_v10, 16  ;;  %v11031_v23 = vpop.permute.xlu1 %5192  ;;  %5142 = vrot.lane.b32.xlu0 %v5120_v51, %s7588_s6  ;;  %v5844_v12 = vsel %vm997_vm10, %v5839_v57, %v11023_v55  ;;  %v12107_v57 = vld [vmem:[#allocation36_spill] sm:$0xff] }
 0x351   : > { %5876 = vrot.lane.b32.xlu1 %v5836_v15, %s7588_s6  ;;  %v5162_v10 = vrot.slane %v10955_v11, 1 }
 0x352   : > { %v4084_v8 = vor.u32 %v4082_v54, %v4081_v63  ;;  %v4085_v53 = vrot.slane %v4081_v63, 4  ;;  %v4089_v20 = vrot.slane %v4087_v62, 7  ;;  %v11036_v33 = vpop.permute.xlu0 %4467  ;;  %v12106_v54 = vrot.slane %v10576_v7, 1  ;;  %v12108_v62 = vld [vmem:[#allocation22_spill] sm:$0xff]  ;;  %v12109_v7 = vld [vmem:[#allocation9_spill] sm:$0xff] }
 0x353   : > { %v5896_v63 = vrot.slane %v10967_v18, 1  ;;  %v4562_v15 = vsel %vm1364_vm12, %v12108_v62, %v12107_v57  ;;  %v5163_v18 = vsel %vm1080_vm9, %v5160_v30, %v5162_v10  ;;  %v5289_v62 = vsel %vm1364_vm12, %v12113_v40, %v10890_v47 }
 0x354   : > { %v4109_v51 = vsel %vm7874_vm7, %v4084_v8, %v4108_v28  ;;  %v4092_v52 = vor.u32 %v4090_v6, %v4089_v20  ;;  %v4094_v42 = vrot.slane %v4089_v20, 4  ;;  %v4517_v24 = vpop.permute.xlu1 %4516  ;;  %5878 = vrot.lane.b32.xlu0 %v5844_v12, %s7588_s6  ;;  %v5161_v5 = vsel %vm1080_vm9, %v12106_v54, %v5160_v30  ;;  %v12111_v12 = vld [vmem:[#allocation17_spill] sm:$0xff]  ;;  %v7573_v30 = vld [vmem:[#allocation3 + $0x38] sm:$0xf] }
 0x355   : > { %4110 = vst [vmem:[#allocation3 + $0xc0] sm:$0xf] %v4109_v51  ;;  %5174 = vrot.lane.b32.xlu1 %v5161_v5, %s7589_s7  ;;  %v4579_v6 = vsel %vm1382_vm13, %v4562_v15, %v12109_v7  ;;  %v6915_v5 = vcombine.low %v7573_v30, %v7573_v30  ;;  %v5216_v30 = vshrl.u32 %v10720_v37, 16 }
 0x356   : > { %v4093_v8 = vsel %vm7866_vm6, %v4085_v53, %v4092_v52  ;;  %v4102_v20 = vsel %vm7866_vm6, %v4094_v42, %v12101_v31  ;;  %v11059_v21 = vpop.permute.xlu0 %5194  ;;  %v5898_v53 = vrot.slane %v10979_v41, 1  ;;  %v12110_v52 = vld [vmem:[#allocation20_spill] sm:$0xff]  ;;  %v12112_v42 = vrot.slane %v10604_v14, 1 }
 0x357   : > { %4111 = vst.msk [vmem:[#allocation3 + $0xc4] sm:$0xf] %vm376_vm3, %v4093_v8  ;;  %4112 = vst.msk [vmem:[#allocation3 + $0xc8] sm:$0xf] %vm376_vm3, %v4102_v20  ;;  %v4595_v31 = vsel %vm1399_vm14, %v4579_v6, %v12110_v52  ;;  %v11088_v8 = vld [vmem:[#allocation3 + $0x84] sm:$0xff]   ;;  %v5306_v20 = vsel %vm1382_vm13, %v5289_v62, %v10916_v56  ;;  %v12114_v6 = vld [vmem:[#allocation37_spill] sm:$0xff] }
 0x358   : > { %v5244_v28 = vpop.permute.xlu1 %5243  ;;  %5176 = vrot.lane.b32.xlu0 %v5163_v18, %s7589_s7  ;;  %v4611_v51 = vsel %vm1416_vm15, %v4595_v31, %v12111_v12  ;;  %v5897_v54 = vsel %vm1080_vm9, %v12112_v42, %v5896_v63  ;;  %v5899_v7 = vsel %vm1080_vm9, %v5896_v63, %v5898_v53  ;;  %v4565_v47 = vsel %vm1364_vm12, %v6915_v5, %v12114_v6  ;;  %v11104_v56 = vld [vmem:[#allocation3 + $0xb4] sm:$0xf]  ;;  %v12116_v42 = vld [vmem:[#allocation29_spill] sm:$0xff] }
 0x359   : > { %v4627_v57 = vsel %vm1433_vm0, %v4611_v51, %v10652_v3  ;;  %5910 = vrot.lane.b32.xlu1 %v5897_v54, %s7589_s7  ;;  %v5220_v3 = vshll.u32 %v11072_v27, 16  ;;  %v5322_v18 = vsel %vm1399_vm14, %v5306_v20, %v10927_v36  ;;  %v5228_v5 = vshll.u32 %v11088_v8, 16  ;;  %v12118_v20 = vld [vmem:[#allocation11_spill] sm:$0xff] }
 0x35a   : > { %v4519_v15 = vpop.permute.xlu0 %4518  ;;  %v4643_v14 = vsel %vm1450_vm1, %v4627_v57, %v11003_v61  ;;  %v12115_v61 = vld [vmem:[#allocation19_spill] sm:$0xff]  ;;  %v5338_v63 = vsel %vm1416_vm15, %v5322_v18, %v10957_v43  ;;  %v12117_v57 = vld [vmem:[#allocation10_spill] sm:$0xff] }
 0x35b   : > { %v4659_v52 = vsel %vm1467_vm2, %v4643_v14, %v4517_v24  ;;  %v4581_v12 = vsel %vm1382_vm13, %v4565_v47, %v12115_v61  ;;  %v5354_v36 = vsel %vm1433_vm0, %v5338_v63, %v10981_v16  ;;  %v5222_v62 = vrot.slane %v5220_v3, 1 }
 0x35c   : > { %v4546_v31 = vpop.permute.xlu1 %4545  ;;  %5912 = vrot.lane.b32.xlu0 %v5899_v7, %s7589_s7  ;;  %v4597_v54 = vsel %vm1399_vm14, %v4581_v12, %v12116_v42  ;;  %v5370_v40 = vsel %vm1450_vm1, %v5354_v36, %v11031_v23  ;;  %v11126_v16 = vcombine.low %v10943_v46, %v11104_v56  ;;  %v5291_v14 = vsel %vm1364_vm12, %v12118_v20, %v10905_v60 }
 0x35d   : > { %v4675_v51 = vsel %vm1484_vm4, %v4659_v52, %v4546_v31  ;;  %5200 = vrot.lane.b32.xlu1 %v10720_v37, %s7590_s8  ;;  %v4613_v43 = vsel %vm1416_vm15, %v4597_v54, %v12117_v57  ;;  %v5386_v6 = vsel %vm1467_vm2, %v5370_v40, %v5244_v28  ;;  %v5224_v23 = vshrl.u32 %v11072_v27, 16 }
 0x35e   : > { %7334 = vmatprep.mubr.msk.bf16.mxu1 %vm1528_vm5, %v4675_v51  ;;  %v5246_v24 = vpop.permute.xlu0 %5245  ;;  %v4629_v7 = vsel %vm1433_vm0, %v4613_v43, %v10989_v19  ;;  %v5308_v3 = vsel %vm1382_vm13, %v5291_v14, %v10923_v58  ;;  %v5218_v60 = vor.u32 %v5216_v30, %v10761_v17  ;;  %v5952_v12 = vshll.u32 %v11126_v16, 16 }
 0x35f   : > { %v4645_v18 = vsel %vm1450_vm1, %v4629_v7, %v11036_v33  ;;  %v5324_v19 = vsel %vm1399_vm14, %v5308_v3, %v10945_v50  ;;  %v5226_v61 = vor.u32 %v5224_v23, %v5222_v62  ;;  %v11161_v63 = vrot.slane %v5228_v5, 1 }
 0x360   : > { %v5273_v47 = vpop.permute.xlu1 %5272  ;;  %5202 = vrot.lane.b32.xlu0 %v11072_v27, %s7590_s8  ;;  %v4661_v28 = vsel %vm1467_vm2, %v4645_v18, %v4519_v15  ;;  %v5340_v58 = vsel %vm1416_vm15, %v5324_v19, %v10970_v26  ;;  %v5223_v15 = vsel %vm997_vm10, %v5218_v60, %v5222_v62  ;;  %v5707_v26 = vshrl.u32 %v10742_v1, 16  ;;  %v12123_v60 = vld [vmem:[#allocation4_spill] sm:$0xff] }
 0x361   : > { %v5402_v52 = vsel %vm1484_vm4, %v5386_v6, %v5273_v47  ;;  %5936 = vrot.lane.b32.xlu1 %v10742_v1, %s7590_s8  ;;  %v5356_v17 = vsel %vm1433_vm0, %v5340_v58, %v11017_v9  ;;  %v5231_v54 = vsel %vm997_vm10, %v5226_v61, %v11161_v63  ;;  %v11170_v30 = vrot.slane %v5952_v12, 1  ;;  %v12122_v47 = vld [vmem:[#allocation14_spill] sm:$0xff] }
 0x362   : > { %7344 = vmatprep.mubr.msk.bf16.mxu0 %vm1528_vm5, %v5402_v52  ;;  %v4548_v31 = vpop.permute.xlu0 %4547  ;;  %v5372_v50 = vsel %vm1450_vm1, %v5356_v17, %v11059_v21  ;;  %v5709_v36 = vor.u32 %v5707_v26, %v10794_v48  ;;  %v5266_v5 = vrot.slane %v11072_v27, 1  ;;  %v12119_v40 = vrot.slane %v10720_v37, 1  ;;  %v4875_v17 = vld [vmem:[#allocation3 + $0x84] sm:$0x1] }
 0x363   : > { %v4677_v33 = vsel %vm1484_vm4, %v4661_v28, %v4548_v31  ;;  %v5388_v51 = vsel %vm1467_vm2, %v5372_v50, %v5246_v24  ;;  %v5955_v48 = vsel %vm997_vm10, %v10994_v59, %v11170_v30  ;;  %v12121_v59 = vrot.slane %v10742_v1, 1 }
 0x364   : > { %5938 = vrot.lane.b32.xlu0 %v10938_v4, %s7590_s8  ;;  %7335 = vmatmul.mubr.msk.bf16.gmra.mrb[32].mxu1 %vm1528_vm5, %v4677_v33  ;;  %v11172_v21 = vpop.permute.xlu1 %4990  ;;  %v5714_v24 = vsel %vm997_vm10, %v5709_v36, %v10985_v13  ;;  %v5267_v62 = vsel %vm1080_vm9, %v12119_v40, %v5266_v5  ;;  %v12120_v13 = vld [vmem:[#allocation42_spill] sm:$0xff]  ;;  %v5268_v37 = vrot.slane %v11088_v8, 1  ;;  %v4983_v23 = vshrl.u32 %v12122_v47, 16 }
 0x365   : > { %5251 = vrot.lane.b32.xlu1 %v5223_v15, %s7591_s13  ;;  %v5757_v14 = vsel %vm1080_vm9, %v12121_v59, %v11014_v39  ;;  %v6004_v18 = vrot.slane %v11126_v16, 1  ;;  %v5018_v31 = vrot.slane %v12122_v47, 1  ;;  %v6964_v50 = vcombine.low %v11045_v25, %v4875_v17 }
 0x366   : > { %v5275_v42 = vpop.permute.xlu0 %5274  ;;  %v5269_v3 = vsel %vm1080_vm9, %v5266_v5, %v5268_v37  ;;  %v4985_v19 = vor.u32 %v4983_v23, %v12123_v60  ;;  %v5121_v36 = vshrl.u32 %v10955_v11, 16 }
 0x367   : > { %v5404_v9 = vsel %vm1484_vm4, %v5388_v51, %v5275_v42  ;;  %v5019_v61 = vsel %vm1080_vm9, %v10804_v32, %v5018_v31  ;;  %v5613_v32 = vld [vmem:[#allocation3 + $0xb8] sm:$0xf]  ;;  %v6963_v42 = vcombine.low %v11045_v25, %v11045_v25 }
 0x368   : > { %5253 = vrot.lane.b32.xlu0 %v5231_v54, %s7591_s13  ;;  %7345 = vmatmul.mubr.msk.bf16.vlgmr.msra.gmra.mrb[32].mxu0 %vm1528_vm5, %v5404_v9  ;;  %v5125_v9 = vshll.u32 %v6964_v50, 16  ;;  %v7019_v54 = vcombine.low %v10921_v34, %v10943_v46  ;;  %v5123_v5 = vor.u32 %v5121_v36, %v10999_v45  ;;  %v4879_v36 = vld [vmem:[#allocation3 + $0x8c] sm:$0xf] }
 0x369   : > { %5987 = vrot.lane.b32.xlu1 %v5714_v24, %s7591_s13 }
 0x36a   : > { %v11179_v57 = vpop.permute.xlu0 %4992  ;;  %v5127_v25 = vrot.slane %v5125_v9, 1  ;;  %v5900_v9 = vrot.slane %v7019_v54, 1 }
 0x36b   : > { %v11186_v43 = vpop.permute.xlu1 %5726 }
 0x36c   : > { %5989 = vrot.lane.b32.xlu0 %v5955_v48, %s7591_s13  ;;  %v5849_v48 = vshll.u32 %v7019_v54, 16 }
 0x36d   : > { %5280 = vrot.lane.b32.xlu1 %v5267_v62, %s7592_s16  ;;  %v5845_v62 = vshrl.u32 %v10979_v41, 16 }
 0x36e   : > { %v11191_v20 = vpop.permute.xlu0 %5728  ;;  %v5851_v59 = vrot.slane %v5849_v48, 1 }
 0x36f   : > { %v11196_v27 = vpop.permute.xlu1 %5024  ;;  %v5847_v45 = vor.u32 %v5845_v62, %v11023_v55 }
 0x370   : > { %4998 = vrot.lane.b32.xlu0 %v12120_v13, %s7586_s29  ;;  %v5128_v13 = vsel %vm997_vm10, %v5123_v5, %v5127_v25  ;;  %v4880_v5 = vld [vmem:[#allocation3 + $0x90] sm:$0x1] }
 0x371   : > { %6016 = vrot.lane.b32.xlu1 %v5757_v14, %s7592_s16  ;;  %v11295_v62 = vcombine.low %v4879_v36, %v4880_v5 }
 0x372   : > { %v11202_v7 = vpop.permute.xlu0 %5026 }
 0x373   : > { %v11208_v6 = vpop.permute.xlu1 %5760 }
 0x374   : > { %5734 = vrot.lane.b32.xlu0 %v10819_v35, %s7586_s29  ;;  %v6005_v35 = vsel %vm1080_vm9, %v11014_v39, %v6004_v18 }
 0x375   : > { %5282 = vrot.lane.b32.xlu1 %v5269_v3, %s7592_s16 }
 0x376   : > { %v11215_v52 = vpop.permute.xlu0 %5762 }
 0x377   : > { %v11220_v28 = vpop.permute.xlu1 %5054 }
 0x378   : > { %5000 = vrot.lane.b32.xlu0 %v4985_v19, %s7586_s29  ;;  %v5852_v19 = vsel %vm997_vm10, %v5847_v45, %v5851_v59 }
 0x379   : > { %6018 = vrot.lane.b32.xlu1 %v6005_v35, %s7592_s16 }
 0x37a   : > { %v11227_v58 = vpop.permute.xlu0 %5056 }
 0x37b   : > { %v11231_v33 = vpop.permute.xlu1 %5790 }
 0x37c   : > { %5736 = vrot.lane.b32.xlu0 %v5714_v24, %s7586_s29 }
 0x37d   : > { %5032 = vrot.lane.b32.xlu1 %v5019_v61, %s7585_s28 }
 0x37e   : > { %v11235_v12 = vpop.permute.xlu0 %5792 }
 0x37f   : > { %v11239_v39 = vpop.permute.xlu1 %5136 }
 0x380   : > { %5034 = vrot.lane.b32.xlu0 %v5018_v31, %s7585_s28  ;;  %v5164_v31 = vrot.slane %v6964_v50, 1 }
 0x381   : > { %5768 = vrot.lane.b32.xlu1 %v10902_v49, %s7585_s28  ;;  %v11259_v49 = vcombine.low %v11104_v56, %v5613_v32  ;;  %v5129_v56 = vshrl.u32 %v6964_v50, 16 }
 0x382   : > { %v11242_v15 = vpop.permute.xlu0 %5138 }
 0x383   : > { %v11247_v26 = vpop.permute.xlu1 %5872  ;;  %v5857_v34 = vshll.u32 %v11259_v49, 16  ;;  %v5131_v23 = vor.u32 %v5129_v56, %v5127_v25  ;;  %v5902_v50 = vrot.slane %v11259_v49, 1  ;;  %v11304_v56 = vld [vmem:[#allocation3 + $0xbc] sm:$0xf] }
 0x384   : > { %5770 = vrot.lane.b32.xlu0 %v5757_v14, %s7585_s28  ;;  %v5853_v14 = vshrl.u32 %v7019_v54, 16 }
 0x385   : > { %5062 = vrot.lane.b32.xlu1 %v10955_v11, %s7587_s30  ;;  %v11277_v3 = vrot.slane %v5857_v34, 1  ;;  %v5901_v11 = vsel %vm1080_vm9, %v5898_v53, %v5900_v9  ;;  %v5903_v45 = vsel %vm1080_vm9, %v5900_v9, %v5902_v50 }
 0x386   : > { %v11249_v51 = vpop.permute.xlu0 %5874  ;;  %v5855_v35 = vor.u32 %v5853_v14, %v5851_v59  ;;  %v11318_v14 = vcombine.low %v5613_v32, %v11304_v56 }
 0x387   : > { %v5171_v24 = vpop.permute.xlu1 %5170 }
 0x388   : > { %5064 = vrot.lane.b32.xlu0 %v6963_v42, %s7587_s30  ;;  %v5860_v55 = vsel %vm997_vm10, %v5855_v35, %v11277_v3  ;;  %v5165_v42 = vsel %vm1080_vm9, %v5162_v10, %v5164_v31  ;;  %v12124_v10 = vld [vmem:[#allocation30_spill] sm:$0xff] }
 0x389   : > { %5798 = vrot.lane.b32.xlu1 %v10979_v41, %s7587_s30 }
 0x38a   : > { %v11263_v40 = vpop.permute.xlu0 %5172 }
 0x38b   : > { %v11270_v46 = vpop.permute.xlu1 %5906 }
 0x38c   : > { %5800 = vrot.lane.b32.xlu0 %v7019_v54, %s7587_s30  ;;  %v5293_v54 = vsel %vm1364_vm12, %v12124_v10, %v11172_v21  ;;  %v5236_v21 = vshll.u32 %v11295_v62, 16 }
 0x38d   : > { %5144 = vrot.lane.b32.xlu1 %v5128_v13, %s7588_s6  ;;  %v5310_v13 = vsel %vm1382_vm13, %v5293_v54, %v11196_v27  ;;  %v12125_v27 = vld [vmem:[#allocation40_spill] sm:$0xff] }
 0x38e   : > { %v11274_v47 = vpop.permute.xlu0 %5908  ;;  %v5326_v41 = vsel %vm1399_vm14, %v5310_v13, %v11220_v28  ;;  %v6969_v28 = vcombine.low %v4879_v36, %v4879_v36  ;;  %v5238_v36 = vrot.slane %v5236_v21, 1  ;;  %v5956_v13 = vshrl.u32 %v11126_v16, 16 }
 0x38f   : > { %v5197_v60 = vpop.permute.xlu1 %5196  ;;  %v5342_v59 = vsel %vm1416_vm15, %v5326_v41, %v11239_v39 }
 0x390   : > { %5146 = vrot.lane.b32.xlu0 %v5131_v23, %s7588_s6  ;;  %v6029_v23 = vsel %vm1364_vm12, %v12125_v27, %v11186_v43  ;;  %v5958_v27 = vor.u32 %v5956_v13, %v11170_v30 }
 0x391   : > { %5880 = vrot.lane.b32.xlu1 %v5852_v19, %s7588_s6  ;;  %v5358_v19 = vsel %vm1433_vm0, %v5342_v59, %v5171_v24  ;;  %v6046_v39 = vsel %vm1382_vm13, %v6029_v23, %v11208_v6  ;;  %v5964_v59 = vshrl.u32 %v11318_v14, 16 }
 0x392   : > { %v11281_v61 = vpop.permute.xlu0 %5198  ;;  %v5374_v32 = vsel %vm1450_vm1, %v5358_v19, %v5197_v60  ;;  %v6062_v43 = vsel %vm1399_vm14, %v6046_v39, %v11231_v33  ;;  %v5960_v60 = vshll.u32 %v11318_v14, 16 }
 0x393   : > { %v5933_v17 = vpop.permute.xlu1 %5932  ;;  %v6078_v5 = vsel %vm1416_vm15, %v6062_v43, %v11247_v26  ;;  %v5270_v43 = vrot.slane %v11295_v62, 1 }
 0x394   : > { %5882 = vrot.lane.b32.xlu0 %v5860_v55, %s7588_s6  ;;  %v11332_v55 = vld [vmem:[#allocation3 + $0xc0] sm:$0xff]   ;;  %v6094_v33 = vsel %vm1433_vm0, %v6078_v5, %v11270_v46  ;;  %v5962_v23 = vrot.slane %v5960_v60, 1 }
 0x395   : > { %5178 = vrot.lane.b32.xlu1 %v5165_v42, %s7589_s7  ;;  %v6110_v54 = vsel %vm1450_vm1, %v6094_v33, %v5933_v17  ;;  %v5271_v33 = vsel %vm1080_vm9, %v5268_v37, %v5270_v43 }
 0x396   : > { %v11290_v48 = vpop.permute.xlu0 %5934 }
 0x397   : > { %v5248_v25 = vpop.permute.xlu1 %5247 }
 0x398   : > { %5180 = vrot.lane.b32.xlu0 %v5164_v31, %s7589_s7  ;;  %v5232_v31 = vshrl.u32 %v11088_v8, 16  ;;  %v5390_v24 = vsel %vm1467_vm2, %v5374_v32, %v5248_v25 }
 0x399   : > { %5914 = vrot.lane.b32.xlu1 %v5901_v11, %s7589_s7  ;;  %v12126_v11 = vld [vmem:[#allocation25_spill] sm:$0xff] }
 0x39a   : > { %v5250_v34 = vpop.permute.xlu0 %5249  ;;  %v5234_v9 = vor.u32 %v5232_v31, %v11161_v63  ;;  %v5295_v10 = vsel %vm1364_vm12, %v12126_v11, %v11179_v57  ;;  %v5240_v63 = vshrl.u32 %v11295_v62, 16  ;;  %v5968_v57 = vshll.u32 %v11332_v55, 16  ;;  %v6338_v62 = vld [vmem:[#allocation3 + $0xc0] sm:$0x1]  ;;  %v11409_v11 = vld [vmem:[#allocation3 + $0xbc] sm:$0xf] }
 0x39b   : > { %v5984_v53 = vpop.permute.xlu1 %5983  ;;  %v5312_v26 = vsel %vm1382_vm13, %v5295_v10, %v11202_v7 }
 0x39c   : > { %5916 = vrot.lane.b32.xlu0 %v5903_v45, %s7589_s7  ;;  %v5328_v46 = vsel %vm1399_vm14, %v5312_v26, %v11227_v58  ;;  %v6126_v45 = vsel %vm1467_vm2, %v6110_v54, %v5984_v53  ;;  %v5239_v21 = vsel %vm997_vm10, %v5234_v9, %v5238_v36  ;;  %v12127_v58 = vld [vmem:[#allocation21_spill] sm:$0xff]  ;;  %v5242_v31 = vor.u32 %v5240_v63, %v5238_v36 }
 0x39d   : > { %5204 = vrot.lane.b32.xlu1 %v11088_v8, %s7590_s8  ;;  %v5344_v7 = vsel %vm1416_vm15, %v5328_v46, %v11242_v15  ;;  %v6031_v53 = vsel %vm1364_vm12, %v12127_v58, %v11191_v20  ;;  %v11383_v39 = vrot.slane %v5968_v57, 1  ;;  %v5966_v36 = vor.u32 %v5964_v59, %v5962_v23 }
 0x39e   : > { %v11324_v35 = vpop.permute.xlu0 %5985  ;;  %v5360_v19 = vsel %vm1433_vm0, %v5344_v7, %v11263_v40  ;;  %v6048_v15 = vsel %vm1382_vm13, %v6031_v53, %v11215_v52  ;;  %v7064_v63 = vcombine.low %v11409_v11, %v6338_v62 }
 0x39f   : > { %v5277_v42 = vpop.permute.xlu1 %5276  ;;  %v5376_v30 = vsel %vm1450_vm1, %v5360_v19, %v11281_v61  ;;  %v6064_v20 = vsel %vm1399_vm14, %v6048_v15, %v11235_v12  ;;  %v5963_v61 = vsel %vm997_vm10, %v5958_v27, %v5962_v23  ;;  %v6339_v23 = vld [vmem:[#allocation3 + $0xb4] sm:$0xe]  ;;  %v5615_v15 = vld [vmem:[#allocation3 + $0xc0] sm:$0x1] }
 0x3a0   : > { %5206 = vrot.lane.b32.xlu0 %v6969_v28, %s7590_s8  ;;  %v5406_v6 = vsel %vm1484_vm4, %v5390_v24, %v5277_v42  ;;  %v5392_v40 = vsel %vm1467_vm2, %v5376_v30, %v5250_v34  ;;  %v6335_v24 = vld [vmem:[#allocation3 + $0xb4] sm:$0xf]  ;;  %v6336_v42 = vld [vmem:[#allocation3 + $0xb8] sm:$0xf]  ;;  %v6080_v52 = vsel %vm1416_vm15, %v6064_v20, %v11249_v51  ;;  %v5971_v51 = vsel %vm997_vm10, %v5966_v36, %v11383_v39  ;;  %v6340_v20 = vld [vmem:[#allocation3 + $0xc0] sm:$0xf] }
 0x3a1   : > { %5940 = vrot.lane.b32.xlu1 %v11126_v16, %s7590_s8  ;;  %7348 = vmatprep.mubr.msk.bf16.mxu0 %vm1528_vm5, %v5406_v6  ;;  %v6096_v12 = vsel %vm1433_vm0, %v6080_v52, %v11274_v47  ;;  %v11404_v6 = vcombine.low %v6335_v24, %v6336_v42  ;;  %v6369_v37 = vshll.u32 %v7064_v63, 16  ;;  %v5723_v16 = vshrl.u32 %v10949_v22, 16  ;;  %v6342_v36 = vld [vmem:[#allocation3 + $0xc8] sm:$0xf] }
 0x3a2   : > { %v11348_v25 = vpop.permute.xlu0 %4994  ;;  %v6112_v34 = vsel %vm1450_vm1, %v6096_v12, %v11290_v48  ;;  %v6006_v48 = vrot.slane %v11318_v14, 1  ;;  %v6373_v27 = vshrl.u32 %v7064_v63, 16 }
 0x3a3   : > { %v6013_v41 = vpop.permute.xlu1 %6012  ;;  %v6128_v60 = vsel %vm1467_vm2, %v6112_v34, %v11324_v35  ;;  %v6008_v35 = vrot.slane %v11332_v55, 1  ;;  %v6364_v54 = vshll.u32 %v11404_v6, 16  ;;  %v6362_v46 = vshrl.u32 %v11404_v6, 16 }
 0x3a4   : > { %5942 = vrot.lane.b32.xlu0 %v11318_v14, %s7590_s8  ;;  %v6142_v17 = vsel %vm1484_vm4, %v6126_v45, %v6013_v41  ;;  %v6007_v8 = vsel %vm1080_vm9, %v6004_v18, %v6006_v48  ;;  %v5725_v59 = vor.u32 %v5723_v16, %v10996_v38  ;;  %v6384_v38 = vrot.slane %v7064_v63, 1 }
 0x3a5   : > { %5255 = vrot.lane.b32.xlu1 %v5239_v21, %s7591_s13  ;;  %7366 = vmatprep.mubr.msk.bf16.mxu1 %vm1528_vm5, %v6142_v17  ;;  %v6009_v57 = vsel %vm1080_vm9, %v6006_v48, %v6008_v35  ;;  %v6366_v45 = vrot.slane %v6364_v54, 1  ;;  %v6371_v21 = vrot.slane %v6369_v37, 1 }
 0x3a6   : > { %v11375_v28 = vpop.permute.xlu0 %5730 }
 0x3a7   : > { %v5279_v32 = vpop.permute.xlu1 %5278  ;;  %v6367_v7 = vor.u32 %v6366_v45, %v6362_v46  ;;  %v6375_v19 = vor.u32 %v6373_v27, %v6371_v21 }
 0x3a8   : > { %5257 = vrot.lane.b32.xlu0 %v5242_v31, %s7591_s13  ;;  %v5408_v9 = vsel %vm1484_vm4, %v5392_v40, %v5279_v32  ;;  %v7065_v31 = vcombine.low %v6339_v23, %v6336_v42  ;;  %v6341_v40 = vld [vmem:[#allocation3 + $0xc4] sm:$0xf]  ;;  %v7022_v42 = vcombine.low %v11304_v56, %v5615_v15 }
 0x3a9   : > { %5991 = vrot.lane.b32.xlu1 %v5963_v61, %s7591_s13  ;;  %7349 = vmatmul.mubr.msk.bf16.gmra.mrb[36].mxu0 %vm1528_vm5, %v5408_v9  ;;  %v6372_v58 = vsel %vm997_vm10, %v6367_v7, %v6371_v21  ;;  %v7066_v9 = vcombine.low %v6340_v20, %v6341_v40 }
 0x3aa   : > { %v11396_v5 = vpop.permute.xlu0 %4996  ;;  %v6383_v32 = vrot.slane %v7065_v31, 1  ;;  %v5869_v45 = vshrl.u32 %v7022_v42, 16  ;;  %v5904_v31 = vrot.slane %v7022_v42, 1 }
 0x3ab   : > { %v6015_v47 = vpop.permute.xlu1 %6014  ;;  %v6408_v34 = vshll.u32 %v7066_v9, 16  ;;  %v6406_v48 = vshrl.u32 %v7066_v9, 16 }
 0x3ac   : > { %5993 = vrot.lane.b32.xlu0 %v5971_v51, %s7591_s13  ;;  %v6144_v10 = vsel %vm1484_vm4, %v6128_v60, %v6015_v47  ;;  %v6385_v52 = vsel %vm1080_vm9, %v6383_v32, %v6384_v38  ;;  %v7021_v60 = vcombine.low %v11304_v56, %v11304_v56  ;;  %v5861_v47 = vshrl.u32 %v11259_v49, 16 }
 0x3ad   : > { %5284 = vrot.lane.b32.xlu1 %v5271_v33, %s7592_s16  ;;  %7367 = vmatmul.mubr.msk.bf16.vlgmr.msra.gmra.mrb[36].mxu1 %vm1528_vm5, %v6144_v10  ;;  %v6410_v63 = vrot.slane %v6408_v34, 1  ;;  %v7067_v56 = vcombine.low %v6342_v36, %v6342_v36  ;;  %v5620_v34 = vld [vmem:[#allocation3 + $0xcc] sm:$0x1] }
 0x3ae   : > { %v11417_v26 = vpop.permute.xlu0 %5732 }
 0x3af   : > { %v11424_v13 = vpop.permute.xlu1 %5028  ;;  %v6411_v21 = vor.u32 %v6410_v63, %v6406_v48 }
 0x3b0   : > { %5286 = vrot.lane.b32.xlu0 %v5270_v43, %s7592_s16  ;;  %v12128_v43 = vrot.slane %v10949_v22, 1  ;;  %v5865_v22 = vshll.u32 %v7022_v42, 16 }
 0x3b1   : > { %6020 = vrot.lane.b32.xlu1 %v6007_v8, %s7592_s16  ;;  %v7565_v8 = vld [vmem:[%s11897_s3] sm:$0xff]  }
 0x3b2   : > { %v11429_v14 = vpop.permute.xlu0 %5030  ;;  %v5867_v33 = vrot.slane %v5865_v22, 1  ;;  %7382 = vmatprep.subr.bf16.mxu0 %v7565_v8  ;;  %v5619_v22 = vld [vmem:[#allocation3 + $0xc8] sm:$0xf] }
 0x3b3   : > { %v11437_v41 = vpop.permute.xlu1 %5764  ;;  %7383 = vmatpush3.bf16.msra.mxu0 %v7565_v8 }
 0x3b4   : > { %6022 = vrot.lane.b32.xlu0 %v6009_v57, %s7592_s16  ;;  %v5863_v57 = vor.u32 %v5861_v47, %v11277_v3  ;;  %v5871_v27 = vor.u32 %v5869_v45, %v5867_v33  ;;  %v11521_v47 = vcombine.low %v5619_v22, %v5620_v34 }
 0x3b5   : > { %5738 = vrot.lane.b32.xlu1 %v11010_v44, %s7586_s29 }
 0x3b6   : > { %v11440_v18 = vpop.permute.xlu0 %5766  ;;  %v5868_v16 = vsel %vm997_vm10, %v5863_v57, %v5867_v33  ;;  %v12129_v33 = vld [vmem:[#allocation28_spill] sm:$0xff] }
 0x3b7   : > { %v11446_v17 = vpop.permute.xlu1 %5058  ;;  %v5297_v48 = vsel %vm1364_vm12, %v12129_v33, %v11348_v25 }
 0x3b8   : > { %5740 = vrot.lane.b32.xlu0 %v5725_v59, %s7586_s29  ;;  %v5314_v8 = vsel %vm1382_vm13, %v5297_v48, %v11424_v13  ;;  %v6033_v13 = vsel %vm1364_vm12, %v12093_v2, %v11375_v28  ;;  %v7567_v2 = vld [vmem:[%s11897_s3 + $0x10] ss:$0 sps:$4 sm:$0x33]   ;;  %v12130_v48 = vld [vmem:[#allocation43_spill] sm:$0xff] }
 0x3b9   : > { %6376 = vrot.lane.b32.xlu1 %v6372_v58, %s7586_s29  ;;  %v6344_v58 = vld [vmem:[#allocation3 + $0xc0] sm:$0xe]  ;;  %v5330_v45 = vsel %vm1399_vm14, %v5314_v8, %v11446_v17  ;;  %v7027_v17 = vcombine.low %v5619_v22, %v5619_v22 }
 0x3ba   : > { %v11449_v53 = vpop.permute.xlu0 %5060 }
 0x3bb   : > { %v11453_v44 = vpop.permute.xlu1 %5794 }
 0x3bc   : > { %6378 = vrot.lane.b32.xlu0 %v6375_v19, %s7586_s29 }
 0x3bd   : > { %5772 = vrot.lane.b32.xlu1 %v11029_v0, %s7585_s28  ;;  %v6343_v0 = vld [vmem:[#allocation3 + $0xcc] sm:$0x1] }
 0x3be   : > { %v11455_v30 = vpop.permute.xlu0 %5796  ;;  %v11472_v62 = vcombine.low %v6342_v36, %v6343_v0 }
 0x3bf   : > { %v11462_v24 = vpop.permute.xlu1 %5140 }
 0x3c0   : > { %5774 = vrot.lane.b32.xlu0 %v12128_v43, %s7585_s28  ;;  %v6413_v54 = vshll.u32 %v11472_v62, 16  ;;  %v6417_v23 = vshrl.u32 %v11472_v62, 16  ;;  %v6345_v43 = vld [vmem:[#allocation3 + $0xcc] sm:$0xf]  ;;  %v6428_v0 = vrot.slane %v11472_v62, 1  ;;  %v5346_v25 = vsel %vm1416_vm15, %v5330_v45, %v11462_v24 }
 0x3c1   : > { %6386 = vrot.lane.b32.xlu1 %v6385_v52, %s7585_s28  ;;  %v11506_v52 = vld [vmem:[#allocation3 + $0xd0] sm:$0xf] }
 0x3c2   : > { %v11466_v61 = vpop.permute.xlu0 %5142  ;;  %v6415_v59 = vrot.slane %v6413_v54, 1  ;;  %v6347_v54 = vld [vmem:[#allocation3 + $0xd4] sm:$0xf] }
 0x3c3   : > { %v11470_v12 = vpop.permute.xlu1 %5876 }
 0x3c4   : > { %6388 = vrot.lane.b32.xlu0 %v6384_v38, %s7585_s28  ;;  %v6416_v19 = vsel %vm997_vm10, %v6411_v21, %v6415_v59  ;;  %v7069_v38 = vcombine.low %v6344_v58, %v6341_v40  ;;  %v6419_v20 = vor.u32 %v6417_v23, %v6415_v59  ;;  %v7566_v40 = vld [vmem:[%s11897_s3 + $0x8] sm:$0xff]   ;;  %v5972_v21 = vshrl.u32 %v11332_v55, 16 }
 0x3c5   : > { %5802 = vrot.lane.b32.xlu1 %v11259_v49, %s7587_s30  ;;  %7384 = vmatprep.subr.bf16.mxu0 %v7566_v40  ;;  %v5976_v59 = vshll.u32 %v11521_v47, 16 }
 0x3c6   : > { %v11474_v51 = vpop.permute.xlu0 %5878  ;;  %v6427_v36 = vrot.slane %v7069_v38, 1  ;;  %7385 = vmatpush3.bf16.msra.mxu0 %v7566_v40 }
 0x3c7   : > { %v11482_v10 = vpop.permute.xlu1 %5174  ;;  %7399 = vmatprep.subr.msk.bf16.mxu0 %vm1545_vm11, %v7567_v2 }
 0x3c8   : > { %5804 = vrot.lane.b32.xlu0 %v7021_v60, %s7587_s30  ;;  %v7070_v60 = vcombine.low %v6345_v43, %v11506_v52  ;;  %v6429_v62 = vsel %vm1080_vm9, %v6427_v36, %v6428_v0  ;;  %v7071_v43 = vcombine.low %v6347_v54, %v6347_v54  ;;  %v5978_v36 = vrot.slane %v5976_v59, 1 }
 0x3c9   : > { %6398 = vrot.lane.b32.xlu1 %v7066_v9, %s7587_s30  ;;  %v5905_v9 = vsel %vm1080_vm9, %v5902_v50, %v5904_v31  ;;  %v6348_v50 = vld [vmem:[#allocation3 + $0xd8] sm:$0x1] }
 0x3ca   : > { %v11488_v37 = vpop.permute.xlu0 %5176  ;;  %v6452_v57 = vshll.u32 %v7070_v60, 16  ;;  %v6450_v58 = vshrl.u32 %v7070_v60, 16 }
 0x3cb   : > { %v11493_v46 = vpop.permute.xlu1 %5910 }
 0x3cc   : > { %6400 = vrot.lane.b32.xlu0 %v7067_v56, %s7587_s30  ;;  %v11531_v56 = vcombine.low %v6347_v54, %v6348_v50  ;;  %v6035_v54 = vsel %vm1364_vm12, %v12130_v48, %v11417_v26 }
 0x3cd   : > { %5884 = vrot.lane.b32.xlu1 %v5868_v16, %s7588_s6 }
 0x3ce   : > { %v11496_v7 = vpop.permute.xlu0 %5912  ;;  %v6457_v38 = vshll.u32 %v11531_v56, 16 }
 0x3cf   : > { %v5201_v3 = vpop.permute.xlu1 %5200 }
 0x3d0   : > { %5886 = vrot.lane.b32.xlu0 %v5871_v27, %s7588_s6  ;;  %v5362_v27 = vsel %vm1433_vm0, %v5346_v25, %v11482_v10  ;;  %v6459_v50 = vrot.slane %v6457_v38, 1 }
 0x3d1   : > { %6420 = vrot.lane.b32.xlu1 %v6416_v19, %s7588_s6  ;;  %v6050_v19 = vsel %vm1382_vm13, %v6033_v13, %v11437_v41  ;;  %v5378_v24 = vsel %vm1450_vm1, %v5362_v27, %v5201_v3  ;;  %v5974_v41 = vor.u32 %v5972_v21, %v11383_v39  ;;  %v5980_v39 = vshrl.u32 %v11521_v47, 16 }
 0x3d2   : > { %v11502_v15 = vpop.permute.xlu0 %5202  ;;  %v6066_v28 = vsel %vm1399_vm14, %v6050_v19, %v11453_v44  ;;  %v5299_v44 = vsel %vm1364_vm12, %v10393_v29, %v11396_v5 }
 0x3d3   : > { %v5937_v32 = vpop.permute.xlu1 %5936  ;;  %v6082_v3 = vsel %vm1416_vm15, %v6066_v28, %v11470_v12  ;;  %v5316_v12 = vsel %vm1382_vm13, %v5299_v44, %v11429_v14 }
 0x3d4   : > { %6422 = vrot.lane.b32.xlu0 %v6419_v20, %s7588_s6  ;;  %v6098_v40 = vsel %vm1433_vm0, %v6082_v3, %v11493_v46  ;;  %v5332_v29 = vsel %vm1399_vm14, %v5316_v12, %v11449_v53 }
 0x3d5   : > { %5918 = vrot.lane.b32.xlu1 %v5905_v9, %s7589_s7  ;;  %v6114_v34 = vsel %vm1450_vm1, %v6098_v40, %v5937_v32  ;;  %v5348_v33 = vsel %vm1416_vm15, %v5332_v29, %v11466_v61  ;;  %v5979_v32 = vsel %vm997_vm10, %v5974_v41, %v5978_v36  ;;  %v6052_v61 = vsel %vm1382_vm13, %v6035_v54, %v11440_v18  ;;  %v4816_v41 = vld [vmem:[%s7636_s24 + $0x8] sm:$0xff] }
 0x3d6   : > { %v11515_v42 = vpop.permute.xlu0 %5938  ;;  %v5364_v53 = vsel %vm1433_vm0, %v5348_v33, %v11488_v37  ;;  %v6068_v37 = vsel %vm1399_vm14, %v6052_v61, %v11455_v30  ;;  %v4818_v33 = vld [vmem:[%s7636_s24 + $0x18] sm:$0xff]  ;;  %v4820_v54 = vld [vmem:[%s7636_s24 + $0x28] sm:$0xff] }
 0x3d7   : > { %v5252_v49 = vpop.permute.xlu1 %5251  ;;  %v5380_v45 = vsel %vm1450_vm1, %v5364_v53, %v11502_v15  ;;  %v6084_v18 = vsel %vm1416_vm15, %v6068_v37, %v11474_v51  ;;  %v6010_v15 = vrot.slane %v11521_v47, 1 }
 0x3d8   : > { %5920 = vrot.lane.b32.xlu0 %v5904_v31, %s7589_s7  ;;  %v6454_v31 = vrot.slane %v6452_v57, 1  ;;  %v5394_v10 = vsel %vm1467_vm2, %v5378_v24, %v5252_v49  ;;  %v5982_v57 = vor.u32 %v5980_v39, %v5978_v36 }
 0x3d9   : > { %6430 = vrot.lane.b32.xlu1 %v6429_v62, %s7589_s7  ;;  %v6349_v62 = vld [vmem:[#allocation3 + $0xcc] sm:$0xe] }
 0x3da   : > { %v11526_v63 = vpop.permute.xlu0 %5253  ;;  %v6455_v49 = vor.u32 %v6454_v31, %v6450_v58  ;;  %v7073_v26 = vcombine.low %v6349_v62, %v11506_v52  ;;  %v6100_v52 = vsel %vm1433_vm0, %v6084_v18, %v11496_v7  ;;  %v6011_v58 = vsel %vm1080_vm9, %v6008_v35, %v6010_v15  ;;  %v4815_v31 = vld [vmem:[%s7636_s24] sm:$0xff] }
 0x3db   : > { %v5988_v16 = vpop.permute.xlu1 %5987  ;;  %v5396_v21 = vsel %vm1467_vm2, %v5380_v45, %v11526_v63  ;;  %v6116_v30 = vsel %vm1450_vm1, %v6100_v52, %v11515_v42 }
 0x3dc   : > { %6432 = vrot.lane.b32.xlu0 %v6428_v0, %s7589_s7  ;;  %v6543_v0 = vsel %vm1545_vm11, %v7567_v2, 0  ;;  %v6130_v5 = vsel %vm1467_vm2, %v6114_v34, %v5988_v16  ;;  %v6460_v16 = vsel %vm997_vm10, %v6455_v49, %v6459_v50  ;;  %v6471_v63 = vrot.slane %v7073_v26, 1 }
 0x3dd   : > { %5944 = vrot.lane.b32.xlu1 %v11332_v55, %s7590_s8  ;;  %7387 = vmatpush3.bf16.msra.mxu0 %v6543_v0  ;;  %v11642_v55 = vld [vmem:[%s11898_s4] ss:$0 sm:$0xff] }
 0x3de   : > { %v11545_v23 = vpop.permute.xlu0 %5989 }
 0x3df   : > { %v5281_v20 = vpop.permute.xlu1 %5280  ;;  %v6132_v51 = vsel %vm1467_vm2, %v6116_v30, %v11545_v23  ;;  %v4822_v30 = vld [vmem:[%s7636_s24 + $0x38] sm:$0xff] }
 0x3e0   : > { %5946 = vrot.lane.b32.xlu0 %v7027_v17, %s7590_s8  ;;  %v5410_v9 = vsel %vm1484_vm4, %v5394_v10, %v5281_v20  ;;  %v6472_v17 = vrot.slane %v11531_v56, 1  ;;  %v4817_v10 = vld [vmem:[%s7636_s24 + $0x10] sm:$0xff] }
 0x3e1   : > { %6442 = vrot.lane.b32.xlu1 %v7070_v60, %s7590_s8  ;;  %7352 = vmatprep.mubr.msk.bf16.mxu0 %vm1528_vm5, %v5410_v9  ;;  %v6461_v60 = vshrl.u32 %v11531_v56, 16 }
 0x3e2   : > { %v11571_v22 = vpop.permute.xlu0 %4998  ;;  %v6473_v42 = vsel %vm1080_vm9, %v6471_v63, %v6472_v17 }
 0x3e3   : > { %v6017_v46 = vpop.permute.xlu1 %6016  ;;  %v6463_v59 = vor.u32 %v6461_v60, %v6459_v50 }
 0x3e4   : > { %6444 = vrot.lane.b32.xlu0 %v7071_v43, %s7590_s8  ;;  %v6146_v14 = vsel %vm1484_vm4, %v6130_v5, %v6017_v46  ;;  %v4819_v46 = vld [vmem:[%s7636_s24 + $0x20] sm:$0xff] }
 0x3e5   : > { %5995 = vrot.lane.b32.xlu1 %v5979_v32, %s7591_s13  ;;  %7370 = vmatprep.mubr.msk.bf16.mxu1 %vm1528_vm5, %v6146_v14 }
 0x3e6   : > { %v11593_v8 = vpop.permute.xlu0 %5734 }
 0x3e7   : > { %v5283_v25 = vpop.permute.xlu1 %5282 }
 0x3e8   : > { %5997 = vrot.lane.b32.xlu0 %v5982_v57, %s7591_s13  ;;  %v5412_v13 = vsel %vm1484_vm4, %v5396_v21, %v5283_v25 }
 0x3e9   : > { %6464 = vrot.lane.b32.xlu1 %v6460_v16, %s7591_s13  ;;  %7353 = vmatmul.mubr.msk.bf16.gmra.mrb[40].mxu0 %vm1528_vm5, %v5412_v13 }
 0x3ea   : > { %v11614_v27 = vpop.permute.xlu0 %5000 }
 0x3eb   : > { %v6019_v47 = vpop.permute.xlu1 %6018 }
 0x3ec   : > { %6466 = vrot.lane.b32.xlu0 %v6463_v59, %s7591_s13  ;;  %v6148_v7 = vsel %vm1484_vm4, %v6132_v51, %v6019_v47 }
 0x3ed   : > { %6024 = vrot.lane.b32.xlu1 %v6011_v58, %s7592_s16  ;;  %7371 = vmatmul.mubr.msk.bf16.gmra.mrb[40].mxu1 %vm1528_vm5, %v6148_v7 }
 0x3ee   : > { %v11628_v19 = vpop.permute.xlu0 %5736 }
 0x3ef   : > { %v11634_v56 = vpop.permute.xlu1 %5032 }
 0x3f0   : > { %6026 = vrot.lane.b32.xlu0 %v6010_v15, %s7592_s16 }
 0x3f1   : > { %6474 = vrot.lane.b32.xlu1 %v6473_v42, %s7592_s16  ;;  %v4821_v42 = vld [vmem:[%s7636_s24 + $0x30] sm:$0xff] }
 0x3f2   : > { %v11636_v23 = vpop.permute.xlu0 %5034 }
 0x3f3   : > { %v7324_v35 = vpop.f32.mrb[20].mxu1  ;;  %v11645_v38 = vpop.permute.xlu1 %5768 }
 0x3f4   : > { %v4758_v24 = vpop.f32.mrb[21].mxu1 }
 0x3f5   : > { %v4759_v2 = vadd.f32 %v11642_v55, %v4758_v24  ;;  %v7325_v28 = vpop.f32.mrb[22].mxu1  ;;  %6476 = vrot.lane.b32.xlu1 %v6472_v17, %s7592_s16 }
 0x3f6   : > { %v4769_v20 = vadd.f32 %v7325_v28, %v11642_v55  ;;  %v4761_v43 = vpop.f32.mrb[23].mxu1  ;;  %v11651_v3 = vpop.permute.xlu0 %5770 }
 0x3f7   : > { %v4825_v9 = vadd.f32 %v4815_v31, %v4759_v2  ;;  %v4762_v36 = vadd.f32 %v11642_v55, %v4761_v43  ;;  %v11655_v44 = vpop.permute.xlu1 %5062 }
 0x3f8   : > { %v4827_v0 = vadd.f32 %v4817_v10, %v4769_v20 }
 0x3f9   : > { %v4835_v40 = vmax.f32 %v4825_v9, 0.0  ;;  %v4826_v39 = vadd.f32 %v4816_v41, %v4762_v36  ;;  %v12131_v36 = vld [vmem:[#allocation13_spill] sm:$0xff] }
 0x3fa   : > { %v4837_v12 = vmax.f32 %v4827_v0, 0.0  ;;  %v11657_v34 = vpop.permute.xlu0 %5064  ;;  %v5301_v0 = vsel %vm1364_vm12, %v12131_v36, %v11571_v22  ;;  %v12132_v22 = vld [vmem:[#allocation44_spill] sm:$0xff] }
 0x3fb   : > { %4845 = vst.msk [vmem:[%s7641_s27] sm:$0xff] %vm1364_vm12, %v4835_v40  ;;  %v4836_v49 = vmax.f32 %v4826_v39, 0.0  ;;  %v11663_v50 = vpop.permute.xlu1 %5798  ;;  %v7574_v40 = vld [vmem:[#allocation3 + $0x74] sm:$0xf] }
 0x3fc   : > { %4847 = vst.msk [vmem:[%s7641_s27 + $0x10] sm:$0xff] %vm1364_vm12, %v4837_v12  ;;  %v6953_v39 = vcombine.low %v7574_v40, %v7574_v40 }
 0x3fd   : > { %4846 = vst.msk [vmem:[%s7641_s27 + $0x8] sm:$0xff] %vm1364_vm12, %v4836_v49  ;;  %v5318_v49 = vsel %vm1382_vm13, %v5301_v0, %v11634_v56 }
 0x3fe   : > { %v11667_v29 = vpop.permute.xlu0 %5800 }
 0x3ff   : > { %v7328_v5 = vpop.f32.mrb[24].mxu1  ;;  %v5145_v14 = vpop.permute.xlu1 %5144 }
 0x400   : > { %v4781_v60 = vadd.f32 %v7328_v5, %v11642_v55  ;;  %v4773_v62 = vpop.f32.mrb[25].mxu1  ;;  %v5304_v5 = vsel %vm1364_vm12, %v6953_v39, %v11614_v27 }
 0x401   : > { %v4774_v32 = vadd.f32 %v11642_v55, %v4773_v62  ;;  %v7329_v48 = vpop.f32.mrb[26].mxu1  ;;  %v5320_v62 = vsel %vm1382_vm13, %v5304_v5, %v11636_v23  ;;  %v6039_v23 = vsel %vm1364_vm12, %v10742_v1, %v11628_v19 }
 0x402   : > { %v4829_v53 = vadd.f32 %v4819_v46, %v4781_v60  ;;  %v4784_v57 = vadd.f32 %v7329_v48, %v11642_v55  ;;  %v4776_v61 = vpop.f32.mrb[27].mxu1  ;;  %v5147_v45 = vpop.permute.xlu0 %5146  ;;  %v5334_v46 = vsel %vm1399_vm14, %v5318_v49, %v11655_v44  ;;  %v5336_v48 = vsel %vm1399_vm14, %v5320_v62, %v11657_v34 }
 0x403   : > { %v4828_v16 = vadd.f32 %v4818_v33, %v4774_v32  ;;  %v5881_v21 = vpop.permute.xlu1 %5880  ;;  %v5350_v33 = vsel %vm1416_vm15, %v5334_v46, %v5145_v14  ;;  %v6037_v32 = vsel %vm1364_vm12, %v12132_v22, %v11593_v8  ;;  %v5352_v44 = vsel %vm1416_vm15, %v5336_v48, %v5147_v45  ;;  %v6985_v48 = vld [vmem:[%s7636_s24 + $0x58] sm:$0xff] }
 0x404   : > { %v4839_v26 = vmax.f32 %v4829_v53, 0.0  ;;  %v4830_v37 = vadd.f32 %v4820_v54, %v4784_v57  ;;  %v6054_v27 = vsel %vm1382_vm13, %v6037_v32, %v11645_v38  ;;  %v6056_v61 = vsel %vm1382_vm13, %v6039_v23, %v11651_v3 }
 0x405   : > { %v4838_v25 = vmax.f32 %v4828_v16, 0.0  ;;  %v6070_v8 = vsel %vm1399_vm14, %v6054_v27, %v11663_v50  ;;  %v6072_v1 = vsel %vm1399_vm14, %v6056_v61, %v11667_v29 }
 0x406   : > { %4849 = vst.msk [vmem:[%s7641_s27 + $0x20] sm:$0xff] %vm1364_vm12, %v4839_v26  ;;  %v4840_v59 = vmax.f32 %v4830_v37, 0.0  ;;  %v5883_v18 = vpop.permute.xlu0 %5882  ;;  %v6086_v38 = vsel %vm1416_vm15, %v6070_v8, %v5881_v21 }
 0x407   : > { %4848 = vst.msk [vmem:[%s7641_s27 + $0x18] sm:$0xff] %vm1364_vm12, %v4838_v25  ;;  %v5179_v13 = vpop.permute.xlu1 %5178  ;;  %v6088_v37 = vsel %vm1416_vm15, %v6072_v1, %v5883_v18 }
 0x408   : > { %4850 = vst.msk [vmem:[%s7641_s27 + $0x28] sm:$0xff] %vm1364_vm12, %v4840_v59  ;;  %v5366_v56 = vsel %vm1433_vm0, %v5350_v33, %v5179_v13  ;;  %v6986_v33 = vld [vmem:[%s7636_s24 + $0x60] sm:$0xff] }
 0x40a   : > { %v5181_v15 = vpop.permute.xlu0 %5180 }
 0x40b   : > { %v7332_v52 = vpop.f32.mrb[28].mxu1  ;;  %v5915_v51 = vpop.permute.xlu1 %5914  ;;  %v5368_v14 = vsel %vm1433_vm0, %v5352_v44, %v5181_v15 }
 0x40c   : > { %v4796_v63 = vadd.f32 %v7332_v52, %v11642_v55  ;;  %v4788_v17 = vpop.f32.mrb[29].mxu1  ;;  %v6102_v19 = vsel %vm1433_vm0, %v6086_v38, %v5915_v51 }
 0x40d   : > { %v7333_v47 = vpop.f32.mrb[30].mxu1 }
 0x40e   : > { %v4832_v7 = vadd.f32 %v4822_v30, %v4796_v63  ;;  %v4790_v58 = vpop.f32.mrb[31].mxu1  ;;  %v5917_v35 = vpop.permute.xlu0 %5916 }
 0x40f   : > { %v4791_v24 = vadd.f32 %v11642_v55, %v4790_v58  ;;  %v5205_v2 = vpop.permute.xlu1 %5204  ;;  %v6104_v25 = vsel %vm1433_vm0, %v6088_v37, %v5917_v35 }
 0x410   : > { %v4842_v31 = vmax.f32 %v4832_v7, 0.0  ;;  %v5382_v53 = vsel %vm1450_vm1, %v5366_v56, %v5205_v2  ;;  %v4823_v2 = vld [vmem:[%s7636_s24 + $0x40] sm:$0xff] }
 0x411   : > { %v4831_v28 = vadd.f32 %v4821_v42, %v4791_v24 }
 0x412   : > { %4852 = vst.msk [vmem:[%s7641_s27 + $0x38] sm:$0xff] %vm1364_vm12, %v4842_v31  ;;  %v5207_v10 = vpop.permute.xlu0 %5206 }
 0x413   : > { %v4841_v20 = vmax.f32 %v4831_v28, 0.0  ;;  %v5941_v43 = vpop.permute.xlu1 %5940  ;;  %v5384_v45 = vsel %vm1450_vm1, %v5368_v14, %v5207_v10 }
 0x414   : > { %v6118_v3 = vsel %vm1450_vm1, %v6102_v19, %v5941_v43 }
 0x415   : > { %4851 = vst.msk [vmem:[%s7641_s27 + $0x30] sm:$0xff] %vm1364_vm12, %v4841_v20 }
 0x416   : > { %v5943_v41 = vpop.permute.xlu0 %5942 }
 0x417   : > { %v5256_v9 = vpop.permute.xlu1 %5255  ;;  %v6120_v13 = vsel %vm1450_vm1, %v6104_v25, %v5943_v41  ;;  %v4824_v41 = vld [vmem:[%s7636_s24 + $0x48] sm:$0xff] }
 0x418   : > { %v5398_v34 = vsel %vm1467_vm2, %v5382_v53, %v5256_v9 }
 0x41a   : > { %v5258_v12 = vpop.permute.xlu0 %5257 }
 0x41b   : > { %v5992_v60 = vpop.permute.xlu1 %5991  ;;  %v5400_v50 = vsel %vm1467_vm2, %v5384_v45, %v5258_v12  ;;  %v6984_v12 = vld [vmem:[%s7636_s24 + $0x50] sm:$0xff] }
 0x41c   : > { %v6134_v59 = vsel %vm1467_vm2, %v6118_v3, %v5992_v60 }
 0x41e   : > { %v5994_v54 = vpop.permute.xlu0 %5993 }
 0x41f   : > { %v5285_v57 = vpop.permute.xlu1 %5284  ;;  %v6136_v52 = vsel %vm1467_vm2, %v6120_v13, %v5994_v54 }
 0x420   : > { %v5414_v16 = vsel %vm1484_vm4, %v5398_v34, %v5285_v57 }
 0x421   : > { %7356 = vmatprep.mubr.msk.bf16.mxu0 %vm1528_vm5, %v5414_v16 }
 0x422   : > { %v5287_v26 = vpop.permute.xlu0 %5286 }
 0x423   : > { %v5416_v21 = vsel %vm1484_vm4, %v5400_v50, %v5287_v26  ;;  %v6021_v29 = vpop.permute.xlu1 %6020 }
 0x424   : > { %7357 = vmatmul.mubr.msk.bf16.gmra.mrb[44].mxu0 %vm1528_vm5, %v5416_v21  ;;  %v6150_v15 = vsel %vm1484_vm4, %v6134_v59, %v6021_v29  ;;  %v7575_v29 = vld [vmem:[#allocation3 + $0xb0] sm:$0xf] }
 0x425   : > { %7374 = vmatprep.mubr.msk.bf16.mxu1 %vm1528_vm5, %v6150_v15  ;;  %v7011_v13 = vcombine.low %v7575_v29, %v7575_v29 }
 0x426   : > { %v6023_v30 = vpop.permute.xlu0 %6022 }
 0x427   : > { %v6152_v18 = vsel %vm1484_vm4, %v6136_v52, %v6023_v30  ;;  %v5739_v63 = vpop.permute.xlu1 %5738 }
 0x428   : > { %7375 = vmatmul.mubr.msk.bf16.gmra.mrb[44].mxu1 %vm1528_vm5, %v6152_v18  ;;  %v6041_v59 = vsel %vm1364_vm12, %v10938_v4, %v5739_v63 }
 0x42a   : > { %v11740_v17 = vpop.permute.xlu0 %5740 }
 0x42b   : > { %v11742_v51 = vpop.permute.xlu1 %6376  ;;  %v6044_v30 = vsel %vm1364_vm12, %v7011_v13, %v11740_v17 }
 0x42e   : > { %v11744_v47 = vpop.permute.xlu0 %6378 }
 0x42f   : > { %v5773_v7 = vpop.permute.xlu1 %5772 }
 0x430   : > { %v6058_v52 = vsel %vm1382_vm13, %v6041_v59, %v5773_v7 }
 0x432   : > { %v5775_v58 = vpop.permute.xlu0 %5774 }
 0x433   : > { %v11746_v42 = vpop.permute.xlu1 %6386 }
 0x436   : > { %v11748_v35 = vpop.permute.xlu0 %6388 }
 0x437   : > { %v7336_v24 = vpop.f32.mrb[32].mxu1  ;;  %v5803_v28 = vpop.permute.xlu1 %5802 }
 0x438   : > { %v4802_v31 = vpop.f32.mrb[33].mxu1  ;;  %v6074_v18 = vsel %vm1399_vm14, %v6058_v52, %v5803_v28 }
 0x439   : > { %v4803_v10 = vadd.f32 %v11642_v55, %v4802_v31  ;;  %v7337_v20 = vpop.f32.mrb[34].mxu1  ;;  %v6060_v31 = vsel %vm1382_vm13, %v6044_v30, %v5775_v58  ;;  %v7063_v58 = vcombine.low %v11409_v11, %v11409_v11 }
 0x43a   : > { %v4805_v43 = vpop.f32.mrb[35].mxu1  ;;  %v5805_v9 = vpop.permute.xlu0 %5804 }
 0x43b   : > { %v4833_v36 = vadd.f32 %v4823_v2, %v4803_v10  ;;  %v4806_v0 = vadd.f32 %v11642_v55, %v4805_v43  ;;  %v7346_v40 = vpop.f32.mrb[32].mxu0  ;;  %v6399_v49 = vpop.permute.xlu1 %6398  ;;  %v6479_v10 = vsel %vm1364_vm12, %v11404_v6, %v11742_v51  ;;  %v6076_v4 = vsel %vm1399_vm14, %v6060_v31, %v5805_v9 }
 0x43c   : > { %v5497_v39 = vpop.f32.mrb[33].mxu0  ;;  %v6484_v7 = vsel %vm1382_vm13, %v6479_v10, %v11746_v42 }
 0x43d   : > { %v4843_v5 = vmax.f32 %v4833_v36, 0.0  ;;  %v4834_v46 = vadd.f32 %v4824_v41, %v4806_v0  ;;  %v5498_v60 = vadd.f32 %v11642_v55, %v5497_v39  ;;  %v7347_v62 = vpop.f32.mrb[34].mxu0  ;;  %v6488_v43 = vsel %vm1399_vm14, %v6484_v7, %v6399_v49 }
 0x43e   : > { %v5508_v22 = vadd.f32 %v7347_v62, %v11642_v55  ;;  %v5500_v32 = vpop.f32.mrb[35].mxu0  ;;  %v6401_v56 = vpop.permute.xlu0 %6400  ;;  %v6482_v0 = vsel %vm1364_vm12, %v7063_v58, %v11744_v47 }
 0x43f   : > { %4853 = vst.msk [vmem:[%s7641_s27 + $0x40] sm:$0xff] %vm1364_vm12, %v4843_v5  ;;  %v4844_v54 = vmax.f32 %v4834_v46, 0.0  ;;  %v5564_v27 = vadd.f32 %v6984_v12, %v5498_v60  ;;  %v5501_v44 = vadd.f32 %v11642_v55, %v5500_v32  ;;  %v5885_v23 = vpop.permute.xlu1 %5884  ;;  %v6486_v12 = vsel %vm1382_vm13, %v6482_v0, %v11748_v35  ;;  %v7045_v0 = vld [vmem:[%s7636_s24 + $0xb8] sm:$0xff] }
 0x440   : > { %v5566_v53 = vadd.f32 %v6986_v33, %v5508_v22  ;;  %v6090_v2 = vsel %vm1416_vm15, %v6074_v18, %v5885_v23  ;;  %v6490_v46 = vsel %vm1399_vm14, %v6486_v12, %v6401_v56  ;;  %v6987_v23 = vld [vmem:[%s7636_s24 + $0x68] sm:$0xff] }
 0x441   : > { %4854 = vst.msk [vmem:[%s7641_s27 + $0x48] sm:$0xff] %vm1364_vm12, %v4844_v54  ;;  %v5574_v8 = vmax.f32 %v5564_v27, 0.0  ;;  %v5565_v14 = vadd.f32 %v6985_v48, %v5501_v44  ;;  %v6988_v27 = vld [vmem:[%s7636_s24 + $0x70] sm:$0xff]  ;;  %v7047_v12 = vld [vmem:[%s7636_s24 + $0xc8] sm:$0xff] }
 0x442   : > { %v5576_v34 = vmax.f32 %v5566_v53, 0.0  ;;  %v5887_v57 = vpop.permute.xlu0 %5886 }
 0x443   : > { %6994 = vst.msk [vmem:[%s7641_s27 + $0x50] sm:$0xff] %vm1364_vm12, %v5574_v8  ;;  %v5575_v61 = vmax.f32 %v5565_v14, 0.0  ;;  %v6421_v38 = vpop.permute.xlu1 %6420  ;;  %v6092_v17 = vsel %vm1416_vm15, %v6076_v4, %v5887_v57 }
 0x444   : > { %6996 = vst.msk [vmem:[%s7641_s27 + $0x60] sm:$0xff] %vm1364_vm12, %v5576_v34  ;;  %v6492_v9 = vsel %vm1416_vm15, %v6488_v43, %v6421_v38  ;;  %v6989_v34 = vld [vmem:[%s7636_s24 + $0x78] sm:$0xff]  ;;  %v6990_v43 = vld [vmem:[%s7636_s24 + $0x80] sm:$0xff] }
 0x445   : > { %6995 = vst.msk [vmem:[%s7641_s27 + $0x58] sm:$0xff] %vm1364_vm12, %v5575_v61 }
 0x446   : > { %v6423_v45 = vpop.permute.xlu0 %6422 }
 0x447   : > { %v5919_v16 = vpop.permute.xlu1 %5918  ;;  %v6494_v62 = vsel %vm1416_vm15, %v6490_v46, %v6423_v45 }
 0x448   : > { %v6106_v63 = vsel %vm1433_vm0, %v6090_v2, %v5919_v16 }
 0x44a   : > { %v5921_v1 = vpop.permute.xlu0 %5920 }
 0x44b   : > { %v6431_v19 = vpop.permute.xlu1 %6430  ;;  %v6108_v41 = vsel %vm1433_vm0, %v6092_v17, %v5921_v1 }
 0x44c   : > { %v6496_v40 = vsel %vm1433_vm0, %v6492_v9, %v6431_v19 }
 0x44e   : > { %v6433_v50 = vpop.permute.xlu0 %6432 }
 0x44f   : > { %v5945_v26 = vpop.permute.xlu1 %5944  ;;  %v6498_v35 = vsel %vm1433_vm0, %v6494_v62, %v6433_v50 }
 0x450   : > { %v6122_v28 = vsel %vm1450_vm1, %v6106_v63, %v5945_v26  ;;  %v7042_v26 = vld [vmem:[%s7636_s24 + $0xa0] sm:$0xff]  ;;  %v6991_v63 = vld [vmem:[%s7636_s24 + $0x88] sm:$0xff] }
 0x452   : > { %v5947_v37 = vpop.permute.xlu0 %5946 }
 0x453   : > { %v6443_v3 = vpop.permute.xlu1 %6442  ;;  %v6124_v36 = vsel %vm1450_vm1, %v6108_v41, %v5947_v37 }
 0x454   : > { %v6500_v49 = vsel %vm1450_vm1, %v6496_v40, %v6443_v3 }
 0x456   : > { %v6445_v21 = vpop.permute.xlu0 %6444 }
 0x457   : > { %v5996_v25 = vpop.permute.xlu1 %5995  ;;  %v6502_v22 = vsel %vm1450_vm1, %v6498_v35, %v6445_v21 }
 0x458   : > { %v6138_v6 = vsel %vm1467_vm2, %v6122_v28, %v5996_v25  ;;  %v7044_v25 = vld [vmem:[%s7636_s24 + $0xb0] sm:$0xff] }
 0x45a   : > { %v5998_v15 = vpop.permute.xlu0 %5997 }
 0x45b   : > { %v6465_v24 = vpop.permute.xlu1 %6464  ;;  %v6140_v11 = vsel %vm1467_vm2, %v6124_v36, %v5998_v15  ;;  %v7043_v15 = vld [vmem:[%s7636_s24 + $0xa8] sm:$0xff] }
 0x45c   : > { %v6504_v60 = vsel %vm1467_vm2, %v6500_v49, %v6465_v24 }
 0x45e   : > { %v6467_v20 = vpop.permute.xlu0 %6466 }
 0x45f   : > { %v6025_v51 = vpop.permute.xlu1 %6024  ;;  %v6506_v32 = vsel %vm1467_vm2, %v6502_v22, %v6467_v20 }
 0x460   : > { %v6154_v42 = vsel %vm1484_vm4, %v6138_v6, %v6025_v51  ;;  %v7046_v51 = vld [vmem:[%s7636_s24 + $0xc0] sm:$0xff] }
 0x461   : > { %7378 = vmatprep.mubr.msk.bf16.mxu1 %vm1528_vm5, %v6154_v42 }
 0x462   : > { %v6027_v39 = vpop.permute.xlu0 %6026 }
 0x463   : > { %v6156_v5 = vsel %vm1484_vm4, %v6140_v11, %v6027_v39  ;;  %v6475_v47 = vpop.permute.xlu1 %6474 }
 0x464   : > { %7379 = vmatmul.mubr.msk.bf16.gmra.mrb[48].mxu1 %vm1528_vm5, %v6156_v5  ;;  %v6508_v33 = vsel %vm1484_vm4, %v6504_v60, %v6475_v47 }
 0x465   : > { %7388 = vmatprep.mubr.msk.bf16.mxu0 %vm1528_vm5, %v6508_v33 }
 0x467   : > { %v6477_v48 = vpop.permute.xlu1 %6476 }
 0x468   : > { %v6510_v56 = vsel %vm1484_vm4, %v6506_v32, %v6477_v48 }
 0x469   : > { %7389 = vmatmul.mubr.msk.bf16.vlgmr.msra.gmra.mrb[48].mxu0 %vm1528_vm5, %v6510_v56  ;;  %v6992_v56 = vld [vmem:[%s7636_s24 + $0x90] sm:$0xff] }
 0x47c   : > { %v7350_v54 = vpop.f32.mrb[36].mxu0 }
 0x47d   : > { %v5520_v44 = vadd.f32 %v7350_v54, %v11642_v55  ;;  %v5512_v53 = vpop.f32.mrb[37].mxu0 }
 0x47e   : > { %v5513_v8 = vadd.f32 %v11642_v55, %v5512_v53  ;;  %v7351_v14 = vpop.f32.mrb[38].mxu0  ;;  %v6993_v53 = vld [vmem:[%s7636_s24 + $0x98] sm:$0xff] }
 0x47f   : > { %v5568_v57 = vadd.f32 %v6988_v27, %v5520_v44  ;;  %v5523_v61 = vadd.f32 %v7351_v14, %v11642_v55  ;;  %v5515_v38 = vpop.f32.mrb[39].mxu0 }
 0x480   : > { %v5567_v45 = vadd.f32 %v6987_v23, %v5513_v8  ;;  %v7368_v16 = vpop.f32.mrb[36].mxu1 }
 0x481   : > { %v5578_v1 = vmax.f32 %v5568_v57, 0.0  ;;  %v5569_v19 = vadd.f32 %v6989_v34, %v5523_v61  ;;  %v6237_v50 = vpop.f32.mrb[37].mxu1  ;;  %v7049_v34 = vld [vmem:[%s7636_s24 + $0xd8] sm:$0xff] }
 0x482   : > { %v5577_v37 = vmax.f32 %v5567_v45, 0.0  ;;  %v6238_v3 = vadd.f32 %v11642_v55, %v6237_v50  ;;  %v7369_v21 = vpop.f32.mrb[38].mxu1  ;;  %v7048_v50 = vld [vmem:[%s7636_s24 + $0xd0] sm:$0xff] }
 0x483   : > { %6998 = vst.msk [vmem:[%s7641_s27 + $0x70] sm:$0xff] %vm1364_vm12, %v5578_v1  ;;  %v5579_v59 = vmax.f32 %v5569_v19, 0.0  ;;  %v6248_v29 = vadd.f32 %v7369_v21, %v11642_v55  ;;  %v6240_v13 = vpop.f32.mrb[39].mxu1 }
 0x484   : > { %6997 = vst.msk [vmem:[%s7641_s27 + $0x68] sm:$0xff] %vm1364_vm12, %v5577_v37  ;;  %v6304_v52 = vadd.f32 %v7042_v26, %v6238_v3  ;;  %v6241_v30 = vadd.f32 %v11642_v55, %v6240_v13  ;;  %v7050_v13 = vld [vmem:[%s7636_s24 + $0xe0] sm:$0xff] }
 0x485   : > { %6999 = vst.msk [vmem:[%s7641_s27 + $0x78] sm:$0xff] %vm1364_vm12, %v5579_v59  ;;  %v6306_v18 = vadd.f32 %v7044_v25, %v6248_v29 }
 0x486   : > { %v6314_v24 = vmax.f32 %v6304_v52, 0.0  ;;  %v6305_v31 = vadd.f32 %v7043_v15, %v6241_v30 }
 0x487   : > { %v6316_v2 = vmax.f32 %v6306_v18, 0.0  ;;  %v7051_v18 = vld [vmem:[%s7636_s24 + $0xe8] sm:$0xff] }
 0x488   : > { %7052 = vst.msk [vmem:[%s7641_s27 + $0xa0] sm:$0xff] %vm1364_vm12, %v6314_v24  ;;  %v6315_v10 = vmax.f32 %v6305_v31, 0.0 }
 0x489   : > { %7054 = vst.msk [vmem:[%s7641_s27 + $0xb0] sm:$0xff] %vm1364_vm12, %v6316_v2 }
 0x48a   : > { %7053 = vst.msk [vmem:[%s7641_s27 + $0xa8] sm:$0xff] %vm1364_vm12, %v6315_v10 }
 0x4bc   : > { %v7354_v4 = vpop.f32.mrb[40].mxu0 }
 0x4bd   : > { %v5535_v20 = vadd.f32 %v7354_v4, %v11642_v55  ;;  %v5527_v7 = vpop.f32.mrb[41].mxu0 }
 0x4be   : > { %v7355_v17 = vpop.f32.mrb[42].mxu0 }
 0x4bf   : > { %v5571_v28 = vadd.f32 %v6991_v63, %v5535_v20  ;;  %v5529_v58 = vpop.f32.mrb[43].mxu0  ;;  %v7080_v20 = vld [vmem:[%s7636_s24 + $0xf0] sm:$0xff] }
 0x4c0   : > { %v5530_v41 = vadd.f32 %v11642_v55, %v5529_v58  ;;  %v7372_v6 = vpop.f32.mrb[40].mxu1 }
 0x4c1   : > { %v5581_v9 = vmax.f32 %v5571_v28, 0.0  ;;  %v6260_v36 = vadd.f32 %v7372_v6, %v11642_v55  ;;  %v6252_v42 = vpop.f32.mrb[41].mxu1 }
 0x4c2   : > { %v5570_v40 = vadd.f32 %v6990_v43, %v5530_v41  ;;  %v6253_v11 = vadd.f32 %v11642_v55, %v6252_v42  ;;  %v7373_v39 = vpop.f32.mrb[42].mxu1  ;;  %v7081_v43 = vld [vmem:[%s7636_s24 + $0xf8] sm:$0xff] }
 0x4c3   : > { %7001 = vst.msk [vmem:[%s7641_s27 + $0x88] sm:$0xff] %vm1364_vm12, %v5581_v9  ;;  %v6308_v49 = vadd.f32 %v7046_v51, %v6260_v36  ;;  %v6263_v5 = vadd.f32 %v7373_v39, %v11642_v55  ;;  %v6255_v46 = vpop.f32.mrb[43].mxu1 }
 0x4c4   : > { %v5580_v60 = vmax.f32 %v5570_v40, 0.0  ;;  %v6307_v47 = vadd.f32 %v7045_v0, %v6253_v11 }
 0x4c5   : > { %v6318_v62 = vmax.f32 %v6308_v49, 0.0  ;;  %v6309_v33 = vadd.f32 %v7047_v12, %v6263_v5 }
 0x4c6   : > { %7000 = vst.msk [vmem:[%s7641_s27 + $0x80] sm:$0xff] %vm1364_vm12, %v5580_v60  ;;  %v6317_v35 = vmax.f32 %v6307_v47, 0.0 }
 0x4c7   : > { %7056 = vst.msk [vmem:[%s7641_s27 + $0xc0] sm:$0xff] %vm1364_vm12, %v6318_v62  ;;  %v6319_v22 = vmax.f32 %v6309_v33, 0.0 }
 0x4c8   : > { %7055 = vst.msk [vmem:[%s7641_s27 + $0xb8] sm:$0xff] %vm1364_vm12, %v6317_v35 }
 0x4c9   : > { %7057 = vst.msk [vmem:[%s7641_s27 + $0xc8] sm:$0xff] %vm1364_vm12, %v6319_v22 }
 0x4f7   : > { %v7358_v32 = vpop.f32.mrb[44].mxu0 }
 0x4f8   : > { %v5541_v48 = vpop.f32.mrb[45].mxu0 }
 0x4f9   : > { %v5542_v54 = vadd.f32 %v11642_v55, %v5541_v48  ;;  %v7359_v27 = vpop.f32.mrb[46].mxu0 }
 0x4fa   : > { %v5544_v44 = vpop.f32.mrb[47].mxu0 }
 0x4fb   : > { %v5572_v23 = vadd.f32 %v6992_v56, %v5542_v54  ;;  %v5545_v8 = vadd.f32 %v11642_v55, %v5544_v44  ;;  %v7376_v14 = vpop.f32.mrb[44].mxu1 }
 0x4fc   : > { %v6275_v57 = vadd.f32 %v7376_v14, %v11642_v55  ;;  %v6267_v61 = vpop.f32.mrb[45].mxu1 }
 0x4fd   : > { %v5582_v38 = vmax.f32 %v5572_v23, 0.0  ;;  %v5573_v45 = vadd.f32 %v6993_v53, %v5545_v8  ;;  %v7377_v16 = vpop.f32.mrb[46].mxu1 }
 0x4fe   : > { %v6311_v1 = vadd.f32 %v7049_v34, %v6275_v57  ;;  %v6269_v19 = vpop.f32.mrb[47].mxu1 }
 0x4ff   : > { %7002 = vst.msk [vmem:[%s7641_s27 + $0x90] sm:$0xff] %vm1364_vm12, %v5582_v38  ;;  %v5583_v26 = vmax.f32 %v5573_v45, 0.0  ;;  %v6270_v37 = vadd.f32 %v11642_v55, %v6269_v19 }
 0x500   : > { %v6321_v3 = vmax.f32 %v6311_v1, 0.0 }
 0x501   : > { %7003 = vst.msk [vmem:[%s7641_s27 + $0x98] sm:$0xff] %vm1364_vm12, %v5583_v26  ;;  %v6310_v21 = vadd.f32 %v7048_v50, %v6270_v37 }
 0x502   : > { %7059 = vst.msk [vmem:[%s7641_s27 + $0xd8] sm:$0xff] %vm1364_vm12, %v6321_v3 }
 0x503   : > { %v6320_v25 = vmax.f32 %v6310_v21, 0.0 }
 0x505   : > { %7058 = vst.msk [vmem:[%s7641_s27 + $0xd0] sm:$0xff] %vm1364_vm12, %v6320_v25 }
 0x537   : > { %v7380_v59 = vpop.f32.mrb[48].mxu1 }
 0x538   : > { %v6281_v29 = vpop.f32.mrb[49].mxu1 }
 0x539   : > { %v6282_v15 = vadd.f32 %v11642_v55, %v6281_v29  ;;  %v7381_v52 = vpop.f32.mrb[50].mxu1 }
 0x53a   : > { %v6284_v30 = vpop.f32.mrb[51].mxu1 }
 0x53b   : > { %v6312_v24 = vadd.f32 %v7050_v13, %v6282_v15  ;;  %v6285_v31 = vadd.f32 %v11642_v55, %v6284_v30 }
 0x53c   : > { %v7390_v4 = vpop.f32.mrb[48].mxu0 }
 0x53d   : > { %v6322_v2 = vmax.f32 %v6312_v24, 0.0  ;;  %v6313_v10 = vadd.f32 %v7051_v18, %v6285_v31  ;;  %v6579_v63 = vpop.f32.mrb[49].mxu0 }
 0x53e   : > { %v6580_v17 = vadd.f32 %v11642_v55, %v6579_v63  ;;  %v7391_v28 = vpop.f32.mrb[50].mxu0 }
 0x53f   : > { %7060 = vst.msk [vmem:[%s7641_s27 + $0xe0] sm:$0xff] %vm1364_vm12, %v6322_v2  ;;  %v6323_v7 = vmax.f32 %v6313_v10, 0.0  ;;  %v6582_v58 = vpop.f32.mrb[51].mxu0 }
 0x540   : > { %v6594_v41 = vadd.f32 %v7080_v20, %v6580_v17  ;;  %v6583_v6 = vadd.f32 %v11642_v55, %v6582_v58 }
 0x541   : > { %7061 = vst.msk [vmem:[%s7641_s27 + $0xe8] sm:$0xff] %vm1364_vm12, %v6323_v7 }
 0x542   : > { %v6596_v51 = vmax.f32 %v6594_v41, 0.0  ;;  %v6595_v9 = vadd.f32 %v7081_v43, %v6583_v6 }
 0x544   : > { %7082 = vst.msk [vmem:[%s7641_s27 + $0xf0] sm:$0xff] %vm1364_vm12, %v6596_v51  ;;  %v6597_v36 = vmax.f32 %v6595_v9, 0.0 }
 0x546   : > { %7083 = vst.msk [vmem:[%s7641_s27 + $0xf8] sm:$0xff] %vm1364_vm12, %v6597_v36 }
 0x547 PF: > { %s15_s18 = sadd.s32 1, %s7582_s18  }
 0x548   : > { %p12_p5 = scmp.ge.s32.totalorder %s15_s18, 4  }
 0x54a   :  { %14 = sbr.rel (!%p12_p5) target bundleno = 1 (0x1), region = 92 }

</bundles_post_ra>
